<compile_context>
chip_gen: v5e
topology: v5e:2x2
jax: 0.10.0
libtpu: 0.0.40
codegen_flags: <defaults>
</compile_context>

<pallas_src>
import functools

import jax
import jax.numpy as jnp
from jax import lax
from jax.experimental import pallas as pl
from jax.experimental.pallas import tpu as pltpu  # noqa: F401  (production path)

# ------------------------- hyper parameters (small) -------------------------
N_BATCH = 8           # batch size
C, H, W = 4, 16, 16   # image channels / spatial
IN_FEAT = C * H * W   # flattened encoder input (1024)
HIDDEN = 256          # MLP hidden width
DIM = 128             # MoCo projection dim (module default)
K_QUEUE = 512         # queue length (65536 in the paper, shrunk for the demo)
MOMENTUM = 0.999      # m
TEMP = 0.07           # T

# MoCo requires K % batch == 0, so the enqueue never wraps (ptr + batch <= K).
assert K_QUEUE % N_BATCH == 0
# Demo-size invariant exploited by the fused kernel: the whole queue fits in
# VMEM.  At production K use the tiled l_neg sweep described in the header.
assert K_QUEUE * DIM * 2 <= 4 * 1024 * 1024


# ------------------------------ Pallas kernel --------------------------------
def _fused_moco_kernel(xq_ref, xk_ref,
                       w1q_ref, b1q_ref, w2q_ref, b2q_ref,
                       w1k_ref, b1k_ref, w2k_ref, b2k_ref,
                       queue_ref,
                       lpos_out, lneg_out, k_out,
                       w1k_out, b1k_out, w2k_out, b2k_out):
    """EMA(key params) + encoder_q + encoder_k + normalize + l_pos + l_neg."""
    one_minus_m = 1.0 - MOMENTUM

    # --- momentum update, f32 master weights (stay in VMEM, reused below) ----
    w1k = w1k_ref[...] * MOMENTUM + w1q_ref[...] * one_minus_m
    b1k = b1k_ref[...] * MOMENTUM + b1q_ref[...] * one_minus_m
    w2k = w2k_ref[...] * MOMENTUM + w2q_ref[...] * one_minus_m
    b2k = b2k_ref[...] * MOMENTUM + b2q_ref[...] * one_minus_m
    # written back in place (input_output_aliases) — PyTorch buffer semantics
    w1k_out[...] = w1k
    b1k_out[...] = b1k
    w2k_out[...] = w2k
    b2k_out[...] = b2k

    # TODO(synk): the real base_encoder is an arbitrary CNN backbone (ResNet);
    # modeled here as flatten -> Linear -> ReLU -> Linear (num_classes=DIM).
    def mlp_normalize(x, w1, b1, w2, b2):
        # bf16 operands on the MXU, f32 accumulation
        h = jnp.dot(x.astype(jnp.bfloat16), w1.astype(jnp.bfloat16),
                    preferred_element_type=jnp.float32)
        h = jnp.maximum(h + b1, 0.0)                              # ReLU (f32)
        f = jnp.dot(h.astype(jnp.bfloat16), w2.astype(jnp.bfloat16),
                    preferred_element_type=jnp.float32) + b2
        # F.normalize(dim=1): f / max(||f||, 1e-12) == f * rsqrt(max(||f||^2, 1e-24))
        sumsq = jnp.sum(f * f, axis=1, keepdims=True)
        return f * lax.rsqrt(jnp.maximum(sumsq, 1e-24))

    q = mlp_normalize(xq_ref[...], w1q_ref[...], b1q_ref[...],
                      w2q_ref[...], b2q_ref[...])
    k = mlp_normalize(xk_ref[...], w1k, b1k, w2k, b2k)

    # key for the enqueue, already in queue dtype (no wrapper-side cast)
    k_out[...] = k.astype(jnp.bfloat16)

    # Pre-scale q by 1/T once: both logits blocks come out already divided by
    # the temperature, so no post-matmul multiply on the (N, K) tile.
    q_s = q * (1.0 / TEMP)                                         # (N, DIM) f32

    # l_pos = einsum('nc,nc->n')[:, None] / T     (f32, VPU)
    lpos_out[...] = jnp.sum(q_s * k, axis=1, keepdims=True)

    # l_neg = (q @ queue^T) / T : contract on the last dim of both operands;
    # queue is stored lane-dense as (K, DIM) bf16 and fully VMEM-resident here.
    lneg_out[...] = lax.dot_general(
        q_s.astype(jnp.bfloat16), queue_ref[...],
        (((1,), (1,)), ((), ())),
        preferred_element_type=jnp.float32)


# ------------------------------ wrappers --------------------------------------
def fused_moco_step(xq, xk, params_q, params_k, queue):
    """Single launch: EMA + both encoders + normalize + l_pos + l_neg."""
    n = xq.shape[0]
    out_shapes = (
        jax.ShapeDtypeStruct((n, 1), jnp.float32),                # l_pos / T
        jax.ShapeDtypeStruct((n, K_QUEUE), jnp.float32),          # l_neg / T
        jax.ShapeDtypeStruct((n, DIM), jnp.bfloat16),             # k (queue dtype)
        jax.ShapeDtypeStruct(params_k[0].shape, jnp.float32),     # w1_k (EMA)
        jax.ShapeDtypeStruct(params_k[1].shape, jnp.float32),     # b1_k
        jax.ShapeDtypeStruct(params_k[2].shape, jnp.float32),     # w2_k
        jax.ShapeDtypeStruct(params_k[3].shape, jnp.float32),     # b2_k
    )
    return pl.pallas_call(
        _fused_moco_kernel,
        out_shape=out_shapes,
        # Key-encoder params updated in place (inputs 6..9 -> outputs 3..6).
        # Valid because this call is gridless: whole arrays are staged to VMEM
        # before the aliased outputs are written back.
        input_output_aliases={6: 3, 7: 4, 8: 5, 9: 6},
    )(xq, xk, *params_q, *params_k, queue)


@functools.partial(jax.jit, donate_argnums=(2, 3, 4))
def moco_forward(images, params_q, params_k, queue, queue_ptr):
    """Functional equivalent of MoCo.forward.

    Returns (logits, labels) plus the new key-encoder params, queue and ptr
    (PyTorch mutates these registered buffers in place; here they are donated
    and aliased so the same HBM buffers are reused).
    """
    n = images.shape[0]
    xq = images[:, 0].reshape(n, -1)          # row-major flatten == torch
    xk = images[:, 1].reshape(n, -1)

    l_pos, l_neg, k, w1k, b1k, w2k, b2k = fused_moco_step(
        xq, xk, params_q, params_k, queue)
    params_k = (w1k, b1k, w2k, b2k)

    # logits = cat([l_pos, l_neg], 1) / T  (both already scaled in-kernel).
    # At K=512 this concat copies 16 KiB — negligible.  At production K, hand
    # (l_pos, l_neg) to the loss separately or write the l_neg tiles straight
    # into a lane-aligned padded logits buffer instead of concatenating.
    logits = jnp.concatenate([l_pos, l_neg], axis=1)
    labels = jnp.zeros((n,), dtype=jnp.int32)   # torch.long -> int32 (x64 off)

    # enqueue: queue is (K, DIM) so k is written row-wise, no transpose.
    # K % batch == 0 (asserted) => ptr + n <= K, so no wrap handling needed.
    queue = lax.dynamic_update_slice(queue, k, (queue_ptr[0], 0))
    queue_ptr = (queue_ptr + n) % K_QUEUE

    return logits, labels, params_k, queue, queue_ptr


# ------------------------------ main -----------------------------------------
if __name__ == "__main__":
    key = jax.random.PRNGKey(0)
    k_img, k_w1, k_b1, k_w2, k_b2, k_queue = jax.random.split(key, 6)

    # deterministic synthetic inputs / parameters
    images = jax.random.normal(k_img, (N_BATCH, 2, C, H, W), dtype=jnp.float32)

    w1 = jax.random.normal(k_w1, (IN_FEAT, HIDDEN), dtype=jnp.float32) * 0.02
    b1 = jax.random.normal(k_b1, (1, HIDDEN), dtype=jnp.float32) * 0.02
    w2 = jax.random.normal(k_w2, (HIDDEN, DIM), dtype=jnp.float32) * 0.02
    b2 = jax.random.normal(k_b2, (1, DIM), dtype=jnp.float32) * 0.02
    params_q = (w1, b1, w2, b2)
    # encoder_k starts as a copy of encoder_q (distinct buffers, updated in place)
    params_k = tuple(jnp.array(p, copy=True) for p in params_q)

    # queue buffer, stored (K, DIM): each row is one key, L2-normalized.
    # bf16 storage halves the HBM stream of the l_neg contraction.
    queue = jax.random.normal(k_queue, (K_QUEUE, DIM), dtype=jnp.float32)
    queue = queue * lax.rsqrt(
        jnp.maximum(jnp.sum(queue * queue, axis=1, keepdims=True), 1e-24))
    queue = queue.astype(jnp.bfloat16)
    queue_ptr = jnp.zeros((1,), dtype=jnp.int32)

    logits, labels, params_k, queue, queue_ptr = moco_forward(
        images, params_q, params_k, queue, queue_ptr)

    jax.block_until_ready((logits, labels, params_k, queue, queue_ptr))

    # sanity checks
    assert logits.shape == (N_BATCH, 1 + K_QUEUE)
    assert labels.shape == (N_BATCH,)
    assert queue.shape == (K_QUEUE, DIM)
    assert int(queue_ptr[0]) == N_BATCH % K_QUEUE
    assert bool(jnp.isfinite(logits).all())
    # cosine logits are bounded by ~1/T (small bf16 slack)
    assert float(jnp.max(jnp.abs(logits))) <= (1.0 / TEMP) * 1.1
    # enqueued keys are (approximately) unit norm
    enq = queue[:N_BATCH].astype(jnp.float32)
    norms = jnp.sqrt(jnp.sum(enq * enq, axis=1))
    assert bool(jnp.all(jnp.abs(norms - 1.0) < 0.05))

    print("KERNEL_OK")
</pallas_src>

<mosaic_0001>
module attributes {stable_mosaic.version = 11 : i64} {
  func.func @_fused_moco_kernel(%arg0: memref<8x1024xf32, #tpu.memory_space<vmem>>, %arg1: memref<8x1024xf32, #tpu.memory_space<vmem>>, %arg2: memref<1024x256xf32, #tpu.memory_space<vmem>>, %arg3: memref<1x256xf32, #tpu.memory_space<vmem>>, %arg4: memref<256x128xf32, #tpu.memory_space<vmem>>, %arg5: memref<1x128xf32, #tpu.memory_space<vmem>>, %arg6: memref<1024x256xf32, #tpu.memory_space<vmem>>, %arg7: memref<1x256xf32, #tpu.memory_space<vmem>>, %arg8: memref<256x128xf32, #tpu.memory_space<vmem>>, %arg9: memref<1x128xf32, #tpu.memory_space<vmem>>, %arg10: memref<512x128xbf16, #tpu.memory_space<vmem>>, %arg11: memref<8x1xf32, #tpu.memory_space<vmem>>, %arg12: memref<8x512xf32, #tpu.memory_space<vmem>>, %arg13: memref<8x128xbf16, #tpu.memory_space<vmem>>, %arg14: memref<1024x256xf32, #tpu.memory_space<vmem>>, %arg15: memref<1x256xf32, #tpu.memory_space<vmem>>, %arg16: memref<256x128xf32, #tpu.memory_space<vmem>>, %arg17: memref<1x128xf32, #tpu.memory_space<vmem>>) attributes {dimension_semantics = [], scalar_prefetch = 0 : i64, scratch_operands = 0 : i64, tpu.core_type = #tpu.core_type<tc>} {
    %c0 = arith.constant 0 : index
    %c0_0 = arith.constant 0 : index
    %0 = vector.load %arg6[%c0, %c0_0] : memref<1024x256xf32, #tpu.memory_space<vmem>>, vector<1024x256xf32>
    %cst = arith.constant 9.990000e-01 : f32
    %1 = vector.broadcast %cst : f32 to vector<1024x256xf32>
    %2 = arith.mulf %0, %1 : vector<1024x256xf32>
    %c0_1 = arith.constant 0 : index
    %c0_2 = arith.constant 0 : index
    %3 = vector.load %arg2[%c0_1, %c0_2] : memref<1024x256xf32, #tpu.memory_space<vmem>>, vector<1024x256xf32>
    %cst_3 = arith.constant 1.000000e-03 : f32
    %4 = vector.broadcast %cst_3 : f32 to vector<1024x256xf32>
    %5 = arith.mulf %3, %4 : vector<1024x256xf32>
    %6 = arith.addf %2, %5 : vector<1024x256xf32>
    %c0_4 = arith.constant 0 : index
    %c0_5 = arith.constant 0 : index
    %7 = vector.load %arg7[%c0_4, %c0_5] : memref<1x256xf32, #tpu.memory_space<vmem>>, vector<1x256xf32>
    %cst_6 = arith.constant 9.990000e-01 : f32
    %8 = vector.broadcast %cst_6 : f32 to vector<1x256xf32>
    %9 = arith.mulf %7, %8 : vector<1x256xf32>
    %c0_7 = arith.constant 0 : index
    %c0_8 = arith.constant 0 : index
    %10 = vector.load %arg3[%c0_7, %c0_8] : memref<1x256xf32, #tpu.memory_space<vmem>>, vector<1x256xf32>
    %cst_9 = arith.constant 1.000000e-03 : f32
    %11 = vector.broadcast %cst_9 : f32 to vector<1x256xf32>
    %12 = arith.mulf %10, %11 : vector<1x256xf32>
    %13 = arith.addf %9, %12 : vector<1x256xf32>
    %c0_10 = arith.constant 0 : index
    %c0_11 = arith.constant 0 : index
    %14 = vector.load %arg8[%c0_10, %c0_11] : memref<256x128xf32, #tpu.memory_space<vmem>>, vector<256x128xf32>
    %cst_12 = arith.constant 9.990000e-01 : f32
    %15 = vector.broadcast %cst_12 : f32 to vector<256x128xf32>
    %16 = arith.mulf %14, %15 : vector<256x128xf32>
    %c0_13 = arith.constant 0 : index
    %c0_14 = arith.constant 0 : index
    %17 = vector.load %arg4[%c0_13, %c0_14] : memref<256x128xf32, #tpu.memory_space<vmem>>, vector<256x128xf32>
    %cst_15 = arith.constant 1.000000e-03 : f32
    %18 = vector.broadcast %cst_15 : f32 to vector<256x128xf32>
    %19 = arith.mulf %17, %18 : vector<256x128xf32>
    %20 = arith.addf %16, %19 : vector<256x128xf32>
    %c0_16 = arith.constant 0 : index
    %c0_17 = arith.constant 0 : index
    %21 = vector.load %arg9[%c0_16, %c0_17] : memref<1x128xf32, #tpu.memory_space<vmem>>, vector<1x128xf32>
    %cst_18 = arith.constant 9.990000e-01 : f32
    %22 = vector.broadcast %cst_18 : f32 to vector<1x128xf32>
    %23 = arith.mulf %21, %22 : vector<1x128xf32>
    %c0_19 = arith.constant 0 : index
    %c0_20 = arith.constant 0 : index
    %24 = vector.load %arg5[%c0_19, %c0_20] : memref<1x128xf32, #tpu.memory_space<vmem>>, vector<1x128xf32>
    %cst_21 = arith.constant 1.000000e-03 : f32
    %25 = vector.broadcast %cst_21 : f32 to vector<1x128xf32>
    %26 = arith.mulf %24, %25 : vector<1x128xf32>
    %27 = arith.addf %23, %26 : vector<1x128xf32>
    %c0_22 = arith.constant 0 : index
    %c0_23 = arith.constant 0 : index
    %28 = vector.load %arg14[%c0_22, %c0_23] : memref<1024x256xf32, #tpu.memory_space<vmem>>, vector<1024x256xf32>
    tpu.vector_store %arg14[%c0_22, %c0_23], %6 {strides = array<i32>} : memref<1024x256xf32, #tpu.memory_space<vmem>>, vector<1024x256xf32>,
    %c0_24 = arith.constant 0 : index
    %c0_25 = arith.constant 0 : index
    %29 = vector.load %arg15[%c0_24, %c0_25] : memref<1x256xf32, #tpu.memory_space<vmem>>, vector<1x256xf32>
    tpu.vector_store %arg15[%c0_24, %c0_25], %13 {strides = array<i32>} : memref<1x256xf32, #tpu.memory_space<vmem>>, vector<1x256xf32>,
    %c0_26 = arith.constant 0 : index
    %c0_27 = arith.constant 0 : index
    %30 = vector.load %arg16[%c0_26, %c0_27] : memref<256x128xf32, #tpu.memory_space<vmem>>, vector<256x128xf32>
    tpu.vector_store %arg16[%c0_26, %c0_27], %20 {strides = array<i32>} : memref<256x128xf32, #tpu.memory_space<vmem>>, vector<256x128xf32>,
    %c0_28 = arith.constant 0 : index
    %c0_29 = arith.constant 0 : index
    %31 = vector.load %arg17[%c0_28, %c0_29] : memref<1x128xf32, #tpu.memory_space<vmem>>, vector<1x128xf32>
    tpu.vector_store %arg17[%c0_28, %c0_29], %27 {strides = array<i32>} : memref<1x128xf32, #tpu.memory_space<vmem>>, vector<1x128xf32>,
    %c0_30 = arith.constant 0 : index
    %c0_31 = arith.constant 0 : index
    %32 = vector.load %arg0[%c0_30, %c0_31] : memref<8x1024xf32, #tpu.memory_space<vmem>>, vector<8x1024xf32>
    %c0_32 = arith.constant 0 : index
    %c0_33 = arith.constant 0 : index
    %33 = vector.load %arg2[%c0_32, %c0_33] : memref<1024x256xf32, #tpu.memory_space<vmem>>, vector<1024x256xf32>
    %c0_34 = arith.constant 0 : index
    %c0_35 = arith.constant 0 : index
    %34 = vector.load %arg3[%c0_34, %c0_35] : memref<1x256xf32, #tpu.memory_space<vmem>>, vector<1x256xf32>
    %c0_36 = arith.constant 0 : index
    %c0_37 = arith.constant 0 : index
    %35 = vector.load %arg4[%c0_36, %c0_37] : memref<256x128xf32, #tpu.memory_space<vmem>>, vector<256x128xf32>
    %c0_38 = arith.constant 0 : index
    %c0_39 = arith.constant 0 : index
    %36 = vector.load %arg5[%c0_38, %c0_39] : memref<1x128xf32, #tpu.memory_space<vmem>>, vector<1x128xf32>
    %37 = arith.truncf %32 : vector<8x1024xf32> to vector<8x1024xbf16>
    %38 = arith.truncf %33 : vector<1024x256xf32> to vector<1024x256xbf16>
    %cst_40 = arith.constant dense<0.000000e+00> : vector<8x256xf32>
    %39 = tpu.matmul %37, %38, %cst_40 {dimension_numbers = #tpu.dot_dimension_numbers<[1], [0], [0], [1], [0, 0, 1, 1], [], []>} : vector<8x1024xbf16>, vector<1024x256xbf16>, vector<8x256xf32> -> vector<8x256xf32>
    %40 = vector.broadcast %34 : vector<1x256xf32> to vector<8x256xf32>
    %41 = arith.addf %39, %40 : vector<8x256xf32>
    %cst_41 = arith.constant 0.000000e+00 : f32
    %42 = vector.broadcast %cst_41 : f32 to vector<8x256xf32>
    %43 = arith.maximumf %41, %42 : vector<8x256xf32>
    %44 = arith.truncf %43 : vector<8x256xf32> to vector<8x256xbf16>
    %45 = arith.truncf %35 : vector<256x128xf32> to vector<256x128xbf16>
    %cst_42 = arith.constant dense<0.000000e+00> : vector<8x128xf32>
    %46 = tpu.matmul %44, %45, %cst_42 {dimension_numbers = #tpu.dot_dimension_numbers<[1], [0], [0], [1], [0, 0, 1, 1], [], []>} : vector<8x256xbf16>, vector<256x128xbf16>, vector<8x128xf32> -> vector<8x128xf32>
    %47 = vector.broadcast %36 : vector<1x128xf32> to vector<8x128xf32>
    %48 = arith.addf %46, %47 : vector<8x128xf32>
    %49 = arith.mulf %48, %48 : vector<8x128xf32>
    %cst_43 = arith.constant dense<0.000000e+00> : vector<8xf32>
    %50 = vector.multi_reduction <add>, %49, %cst_43 [1] : vector<8x128xf32> to vector<8xf32>
    %51 = vector.shape_cast %50 : vector<8xf32> to vector<8x1xf32>
    %cst_44 = arith.constant 1.000000e-24 : f32
    %52 = vector.broadcast %cst_44 : f32 to vector<8x1xf32>
    %53 = arith.maximumf %51, %52 : vector<8x1xf32>
    %54 = math.rsqrt %53 : vector<8x1xf32>
    %55 = vector.broadcast %54 : vector<8x1xf32> to vector<8x128xf32>
    %56 = arith.mulf %48, %55 : vector<8x128xf32>
    %c0_45 = arith.constant 0 : index
    %c0_46 = arith.constant 0 : index
    %57 = vector.load %arg1[%c0_45, %c0_46] : memref<8x1024xf32, #tpu.memory_space<vmem>>, vector<8x1024xf32>
    %58 = arith.truncf %57 : vector<8x1024xf32> to vector<8x1024xbf16>
    %59 = arith.truncf %6 : vector<1024x256xf32> to vector<1024x256xbf16>
    %cst_47 = arith.constant dense<0.000000e+00> : vector<8x256xf32>
    %60 = tpu.matmul %58, %59, %cst_47 {dimension_numbers = #tpu.dot_dimension_numbers<[1], [0], [0], [1], [0, 0, 1, 1], [], []>} : vector<8x1024xbf16>, vector<1024x256xbf16>, vector<8x256xf32> -> vector<8x256xf32>
    %61 = vector.broadcast %13 : vector<1x256xf32> to vector<8x256xf32>
    %62 = arith.addf %60, %61 : vector<8x256xf32>
    %cst_48 = arith.constant 0.000000e+00 : f32
    %63 = vector.broadcast %cst_48 : f32 to vector<8x256xf32>
    %64 = arith.maximumf %62, %63 : vector<8x256xf32>
    %65 = arith.truncf %64 : vector<8x256xf32> to vector<8x256xbf16>
    %66 = arith.truncf %20 : vector<256x128xf32> to vector<256x128xbf16>
    %cst_49 = arith.constant dense<0.000000e+00> : vector<8x128xf32>
    %67 = tpu.matmul %65, %66, %cst_49 {dimension_numbers = #tpu.dot_dimension_numbers<[1], [0], [0], [1], [0, 0, 1, 1], [], []>} : vector<8x256xbf16>, vector<256x128xbf16>, vector<8x128xf32> -> vector<8x128xf32>
    %68 = vector.broadcast %27 : vector<1x128xf32> to vector<8x128xf32>
    %69 = arith.addf %67, %68 : vector<8x128xf32>
    %70 = arith.mulf %69, %69 : vector<8x128xf32>
    %cst_50 = arith.constant dense<0.000000e+00> : vector<8xf32>
    %71 = vector.multi_reduction <add>, %70, %cst_50 [1] : vector<8x128xf32> to vector<8xf32>
    %72 = vector.shape_cast %71 : vector<8xf32> to vector<8x1xf32>
    %cst_51 = arith.constant 1.000000e-24 : f32
    %73 = vector.broadcast %cst_51 : f32 to vector<8x1xf32>
    %74 = arith.maximumf %72, %73 : vector<8x1xf32>
    %75 = math.rsqrt %74 : vector<8x1xf32>
    %76 = vector.broadcast %75 : vector<8x1xf32> to vector<8x128xf32>
    %77 = arith.mulf %69, %76 : vector<8x128xf32>
    %78 = arith.truncf %77 : vector<8x128xf32> to vector<8x128xbf16>
    %c0_52 = arith.constant 0 : index
    %c0_53 = arith.constant 0 : index
    %79 = vector.load %arg13[%c0_52, %c0_53] : memref<8x128xbf16, #tpu.memory_space<vmem>>, vector<8x128xbf16>
    tpu.vector_store %arg13[%c0_52, %c0_53], %78 {strides = array<i32>} : memref<8x128xbf16, #tpu.memory_space<vmem>>, vector<8x128xbf16>,
    %cst_54 = arith.constant 14.2857141 : f32
    %80 = vector.broadcast %cst_54 : f32 to vector<8x128xf32>
    %81 = arith.mulf %56, %80 : vector<8x128xf32>
    %82 = arith.mulf %81, %77 : vector<8x128xf32>
    %cst_55 = arith.constant dense<0.000000e+00> : vector<8xf32>
    %83 = vector.multi_reduction <add>, %82, %cst_55 [1] : vector<8x128xf32> to vector<8xf32>
    %84 = vector.shape_cast %83 : vector<8xf32> to vector<8x1xf32>
    %c0_56 = arith.constant 0 : index
    %c0_57 = arith.constant 0 : index
    %85 = vector.load %arg11[%c0_56, %c0_57] : memref<8x1xf32, #tpu.memory_space<vmem>>, vector<8x1xf32>
    tpu.vector_store %arg11[%c0_56, %c0_57], %84 {strides = array<i32>} : memref<8x1xf32, #tpu.memory_space<vmem>>, vector<8x1xf32>,
    %86 = arith.truncf %81 : vector<8x128xf32> to vector<8x128xbf16>
    %c0_58 = arith.constant 0 : index
    %c0_59 = arith.constant 0 : index
    %87 = vector.load %arg10[%c0_58, %c0_59] : memref<512x128xbf16, #tpu.memory_space<vmem>>, vector<512x128xbf16>
    %cst_60 = arith.constant dense<0.000000e+00> : vector<8x512xf32>
    %88 = tpu.matmul %86, %87, %cst_60 {dimension_numbers = #tpu.dot_dimension_numbers<[1], [1], [0], [0], [0, 0, 1, 0], [], []>} : vector<8x128xbf16>, vector<512x128xbf16>, vector<8x512xf32> -> vector<8x512xf32>
    %c0_61 = arith.constant 0 : index
    %c0_62 = arith.constant 0 : index
    %89 = vector.load %arg12[%c0_61, %c0_62] : memref<8x512xf32, #tpu.memory_space<vmem>>, vector<8x512xf32>
    tpu.vector_store %arg12[%c0_61, %c0_62], %88 {strides = array<i32>} : memref<8x512xf32, #tpu.memory_space<vmem>>, vector<8x512xf32>,
    return
  }
}

</mosaic_0001>

<bundles_post_ra>
// kernel: squeeze.3
= control target key start
LH: loop header
LB: loop body
LE: loop exit
PB: predicated region body
PF: predicated region fallthrough
CT: control target
= control target key end

     0   :  { %vm90_vm0 = vcmask 1041409   ;;  %vm94_vm1 = vcmask 1042434   ;;  %vm98_vm2 = vcmask 1043459   ;;  %vm102_vm3 = vcmask 1044484   ;;  %s2571_s25 = smov 112   ;;  %s2572_s23 = smov 96   ;;  %s4760_s0 = inlined_call_operand.vmem [shape: f32[8,1,4,16,16], index: 0, kind: input, shape index: {}]   ;;  %s4761_s1 = inlined_call_operand.vmem [shape: f32[8,1024], index: 1, kind: output, shape index: {}]  }
   0x1   :  { %vm106_vm4 = vcmask 1045509   ;;  %v2084_v0 = vld [vmem:[%s4760_s0 + $0xf] sm:$0x1]   ;;  %vm110_vm5 = vcmask 1046534   ;;  %vm114_vm6 = vcmask 1047559   ;;  %s2573_s8 = smov 80  }
   0x2   :  { %v2085_v1 = vld [vmem:[%s4760_s0 + $0x4e] sm:$0x2]   ;;  %v2067_v9 = vld [vmem:[%s4760_s0 + $0x7] sm:$0x1]   ;;  %v2129_v52 = vld [vmem:[%s4760_s0 + $0x3f] sm:$0x1]  }
   0x3   :  { %v2086_v2 = vld [vmem:[%s4760_s0 + $0x8d] sm:$0x4]   ;;  %v160_v4 = vsel %vm90_vm0, %v2085_v1, %v2084_v0  ;;  %v2068_v10 = vld [vmem:[%s4760_s0 + $0x46] sm:$0x2]   ;;  %v2130_v53 = vld [vmem:[%s4760_s0 + $0x7e] sm:$0x2]  }
   0x4   :  { %v2087_v3 = vld [vmem:[%s4760_s0 + $0xcc] sm:$0x8]   ;;  %v164_v7 = vsel %vm94_vm1, %v2086_v2, %v160_v4  ;;  %v91_v12 = vsel %vm90_vm0, %v2068_v10, %v2067_v9  ;;  %v2069_v13 = vld [vmem:[%s4760_s0 + $0x85] sm:$0x4]   ;;  %v335_v56 = vsel %vm90_vm0, %v2130_v53, %v2129_v52  ;;  %v2131_v57 = vld [vmem:[%s4760_s0 + $0xbd] sm:$0x4]  }
   0x5   :  { %v2088_v5 = vld [vmem:[%s4760_s0 + $0x10b] sm:$0x10]   ;;  %v168_v11 = vsel %vm98_vm2, %v2087_v3, %v164_v7  ;;  %v2070_v14 = vld [vmem:[%s4760_s0 + $0xc4] sm:$0x8]   ;;  %v95_v18 = vsel %vm94_vm1, %v2069_v13, %v91_v12  ;;  %v2132_v58 = vld [vmem:[%s4760_s0 + $0xfc] sm:$0x8]   ;;  %v339_v62 = vsel %vm94_vm1, %v2131_v57, %v335_v56 }
   0x6   :  { %v2089_v6 = vld [vmem:[%s4760_s0 + $0x14a] sm:$0x20]   ;;  %v2071_v15 = vld [vmem:[%s4760_s0 + $0x103] sm:$0x10]   ;;  %v172_v16 = vsel %vm102_vm3, %v2088_v5, %v168_v11  ;;  %v99_v22 = vsel %vm98_vm2, %v2070_v14, %v95_v18  ;;  %v2133_v59 = vld [vmem:[%s4760_s0 + $0x13b] sm:$0x10]   ;;  %v343_v2 = vsel %vm98_vm2, %v2132_v58, %v339_v62 }
   0x7   :  { %v2090_v8 = vld [vmem:[%s4760_s0 + $0x189] sm:$0x40]   ;;  %v2072_v19 = vld [vmem:[%s4760_s0 + $0x142] sm:$0x20]   ;;  %v176_v21 = vsel %vm106_vm4, %v2089_v6, %v172_v16  ;;  %v103_v27 = vsel %vm102_vm3, %v2071_v15, %v99_v22  ;;  %v2134_v63 = vld [vmem:[%s4760_s0 + $0x17a] sm:$0x20]   ;;  %v347_v7 = vsel %vm102_vm3, %v2133_v59, %v343_v2 }
   0x8   :  { %v2091_v17 = vld [vmem:[%s4760_s0 + $0x1c8] sm:$0x80]   ;;  %v2073_v20 = vld [vmem:[%s4760_s0 + $0x181] sm:$0x40]   ;;  %v180_v26 = vsel %vm110_vm5, %v2090_v8, %v176_v21  ;;  %v107_v33 = vsel %vm106_vm4, %v2072_v19, %v103_v27  ;;  %v2120_v3 = vld [vmem:[%s4760_s0 + $0x1f] sm:$0x1]   ;;  %v351_v12 = vsel %vm106_vm4, %v2134_v63, %v347_v7 }
   0x9   :  { %v2093_v23 = vld [vmem:[%s4760_s0 + $0x2f] sm:$0x1]   ;;  %v2074_v28 = vld [vmem:[%s4760_s0 + $0x1c0] sm:$0x80]   ;;  %v184_v32 = vsel %vm114_vm6, %v2091_v17, %v180_v26  ;;  %v111_v38 = vsel %vm110_vm5, %v2073_v20, %v107_v33  ;;  %v2121_v4 = vld [vmem:[%s4760_s0 + $0x5e] sm:$0x2]  }
   0xa   :  { %v2094_v24 = vld [vmem:[%s4760_s0 + $0x6e] sm:$0x2]   ;;  %v2075_v37 = vld [vmem:[%s4760_s0 + $0x27] sm:$0x1]   ;;  %185 = vrot.lane.b32.xlu1 %v184_v32, %s2571_s25  ;;  %v115_v43 = vsel %vm114_vm6, %v2074_v28, %v111_v38  ;;  %v2122_v5 = vld [vmem:[%s4760_s0 + $0x9d] sm:$0x4]   ;;  %v300_v8 = vsel %vm90_vm0, %v2121_v4, %v2120_v3 }
   0xb   :  { %v2095_v25 = vld [vmem:[%s4760_s0 + $0xad] sm:$0x4]   ;;  %v195_v29 = vsel %vm90_vm0, %v2094_v24, %v2093_v23  ;;  %v2076_v40 = vld [vmem:[%s4760_s0 + $0x66] sm:$0x2]   ;;  %116 = vrot.lane.b32.xlu0 %v115_v43, %s2571_s25  ;;  %v2123_v9 = vld [vmem:[%s4760_s0 + $0xdc] sm:$0x8]   ;;  %v304_v14 = vsel %vm94_vm1, %v2122_v5, %v300_v8 }
   0xc   :  { %v2096_v30 = vld [vmem:[%s4760_s0 + $0xec] sm:$0x8]   ;;  %v199_v34 = vsel %vm94_vm1, %v2095_v25, %v195_v29  ;;  %v2077_v41 = vld [vmem:[%s4760_s0 + $0xa5] sm:$0x4]   ;;  %v125_v46 = vsel %vm90_vm0, %v2076_v40, %v2075_v37  ;;  %v2124_v10 = vld [vmem:[%s4760_s0 + $0x11b] sm:$0x10]   ;;  %v308_v17 = vsel %vm98_vm2, %v2123_v9, %v304_v14 }
   0xd   :  { %v2097_v31 = vld [vmem:[%s4760_s0 + $0x12b] sm:$0x10]   ;;  %v203_v39 = vsel %vm98_vm2, %v2096_v30, %v199_v34  ;;  %v2078_v42 = vld [vmem:[%s4760_s0 + $0xe4] sm:$0x8]   ;;  %v129_v50 = vsel %vm94_vm1, %v2077_v41, %v125_v46  ;;  %v2135_v13 = vld [vmem:[%s4760_s0 + $0x1b9] sm:$0x40]   ;;  %v312_v21 = vsel %vm102_vm3, %v2124_v10, %v308_v17 }
   0xe   :  { %v2098_v35 = vld [vmem:[%s4760_s0 + $0x16a] sm:$0x20]   ;;  %v207_v44 = vsel %vm102_vm3, %v2097_v31, %v203_v39  ;;  %v2079_v47 = vld [vmem:[%s4760_s0 + $0x123] sm:$0x10]   ;;  %v133_v55 = vsel %vm98_vm2, %v2078_v42, %v129_v50  ;;  %v2125_v15 = vld [vmem:[%s4760_s0 + $0x15a] sm:$0x20]   ;;  %v355_v25 = vsel %vm110_vm5, %v2135_v13, %v351_v12 }
   0xf   :  { %v2099_v36 = vld [vmem:[%s4760_s0 + $0x1a9] sm:$0x40]   ;;  %v2080_v48 = vld [vmem:[%s4760_s0 + $0x162] sm:$0x20]   ;;  %v211_v49 = vsel %vm106_vm4, %v2098_v35, %v207_v44  ;;  %v137_v60 = vsel %vm102_vm3, %v2079_v47, %v133_v55  ;;  %v2155_v16 = vld [vmem:[%s4760_s0 + $0xe] sm:$0x1]   ;;  %v316_v27 = vsel %vm106_vm4, %v2125_v15, %v312_v21 }
  0x10   :  { %v2100_v45 = vld [vmem:[%s4760_s0 + $0x1e8] sm:$0x80]   ;;  %v2081_v51 = vld [vmem:[%s4760_s0 + $0x1a1] sm:$0x40]   ;;  %v215_v54 = vsel %vm110_vm5, %v2099_v36, %v211_v49  ;;  %v141_v1 = vsel %vm106_vm4, %v2080_v48, %v137_v60  ;;  %v2156_v18 = vld [vmem:[%s4760_s0 + $0x4d] sm:$0x2]  }
  0x11   :  { %v2082_v61 = vld [vmem:[%s4760_s0 + $0x1e0] sm:$0x80]   ;;  %v219_v0 = vsel %vm114_vm6, %v2100_v45, %v215_v54  ;;  %v145_v6 = vsel %vm110_vm5, %v2081_v51, %v141_v1  ;;  %v2157_v19 = vld [vmem:[%s4760_s0 + $0x8c] sm:$0x4]   ;;  %v2126_v22 = vld [vmem:[%s4760_s0 + $0x199] sm:$0x40]   ;;  %v439_v23 = vsel %vm90_vm0, %v2156_v18, %v2155_v16 }
  0x12   :  { %v149_v11 = vsel %vm114_vm6, %v2082_v61, %v145_v6  ;;  %220 = vrot.lane.b32.xlu1 %v219_v0, %s2571_s25  ;;  %v2158_v20 = vld [vmem:[%s4760_s0 + $0xcb] sm:$0x8]   ;;  %v2136_v26 = vld [vmem:[%s4760_s0 + $0x1f8] sm:$0x80]   ;;  %v443_v28 = vsel %vm94_vm1, %v2157_v19, %v439_v23  ;;  %v2146_v29 = vld [vmem:[%s4760_s0 + $0x26] sm:$0x1]   ;;  %v320_v36 = vsel %vm110_vm5, %v2126_v22, %v316_v27 }
  0x13   :  { %v2159_v24 = vld [vmem:[%s4760_s0 + $0x10a] sm:$0x10]   ;;  %150 = vrot.lane.b32.xlu0 %v149_v11, %s2571_s25  ;;  %v2147_v30 = vld [vmem:[%s4760_s0 + $0x65] sm:$0x2]   ;;  %v447_v31 = vsel %vm98_vm2, %v2158_v20, %v443_v28  ;;  %v2127_v37 = vld [vmem:[%s4760_s0 + $0x1d8] sm:$0x80]   ;;  %v359_v41 = vsel %vm114_vm6, %v2136_v26, %v355_v25 }
  0x14   :  { %v404_v32 = vsel %vm90_vm0, %v2147_v30, %v2146_v29  ;;  %v2148_v33 = vld [vmem:[%s4760_s0 + $0xa4] sm:$0x4]   ;;  %v451_v38 = vsel %vm102_vm3, %v2159_v24, %v447_v31  ;;  %v2160_v39 = vld [vmem:[%s4760_s0 + $0x149] sm:$0x20]   ;;  %v2102_v44 = vld [vmem:[%s4760_s0 + $0x17] sm:$0x1]   ;;  %v324_v52 = vsel %vm114_vm6, %v2127_v37, %v320_v36 }
  0x15   :  { %v2149_v34 = vld [vmem:[%s4760_s0 + $0xe3] sm:$0x8]   ;;  %v408_v40 = vsel %vm94_vm1, %v2148_v33, %v404_v32  ;;  %v2161_v42 = vld [vmem:[%s4760_s0 + $0x188] sm:$0x40]   ;;  %v2103_v45 = vld [vmem:[%s4760_s0 + $0x56] sm:$0x2]   ;;  %v455_v53 = vsel %vm106_vm4, %v2160_v39, %v451_v38 }
  0x16   :  { %v2150_v35 = vld [vmem:[%s4760_s0 + $0x122] sm:$0x10]   ;;  %v412_v43 = vsel %vm98_vm2, %v2149_v34, %v408_v40  ;;  %v2104_v46 = vld [vmem:[%s4760_s0 + $0x95] sm:$0x4]   ;;  %v230_v49 = vsel %vm90_vm0, %v2103_v45, %v2102_v44  ;;  %v2182_v57 = vld [vmem:[%s4760_s0 + $0x36] sm:$0x1]   ;;  %v459_v4 = vsel %vm110_vm5, %v2161_v42, %v455_v53 }
  0x17   :  { %v416_v47 = vsel %vm102_vm3, %v2150_v35, %v412_v43  ;;  %v2151_v48 = vld [vmem:[%s4760_s0 + $0x161] sm:$0x20]   ;;  %v2105_v50 = vld [vmem:[%s4760_s0 + $0xd4] sm:$0x8]   ;;  %v234_v54 = vsel %vm94_vm1, %v2104_v46, %v230_v49  ;;  %v2183_v59 = vld [vmem:[%s4760_s0 + $0x75] sm:$0x2]  }
  0x18   :  { %v2106_v51 = vld [vmem:[%s4760_s0 + $0x113] sm:$0x10]   ;;  %v238_v58 = vsel %vm98_vm2, %v2105_v50, %v234_v54  ;;  %v2184_v60 = vld [vmem:[%s4760_s0 + $0xb4] sm:$0x4]   ;;  %v420_v62 = vsel %vm106_vm4, %v2151_v48, %v416_v47  ;;  %v2152_v63 = vld [vmem:[%s4760_s0 + $0x1a0] sm:$0x40]   ;;  %v544_v2 = vsel %vm90_vm0, %v2183_v59, %v2182_v57 }
  0x19   :  { %v2107_v55 = vld [vmem:[%s4760_s0 + $0x152] sm:$0x20]   ;;  %v2185_v61 = vld [vmem:[%s4760_s0 + $0xf3] sm:$0x8]   ;;  %v242_v0 = vsel %vm102_vm3, %v2106_v51, %v238_v58  ;;  %v2162_v5 = vld [vmem:[%s4760_s0 + $0x1c7] sm:$0x80]   ;;  %v548_v7 = vsel %vm94_vm1, %v2184_v60, %v544_v2  ;;  %v424_v16 = vsel %vm110_vm5, %v2152_v63, %v420_v62 }
  0x1a   :  { %v2108_v56 = vld [vmem:[%s4760_s0 + $0x191] sm:$0x40]   ;;  %360 = vrot.lane.b32.xlu1 %v359_v41, %s2571_s25  ;;  %v2186_v3 = vld [vmem:[%s4760_s0 + $0x132] sm:$0x10]   ;;  %v246_v6 = vsel %vm106_vm4, %v2107_v55, %v242_v0  ;;  %v552_v11 = vsel %vm98_vm2, %v2185_v61, %v548_v7  ;;  %v2153_v17 = vld [vmem:[%s4760_s0 + $0x1df] sm:$0x80]   ;;  %v463_v22 = vsel %vm114_vm6, %v2162_v5, %v459_v4 }
  0x1b   :  { %v2109_v1 = vld [vmem:[%s4760_s0 + $0x1d0] sm:$0x80]   ;;  %325 = vrot.lane.b32.xlu0 %v324_v52, %s2571_s25  ;;  %v2173_v8 = vld [vmem:[%s4760_s0 + $0x16] sm:$0x1]   ;;  %v250_v10 = vsel %vm110_vm5, %v2108_v56, %v246_v6  ;;  %v556_v19 = vsel %vm102_vm3, %v2186_v3, %v552_v11  ;;  %v428_v33 = vsel %vm114_vm6, %v2153_v17, %v424_v16  ;;  %v2209_v38 = vld [vmem:[%s4760_s0 + $0x5] sm:$0x1]  }
  0x1c   :  { %v2174_v9 = vld [vmem:[%s4760_s0 + $0x55] sm:$0x2]   ;;  %v254_v18 = vsel %vm114_vm6, %v2109_v1, %v250_v10  ;;  %v2111_v25 = vld [vmem:[%s4760_s0 + $0x37] sm:$0x1]   ;;  %v2210_v40 = vld [vmem:[%s4760_s0 + $0x44] sm:$0x2]  }
  0x1d   :  { %v509_v12 = vsel %vm90_vm0, %v2174_v9, %v2173_v8  ;;  %v2175_v13 = vld [vmem:[%s4760_s0 + $0x94] sm:$0x4]   ;;  %255 = vrot.lane.b32.xlu2 %v254_v18, %s2571_s25  ;;  %v2112_v26 = vld [vmem:[%s4760_s0 + $0x76] sm:$0x2]   ;;  %v2211_v41 = vld [vmem:[%s4760_s0 + $0x83] sm:$0x4]   ;;  %v649_v47 = vsel %vm90_vm0, %v2210_v40, %v2209_v38 }
  0x1e   :  { %v2176_v14 = vld [vmem:[%s4760_s0 + $0xd3] sm:$0x8]   ;;  %v513_v21 = vsel %vm94_vm1, %v2175_v13, %v509_v12  ;;  %v2113_v27 = vld [vmem:[%s4760_s0 + $0xb5] sm:$0x4]   ;;  %v265_v30 = vsel %vm90_vm0, %v2112_v26, %v2111_v25  ;;  %v2212_v42 = vld [vmem:[%s4760_s0 + $0xc2] sm:$0x8]   ;;  %v653_v52 = vsel %vm94_vm1, %v2211_v41, %v649_v47 }
  0x1f   :  { %v2177_v15 = vld [vmem:[%s4760_s0 + $0x112] sm:$0x10]   ;;  %v517_v24 = vsel %vm98_vm2, %v2176_v14, %v513_v21  ;;  %v2114_v31 = vld [vmem:[%s4760_s0 + $0xf4] sm:$0x8]   ;;  %v269_v35 = vsel %vm94_vm1, %v2113_v27, %v265_v30  ;;  %v2213_v48 = vld [vmem:[%s4760_s0 + $0x101] sm:$0x10]   ;;  %v657_v56 = vsel %vm98_vm2, %v2212_v42, %v653_v52 }
  0x20   :  { %v2187_v20 = vld [vmem:[%s4760_s0 + $0x171] sm:$0x20]   ;;  %v521_v28 = vsel %vm102_vm3, %v2177_v15, %v517_v24  ;;  %v2115_v32 = vld [vmem:[%s4760_s0 + $0x133] sm:$0x10]   ;;  %v273_v39 = vsel %vm98_vm2, %v2114_v31, %v269_v35  ;;  %v2200_v53 = vld [vmem:[%s4760_s0 + $0x3e] sm:$0x1]   ;;  %v661_v0 = vsel %vm102_vm3, %v2213_v48, %v657_v56 }
  0x21   :  { %v2188_v23 = vld [vmem:[%s4760_s0 + $0x1b0] sm:$0x40]   ;;  %v560_v34 = vsel %vm106_vm4, %v2187_v20, %v556_v19  ;;  %v2116_v36 = vld [vmem:[%s4760_s0 + $0x172] sm:$0x20]   ;;  %v277_v45 = vsel %vm102_vm3, %v2115_v32, %v273_v39  ;;  %v2201_v54 = vld [vmem:[%s4760_s0 + $0x7d] sm:$0x2]  }
  0x22   :  { %v2178_v29 = vld [vmem:[%s4760_s0 + $0x151] sm:$0x20]   ;;  %v2117_v37 = vld [vmem:[%s4760_s0 + $0x1b1] sm:$0x40]   ;;  %464 = vrot.lane.b32.xlu1 %v463_v22, %s2572_s23  ;;  %v564_v49 = vsel %vm110_vm5, %v2188_v23, %v560_v34  ;;  %v281_v51 = vsel %vm106_vm4, %v2116_v36, %v277_v45  ;;  %v614_v57 = vsel %vm90_vm0, %v2201_v54, %v2200_v53  ;;  %v2202_v58 = vld [vmem:[%s4760_s0 + $0xbc] sm:$0x4]  }
  0x23   :  { %v525_v43 = vsel %vm106_vm4, %v2178_v29, %v521_v28  ;;  %v2179_v44 = vld [vmem:[%s4760_s0 + $0x190] sm:$0x40]   ;;  %v2118_v46 = vld [vmem:[%s4760_s0 + $0x1f0] sm:$0x80]   ;;  %429 = vrot.lane.b32.xlu0 %v428_v33, %s2572_s23  ;;  %v285_v55 = vsel %vm110_vm5, %v2117_v37, %v281_v51  ;;  %v2203_v59 = vld [vmem:[%s4760_s0 + $0xfb] sm:$0x8]   ;;  %v618_v2 = vsel %vm94_vm1, %v2202_v58, %v614_v57 }
  0x24   :  { %v2189_v50 = vld [vmem:[%s4760_s0 + $0x1ef] sm:$0x80]   ;;  %v2204_v60 = vld [vmem:[%s4760_s0 + $0x13a] sm:$0x10]   ;;  %v529_v61 = vsel %vm110_vm5, %v2179_v44, %v525_v43  ;;  %v289_v63 = vsel %vm114_vm6, %v2118_v46, %v285_v55  ;;  %v2214_v1 = vld [vmem:[%s4760_s0 + $0x140] sm:$0x20]   ;;  %v622_v5 = vsel %vm98_vm2, %v2203_v59, %v618_v2 }
  0x25   :  { %v2180_v62 = vld [vmem:[%s4760_s0 + $0x1cf] sm:$0x80]   ;;  %v568_v3 = vsel %vm114_vm6, %v2189_v50, %v564_v49  ;;  %290 = vrot.lane.b32.xlu2 %v289_v63, %s2571_s25  ;;  %v2215_v4 = vld [vmem:[%s4760_s0 + $0x17f] sm:$0x40]   ;;  %v2138_v6 = vld [vmem:[%s4760_s0 + $0x6] sm:$0x1]   ;;  %v626_v9 = vsel %vm102_vm3, %v2204_v60, %v622_v5  ;;  %v665_v15 = vsel %vm106_vm4, %v2214_v1, %v661_v0 }
  0x26   :  { %v2139_v7 = vld [vmem:[%s4760_s0 + $0x45] sm:$0x2]   ;;  %v2205_v10 = vld [vmem:[%s4760_s0 + $0x179] sm:$0x20]   ;;  %v533_v14 = vsel %vm114_vm6, %v2180_v62, %v529_v61  ;;  %v2235_v19 = vld [vmem:[%s4760_s0 + $0x2d] sm:$0x1]   ;;  %v669_v30 = vsel %vm110_vm5, %v2215_v4, %v665_v15 }
  0x27   :  { %v2140_v8 = vld [vmem:[%s4760_s0 + $0x84] sm:$0x4]   ;;  %v370_v11 = vsel %vm90_vm0, %v2139_v7, %v2138_v6  ;;  %v2236_v21 = vld [vmem:[%s4760_s0 + $0x6c] sm:$0x2]   ;;  %v630_v24 = vsel %vm106_vm4, %v2205_v10, %v626_v9  ;;  %v2206_v25 = vld [vmem:[%s4760_s0 + $0x1b8] sm:$0x40]  }
  0x28   :  { %v2141_v12 = vld [vmem:[%s4760_s0 + $0xc3] sm:$0x8]   ;;  %v374_v16 = vsel %vm94_vm1, %v2140_v8, %v370_v11  ;;  %v2237_v22 = vld [vmem:[%s4760_s0 + $0xab] sm:$0x4]   ;;  %v753_v28 = vsel %vm90_vm0, %v2236_v21, %v2235_v19  ;;  %v2216_v31 = vld [vmem:[%s4760_s0 + $0x1be] sm:$0x80]   ;;  %v634_v42 = vsel %vm110_vm5, %v2206_v25, %v630_v24 }
  0x29   :  { %v2142_v13 = vld [vmem:[%s4760_s0 + $0x102] sm:$0x10]   ;;  %v378_v20 = vsel %vm98_vm2, %v2141_v12, %v374_v16  ;;  %v2238_v23 = vld [vmem:[%s4760_s0 + $0xea] sm:$0x8]   ;;  %v757_v33 = vsel %vm94_vm1, %v2237_v22, %v753_v28  ;;  %v2207_v43 = vld [vmem:[%s4760_s0 + $0x1f7] sm:$0x80]   ;;  %v673_v48 = vsel %vm114_vm6, %v2216_v31, %v669_v30 }
  0x2a   :  { %v2143_v17 = vld [vmem:[%s4760_s0 + $0x141] sm:$0x20]   ;;  %569 = vrot.lane.b32.xlu1 %v568_v3, %s2572_s23  ;;  %v382_v26 = vsel %vm102_vm3, %v2142_v13, %v378_v20  ;;  %v2239_v29 = vld [vmem:[%s4760_s0 + $0x129] sm:$0x10]   ;;  %v761_v37 = vsel %vm98_vm2, %v2238_v23, %v757_v33  ;;  %v2164_v51 = vld [vmem:[%s4760_s0 + $0x2e] sm:$0x1]   ;;  %v638_v59 = vsel %vm114_vm6, %v2207_v43, %v634_v42 }
  0x2b   :  { %v2144_v18 = vld [vmem:[%s4760_s0 + $0x180] sm:$0x40]   ;;  %534 = vrot.lane.b32.xlu0 %v533_v14, %s2572_s23  ;;  %v386_v32 = vsel %vm106_vm4, %v2143_v17, %v382_v26  ;;  %v2226_v34 = vld [vmem:[%s4760_s0 + $0xd] sm:$0x1]   ;;  %v765_v45 = vsel %vm102_vm3, %v2239_v29, %v761_v37  ;;  %v2165_v52 = vld [vmem:[%s4760_s0 + $0x6d] sm:$0x2]  }
  0x2c   :  { %v2145_v27 = vld [vmem:[%s4760_s0 + $0x1bf] sm:$0x80]   ;;  %v2227_v35 = vld [vmem:[%s4760_s0 + $0x4c] sm:$0x2]   ;;  %v390_v36 = vsel %vm110_vm5, %v2144_v18, %v386_v32  ;;  %v2166_v53 = vld [vmem:[%s4760_s0 + $0xac] sm:$0x4]   ;;  %v474_v56 = vsel %vm90_vm0, %v2165_v52, %v2164_v51 }
  0x2d   :  { %v718_v38 = vsel %vm90_vm0, %v2227_v35, %v2226_v34  ;;  %v2228_v39 = vld [vmem:[%s4760_s0 + $0x8b] sm:$0x4]   ;;  %v394_v44 = vsel %vm114_vm6, %v2145_v27, %v390_v36  ;;  %v2167_v57 = vld [vmem:[%s4760_s0 + $0xeb] sm:$0x8]   ;;  %v478_v61 = vsel %vm94_vm1, %v2166_v53, %v474_v56  ;;  %v2262_v0 = vld [vmem:[%s4760_s0 + $0x1d] sm:$0x1]  }
  0x2e   :  { %v2229_v40 = vld [vmem:[%s4760_s0 + $0xca] sm:$0x8]   ;;  %v722_v47 = vsel %vm94_vm1, %v2228_v39, %v718_v38  ;;  %395 = vrot.lane.b32.xlu2 %v394_v44, %s2572_s23  ;;  %v2168_v58 = vld [vmem:[%s4760_s0 + $0x12a] sm:$0x10]   ;;  %v482_v1 = vsel %vm98_vm2, %v2167_v57, %v478_v61  ;;  %v2263_v2 = vld [vmem:[%s4760_s0 + $0x5c] sm:$0x2]  }
  0x2f   :  { %v2230_v41 = vld [vmem:[%s4760_s0 + $0x109] sm:$0x10]   ;;  %v726_v50 = vsel %vm98_vm2, %v2229_v40, %v722_v47  ;;  %v2169_v62 = vld [vmem:[%s4760_s0 + $0x169] sm:$0x20]   ;;  %v2264_v3 = vld [vmem:[%s4760_s0 + $0x9b] sm:$0x4]   ;;  %v486_v7 = vsel %vm102_vm3, %v2168_v58, %v482_v1  ;;  %v858_v9 = vsel %vm90_vm0, %v2263_v2, %v2262_v0 }
  0x30   :  { %v2240_v46 = vld [vmem:[%s4760_s0 + $0x168] sm:$0x20]   ;;  %v730_v54 = vsel %vm102_vm3, %v2230_v41, %v726_v50  ;;  %v2170_v63 = vld [vmem:[%s4760_s0 + $0x1a8] sm:$0x40]   ;;  %v2265_v4 = vld [vmem:[%s4760_s0 + $0xda] sm:$0x8]   ;;  %v490_v13 = vsel %vm106_vm4, %v2169_v62, %v486_v7  ;;  %v862_v14 = vsel %vm94_vm1, %v2264_v3, %v858_v9 }
  0x31   :  { %v2241_v49 = vld [vmem:[%s4760_s0 + $0x1a7] sm:$0x40]   ;;  %v769_v60 = vsel %vm106_vm4, %v2240_v46, %v765_v45  ;;  %v2171_v8 = vld [vmem:[%s4760_s0 + $0x1e7] sm:$0x80]   ;;  %v2266_v10 = vld [vmem:[%s4760_s0 + $0x119] sm:$0x10]   ;;  %v494_v17 = vsel %vm110_vm5, %v2170_v63, %v490_v13  ;;  %v866_v18 = vsel %vm98_vm2, %v2265_v4, %v862_v14 }
  0x32   :  { %v2231_v55 = vld [vmem:[%s4760_s0 + $0x148] sm:$0x20]   ;;  %674 = vrot.lane.b32.xlu1 %v673_v48, %s2573_s8  ;;  %v773_v11 = vsel %vm110_vm5, %v2241_v49, %v769_v60  ;;  %v2253_v15 = vld [vmem:[%s4760_s0 + $0x35] sm:$0x1]   ;;  %v498_v25 = vsel %vm114_vm6, %v2171_v8, %v494_v17  ;;  %v870_v26 = vsel %vm102_vm3, %v2266_v10, %v866_v18  ;;  %v2267_v27 = vld [vmem:[%s4760_s0 + $0x158] sm:$0x20]  }
  0x33   :  { %v734_v5 = vsel %vm106_vm4, %v2231_v55, %v730_v54  ;;  %v2232_v6 = vld [vmem:[%s4760_s0 + $0x187] sm:$0x40]   ;;  %639 = vrot.lane.b32.xlu0 %v638_v59, %s2572_s23  ;;  %v2254_v16 = vld [vmem:[%s4760_s0 + $0x74] sm:$0x2]   ;;  %v2268_v30 = vld [vmem:[%s4760_s0 + $0x197] sm:$0x40]   ;;  %v874_v41 = vsel %vm106_vm4, %v2267_v27, %v870_v26 }
  0x34   :  { %v2242_v12 = vld [vmem:[%s4760_s0 + $0x1e6] sm:$0x80]   ;;  %v823_v19 = vsel %vm90_vm0, %v2254_v16, %v2253_v15  ;;  %v2255_v20 = vld [vmem:[%s4760_s0 + $0xb3] sm:$0x4]   ;;  %v738_v23 = vsel %vm110_vm5, %v2232_v6, %v734_v5  ;;  %v2191_v32 = vld [vmem:[%s4760_s0 + $0x1e] sm:$0x1]   ;;  %v878_v56 = vsel %vm110_vm5, %v2268_v30, %v874_v41 }
  0x35   :  { %v2256_v21 = vld [vmem:[%s4760_s0 + $0xf2] sm:$0x8]   ;;  %v2233_v24 = vld [vmem:[%s4760_s0 + $0x1c6] sm:$0x80]   ;;  %v827_v28 = vsel %vm94_vm1, %v2255_v20, %v823_v19  ;;  %v777_v29 = vsel %vm114_vm6, %v2242_v12, %v773_v11  ;;  %v2192_v33 = vld [vmem:[%s4760_s0 + $0x5d] sm:$0x2]  }
  0x36   :  { %v2257_v22 = vld [vmem:[%s4760_s0 + $0x131] sm:$0x10]   ;;  %499 = vrot.lane.b32.xlu2 %v498_v25, %s2572_s23  ;;  %v831_v31 = vsel %vm98_vm2, %v2256_v21, %v827_v28  ;;  %v2193_v34 = vld [vmem:[%s4760_s0 + $0x9c] sm:$0x4]   ;;  %v579_v37 = vsel %vm90_vm0, %v2192_v33, %v2191_v32  ;;  %v742_v40 = vsel %vm114_vm6, %v2233_v24, %v738_v23  ;;  %v2288_v47 = vld [vmem:[%s4760_s0 + $0x24] sm:$0x1]  }
  0x37   :  { %v835_v35 = vsel %vm102_vm3, %v2257_v22, %v831_v31  ;;  %v2258_v36 = vld [vmem:[%s4760_s0 + $0x170] sm:$0x20]   ;;  %v2194_v38 = vld [vmem:[%s4760_s0 + $0xdb] sm:$0x8]   ;;  %v583_v43 = vsel %vm94_vm1, %v2193_v34, %v579_v37  ;;  %v2289_v48 = vld [vmem:[%s4760_s0 + $0x63] sm:$0x2]  }
  0x38   :  { %v2195_v39 = vld [vmem:[%s4760_s0 + $0x11a] sm:$0x10]   ;;  %v2259_v42 = vld [vmem:[%s4760_s0 + $0x1af] sm:$0x40]   ;;  %v587_v46 = vsel %vm98_vm2, %v2194_v38, %v583_v43  ;;  %v2290_v49 = vld [vmem:[%s4760_s0 + $0xa2] sm:$0x4]   ;;  %v839_v50 = vsel %vm106_vm4, %v2258_v36, %v835_v35  ;;  %v962_v53 = vsel %vm90_vm0, %v2289_v48, %v2288_v47 }
  0x39   :  { %v2196_v44 = vld [vmem:[%s4760_s0 + $0x159] sm:$0x20]   ;;  %v591_v51 = vsel %vm102_vm3, %v2195_v39, %v587_v46  ;;  %v2291_v54 = vld [vmem:[%s4760_s0 + $0xe1] sm:$0x8]   ;;  %v2269_v57 = vld [vmem:[%s4760_s0 + $0x1d6] sm:$0x80]   ;;  %v966_v59 = vsel %vm94_vm1, %v2290_v49, %v962_v53  ;;  %v843_v2 = vsel %vm110_vm5, %v2259_v42, %v839_v50 }
  0x3a   :  { %v2197_v45 = vld [vmem:[%s4760_s0 + $0x198] sm:$0x40]   ;;  %778 = vrot.lane.b32.xlu1 %v777_v29, %s2573_s8  ;;  %v2292_v55 = vld [vmem:[%s4760_s0 + $0x120] sm:$0x10]   ;;  %v595_v58 = vsel %vm106_vm4, %v2196_v44, %v591_v51  ;;  %v970_v62 = vsel %vm98_vm2, %v2291_v54, %v966_v59  ;;  %v2260_v3 = vld [vmem:[%s4760_s0 + $0x1ee] sm:$0x80]   ;;  %v882_v9 = vsel %vm114_vm6, %v2269_v57, %v878_v56 }
  0x3b   :  { %v2198_v52 = vld [vmem:[%s4760_s0 + $0x1d7] sm:$0x80]   ;;  %743 = vrot.lane.b32.xlu0 %v742_v40, %s2573_s8  ;;  %v2280_v60 = vld [vmem:[%s4760_s0 + $0x4] sm:$0x1]   ;;  %v599_v61 = vsel %vm110_vm5, %v2197_v45, %v595_v58  ;;  %v974_v5 = vsel %vm102_vm3, %v2292_v55, %v970_v62  ;;  %v2217_v13 = vld [vmem:[%s4760_s0 + $0x25] sm:$0x1]   ;;  %v847_v20 = vsel %vm114_vm6, %v2260_v3, %v843_v2 }
  0x3c   :  { %v2281_v63 = vld [vmem:[%s4760_s0 + $0x43] sm:$0x2]   ;;  %v603_v4 = vsel %vm114_vm6, %v2198_v52, %v599_v61  ;;  %v2218_v14 = vld [vmem:[%s4760_s0 + $0x64] sm:$0x2]   ;;  %v2315_v28 = vld [vmem:[%s4760_s0 + $0x14] sm:$0x1]  }
  0x3d   :  { %v2282_v0 = vld [vmem:[%s4760_s0 + $0x82] sm:$0x4]   ;;  %v928_v7 = vsel %vm90_vm0, %v2281_v63, %v2280_v60  ;;  %v683_v16 = vsel %vm90_vm0, %v2218_v14, %v2217_v13  ;;  %v2219_v17 = vld [vmem:[%s4760_s0 + $0xa3] sm:$0x4]   ;;  %v2316_v29 = vld [vmem:[%s4760_s0 + $0x53] sm:$0x2]  }
  0x3e   :  { %v2283_v1 = vld [vmem:[%s4760_s0 + $0xc1] sm:$0x8]   ;;  %604 = vrot.lane.b32.xlu2 %v603_v4, %s2572_s23  ;;  %v932_v11 = vsel %vm94_vm1, %v2282_v0, %v928_v7  ;;  %v2220_v18 = vld [vmem:[%s4760_s0 + $0xe2] sm:$0x8]   ;;  %v687_v24 = vsel %vm94_vm1, %v2219_v17, %v683_v16  ;;  %v2317_v30 = vld [vmem:[%s4760_s0 + $0x92] sm:$0x4]   ;;  %v1067_v34 = vsel %vm90_vm0, %v2316_v29, %v2315_v28 }
  0x3f   :  { %v2293_v6 = vld [vmem:[%s4760_s0 + $0x15f] sm:$0x20]   ;;  %v936_v15 = vsel %vm98_vm2, %v2283_v1, %v932_v11  ;;  %v2221_v19 = vld [vmem:[%s4760_s0 + $0x121] sm:$0x10]   ;;  %v691_v27 = vsel %vm98_vm2, %v2220_v18, %v687_v24  ;;  %v2318_v35 = vld [vmem:[%s4760_s0 + $0xd1] sm:$0x8]   ;;  %v1071_v40 = vsel %vm94_vm1, %v2317_v30, %v1067_v34 }
  0x40   :  { %v2284_v8 = vld [vmem:[%s4760_s0 + $0x100] sm:$0x10]   ;;  %v978_v21 = vsel %vm106_vm4, %v2293_v6, %v974_v5  ;;  %v2222_v25 = vld [vmem:[%s4760_s0 + $0x160] sm:$0x20]   ;;  %v695_v32 = vsel %vm102_vm3, %v2221_v19, %v691_v27  ;;  %v2319_v36 = vld [vmem:[%s4760_s0 + $0x110] sm:$0x10]   ;;  %v1075_v43 = vsel %vm98_vm2, %v2318_v35, %v1071_v40 }
  0x41   :  { %v2294_v10 = vld [vmem:[%s4760_s0 + $0x19e] sm:$0x40]   ;;  %v940_v22 = vsel %vm102_vm3, %v2284_v8, %v936_v15  ;;  %v2223_v26 = vld [vmem:[%s4760_s0 + $0x19f] sm:$0x40]   ;;  %v699_v39 = vsel %vm106_vm4, %v2222_v25, %v695_v32  ;;  %v2306_v41 = vld [vmem:[%s4760_s0 + $0x2c] sm:$0x1]   ;;  %v1079_v50 = vsel %vm102_vm3, %v2319_v36, %v1075_v43 }
  0x42   :  { %v2285_v12 = vld [vmem:[%s4760_s0 + $0x13f] sm:$0x20]   ;;  %883 = vrot.lane.b32.xlu1 %v882_v9, %s2573_s8  ;;  %v2224_v33 = vld [vmem:[%s4760_s0 + $0x1de] sm:$0x80]   ;;  %v982_v37 = vsel %vm110_vm5, %v2294_v10, %v978_v21  ;;  %v703_v42 = vsel %vm110_vm5, %v2223_v26, %v699_v39  ;;  %v2307_v44 = vld [vmem:[%s4760_s0 + $0x6b] sm:$0x2]  }
  0x43   :  { %v2286_v23 = vld [vmem:[%s4760_s0 + $0x17e] sm:$0x40]   ;;  %v944_v31 = vsel %vm106_vm4, %v2285_v12, %v940_v22  ;;  %848 = vrot.lane.b32.xlu0 %v847_v20, %s2573_s8  ;;  %v2308_v45 = vld [vmem:[%s4760_s0 + $0xaa] sm:$0x4]   ;;  %v707_v49 = vsel %vm114_vm6, %v2224_v33, %v703_v42  ;;  %v2320_v51 = vld [vmem:[%s4760_s0 + $0x14f] sm:$0x20]   ;;  %v1032_v52 = vsel %vm90_vm0, %v2307_v44, %v2306_v41 }
  0x44   :  { %v2295_v38 = vld [vmem:[%s4760_s0 + $0x1dd] sm:$0x80]   ;;  %v2309_v46 = vld [vmem:[%s4760_s0 + $0xe9] sm:$0x8]   ;;  %v948_v47 = vsel %vm110_vm5, %v2286_v23, %v944_v31  ;;  %v2321_v55 = vld [vmem:[%s4760_s0 + $0x18e] sm:$0x40]   ;;  %v1036_v56 = vsel %vm94_vm1, %v2308_v45, %v1032_v52  ;;  %v1083_v2 = vsel %vm106_vm4, %v2320_v51, %v1079_v50 }
  0x45   :  { %v2287_v48 = vld [vmem:[%s4760_s0 + $0x1bd] sm:$0x80]   ;;  %v2310_v53 = vld [vmem:[%s4760_s0 + $0x128] sm:$0x10]   ;;  %v986_v54 = vsel %vm114_vm6, %v2295_v38, %v982_v37  ;;  %v2244_v58 = vld [vmem:[%s4760_s0 + $0x15] sm:$0x1]   ;;  %v1040_v60 = vsel %vm98_vm2, %v2309_v46, %v1036_v56  ;;  %v1087_v18 = vsel %vm110_vm5, %v2321_v55, %v1083_v2 }
  0x46   :  { %708 = vrot.lane.b32.xlu2 %v707_v49, %s2573_s8  ;;  %v2311_v57 = vld [vmem:[%s4760_s0 + $0x167] sm:$0x20]   ;;  %v2245_v59 = vld [vmem:[%s4760_s0 + $0x54] sm:$0x2]   ;;  %v952_v1 = vsel %vm114_vm6, %v2287_v48, %v948_v47  ;;  %v1044_v3 = vsel %vm102_vm3, %v2310_v53, %v1040_v60  ;;  %s2574_s15 = smov 64   ;;  %s2575_s22 = smov 48  }
  0x47   :  { %v788_v61 = vsel %vm90_vm0, %v2245_v59, %v2244_v58  ;;  %v2246_v62 = vld [vmem:[%s4760_s0 + $0x93] sm:$0x4]   ;;  %v2312_v4 = vld [vmem:[%s4760_s0 + $0x1a6] sm:$0x40]   ;;  %v2342_v9 = vld [vmem:[%s4760_s0 + $0x3c] sm:$0x1]   ;;  %v1048_v12 = vsel %vm106_vm4, %v2311_v57, %v1044_v3 }
  0x48   :  { %v2247_v63 = vld [vmem:[%s4760_s0 + $0xd2] sm:$0x8]   ;;  %v792_v5 = vsel %vm94_vm1, %v2246_v62, %v788_v61  ;;  %v2343_v10 = vld [vmem:[%s4760_s0 + $0x7b] sm:$0x2]   ;;  %v2322_v19 = vld [vmem:[%s4760_s0 + $0x1cd] sm:$0x80]   ;;  %v1052_v28 = vsel %vm110_vm5, %v2312_v4, %v1048_v12 }
  0x49   :  { %v2248_v0 = vld [vmem:[%s4760_s0 + $0x111] sm:$0x10]   ;;  %v796_v8 = vsel %vm98_vm2, %v2247_v63, %v792_v5  ;;  %v2344_v11 = vld [vmem:[%s4760_s0 + $0xba] sm:$0x4]   ;;  %v1172_v15 = vsel %vm90_vm0, %v2343_v10, %v2342_v9  ;;  %v2313_v29 = vld [vmem:[%s4760_s0 + $0x1e5] sm:$0x80]   ;;  %v1091_v35 = vsel %vm114_vm6, %v2322_v19, %v1087_v18 }
  0x4a   :  { %v2249_v6 = vld [vmem:[%s4760_s0 + $0x150] sm:$0x20]   ;;  %987 = vrot.lane.b32.xlu1 %v986_v54, %s2574_s15  ;;  %v800_v13 = vsel %vm102_vm3, %v2248_v0, %v796_v8  ;;  %v2345_v16 = vld [vmem:[%s4760_s0 + $0xf9] sm:$0x8]   ;;  %v1176_v21 = vsel %vm94_vm1, %v2344_v11, %v1172_v15  ;;  %v2271_v39 = vld [vmem:[%s4760_s0 + $0x3d] sm:$0x1]   ;;  %v1056_v46 = vsel %vm114_vm6, %v2313_v29, %v1052_v28 }
  0x4b   :  { %v2250_v7 = vld [vmem:[%s4760_s0 + $0x18f] sm:$0x40]   ;;  %v2346_v17 = vld [vmem:[%s4760_s0 + $0x138] sm:$0x10]   ;;  %953 = vrot.lane.b32.xlu0 %v952_v1, %s2574_s15  ;;  %v804_v20 = vsel %vm106_vm4, %v2249_v6, %v800_v13  ;;  %v1180_v24 = vsel %vm98_vm2, %v2345_v16, %v1176_v21  ;;  %v2272_v40 = vld [vmem:[%s4760_s0 + $0x7c] sm:$0x2]  }
  0x4c   :  { %v2251_v14 = vld [vmem:[%s4760_s0 + $0x1ce] sm:$0x80]   ;;  %v2333_v22 = vld [vmem:[%s4760_s0 + $0x1c] sm:$0x1]   ;;  %v808_v23 = vsel %vm110_vm5, %v2250_v7, %v804_v20  ;;  %v1184_v31 = vsel %vm102_vm3, %v2346_v17, %v1180_v24  ;;  %v893_v42 = vsel %vm90_vm0, %v2272_v40, %v2271_v39  ;;  %v2273_v43 = vld [vmem:[%s4760_s0 + $0xbb] sm:$0x4]  }
  0x4d   :  { %v2334_v25 = vld [vmem:[%s4760_s0 + $0x5b] sm:$0x2]   ;;  %v812_v30 = vsel %vm114_vm6, %v2251_v14, %v808_v23  ;;  %v2274_v44 = vld [vmem:[%s4760_s0 + $0xfa] sm:$0x8]   ;;  %v897_v50 = vsel %vm94_vm1, %v2273_v43, %v893_v42  ;;  %v2368_v54 = vld [vmem:[%s4760_s0 + $0xb] sm:$0x1]  }
  0x4e   :  { %v2335_v26 = vld [vmem:[%s4760_s0 + $0x9a] sm:$0x4]   ;;  %v1137_v33 = vsel %vm90_vm0, %v2334_v25, %v2333_v22  ;;  %813 = vrot.lane.b32.xlu2 %v812_v30, %s2573_s8  ;;  %v2275_v45 = vld [vmem:[%s4760_s0 + $0x139] sm:$0x10]   ;;  %v901_v53 = vsel %vm98_vm2, %v2274_v44, %v897_v50  ;;  %v2369_v55 = vld [vmem:[%s4760_s0 + $0x4a] sm:$0x2]  }
  0x4f   :  { %v2336_v27 = vld [vmem:[%s4760_s0 + $0xd9] sm:$0x8]   ;;  %v1141_v37 = vsel %vm94_vm1, %v2335_v26, %v1137_v33  ;;  %v2276_v51 = vld [vmem:[%s4760_s0 + $0x178] sm:$0x20]   ;;  %v2370_v56 = vld [vmem:[%s4760_s0 + $0x89] sm:$0x4]   ;;  %v905_v58 = vsel %vm102_vm3, %v2275_v45, %v901_v53  ;;  %v1276_v60 = vsel %vm90_vm0, %v2369_v55, %v2368_v54 }
  0x50   :  { %v2347_v32 = vld [vmem:[%s4760_s0 + $0x177] sm:$0x20]   ;;  %v1145_v41 = vsel %vm98_vm2, %v2336_v27, %v1141_v37  ;;  %v2277_v52 = vld [vmem:[%s4760_s0 + $0x1b7] sm:$0x40]   ;;  %v2371_v61 = vld [vmem:[%s4760_s0 + $0xc8] sm:$0x8]   ;;  %v909_v1 = vsel %vm106_vm4, %v2276_v51, %v905_v58  ;;  %v1280_v2 = vsel %vm94_vm1, %v2370_v56, %v1276_v60 }
  0x51   :  { %v2337_v34 = vld [vmem:[%s4760_s0 + $0x118] sm:$0x10]   ;;  %v1188_v47 = vsel %vm106_vm4, %v2347_v32, %v1184_v31  ;;  %v2278_v59 = vld [vmem:[%s4760_s0 + $0x1f6] sm:$0x80]   ;;  %v2372_v62 = vld [vmem:[%s4760_s0 + $0x107] sm:$0x10]   ;;  %v913_v4 = vsel %vm110_vm5, %v2277_v52, %v909_v1  ;;  %v1284_v5 = vsel %vm98_vm2, %v2371_v61, %v1280_v2 }
  0x52   :  { %v2348_v36 = vld [vmem:[%s4760_s0 + $0x1b6] sm:$0x40]   ;;  %v1149_v48 = vsel %vm102_vm3, %v2337_v34, %v1145_v41  ;;  %1092 = vrot.lane.b32.xlu1 %v1091_v35, %s2574_s15  ;;  %v2359_v3 = vld [vmem:[%s4760_s0 + $0x23] sm:$0x1]   ;;  %v917_v11 = vsel %vm114_vm6, %v2278_v59, %v913_v4  ;;  %v1288_v12 = vsel %vm102_vm3, %v2372_v62, %v1284_v5  ;;  %v2373_v13 = vld [vmem:[%s4760_s0 + $0x146] sm:$0x20]  }
  0x53   :  { %v2338_v38 = vld [vmem:[%s4760_s0 + $0x157] sm:$0x20]   ;;  %1057 = vrot.lane.b32.xlu0 %v1056_v46, %s2574_s15  ;;  %v1192_v63 = vsel %vm110_vm5, %v2348_v36, %v1188_v47  ;;  %v2360_v6 = vld [vmem:[%s4760_s0 + $0x62] sm:$0x2]   ;;  %v2374_v17 = vld [vmem:[%s4760_s0 + $0x185] sm:$0x40]   ;;  %v1292_v28 = vsel %vm106_vm4, %v2373_v13, %v1288_v12 }
  0x54   :  { %v2339_v49 = vld [vmem:[%s4760_s0 + $0x196] sm:$0x40]   ;;  %v1153_v57 = vsel %vm106_vm4, %v2338_v38, %v1149_v48  ;;  %v2361_v7 = vld [vmem:[%s4760_s0 + $0xa1] sm:$0x4]   ;;  %v1241_v14 = vsel %vm90_vm0, %v2360_v6, %v2359_v3  ;;  %v2297_v20 = vld [vmem:[%s4760_s0 + $0xc] sm:$0x1]   ;;  %v1296_v44 = vsel %vm110_vm5, %v2374_v17, %v1292_v28 }
  0x55   :  { %v2349_v0 = vld [vmem:[%s4760_s0 + $0x1f5] sm:$0x80]   ;;  %v2362_v8 = vld [vmem:[%s4760_s0 + $0xe0] sm:$0x8]   ;;  %v1157_v9 = vsel %vm110_vm5, %v2339_v49, %v1153_v57  ;;  %v1245_v18 = vsel %vm94_vm1, %v2361_v7, %v1241_v14  ;;  %v2298_v21 = vld [vmem:[%s4760_s0 + $0x4b] sm:$0x2]  }
  0x56   :  { %v2340_v10 = vld [vmem:[%s4760_s0 + $0x1d5] sm:$0x80]   ;;  %v2363_v15 = vld [vmem:[%s4760_s0 + $0x11f] sm:$0x10]   ;;  %v1196_v16 = vsel %vm114_vm6, %v2349_v0, %v1192_v63  ;;  %918 = vrot.lane.b32.xlu2 %v917_v11, %s2573_s8  ;;  %v1249_v22 = vsel %vm98_vm2, %v2362_v8, %v1245_v18  ;;  %v997_v23 = vsel %vm90_vm0, %v2298_v21, %v2297_v20  ;;  %v2299_v24 = vld [vmem:[%s4760_s0 + $0x8a] sm:$0x4]  }
  0x57   :  { %v2364_v19 = vld [vmem:[%s4760_s0 + $0x15e] sm:$0x20]   ;;  %v2300_v25 = vld [vmem:[%s4760_s0 + $0xc9] sm:$0x8]   ;;  %v1161_v27 = vsel %vm114_vm6, %v2340_v10, %v1157_v9  ;;  %v1253_v29 = vsel %vm102_vm3, %v2363_v15, %v1249_v22  ;;  %v1001_v31 = vsel %vm94_vm1, %v2299_v24, %v997_v23  ;;  %v2395_v35 = vld [vmem:[%s4760_s0 + $0x33] sm:$0x1]  }
  0x58   :  { %v2301_v26 = vld [vmem:[%s4760_s0 + $0x108] sm:$0x10]   ;;  %v2365_v30 = vld [vmem:[%s4760_s0 + $0x19d] sm:$0x40]   ;;  %v1005_v34 = vsel %vm98_vm2, %v2300_v25, %v1001_v31  ;;  %v2396_v36 = vld [vmem:[%s4760_s0 + $0x72] sm:$0x2]   ;;  %v1257_v38 = vsel %vm106_vm4, %v2364_v19, %v1253_v29 }
  0x59   :  { %v2302_v32 = vld [vmem:[%s4760_s0 + $0x147] sm:$0x20]   ;;  %v2397_v37 = vld [vmem:[%s4760_s0 + $0xb1] sm:$0x4]   ;;  %v1009_v39 = vsel %vm102_vm3, %v2301_v26, %v1005_v34  ;;  %v1381_v41 = vsel %vm90_vm0, %v2396_v36, %v2395_v35  ;;  %v2375_v45 = vld [vmem:[%s4760_s0 + $0x1c4] sm:$0x80]   ;;  %v1261_v54 = vsel %vm110_vm5, %v2365_v30, %v1257_v38 }
  0x5a   :  { %v2303_v33 = vld [vmem:[%s4760_s0 + $0x186] sm:$0x40]   ;;  %1197 = vrot.lane.b32.xlu1 %v1196_v16, %s2574_s15  ;;  %v2398_v42 = vld [vmem:[%s4760_s0 + $0xf0] sm:$0x8]   ;;  %v1013_v46 = vsel %vm106_vm4, %v2302_v32, %v1009_v39  ;;  %v1385_v47 = vsel %vm94_vm1, %v2397_v37, %v1381_v41  ;;  %v2366_v55 = vld [vmem:[%s4760_s0 + $0x1dc] sm:$0x80]   ;;  %v1300_v61 = vsel %vm114_vm6, %v2375_v45, %v1296_v44 }
  0x5b   :  { %v2304_v40 = vld [vmem:[%s4760_s0 + $0x1c5] sm:$0x80]   ;;  %v2399_v43 = vld [vmem:[%s4760_s0 + $0x12f] sm:$0x10]   ;;  %1162 = vrot.lane.b32.xlu0 %v1161_v27, %s2574_s15  ;;  %v1017_v49 = vsel %vm110_vm5, %v2303_v33, %v1013_v46  ;;  %v1389_v50 = vsel %vm98_vm2, %v2398_v42, %v1385_v47  ;;  %v2324_v1 = vld [vmem:[%s4760_s0 + $0x34] sm:$0x1]   ;;  %v1265_v8 = vsel %vm114_vm6, %v2366_v55, %v1261_v54 }
  0x5c   :  { %v2386_v48 = vld [vmem:[%s4760_s0 + $0x13] sm:$0x1]   ;;  %v1021_v56 = vsel %vm114_vm6, %v2304_v40, %v1017_v49  ;;  %v1393_v57 = vsel %vm102_vm3, %v2399_v43, %v1389_v50  ;;  %v2325_v2 = vld [vmem:[%s4760_s0 + $0x73] sm:$0x2]   ;;  %v2422_v16 = vld [vmem:[%s4760_s0 + $0x2] sm:$0x1]  }
  0x5d   :  { %v2387_v51 = vld [vmem:[%s4760_s0 + $0x52] sm:$0x2]   ;;  %v1102_v4 = vsel %vm90_vm0, %v2325_v2, %v2324_v1  ;;  %v2326_v5 = vld [vmem:[%s4760_s0 + $0xb2] sm:$0x4]   ;;  %v2423_v17 = vld [vmem:[%s4760_s0 + $0x41] sm:$0x2]  }
  0x5e   :  { %v2388_v52 = vld [vmem:[%s4760_s0 + $0x91] sm:$0x4]   ;;  %v1346_v59 = vsel %vm90_vm0, %v2387_v51, %v2386_v48  ;;  %1022 = vrot.lane.b32.xlu2 %v1021_v56, %s2574_s15  ;;  %v2327_v6 = vld [vmem:[%s4760_s0 + $0xf1] sm:$0x8]   ;;  %v1106_v12 = vsel %vm94_vm1, %v2326_v5, %v1102_v4  ;;  %v2424_v18 = vld [vmem:[%s4760_s0 + $0x80] sm:$0x4]   ;;  %v1486_v22 = vsel %vm90_vm0, %v2423_v17, %v2422_v16 }
  0x5f   :  { %v2389_v53 = vld [vmem:[%s4760_s0 + $0xd0] sm:$0x8]   ;;  %v1350_v63 = vsel %vm94_vm1, %v2388_v52, %v1346_v59  ;;  %v2328_v7 = vld [vmem:[%s4760_s0 + $0x130] sm:$0x10]   ;;  %v1110_v15 = vsel %vm98_vm2, %v2327_v6, %v1106_v12  ;;  %v2425_v23 = vld [vmem:[%s4760_s0 + $0xbf] sm:$0x8]   ;;  %v1490_v29 = vsel %vm94_vm1, %v2424_v18, %v1486_v22 }
  0x60   :  { %v2400_v58 = vld [vmem:[%s4760_s0 + $0x16e] sm:$0x20]   ;;  %v1354_v3 = vsel %vm98_vm2, %v2389_v53, %v1350_v63  ;;  %v2329_v13 = vld [vmem:[%s4760_s0 + $0x16f] sm:$0x20]   ;;  %v1114_v20 = vsel %vm102_vm3, %v2328_v7, %v1110_v15  ;;  %v2426_v24 = vld [vmem:[%s4760_s0 + $0xfe] sm:$0x10]   ;;  %v1494_v31 = vsel %vm98_vm2, %v2425_v23, %v1490_v29 }
  0x61   :  { %v2390_v60 = vld [vmem:[%s4760_s0 + $0x10f] sm:$0x10]   ;;  %v1397_v9 = vsel %vm106_vm4, %v2400_v58, %v1393_v57  ;;  %v2330_v14 = vld [vmem:[%s4760_s0 + $0x1ae] sm:$0x40]   ;;  %v1118_v28 = vsel %vm106_vm4, %v2329_v13, %v1114_v20  ;;  %v2413_v32 = vld [vmem:[%s4760_s0 + $0x3b] sm:$0x1]   ;;  %v1498_v37 = vsel %vm102_vm3, %v2426_v24, %v1494_v31 }
  0x62   :  { %v2401_v62 = vld [vmem:[%s4760_s0 + $0x1ad] sm:$0x40]   ;;  %v1358_v10 = vsel %vm102_vm3, %v2390_v60, %v1354_v3  ;;  %1301 = vrot.lane.b32.xlu1 %v1300_v61, %s2575_s22  ;;  %v2331_v21 = vld [vmem:[%s4760_s0 + $0x1ed] sm:$0x80]   ;;  %v1122_v30 = vsel %vm110_vm5, %v2330_v14, %v1118_v28  ;;  %v2414_v33 = vld [vmem:[%s4760_s0 + $0x7a] sm:$0x2]  }
  0x63   :  { %v2391_v0 = vld [vmem:[%s4760_s0 + $0x14e] sm:$0x20]   ;;  %1266 = vrot.lane.b32.xlu0 %v1265_v8, %s2575_s22  ;;  %v1401_v25 = vsel %vm110_vm5, %v2401_v62, %v1397_v9  ;;  %v2415_v34 = vld [vmem:[%s4760_s0 + $0xb9] sm:$0x4]   ;;  %v1126_v36 = vsel %vm114_vm6, %v2331_v21, %v1122_v30  ;;  %v2427_v38 = vld [vmem:[%s4760_s0 + $0x13d] sm:$0x20]   ;;  %v1451_v39 = vsel %vm90_vm0, %v2414_v33, %v2413_v32 }
  0x64   :  { %v2392_v11 = vld [vmem:[%s4760_s0 + $0x18d] sm:$0x40]   ;;  %v1362_v19 = vsel %vm106_vm4, %v2391_v0, %v1358_v10  ;;  %v2416_v40 = vld [vmem:[%s4760_s0 + $0xf8] sm:$0x8]   ;;  %v2428_v43 = vld [vmem:[%s4760_s0 + $0x17c] sm:$0x40]   ;;  %v1455_v44 = vsel %vm94_vm1, %v2415_v34, %v1451_v39  ;;  %v1502_v52 = vsel %vm106_vm4, %v2427_v38, %v1498_v37 }
  0x65   :  { %v2402_v26 = vld [vmem:[%s4760_s0 + $0x1ec] sm:$0x80]   ;;  %v1366_v35 = vsel %vm110_vm5, %v2392_v11, %v1362_v19  ;;  %v2417_v41 = vld [vmem:[%s4760_s0 + $0x137] sm:$0x10]   ;;  %v2351_v46 = vld [vmem:[%s4760_s0 + $0x3] sm:$0x1]   ;;  %v1459_v47 = vsel %vm98_vm2, %v2416_v40, %v1455_v44  ;;  %v1506_v5 = vsel %vm110_vm5, %v2428_v43, %v1502_v52 }
  0x66   :  { %v2393_v27 = vld [vmem:[%s4760_s0 + $0x1cc] sm:$0x80]   ;;  %v1405_v42 = vsel %vm114_vm6, %v2402_v26, %v1401_v25  ;;  %1127 = vrot.lane.b32.xlu2 %v1126_v36, %s2574_s15  ;;  %v2418_v45 = vld [vmem:[%s4760_s0 + $0x176] sm:$0x20]   ;;  %v2352_v48 = vld [vmem:[%s4760_s0 + $0x42] sm:$0x2]   ;;  %v1463_v53 = vsel %vm102_vm3, %v2417_v41, %v1459_v47 }
  0x67   :  { %v2353_v49 = vld [vmem:[%s4760_s0 + $0x81] sm:$0x4]   ;;  %v1370_v51 = vsel %vm114_vm6, %v2393_v27, %v1366_v35  ;;  %v2419_v54 = vld [vmem:[%s4760_s0 + $0x1b5] sm:$0x40]   ;;  %v1207_v55 = vsel %vm90_vm0, %v2352_v48, %v2351_v46  ;;  %v2429_v58 = vld [vmem:[%s4760_s0 + $0x1bb] sm:$0x80]   ;;  %v1467_v63 = vsel %vm106_vm4, %v2418_v45, %v1463_v53 }
  0x68   :  { %v2354_v50 = vld [vmem:[%s4760_s0 + $0xc0] sm:$0x8]   ;;  %v1211_v59 = vsel %vm94_vm1, %v2353_v49, %v1207_v55  ;;  %v2448_v61 = vld [vmem:[%s4760_s0 + $0x2a] sm:$0x1]   ;;  %v2420_v6 = vld [vmem:[%s4760_s0 + $0x1f4] sm:$0x80]   ;;  %v1471_v15 = vsel %vm110_vm5, %v2419_v54, %v1467_v63  ;;  %v1510_v22 = vsel %vm114_vm6, %v2429_v58, %v1506_v5 }
  0x69   :  { %v2355_v56 = vld [vmem:[%s4760_s0 + $0xff] sm:$0x10]   ;;  %v2449_v62 = vld [vmem:[%s4760_s0 + $0x69] sm:$0x2]   ;;  %v1215_v0 = vsel %vm98_vm2, %v2354_v50, %v1211_v59  ;;  %v2377_v27 = vld [vmem:[%s4760_s0 + $0x2b] sm:$0x1]   ;;  %v1475_v32 = vsel %vm114_vm6, %v2420_v6, %v1471_v15 }
  0x6a   :  { %v2356_v57 = vld [vmem:[%s4760_s0 + $0x13e] sm:$0x20]   ;;  %1406 = vrot.lane.b32.xlu1 %v1405_v42, %s2575_s22  ;;  %v1590_v1 = vsel %vm90_vm0, %v2449_v62, %v2448_v61  ;;  %v2450_v2 = vld [vmem:[%s4760_s0 + $0xa8] sm:$0x4]   ;;  %v1219_v7 = vsel %vm102_vm3, %v2355_v56, %v1215_v0  ;;  %v2378_v29 = vld [vmem:[%s4760_s0 + $0x6a] sm:$0x2]  }
  0x6b   :  { %v2357_v60 = vld [vmem:[%s4760_s0 + $0x17d] sm:$0x40]   ;;  %v2451_v3 = vld [vmem:[%s4760_s0 + $0xe7] sm:$0x8]   ;;  %1371 = vrot.lane.b32.xlu0 %v1370_v51, %s2575_s22  ;;  %v1594_v9 = vsel %vm94_vm1, %v2450_v2, %v1590_v1  ;;  %v1223_v10 = vsel %vm106_vm4, %v2356_v57, %v1219_v7  ;;  %v2379_v30 = vld [vmem:[%s4760_s0 + $0xa9] sm:$0x4]   ;;  %v1311_v36 = vsel %vm90_vm0, %v2378_v29, %v2377_v27 }
  0x6c   :  { %v2452_v4 = vld [vmem:[%s4760_s0 + $0x126] sm:$0x10]   ;;  %v2358_v8 = vld [vmem:[%s4760_s0 + $0x1bc] sm:$0x80]   ;;  %v1598_v11 = vsel %vm98_vm2, %v2451_v3, %v1594_v9  ;;  %v1227_v16 = vsel %vm110_vm5, %v2357_v60, %v1223_v10  ;;  %v2380_v31 = vld [vmem:[%s4760_s0 + $0xe8] sm:$0x8]   ;;  %v1315_v39 = vsel %vm94_vm1, %v2379_v30, %v1311_v36 }
  0x6d   :  { %v2439_v12 = vld [vmem:[%s4760_s0 + $0xa] sm:$0x1]   ;;  %v1602_v17 = vsel %vm102_vm3, %v2452_v4, %v1598_v11  ;;  %v1231_v23 = vsel %vm114_vm6, %v2358_v8, %v1227_v16  ;;  %v2381_v37 = vld [vmem:[%s4760_s0 + $0x127] sm:$0x10]   ;;  %s2576_s4 = smov 32   ;;  %v1319_v44 = vsel %vm98_vm2, %v2380_v31, %v1315_v39  ;;  %vm4_vm7 = vcmask 1047556  }
  0x6e   :  { %v2440_v13 = vld [vmem:[%s4760_s0 + $0x49] sm:$0x2]   ;;  %1232 = vrot.lane.b32.xlu2 %v1231_v23, %s2575_s22  ;;  %v2382_v38 = vld [vmem:[%s4760_s0 + $0x166] sm:$0x20]   ;;  %v2475_v41 = vld [vmem:[%s4760_s0 + $0x1a] sm:$0x1]   ;;  %v1323_v52 = vsel %vm102_vm3, %v2381_v37, %v1319_v44 }
  0x6f   :  { %v2441_v14 = vld [vmem:[%s4760_s0 + $0x88] sm:$0x4]   ;;  %v1555_v19 = vsel %vm90_vm0, %v2440_v13, %v2439_v12  ;;  %v2383_v40 = vld [vmem:[%s4760_s0 + $0x1a5] sm:$0x40]   ;;  %v2476_v42 = vld [vmem:[%s4760_s0 + $0x59] sm:$0x2]   ;;  %v1327_v55 = vsel %vm106_vm4, %v2382_v38, %v1323_v52 }
  0x70   :  { %v2453_v18 = vld [vmem:[%s4760_s0 + $0x165] sm:$0x20]   ;;  %v1559_v25 = vsel %vm94_vm1, %v2441_v14, %v1555_v19  ;;  %v1695_v45 = vsel %vm90_vm0, %v2476_v42, %v2475_v41  ;;  %v2477_v46 = vld [vmem:[%s4760_s0 + $0x98] sm:$0x4]   ;;  %v2384_v53 = vld [vmem:[%s4760_s0 + $0x1e4] sm:$0x80]   ;;  %v1331_v61 = vsel %vm110_vm5, %v2383_v40, %v1327_v55 }
  0x71   :  { %v2442_v20 = vld [vmem:[%s4760_s0 + $0xc7] sm:$0x8]   ;;  %v1606_v33 = vsel %vm106_vm4, %v2453_v18, %v1602_v17  ;;  %v2478_v47 = vld [vmem:[%s4760_s0 + $0xd7] sm:$0x8]   ;;  %v1699_v54 = vsel %vm94_vm1, %v2477_v46, %v1695_v45  ;;  %v2466_v57 = vld [vmem:[%s4760_s0 + $0x32] sm:$0x1]   ;;  %v1335_v4 = vsel %vm114_vm6, %v2384_v53, %v1331_v61 }
  0x72   :  { %v2443_v21 = vld [vmem:[%s4760_s0 + $0x106] sm:$0x10]   ;;  %v1563_v28 = vsel %vm98_vm2, %v2442_v20, %v1559_v25  ;;  %1511 = vrot.lane.b32.xlu1 %v1510_v22, %s2576_s4  ;;  %v2479_v48 = vld [vmem:[%s4760_s0 + $0x116] sm:$0x10]   ;;  %v1703_v56 = vsel %vm98_vm2, %v2478_v47, %v1699_v54  ;;  %v2467_v58 = vld [vmem:[%s4760_s0 + $0x71] sm:$0x2]  }
  0x73   :  { %v2454_v24 = vld [vmem:[%s4760_s0 + $0x1a4] sm:$0x40]   ;;  %v1567_v34 = vsel %vm102_vm3, %v2443_v21, %v1563_v28  ;;  %1476 = vrot.lane.b32.xlu0 %v1475_v32, %s2575_s22  ;;  %v2468_v59 = vld [vmem:[%s4760_s0 + $0xb0] sm:$0x4]   ;;  %v1707_v62 = vsel %vm102_vm3, %v2479_v48, %v1703_v56  ;;  %v2480_v63 = vld [vmem:[%s4760_s0 + $0x155] sm:$0x20]   ;;  %v1660_v0 = vsel %vm90_vm0, %v2467_v58, %v2466_v57 }
  0x74   :  { %v2444_v26 = vld [vmem:[%s4760_s0 + $0x145] sm:$0x20]   ;;  %v1610_v49 = vsel %vm110_vm5, %v2454_v24, %v1606_v33  ;;  %v2469_v1 = vld [vmem:[%s4760_s0 + $0xef] sm:$0x8]   ;;  %v2481_v5 = vld [vmem:[%s4760_s0 + $0x194] sm:$0x40]   ;;  %v1664_v6 = vsel %vm94_vm1, %v2468_v59, %v1660_v0  ;;  %v1711_v14 = vsel %vm106_vm4, %v2480_v63, %v1707_v62 }
  0x75   :  { %v2445_v35 = vld [vmem:[%s4760_s0 + $0x184] sm:$0x40]   ;;  %v1571_v43 = vsel %vm106_vm4, %v2444_v26, %v1567_v34  ;;  %v2470_v2 = vld [vmem:[%s4760_s0 + $0x12e] sm:$0x10]   ;;  %v2404_v8 = vld [vmem:[%s4760_s0 + $0x1b] sm:$0x1]   ;;  %v1668_v9 = vsel %vm98_vm2, %v2469_v1, %v1664_v6  ;;  %v1715_v32 = vsel %vm110_vm5, %v2481_v5, %v1711_v14 }
  0x76   :  { %v2455_v50 = vld [vmem:[%s4760_s0 + $0x1e3] sm:$0x80]   ;;  %v1575_v60 = vsel %vm110_vm5, %v2445_v35, %v1571_v43  ;;  %v2471_v7 = vld [vmem:[%s4760_s0 + $0x16d] sm:$0x20]   ;;  %1336 = vrot.lane.b32.xlu2 %v1335_v4, %s2575_s22  ;;  %v2405_v10 = vld [vmem:[%s4760_s0 + $0x5a] sm:$0x2]   ;;  %v1672_v15 = vsel %vm102_vm3, %v2470_v2, %v1668_v9 }
  0x77   :  { %v2446_v51 = vld [vmem:[%s4760_s0 + $0x1c3] sm:$0x80]   ;;  %v1614_v3 = vsel %vm114_vm6, %v2455_v50, %v1610_v49  ;;  %v2406_v11 = vld [vmem:[%s4760_s0 + $0x99] sm:$0x4]   ;;  %v2472_v16 = vld [vmem:[%s4760_s0 + $0x1ac] sm:$0x40]   ;;  %v3993_v17 = vpop.permute.xlu2 %255   ;;  %v1416_v18 = vsel %vm90_vm0, %v2405_v10, %v2404_v8  ;;  %v1676_v25 = vsel %vm106_vm4, %v2471_v7, %v1672_v15 }
  0x78   :  { %v2407_v12 = vld [vmem:[%s4760_s0 + $0xd8] sm:$0x8]   ;;  %v1579_v13 = vsel %vm114_vm6, %v2446_v51, %v1575_v60  ;;  %v1420_v21 = vsel %vm94_vm1, %v2406_v11, %v1416_v18  ;;  %v2501_v23 = vld [vmem:[%s4760_s0 + $0x21] sm:$0x1]   ;;  %v2482_v33 = vld [vmem:[%s4760_s0 + $0x1d3] sm:$0x80]   ;;  %v1680_v44 = vsel %vm110_vm5, %v2472_v16, %v1676_v25 }
  0x79   :  { %v2408_v19 = vld [vmem:[%s4760_s0 + $0x117] sm:$0x10]   ;;  %v2502_v24 = vld [vmem:[%s4760_s0 + $0x60] sm:$0x2]   ;;  %v1424_v26 = vsel %vm98_vm2, %v2407_v12, %v1420_v21  ;;  %v2473_v34 = vld [vmem:[%s4760_s0 + $0x1eb] sm:$0x80]   ;;  %v1719_v51 = vsel %vm114_vm6, %v2482_v33, %v1715_v32 }
  0x7a   :  { %v2409_v20 = vld [vmem:[%s4760_s0 + $0x156] sm:$0x20]   ;;  %1615 = vrot.lane.b32.xlu1 %v1614_v3, %s2576_s4  ;;  %v1799_v27 = vsel %vm90_vm0, %v2502_v24, %v2501_v23  ;;  %v2503_v28 = vld [vmem:[%s4760_s0 + $0x9f] sm:$0x4]   ;;  %v1428_v35 = vsel %vm102_vm3, %v2408_v19, %v1424_v26  ;;  %v2430_v56 = vld [vmem:[%s4760_s0 + $0x22] sm:$0x1]   ;;  %v1684_v61 = vsel %vm114_vm6, %v2473_v34, %v1680_v44 }
  0x7b   :  { %v2410_v22 = vld [vmem:[%s4760_s0 + $0x195] sm:$0x40]   ;;  %v2504_v29 = vld [vmem:[%s4760_s0 + $0xde] sm:$0x8]   ;;  %1580 = vrot.lane.b32.xlu0 %v1579_v13, %s2576_s4  ;;  %v1803_v37 = vsel %vm94_vm1, %v2503_v28, %v1799_v27  ;;  %v1432_v38 = vsel %vm106_vm4, %v2409_v20, %v1428_v35  ;;  %v2431_v58 = vld [vmem:[%s4760_s0 + $0x61] sm:$0x2]  }
  0x7c   :  { %v2505_v30 = vld [vmem:[%s4760_s0 + $0x11d] sm:$0x10]   ;;  %v4026_v31 = vpop.permute.xlu1 %185   ;;  %v2411_v36 = vld [vmem:[%s4760_s0 + $0x1d4] sm:$0x80]   ;;  %v1807_v39 = vsel %vm98_vm2, %v2504_v29, %v1803_v37  ;;  %v1436_v45 = vsel %vm110_vm5, %v2410_v22, %v1432_v38  ;;  %v2432_v59 = vld [vmem:[%s4760_s0 + $0xa0] sm:$0x4]   ;;  %v1520_v2 = vsel %vm90_vm0, %v2431_v58, %v2430_v56 }
  0x7d   :  { %v2493_v40 = vld [vmem:[%s4760_s0 + $0x1] sm:$0x1]   ;;  %v4051_v43 = vpop.permute.xlu0 %116   ;;  %v1811_v46 = vsel %vm102_vm3, %v2505_v30, %v1807_v39  ;;  %v1440_v52 = vsel %vm114_vm6, %v2411_v36, %v1436_v45  ;;  %v2433_v60 = vld [vmem:[%s4760_s0 + $0xdf] sm:$0x8]   ;;  %v1524_v5 = vsel %vm94_vm1, %v2432_v59, %v1520_v2  ;;  %v2528_v7 = vld [vmem:[%s4760_s0 + $0x11] sm:$0x1]  }
  0x7e   :  { %v2494_v41 = vld [vmem:[%s4760_s0 + $0x40] sm:$0x2]   ;;  %1441 = vrot.lane.b32.xlu2 %v1440_v52, %s2575_s22  ;;  %v2434_v3 = vld [vmem:[%s4760_s0 + $0x11e] sm:$0x10]   ;;  %v2529_v8 = vld [vmem:[%s4760_s0 + $0x50] sm:$0x2]   ;;  %v1528_v10 = vsel %vm98_vm2, %v2433_v60, %v1524_v5 }
  0x7f   :  { %v2495_v42 = vld [vmem:[%s4760_s0 + $0x7f] sm:$0x4]   ;;  %v1765_v48 = vsel %vm90_vm0, %v2494_v41, %v2493_v40  ;;  %v4095_v1 = vpop.permute.xlu2 %290   ;;  %v2435_v4 = vld [vmem:[%s4760_s0 + $0x15d] sm:$0x20]   ;;  %v1904_v11 = vsel %vm90_vm0, %v2529_v8, %v2528_v7  ;;  %v2530_v12 = vld [vmem:[%s4760_s0 + $0x8f] sm:$0x4]   ;;  %v1532_v20 = vsel %vm102_vm3, %v2434_v3, %v1528_v10 }
  0x80   :  { %v2506_v47 = vld [vmem:[%s4760_s0 + $0x15c] sm:$0x20]   ;;  %v1769_v54 = vsel %vm94_vm1, %v2495_v42, %v1765_v48  ;;  %v2436_v6 = vld [vmem:[%s4760_s0 + $0x19c] sm:$0x40]   ;;  %v2531_v13 = vld [vmem:[%s4760_s0 + $0xce] sm:$0x8]   ;;  %v1908_v22 = vsel %vm94_vm1, %v2530_v12, %v1904_v11  ;;  %v1536_v23 = vsel %vm106_vm4, %v2435_v4, %v1532_v20 }
  0x81   :  { %v2496_v49 = vld [vmem:[%s4760_s0 + $0xbe] sm:$0x8]   ;;  %v1815_v62 = vsel %vm106_vm4, %v2506_v47, %v1811_v46  ;;  %v2532_v14 = vld [vmem:[%s4760_s0 + $0x10d] sm:$0x10]   ;;  %v2437_v21 = vld [vmem:[%s4760_s0 + $0x1db] sm:$0x80]   ;;  %v1912_v24 = vsel %vm98_vm2, %v2531_v13, %v1908_v22  ;;  %v1540_v30 = vsel %vm110_vm5, %v2436_v6, %v1536_v23 }
  0x82   :  { %v2497_v50 = vld [vmem:[%s4760_s0 + $0xfd] sm:$0x10]   ;;  %v1773_v57 = vsel %vm98_vm2, %v2496_v49, %v1769_v54  ;;  %1720 = vrot.lane.b32.xlu1 %v1719_v51, %s2576_s4  ;;  %v2519_v25 = vld [vmem:[%s4760_s0 + $0x29] sm:$0x1]   ;;  %v1916_v32 = vsel %vm102_vm3, %v2532_v14, %v1912_v24  ;;  %v2533_v33 = vld [vmem:[%s4760_s0 + $0x14c] sm:$0x20]   ;;  %v1544_v38 = vsel %vm114_vm6, %v2437_v21, %v1540_v30 }
  0x83   :  { %v2507_v53 = vld [vmem:[%s4760_s0 + $0x19b] sm:$0x40]   ;;  %v1777_v63 = vsel %vm102_vm3, %v2497_v50, %v1773_v57  ;;  %1685 = vrot.lane.b32.xlu0 %v1684_v61, %s2576_s4  ;;  %v2520_v26 = vld [vmem:[%s4760_s0 + $0x68] sm:$0x2]   ;;  %v2534_v39 = vld [vmem:[%s4760_s0 + $0x18b] sm:$0x40]   ;;  %v1920_v46 = vsel %vm106_vm4, %v2533_v33, %v1916_v32 }
  0x84   :  { %v2498_v55 = vld [vmem:[%s4760_s0 + $0x13c] sm:$0x20]   ;;  %v4128_v15 = vpop.permute.xlu1 %220   ;;  %v1819_v16 = vsel %vm110_vm5, %v2507_v53, %v1815_v62  ;;  %v2521_v27 = vld [vmem:[%s4760_s0 + $0xa7] sm:$0x4]   ;;  %v1869_v34 = vsel %vm90_vm0, %v2520_v26, %v2519_v25  ;;  %vm6_vm8 = vcmask 130048   ;;  %s2577_s3 = smov 16   ;;  %v1924_v59 = vsel %vm110_vm5, %v2534_v39, %v1920_v46 }
  0x85   :  { %v2499_v0 = vld [vmem:[%s4760_s0 + $0x17b] sm:$0x40]   ;;  %v1781_v9 = vsel %vm106_vm4, %v2498_v55, %v1777_v63  ;;  %v4153_v28 = vpop.permute.xlu0 %150   ;;  %v2522_v35 = vld [vmem:[%s4760_s0 + $0xe6] sm:$0x8]   ;;  %v1873_v40 = vsel %vm94_vm1, %v2521_v27, %v1869_v34  ;;  %v2535_v51 = vld [vmem:[%s4760_s0 + $0x1ca] sm:$0x80]  }
  0x86   :  { %v2508_v18 = vld [vmem:[%s4760_s0 + $0x1da] sm:$0x80]   ;;  %v1785_v29 = vsel %vm110_vm5, %v2499_v0, %v1781_v9  ;;  %v2523_v36 = vld [vmem:[%s4760_s0 + $0x125] sm:$0x10]   ;;  %1545 = vrot.lane.b32.xlu2 %v1544_v38, %s2576_s4  ;;  %v1877_v41 = vsel %vm98_vm2, %v2522_v35, %v1873_v40  ;;  %vm118_vm9 = vcmask 1048448   ;;  %v1928_v6 = vsel %vm114_vm6, %v2535_v51, %v1924_v59 }
  0x87   :  { %v2500_v19 = vld [vmem:[%s4760_s0 + $0x1ba] sm:$0x80]   ;;  %v1823_v37 = vsel %vm114_vm6, %v2508_v18, %v1819_v16  ;;  %v2524_v42 = vld [vmem:[%s4760_s0 + $0x164] sm:$0x20]   ;;  %v1881_v47 = vsel %vm102_vm3, %v2523_v36, %v1877_v41  ;;  %v2457_v11 = vld [vmem:[%s4760_s0 + $0x12] sm:$0x1]  }
  0x88   :  { %v2_v44 = vld [vmem:[%s4760_s0] ss:$8 sm:$0xf]   ;;  %v1789_v45 = vsel %vm114_vm6, %v2500_v19, %v1785_v29  ;;  %v2525_v48 = vld [vmem:[%s4760_s0 + $0x1a3] sm:$0x40]   ;;  %v396_v49 = vpop.permute.xlu2 %395   ;;  %v1885_v55 = vsel %vm106_vm4, %v2524_v42, %v1881_v47  ;;  %vm397_vm10 = vcmask 917248  }
  0x89   :  { %v3_v50 = vld [vmem:[%s4760_s0] ss:$8 sm:$0xf0]   ;;  %v2526_v60 = vld [vmem:[%s4760_s0 + $0x1e2] sm:$0x80]   ;;  %v1889_v3 = vsel %vm110_vm5, %v2525_v48, %v1885_v55  ;;  %vm676_vm11 = vcmask 786048  }
  0x8a   :  { %1824 = vrot.lane.b32.xlu1 %v1823_v37, %s2577_s3  ;;  %v5_v52 = vsel %vm4_vm7, %v3_v50, %v2_v44  ;;  %v2039_v53 = vld [vmem:[%s4760_s0 + $0x40] ss:$8 sm:$0xf]   ;;  %v1893_v12 = vsel %vm114_vm6, %v2526_v60, %v1889_v3  ;;  %v2458_v24 = vld [vmem:[%s4760_s0 + $0x51] sm:$0x2]   ;;  %vm955_vm12 = vcmask 654848  }
  0x8b   :  { %v2040_v54 = vld [vmem:[%s4760_s0 + $0x40] ss:$8 sm:$0xf0]   ;;  %7 = vst.msk [vmem:[%s4761_s1] ss:$8 sm:$0xf] %vm6_vm8, %v5_v52   ;;  %1790 = vrot.lane.b32.xlu0 %v1789_v45, %s2577_s3  ;;  %v1625_v25 = vsel %vm90_vm0, %v2458_v24, %v2457_v11 }
  0x8c   :  { %v14_v56 = vsel %vm4_vm7, %v2040_v54, %v2039_v53  ;;  %v2043_v57 = vld [vmem:[%s4760_s0 + $0x80] ss:$8 sm:$0xf]   ;;  %v4212_v58 = vpop.permute.xlu1 %360   ;;  %v2459_v26 = vld [vmem:[%s4760_s0 + $0x90] sm:$0x4]   ;;  %vm1234_vm13 = vcmask 523648  }
  0x8d   :  { %2041 = vst.msk [vmem:[%s4761_s1 + $0x1] ss:$8 sm:$0xf] %vm6_vm8, %v14_v56   ;;  %v2044_v61 = vld [vmem:[%s4760_s0 + $0x80] ss:$8 sm:$0xf0]   ;;  %v4232_v2 = vpop.permute.xlu0 %325   ;;  %v1629_v27 = vsel %vm94_vm1, %v2459_v26, %v1625_v25 }
  0x8e   :  { %v25_v62 = vsel %vm4_vm7, %v2044_v61, %v2043_v57  ;;  %v2047_v63 = vld [vmem:[%s4760_s0 + $0xc0] ss:$8 sm:$0xf]   ;;  %v2460_v29 = vld [vmem:[%s4760_s0 + $0xcf] sm:$0x8]   ;;  %vm1513_vm14 = vcmask 392448  }
  0x8f   :  { %v2048_v0 = vld [vmem:[%s4760_s0 + $0xc0] ss:$8 sm:$0xf0]   ;;  %2045 = vst.msk [vmem:[%s4761_s1 + $0x2] ss:$8 sm:$0xf] %vm6_vm8, %v25_v62   ;;  %v1633_v32 = vsel %vm98_vm2, %v2460_v29, %v1629_v27 }
  0x90   :  { %v36_v4 = vsel %vm4_vm7, %v2048_v0, %v2047_v63  ;;  %v2051_v5 = vld [vmem:[%s4760_s0 + $0x100] ss:$8 sm:$0xf]   ;;  %v4270_v16 = vpop.permute.xlu2 %499   ;;  %v2461_v30 = vld [vmem:[%s4760_s0 + $0x10e] sm:$0x10]   ;;  %vm1792_vm15 = vcmask 261248  }
  0x91   :  { %2049 = vst.msk [vmem:[%s4761_s1 + $0x3] ss:$8 sm:$0xf] %vm6_vm8, %v36_v4   ;;  %v2052_v7 = vld [vmem:[%s4760_s0 + $0x100] ss:$8 sm:$0xf0]   ;;  %v1637_v35 = vsel %vm102_vm3, %v2461_v30, %v1633_v32 }
  0x92   :  { %v47_v8 = vsel %vm4_vm7, %v2052_v7, %v2051_v5  ;;  %v2055_v9 = vld [vmem:[%s4760_s0 + $0x140] ss:$8 sm:$0xf]   ;;  %1929 = vrot.lane.b32.xlu1 %v1928_v6, %s2577_s3  ;;  %v2462_v33 = vld [vmem:[%s4760_s0 + $0x14d] sm:$0x20]  }
  0x93   :  { %v2056_v10 = vld [vmem:[%s4760_s0 + $0x140] ss:$8 sm:$0xf0]   ;;  %2053 = vst.msk [vmem:[%s4761_s1 + $0x4] ss:$8 sm:$0xf] %vm6_vm8, %v47_v8   ;;  %1894 = vrot.lane.b32.xlu0 %v1893_v12, %s2577_s3  ;;  %v1641_v37 = vsel %vm106_vm4, %v2462_v33, %v1637_v35 }
  0x94   :  { %v58_v13 = vsel %vm4_vm7, %v2056_v10, %v2055_v9  ;;  %v2059_v14 = vld [vmem:[%s4760_s0 + $0x180] ss:$8 sm:$0xf]   ;;  %v465_v23 = vpop.permute.xlu1 %464   ;;  %v2463_v34 = vld [vmem:[%s4760_s0 + $0x18c] sm:$0x40]  }
  0x95   :  { %2057 = vst.msk [vmem:[%s4761_s1 + $0x5] ss:$8 sm:$0xf] %vm6_vm8, %v58_v13   ;;  %v2060_v18 = vld [vmem:[%s4760_s0 + $0x180] ss:$8 sm:$0xf0]   ;;  %v1645_v40 = vsel %vm110_vm5, %v2463_v34, %v1641_v37 }
  0x96   :  { %v69_v19 = vsel %vm4_vm7, %v2060_v18, %v2059_v14  ;;  %v2063_v20 = vld [vmem:[%s4760_s0 + $0x1c0] ss:$8 sm:$0xf]   ;;  %8 = vst.msk [vmem:[%s4761_s1] ss:$8 sm:$0xf0] %vm6_vm8, %v5_v52  }
  0x97   :  { %v2064_v21 = vld [vmem:[%s4760_s0 + $0x1c0] ss:$8 sm:$0xf0]   ;;  %2061 = vst.msk [vmem:[%s4761_s1 + $0x6] ss:$8 sm:$0xf] %vm6_vm8, %v69_v19  }
  0x98   :  { %v80_v22 = vsel %vm4_vm7, %v2064_v21, %v2063_v20  ;;  %v2464_v36 = vld [vmem:[%s4760_s0 + $0x1cb] sm:$0x80]   ;;  %2042 = vst.msk [vmem:[%s4761_s1 + $0x1] ss:$8 sm:$0xf0] %vm6_vm8, %v14_v56   ;;  %v4345_v39 = vpop.permute.xlu2 %604  }
  0x99   :  { %2065 = vst.msk [vmem:[%s4761_s1 + $0x7] ss:$8 sm:$0xf] %vm6_vm8, %v80_v22   ;;  %v2555_v38 = vld [vmem:[%s4760_s0 + $0x39] sm:$0x1]   ;;  %v1649_v42 = vsel %vm114_vm6, %v2464_v36, %v1645_v40 }
  0x9a   :  { %119 = vst.msk [vmem:[%s4761_s1] sm:$0xff] %vm118_vm9, %v4051_v43   ;;  %v4309_v43 = vpop.permute.xlu0 %429   ;;  %v2556_v41 = vld [vmem:[%s4760_s0 + $0x78] sm:$0x2]   ;;  %1650 = vrot.lane.b32.xlu2 %v1649_v42, %s2576_s4  ;;  %v2484_v6 = vld [vmem:[%s4760_s0 + $0x3a] sm:$0x1]  }
  0x9b   :  { %398 = vst.msk [vmem:[%s4761_s1] sm:$0xff] %vm397_vm10, %v396_v49   ;;  %v2009_v44 = vsel %vm90_vm0, %v2556_v41, %v2555_v38  ;;  %v2557_v45 = vld [vmem:[%s4760_s0 + $0xb7] sm:$0x4]   ;;  %v2486_v9 = vld [vmem:[%s4760_s0 + $0xb8] sm:$0x4]  }
  0x9c   :  { %2046 = vst.msk [vmem:[%s4761_s1 + $0x2] ss:$8 sm:$0xf0] %vm6_vm8, %v25_v62   ;;  %v2013_v46 = vsel %vm94_vm1, %v2557_v45, %v2009_v44  ;;  %v2558_v47 = vld [vmem:[%s4760_s0 + $0xf6] sm:$0x8]   ;;  %v570_v48 = vpop.permute.xlu1 %569  }
  0x9d   :  { %2050 = vst.msk [vmem:[%s4761_s1 + $0x3] ss:$8 sm:$0xf0] %vm6_vm8, %v36_v4   ;;  %v2017_v49 = vsel %vm98_vm2, %v2558_v47, %v2013_v46  ;;  %v2559_v50 = vld [vmem:[%s4760_s0 + $0x135] sm:$0x10]  }
  0x9e   :  { %2054 = vst.msk [vmem:[%s4761_s1 + $0x4] ss:$8 sm:$0xf0] %vm6_vm8, %v47_v8   ;;  %v2021_v51 = vsel %vm102_vm3, %v2559_v50, %v2017_v49  ;;  %v2560_v52 = vld [vmem:[%s4760_s0 + $0x174] sm:$0x20]  }
  0x9f   :  { %2058 = vst.msk [vmem:[%s4761_s1 + $0x5] ss:$8 sm:$0xf0] %vm6_vm8, %v58_v13   ;;  %v2025_v54 = vsel %vm106_vm4, %v2560_v52, %v2021_v51  ;;  %v2561_v55 = vld [vmem:[%s4760_s0 + $0x1b3] sm:$0x40]  }
  0xa0   :  { %2062 = vst.msk [vmem:[%s4761_s1 + $0x6] ss:$8 sm:$0xf0] %vm6_vm8, %v69_v19   ;;  %v2562_v56 = vld [vmem:[%s4760_s0 + $0x1f2] sm:$0x80]   ;;  %v4421_v61 = vpop.permute.xlu2 %708  }
  0xa1   :  { %2066 = vst.msk [vmem:[%s4761_s1 + $0x7] ss:$8 sm:$0xf0] %vm6_vm8, %v80_v22   ;;  %v2546_v57 = vld [vmem:[%s4760_s0 + $0x19] sm:$0x1]  }
  0xa2   :  { %v535_v53 = vpop.permute.xlu0 %534   ;;  %2092 = vst.msk [vmem:[%s4761_s1 + $0x8] sm:$0xff] %vm118_vm9, %v4026_v31   ;;  %v2029_v31 = vsel %vm110_vm5, %v2561_v55, %v2025_v54  ;;  %v2547_v59 = vld [vmem:[%s4760_s0 + $0x58] sm:$0x2]   ;;  %v2485_v8 = vld [vmem:[%s4760_s0 + $0x79] sm:$0x2]  }
  0xa3   :  { %2110 = vst.msk [vmem:[%s4761_s1 + $0x10] sm:$0xff] %vm118_vm9, %v3993_v17   ;;  %v2033_v17 = vsel %vm114_vm6, %v2562_v56, %v2029_v31  ;;  %v2548_v60 = vld [vmem:[%s4760_s0 + $0x97] sm:$0x4]   ;;  %v1974_v62 = vsel %vm90_vm0, %v2547_v59, %v2546_v57  ;;  %v1730_v10 = vsel %vm90_vm0, %v2485_v8, %v2484_v6  ;;  %v2487_v11 = vld [vmem:[%s4760_s0 + $0xf7] sm:$0x8]  }
  0xa4   :  { %2128 = vst.msk [vmem:[%s4761_s1 + $0x18] sm:$0xff] %vm118_vm9, %v4232_v2   ;;  %2034 = vrot.lane.b32.xlu1 %v2033_v17, %s2577_s3  ;;  %v2549_v63 = vld [vmem:[%s4760_s0 + $0xd6] sm:$0x8]   ;;  %v1978_v2 = vsel %vm94_vm1, %v2548_v60, %v1974_v62  ;;  %v675_v7 = vpop.permute.xlu1 %674   ;;  %v2488_v12 = vld [vmem:[%s4760_s0 + $0x136] sm:$0x10]   ;;  %v1734_v14 = vsel %vm94_vm1, %v2486_v9, %v1730_v10 }
  0xa5   :  { %v2550_v0 = vld [vmem:[%s4760_s0 + $0x115] sm:$0x10]   ;;  %2163 = vst.msk [vmem:[%s4761_s1 + $0x8] sm:$0xff] %vm397_vm10, %v465_v23   ;;  %v2489_v18 = vld [vmem:[%s4760_s0 + $0x175] sm:$0x20]   ;;  %v1738_v21 = vsel %vm98_vm2, %v2487_v11, %v1734_v14 }
  0xa6   :  { %v2551_v3 = vld [vmem:[%s4760_s0 + $0x154] sm:$0x20]   ;;  %2083 = vst.msk [vmem:[%s4761_s1 + $0x20] sm:$0xff] %vm118_vm9, %v4153_v28   ;;  %v1982_v28 = vsel %vm98_vm2, %v2549_v63, %v1978_v2  ;;  %v2490_v19 = vld [vmem:[%s4760_s0 + $0x1b4] sm:$0x40]  }
  0xa7   :  { %v2552_v4 = vld [vmem:[%s4760_s0 + $0x193] sm:$0x40]   ;;  %2101 = vst.msk [vmem:[%s4761_s1 + $0x28] sm:$0xff] %vm118_vm9, %v4128_v15   ;;  %v1986_v15 = vsel %vm102_vm3, %v2550_v0, %v1982_v28  ;;  %v2491_v22 = vld [vmem:[%s4760_s0 + $0x1f3] sm:$0x80]  }
  0xa8   :  { %v2553_v5 = vld [vmem:[%s4760_s0 + $0x1d2] sm:$0x80]   ;;  %2119 = vst.msk [vmem:[%s4761_s1 + $0x30] sm:$0xff] %vm118_vm9, %v4095_v1   ;;  %v1990_v1 = vsel %vm106_vm4, %v2551_v3, %v1986_v15  ;;  %v2510_v23 = vld [vmem:[%s4760_s0 + $0x9] sm:$0x1]   ;;  %v814_v26 = vpop.permute.xlu2 %813  }
  0xa9   :  { %2137 = vst.msk [vmem:[%s4761_s1 + $0x38] sm:$0xff] %vm118_vm9, %v4212_v58   ;;  %v1994_v58 = vsel %vm110_vm5, %v2552_v4, %v1990_v1  ;;  %v2511_v24 = vld [vmem:[%s4760_s0 + $0x48] sm:$0x2]   ;;  %v2538_v41 = vld [vmem:[%s4760_s0 + $0x70] sm:$0x2]  }
  0xaa   :  { %v640_v13 = vpop.permute.xlu0 %639   ;;  %2154 = vst.msk [vmem:[%s4761_s1 + $0x20] sm:$0xff] %vm397_vm10, %v4309_v43   ;;  %v1998_v20 = vsel %vm114_vm6, %v2553_v5, %v1994_v58  ;;  %v2512_v25 = vld [vmem:[%s4760_s0 + $0x87] sm:$0x4]   ;;  %v1834_v27 = vsel %vm90_vm0, %v2511_v24, %v2510_v23  ;;  %v2539_v42 = vld [vmem:[%s4760_s0 + $0xaf] sm:$0x4]  }
  0xab   :  { %1999 = vrot.lane.b32.xlu0 %v1998_v20, %s2577_s3  ;;  %2172 = vst.msk [vmem:[%s4761_s1 + $0x28] sm:$0xff] %vm397_vm10, %v4270_v16   ;;  %v1742_v16 = vsel %vm102_vm3, %v2488_v12, %v1738_v21  ;;  %v2513_v29 = vld [vmem:[%s4760_s0 + $0xc6] sm:$0x8]   ;;  %v1838_v33 = vsel %vm94_vm1, %v2512_v25, %v1834_v27  ;;  %v2540_v47 = vld [vmem:[%s4760_s0 + $0xee] sm:$0x8]  }
  0xac   :  { %2190 = vst.msk [vmem:[%s4761_s1 + $0x30] sm:$0xff] %vm397_vm10, %v570_v48   ;;  %v1746_v43 = vsel %vm106_vm4, %v2489_v18, %v1742_v16  ;;  %v2514_v30 = vld [vmem:[%s4760_s0 + $0x105] sm:$0x10]   ;;  %v1842_v36 = vsel %vm98_vm2, %v2513_v29, %v1838_v33  ;;  %v779_v38 = vpop.permute.xlu1 %778   ;;  %v2541_v48 = vld [vmem:[%s4760_s0 + $0x12d] sm:$0x10]  }
  0xad   :  { %2181 = vst.msk [vmem:[%s4761_s1 + $0x10] sm:$0xff] %vm397_vm10, %v535_v53   ;;  %v1750_v32 = vsel %vm110_vm5, %v2490_v19, %v1746_v43  ;;  %v2515_v34 = vld [vmem:[%s4760_s0 + $0x144] sm:$0x20]   ;;  %v1846_v40 = vsel %vm102_vm3, %v2514_v30, %v1842_v36  ;;  %v2542_v54 = vld [vmem:[%s4760_s0 + $0x16c] sm:$0x20]  }
  0xae   :  { %v1754_v35 = vsel %vm114_vm6, %v2491_v22, %v1750_v32  ;;  %2199 = vst.msk [vmem:[%s4761_s1 + $0x18] sm:$0xff] %vm397_vm10, %v4345_v39   ;;  %v2516_v37 = vld [vmem:[%s4760_s0 + $0x183] sm:$0x40]   ;;  %v2537_v39 = vld [vmem:[%s4760_s0 + $0x31] sm:$0x1]   ;;  %v1850_v44 = vsel %vm106_vm4, %v2515_v34, %v1846_v40 }
  0xaf   :  { %1755 = vrot.lane.b32.xlu2 %v1754_v35, %s2576_s4  ;;  %677 = vst.msk [vmem:[%s4761_s1] sm:$0xff] %vm676_vm11, %v675_v7   ;;  %v1939_v46 = vsel %vm90_vm0, %v2538_v41, %v2537_v39  ;;  %v1854_v49 = vsel %vm110_vm5, %v2516_v37, %v1850_v44  ;;  %v2517_v50 = vld [vmem:[%s4760_s0 + $0x1c2] sm:$0x80]   ;;  %v2543_v57 = vld [vmem:[%s4760_s0 + $0x1ab] sm:$0x40]  }
  0xb0   :  { %2208 = vst.msk [vmem:[%s4761_s1 + $0x38] sm:$0xff] %vm397_vm10, %v640_v13   ;;  %v1943_v51 = vsel %vm94_vm1, %v2539_v42, %v1939_v46  ;;  %v919_v55 = vpop.permute.xlu2 %918   ;;  %v1858_v31 = vsel %vm114_vm6, %v2517_v50, %v1854_v49 }
  0xb1   :  { %2225 = vst.msk [vmem:[%s4761_s1 + $0x20] sm:$0xff] %vm676_vm11, %v4421_v61   ;;  %v1947_v52 = vsel %vm98_vm2, %v2540_v47, %v1943_v51  ;;  %v2544_v61 = vld [vmem:[%s4760_s0 + $0x1ea] sm:$0x80]  }
  0xb2   :  { %v744_v45 = vpop.permute.xlu0 %743   ;;  %2243 = vst.msk [vmem:[%s4761_s1 + $0x28] sm:$0xff] %vm676_vm11, %v779_v38   ;;  %v1951_v53 = vsel %vm102_vm3, %v2541_v48, %v1947_v52 }
  0xb3   :  { %2234 = vst.msk [vmem:[%s4761_s1 + $0x8] sm:$0xff] %vm676_vm11, %v744_v45   ;;  %v1955_v56 = vsel %vm106_vm4, %v2542_v54, %v1951_v53 }
  0xb4   :  { %2252 = vst.msk [vmem:[%s4761_s1 + $0x10] sm:$0xff] %vm676_vm11, %v814_v26   ;;  %v884_v17 = vpop.permute.xlu1 %883   ;;  %v1959_v60 = vsel %vm110_vm5, %v2543_v57, %v1955_v56 }
  0xb5   :  { %2279 = vst.msk [vmem:[%s4761_s1 + $0x38] sm:$0xff] %vm676_vm11, %v919_v55   ;;  %v1963_v63 = vsel %vm114_vm6, %v2544_v61, %v1959_v60 }
  0xb6   :  { %2270 = vst.msk [vmem:[%s4761_s1 + $0x18] sm:$0xff] %vm676_vm11, %v884_v17  }
  0xb7   :  { %1859 = vrot.lane.b32.xlu2 %v1858_v31, %s2577_s3 }
  0xb8   :  { %v1023_v62 = vpop.permute.xlu2 %1022  }
  0xb9   :  { %2305 = vst.msk [vmem:[%s4761_s1 + $0x8] sm:$0xff] %vm955_vm12, %v1023_v62  }
  0xba   :  { %v849_v59 = vpop.permute.xlu0 %848  }
  0xbb   :  { %2261 = vst.msk [vmem:[%s4761_s1 + $0x30] sm:$0xff] %vm676_vm11, %v849_v59  }
  0xbc   :  { %v988_v0 = vpop.permute.xlu1 %987  }
  0xbd   :  { %2296 = vst.msk [vmem:[%s4761_s1 + $0x20] sm:$0xff] %vm955_vm12, %v988_v0  }
  0xbf   :  { %1964 = vrot.lane.b32.xlu2 %v1963_v63, %s2577_s3 }
  0xc0   :  { %v1128_v3 = vpop.permute.xlu2 %1127  }
  0xc1   :  { %2332 = vst.msk [vmem:[%s4761_s1 + $0x30] sm:$0xff] %vm955_vm12, %v1128_v3  }
  0xc2   :  { %v954_v2 = vpop.permute.xlu0 %953  }
  0xc3   :  { %956 = vst.msk [vmem:[%s4761_s1] sm:$0xff] %vm955_vm12, %v954_v2  }
  0xc4   :  { %v1093_v4 = vpop.permute.xlu1 %1092  }
  0xc5   :  { %2323 = vst.msk [vmem:[%s4761_s1 + $0x10] sm:$0xff] %vm955_vm12, %v1093_v4  }
  0xc8   :  { %v1233_v5 = vpop.permute.xlu2 %1232  }
  0xc9   :  { %1235 = vst.msk [vmem:[%s4761_s1] sm:$0xff] %vm1234_vm13, %v1233_v5  }
  0xca   :  { %v1058_v28 = vpop.permute.xlu0 %1057  }
  0xcb   :  { %2314 = vst.msk [vmem:[%s4761_s1 + $0x28] sm:$0xff] %vm955_vm12, %v1058_v28  }
  0xcc   :  { %v1198_v6 = vpop.permute.xlu1 %1197  }
  0xcd   :  { %2350 = vst.msk [vmem:[%s4761_s1 + $0x38] sm:$0xff] %vm955_vm12, %v1198_v6  }
  0xd0   :  { %v1337_v15 = vpop.permute.xlu2 %1336  }
  0xd1   :  { %2385 = vst.msk [vmem:[%s4761_s1 + $0x28] sm:$0xff] %vm1234_vm13, %v1337_v15  }
  0xd2   :  { %v1163_v7 = vpop.permute.xlu0 %1162  }
  0xd3   :  { %2341 = vst.msk [vmem:[%s4761_s1 + $0x18] sm:$0xff] %vm955_vm12, %v1163_v7  }
  0xd4   :  { %v1302_v8 = vpop.permute.xlu1 %1301  }
  0xd5   :  { %2376 = vst.msk [vmem:[%s4761_s1 + $0x8] sm:$0xff] %vm1234_vm13, %v1302_v8  }
  0xd8   :  { %v1442_v1 = vpop.permute.xlu2 %1441  }
  0xd9   :  { %2412 = vst.msk [vmem:[%s4761_s1 + $0x18] sm:$0xff] %vm1234_vm13, %v1442_v1  }
  0xda   :  { %v1267_v9 = vpop.permute.xlu0 %1266  }
  0xdb   :  { %2367 = vst.msk [vmem:[%s4761_s1 + $0x20] sm:$0xff] %vm1234_vm13, %v1267_v9  }
  0xdc   :  { %v1407_v10 = vpop.permute.xlu1 %1406  }
  0xdd   :  { %2403 = vst.msk [vmem:[%s4761_s1 + $0x30] sm:$0xff] %vm1234_vm13, %v1407_v10  }
  0xe0   :  { %v1546_v12 = vpop.permute.xlu2 %1545  }
  0xe1   :  { %2438 = vst.msk [vmem:[%s4761_s1 + $0x20] sm:$0xff] %vm1513_vm14, %v1546_v12  }
  0xe2   :  { %v1372_v11 = vpop.permute.xlu0 %1371  }
  0xe3   :  { %2394 = vst.msk [vmem:[%s4761_s1 + $0x10] sm:$0xff] %vm1234_vm13, %v1372_v11  }
  0xe4   :  { %v1512_v13 = vpop.permute.xlu1 %1511  }
  0xe5   :  { %1514 = vst.msk [vmem:[%s4761_s1] sm:$0xff] %vm1513_vm14, %v1512_v13  }
  0xea   :  { %v1477_v58 = vpop.permute.xlu0 %1476  }
  0xeb   :  { %2421 = vst.msk [vmem:[%s4761_s1 + $0x38] sm:$0xff] %vm1234_vm13, %v1477_v58  }
  0xec   :  { %v1616_v14 = vpop.permute.xlu1 %1615  }
  0xed   :  { %2456 = vst.msk [vmem:[%s4761_s1 + $0x28] sm:$0xff] %vm1513_vm14, %v1616_v14  }
  0xf2   :  { %v1581_v18 = vpop.permute.xlu0 %1580  }
  0xf3   :  { %2447 = vst.msk [vmem:[%s4761_s1 + $0x8] sm:$0xff] %vm1513_vm14, %v1581_v18  }
  0xf4   :  { %v1721_v19 = vpop.permute.xlu1 %1720   ;;  %v1651_v20 = vpop.permute.xlu2 %1650  }
  0xf5   :  { %2483 = vst.msk [vmem:[%s4761_s1 + $0x18] sm:$0xff] %vm1513_vm14, %v1721_v19  }
  0xf6   :  { %2465 = vst.msk [vmem:[%s4761_s1 + $0x10] sm:$0xff] %vm1513_vm14, %v1651_v20  }
  0xfa   :  { %v1686_v21 = vpop.permute.xlu0 %1685  }
  0xfb   :  { %2474 = vst.msk [vmem:[%s4761_s1 + $0x30] sm:$0xff] %vm1513_vm14, %v1686_v21  }
  0xfc   :  { %v1825_v22 = vpop.permute.xlu1 %1824  }
  0xfd   :  { %2509 = vst.msk [vmem:[%s4761_s1 + $0x20] sm:$0xff] %vm1792_vm15, %v1825_v22  }
 0x102   :  { %v1791_v23 = vpop.permute.xlu0 %1790  }
 0x103   :  { %1793 = vst.msk [vmem:[%s4761_s1] sm:$0xff] %vm1792_vm15, %v1791_v23  }
 0x104   :  { %v1930_v16 = vpop.permute.xlu1 %1929  }
 0x105   :  { %2536 = vst.msk [vmem:[%s4761_s1 + $0x10] sm:$0xff] %vm1792_vm15, %v1930_v16  }
 0x109   :  { %v1756_v25 = vpop.permute.xlu2 %1755  }
 0x10a   :  { %v1895_v24 = vpop.permute.xlu0 %1894   ;;  %2492 = vst.msk [vmem:[%s4761_s1 + $0x38] sm:$0xff] %vm1513_vm14, %v1756_v25  }
 0x10b   :  { %2527 = vst.msk [vmem:[%s4761_s1 + $0x28] sm:$0xff] %vm1792_vm15, %v1895_v24  }
 0x111   :  { %v1860_v26 = vpop.permute.xlu2 %1859  }
 0x112   :  { %2518 = vst.msk [vmem:[%s4761_s1 + $0x8] sm:$0xff] %vm1792_vm15, %v1860_v26  }
 0x116   :  { %v2035_v43 = vpop.permute.xlu1 %2034  }
 0x117   :  { %2563 = vst.msk [vmem:[%s4761_s1 + $0x38] sm:$0xff] %vm1792_vm15, %v2035_v43  }
 0x119   :  { %v1965_v27 = vpop.permute.xlu2 %1964  }
 0x11a   :  { %2545 = vst.msk [vmem:[%s4761_s1 + $0x30] sm:$0xff] %vm1792_vm15, %v1965_v27  }
 0x11d   :  { %v2000_v29 = vpop.permute.xlu0 %1999  }
 0x11e   :  { %2554 = vst.msk [vmem:[%s4761_s1 + $0x18] sm:$0xff] %vm1792_vm15, %v2000_v29  }

// kernel: moco_forward.1
= control target key start
LH: loop header
LB: loop body
LE: loop exit
PB: predicated region body
PF: predicated region fallthrough
CT: control target
= control target key end

     0   :  { %s5822_s0 = inlined_call_operand.vmem [shape: f32[8,1024], index: 0, kind: input, shape index: {}]   ;;  %s5823_s1 = inlined_call_operand.vmem [shape: f32[8,1024], index: 1, kind: input, shape index: {}]   ;;  %s5824_s2 = inlined_call_operand.hbm [shape: f32[1024,256], index: 2, kind: input, shape index: {}]   ;;  %s5825_s3 = inlined_call_operand.vmem [shape: f32[1,256], index: 3, kind: input, shape index: {}]   ;;  %s5826_s4 = inlined_call_operand.vmem [shape: f32[256,128], index: 4, kind: input, shape index: {}]   ;;  %s5827_s5 = inlined_call_operand.vmem [shape: f32[1,128], index: 5, kind: input, shape index: {}]   ;;  %s5828_s6 = inlined_call_operand.vmem [shape: f32[1024,256], index: 6, kind: input, shape index: {}, may-alias: {6,14}]   ;;  %s5829_s7 = inlined_call_operand.vmem [shape: f32[1,256], index: 7, kind: input, shape index: {}, may-alias: {7,15}]   ;;  %s5830_s8 = inlined_call_operand.vmem [shape: f32[256,128], index: 8, kind: input, shape index: {}, may-alias: {8,16}]   ;;  %s5831_s9 = inlined_call_operand.vmem [shape: f32[1,128], index: 9, kind: input, shape index: {}, may-alias: {9,17}]   ;;  %s5832_s10 = inlined_call_operand.vmem [shape: bf16[512,128], index: 10, kind: input, shape index: {}]   ;;  %s5833_s11 = inlined_call_operand.vmem [shape: f32[8,1], index: 11, kind: output, shape index: {0}]   ;;  %s5834_s12 = inlined_call_operand.vmem [shape: f32[8,512], index: 12, kind: output, shape index: {1}]   ;;  %s5835_s13 = inlined_call_operand.vmem [shape: bf16[8,128], index: 13, kind: output, shape index: {2}]   ;;  %s5836_s14 = inlined_call_operand.vmem [shape: f32[1024,256], index: 14, kind: output, shape index: {3}, may-alias: {6,14}]   ;;  %s5837_s15 = inlined_call_operand.vmem [shape: f32[1,256], index: 15, kind: output, shape index: {4}, may-alias: {7,15}]   ;;  %s5838_s16 = inlined_call_operand.vmem [shape: f32[256,128], index: 16, kind: output, shape index: {5}, may-alias: {8,16}]   ;;  %s5839_s17 = inlined_call_operand.vmem [shape: f32[1,128], index: 17, kind: output, shape index: {6}, may-alias: {9,17}]  }
   0x1   :  { %5842 = sst [smem:[#allocation5_spill]] %s5822_s0 }
   0x2   :  { %5843 = sst [smem:[#allocation6_spill]] %s5823_s1 }
   0x3   :  { %23 = vsyncpa [#allocation3], 0  ;;  %s32_s26 = sshll.u32 %s5824_s2, 4  ;;  %s3481_s27 = smov [#allocation2]   ;;  %s33_s26 = int_to_ptr.hbm [resolvable:$true] %s32_s26 }
   0x4   :  { %s34_s28 = sshll.u32 %s3481_s27, 4  ;;  %s3482_s29 = smov 256   ;;  %s35_s28 = int_to_ptr.vmem [resolvable:$true] %s34_s28 }
   0x5   :  { %s3483_s0 = smov 16  }
   0x6   :  { %40 = dma.hbm_to_vmem [thread:$0]  %s33_s26, 32768, %s35_s28, [#allocation3], %s3482_s29, %s3482_s29, %s3483_s0  }
   0x7   :  { %3479 = dma.done.wait [#allocation3], 32768  }
   0x8   :  { %3480 = vsyncadd [#allocation3], 4294934528  ;;  %v1841_v0 = vld [vmem:[#allocation2 + $0xe0] sm:$0xff]  ;;  %v1843_v1 = vld [vmem:[#allocation2 + $0xf0] sm:$0xff]  ;;  %s5844_s18 = sld [smem:[#allocation5_spill]]  ;;  %vm2943_vm7 = vcmask 7168  }
   0x9   :  { %v1873_v2 = vld [vmem:[#allocation2 + $0x1e0] sm:$0xff]  ;;  %v2125_v3 = vpack.c.bf16 %v1843_v1, %v1841_v0  ;;  %v1875_v4 = vld [vmem:[#allocation2 + $0x1f0] sm:$0xff]  ;;  %s5845_s20 = sld [smem:[#allocation6_spill]] }
   0xa   :  { %v1905_v5 = vld [vmem:[#allocation2 + $0x2e0] sm:$0xff]  ;;  %v1907_v6 = vld [vmem:[#allocation2 + $0x2f0] sm:$0xff]  ;;  %v2141_v7 = vpack.c.bf16 %v1875_v4, %v1873_v2 }
   0xb   :  { %v2157_v8 = vpack.c.bf16 %v1907_v6, %v1905_v5  ;;  %v1937_v9 = vld [vmem:[#allocation2 + $0x3e0] sm:$0xff]  ;;  %v1939_v10 = vld [vmem:[#allocation2 + $0x3f0] sm:$0xff]  ;;  %2244 = vmatpush.bf16.msra.mxu0 %v2125_v3 }
   0xc   :  { %v1837_v11 = vld [vmem:[#allocation2 + $0xc0] sm:$0xff]  ;;  %v2173_v12 = vpack.c.bf16 %v1939_v10, %v1937_v9  ;;  %v1839_v13 = vld [vmem:[#allocation2 + $0xd0] sm:$0xff]  ;;  %2257 = vmatpush.bf16.msra.mxu1 %v2141_v7 }
   0xd   :  { %v1869_v14 = vld [vmem:[#allocation2 + $0x1c0] sm:$0xff]  ;;  %v1871_v15 = vld [vmem:[#allocation2 + $0x1d0] sm:$0xff]  ;;  %2270 = vmatpush.bf16.msra.mxu2 %v2157_v8  ;;  %v2123_v16 = vpack.c.bf16 %v1839_v13, %v1837_v11 }
   0xe   :  { %v2139_v17 = vpack.c.bf16 %v1871_v15, %v1869_v14  ;;  %v1901_v18 = vld [vmem:[#allocation2 + $0x2c0] sm:$0xff]  ;;  %v1903_v19 = vld [vmem:[#allocation2 + $0x2d0] sm:$0xff]  ;;  %2283 = vmatpush.bf16.msra.mxu3 %v2173_v12 }
   0xf   :  { %v1933_v20 = vld [vmem:[#allocation2 + $0x3c0] sm:$0xff]  ;;  %v2155_v21 = vpack.c.bf16 %v1903_v19, %v1901_v18  ;;  %v1935_v22 = vld [vmem:[#allocation2 + $0x3d0] sm:$0xff]  ;;  %2245 = vmatpush.bf16.msra.mxu0 %v2123_v16 }
  0x10   :  { %v1833_v23 = vld [vmem:[#allocation2 + $0xa0] sm:$0xff]  ;;  %v1835_v24 = vld [vmem:[#allocation2 + $0xb0] sm:$0xff]  ;;  %v2171_v25 = vpack.c.bf16 %v1935_v22, %v1933_v20  ;;  %2258 = vmatpush.bf16.msra.mxu1 %v2139_v17 }
  0x11   :  { %v1865_v26 = vld [vmem:[#allocation2 + $0x1a0] sm:$0xff]  ;;  %v1867_v27 = vld [vmem:[#allocation2 + $0x1b0] sm:$0xff]  ;;  %v2121_v29 = vpack.c.bf16 %v1835_v24, %v1833_v23  ;;  %2271 = vmatpush.bf16.msra.mxu2 %v2155_v21 }
  0x12   :  { %v1897_v28 = vld [vmem:[#allocation2 + $0x2a0] sm:$0xff]  ;;  %v1899_v30 = vld [vmem:[#allocation2 + $0x2b0] sm:$0xff]  ;;  %v2137_v33 = vpack.c.bf16 %v1867_v27, %v1865_v26  ;;  %2284 = vmatpush.bf16.msra.mxu3 %v2171_v25 }
  0x13   :  { %v1929_v31 = vld [vmem:[#allocation2 + $0x3a0] sm:$0xff]  ;;  %v1931_v32 = vld [vmem:[#allocation2 + $0x3b0] sm:$0xff]  ;;  %v2153_v34 = vpack.c.bf16 %v1899_v30, %v1897_v28  ;;  %2246 = vmatpush.bf16.msra.mxu0 %v2121_v29 }
  0x14   :  { %v1829_v35 = vld [vmem:[#allocation2 + $0x80] sm:$0xff]  ;;  %v1831_v36 = vld [vmem:[#allocation2 + $0x90] sm:$0xff]  ;;  %v2169_v38 = vpack.c.bf16 %v1931_v32, %v1929_v31  ;;  %2259 = vmatpush.bf16.msra.mxu1 %v2137_v33 }
  0x15   :  { %v1861_v37 = vld [vmem:[#allocation2 + $0x180] sm:$0xff]  ;;  %v1863_v39 = vld [vmem:[#allocation2 + $0x190] sm:$0xff]  ;;  %v2119_v44 = vpack.c.bf16 %v1831_v36, %v1829_v35  ;;  %2272 = vmatpush.bf16.msra.mxu2 %v2153_v34 }
  0x16   :  { %v1893_v40 = vld [vmem:[#allocation2 + $0x280] sm:$0xff]  ;;  %v1895_v41 = vld [vmem:[#allocation2 + $0x290] sm:$0xff]  ;;  %v2135_v45 = vpack.c.bf16 %v1863_v39, %v1861_v37  ;;  %2285 = vmatpush.bf16.msra.mxu3 %v2169_v38 }
  0x17   :  { %v1925_v42 = vld [vmem:[#allocation2 + $0x380] sm:$0xff]  ;;  %v1927_v43 = vld [vmem:[#allocation2 + $0x390] sm:$0xff]  ;;  %v2151_v46 = vpack.c.bf16 %v1895_v41, %v1893_v40  ;;  %2247 = vmatpush.bf16.msra.mxu0 %v2119_v44 }
  0x18   :  { %v1825_v47 = vld [vmem:[#allocation2 + $0x60] sm:$0xff]  ;;  %v1827_v48 = vld [vmem:[#allocation2 + $0x70] sm:$0xff]  ;;  %v2167_v50 = vpack.c.bf16 %v1927_v43, %v1925_v42  ;;  %2260 = vmatpush.bf16.msra.mxu1 %v2135_v45 }
  0x19   :  { %v1857_v49 = vld [vmem:[#allocation2 + $0x160] sm:$0xff]  ;;  %v1859_v51 = vld [vmem:[#allocation2 + $0x170] sm:$0xff]  ;;  %v2117_v56 = vpack.c.bf16 %v1827_v48, %v1825_v47  ;;  %2273 = vmatpush.bf16.msra.mxu2 %v2151_v46 }
  0x1a   :  { %v1889_v52 = vld [vmem:[#allocation2 + $0x260] sm:$0xff]  ;;  %v1891_v53 = vld [vmem:[#allocation2 + $0x270] sm:$0xff]  ;;  %v2133_v57 = vpack.c.bf16 %v1859_v51, %v1857_v49  ;;  %2286 = vmatpush.bf16.msra.mxu3 %v2167_v50 }
  0x1b   :  { %v1921_v54 = vld [vmem:[#allocation2 + $0x360] sm:$0xff]  ;;  %v1923_v55 = vld [vmem:[#allocation2 + $0x370] sm:$0xff]  ;;  %v2149_v58 = vpack.c.bf16 %v1891_v53, %v1889_v52  ;;  %2248 = vmatpush.bf16.msra.mxu0 %v2117_v56 }
  0x1c   :  { %v1821_v59 = vld [vmem:[#allocation2 + $0x40] sm:$0xff]  ;;  %v1823_v60 = vld [vmem:[#allocation2 + $0x50] sm:$0xff]  ;;  %v2165_v62 = vpack.c.bf16 %v1923_v55, %v1921_v54  ;;  %2261 = vmatpush.bf16.msra.mxu1 %v2133_v57 }
  0x1d   :  { %v1853_v61 = vld [vmem:[#allocation2 + $0x140] sm:$0xff]  ;;  %v1855_v63 = vld [vmem:[#allocation2 + $0x150] sm:$0xff]  ;;  %v2115_v4 = vpack.c.bf16 %v1823_v60, %v1821_v59  ;;  %2274 = vmatpush.bf16.msra.mxu2 %v2149_v58 }
  0x1e   :  { %v1885_v0 = vld [vmem:[#allocation2 + $0x240] sm:$0xff]  ;;  %v1887_v1 = vld [vmem:[#allocation2 + $0x250] sm:$0xff]  ;;  %v2131_v5 = vpack.c.bf16 %v1855_v63, %v1853_v61  ;;  %2287 = vmatpush.bf16.msra.mxu3 %v2165_v62 }
  0x1f   :  { %v1917_v2 = vld [vmem:[#allocation2 + $0x340] sm:$0xff]  ;;  %v1919_v3 = vld [vmem:[#allocation2 + $0x350] sm:$0xff]  ;;  %v2147_v6 = vpack.c.bf16 %v1887_v1, %v1885_v0  ;;  %2249 = vmatpush.bf16.msra.mxu0 %v2115_v4  ;;  %v1808_v1 = vld [vmem:[%s5844_s18 + $0x18] sm:$0xff] }
  0x20   :  { %v1817_v7 = vld [vmem:[#allocation2 + $0x20] sm:$0xff]  ;;  %v1819_v8 = vld [vmem:[#allocation2 + $0x30] sm:$0xff]  ;;  %v2163_v10 = vpack.c.bf16 %v1919_v3, %v1917_v2  ;;  %2262 = vmatpush.bf16.msra.mxu1 %v2131_v5  ;;  %v1806_v2 = vld [vmem:[%s5844_s18 + $0x8] sm:$0xff] }
  0x21   :  { %v1849_v9 = vld [vmem:[#allocation2 + $0x120] sm:$0xff]  ;;  %v1851_v11 = vld [vmem:[#allocation2 + $0x130] sm:$0xff]  ;;  %v2113_v16 = vpack.c.bf16 %v1819_v8, %v1817_v7  ;;  %2275 = vmatpush.bf16.msra.mxu2 %v2147_v6  ;;  %v3594_v6 = vpack.c.bf16 %v1808_v1, %v1808_v1  ;;  %v3596_v7 = vpack.c.bf16 %v1806_v2, %v1806_v2 }
  0x22   :  { %v1881_v12 = vld [vmem:[#allocation2 + $0x220] sm:$0xff]  ;;  %v1883_v13 = vld [vmem:[#allocation2 + $0x230] sm:$0xff]  ;;  %v2129_v19 = vpack.c.bf16 %v1851_v11, %v1849_v9  ;;  %2288 = vmatpush.bf16.msra.mxu3 %v2163_v10 }
  0x23   :  { %v1913_v14 = vld [vmem:[#allocation2 + $0x320] sm:$0xff]  ;;  %v1915_v15 = vld [vmem:[#allocation2 + $0x330] sm:$0xff]  ;;  %v2145_v20 = vpack.c.bf16 %v1883_v13, %v1881_v12  ;;  %2250 = vmatpush.bf16.msra.mxu0 %v2113_v16 }
  0x24   :  { %v1813_v17 = vld [vmem:[#allocation2] sm:$0xff]  ;;  %v1815_v18 = vld [vmem:[#allocation2 + $0x10] sm:$0xff]  ;;  %v2161_v24 = vpack.c.bf16 %v1915_v15, %v1913_v14  ;;  %2263 = vmatpush.bf16.msra.mxu1 %v2129_v19 }
  0x25   :  { %v1845_v21 = vld [vmem:[#allocation2 + $0x100] sm:$0xff]  ;;  %v1847_v22 = vld [vmem:[#allocation2 + $0x110] sm:$0xff]  ;;  %v2111_v31 = vpack.c.bf16 %v1815_v18, %v1813_v17  ;;  %2276 = vmatpush.bf16.msra.mxu2 %v2145_v20 }
  0x26   :  { %v1877_v23 = vld [vmem:[#allocation2 + $0x200] sm:$0xff]  ;;  %v1879_v25 = vld [vmem:[#allocation2 + $0x210] sm:$0xff]  ;;  %v2127_v35 = vpack.c.bf16 %v1847_v22, %v1845_v21  ;;  %2289 = vmatpush.bf16.msra.mxu3 %v2161_v24 }
  0x27   :  { %v1909_v26 = vld [vmem:[#allocation2 + $0x300] sm:$0xff]  ;;  %v1911_v27 = vld [vmem:[#allocation2 + $0x310] sm:$0xff]  ;;  %v2143_v36 = vpack.c.bf16 %v1879_v25, %v1877_v23  ;;  %2251 = vmatpush.bf16.msra.mxu0 %v2111_v31 }
  0x28   :  { %v1969_v28 = vld [vmem:[#allocation2 + $0x4e0] sm:$0xff]  ;;  %v1971_v29 = vld [vmem:[#allocation2 + $0x4f0] sm:$0xff]  ;;  %v2159_v39 = vpack.c.bf16 %v1911_v27, %v1909_v26  ;;  %2264 = vmatpush.bf16.msra.mxu1 %v2127_v35 }
  0x29   :  { %v2001_v30 = vld [vmem:[#allocation2 + $0x5e0] sm:$0xff]  ;;  %v2003_v32 = vld [vmem:[#allocation2 + $0x5f0] sm:$0xff]  ;;  %v2189_v40 = vpack.c.bf16 %v1971_v29, %v1969_v28  ;;  %2277 = vmatpush.bf16.msra.mxu2 %v2143_v36 }
  0x2a   :  { %v2033_v33 = vld [vmem:[#allocation2 + $0x6e0] sm:$0xff]  ;;  %v2035_v34 = vld [vmem:[#allocation2 + $0x6f0] sm:$0xff]  ;;  %v2205_v41 = vpack.c.bf16 %v2003_v32, %v2001_v30  ;;  %2290 = vmatpush.bf16.msra.mxu3 %v2159_v39 }
  0x2b   :  { %v2065_v37 = vld [vmem:[#allocation2 + $0x7e0] sm:$0xff]  ;;  %v2067_v38 = vld [vmem:[#allocation2 + $0x7f0] sm:$0xff]  ;;  %v2221_v42 = vpack.c.bf16 %v2035_v34, %v2033_v33  ;;  %2296 = vmatpush.bf16.msrb.mxu0 %v2189_v40  ;;  %2265 = vmatmul.bf16.vlgmr.msra.gmra.mxu1 %v3596_v7 }
  0x2c   :  { %v1965_v43 = vld [vmem:[#allocation2 + $0x4c0] sm:$0xff]  ;;  %v1967_v44 = vld [vmem:[#allocation2 + $0x4d0] sm:$0xff]  ;;  %v2237_v46 = vpack.c.bf16 %v2067_v38, %v2065_v37  ;;  %2309 = vmatpush.bf16.msrb.mxu1 %v2205_v41 }
  0x2d   :  { %v1997_v45 = vld [vmem:[#allocation2 + $0x5c0] sm:$0xff]  ;;  %v1999_v47 = vld [vmem:[#allocation2 + $0x5d0] sm:$0xff]  ;;  %v2187_v53 = vpack.c.bf16 %v1967_v44, %v1965_v43  ;;  %2322 = vmatpush.bf16.msrb.mxu2 %v2221_v42  ;;  %2291 = vmatmul.bf16.vlgmr.msra.gmra.mxu3 %v3594_v6 }
  0x2e   :  { %v2029_v48 = vld [vmem:[#allocation2 + $0x6c0] sm:$0xff]  ;;  %v2031_v49 = vld [vmem:[#allocation2 + $0x6d0] sm:$0xff]  ;;  %v2203_v58 = vpack.c.bf16 %v1999_v47, %v1997_v45  ;;  %2335 = vmatpush.bf16.msrb.mxu3 %v2237_v46 }
  0x2f   :  { %v2061_v50 = vld [vmem:[#allocation2 + $0x7c0] sm:$0xff]  ;;  %v2063_v51 = vld [vmem:[#allocation2 + $0x7d0] sm:$0xff]  ;;  %v2219_v59 = vpack.c.bf16 %v2031_v49, %v2029_v48  ;;  %2297 = vmatpush.bf16.msrb.mxu0 %v2187_v53 }
  0x30   :  { %v1807_v52 = vld [vmem:[%s5844_s18 + $0x10] sm:$0xff]  ;;  %v1961_v54 = vld [vmem:[#allocation2 + $0x4a0] sm:$0xff]  ;;  %v2235_v63 = vpack.c.bf16 %v2063_v51, %v2061_v50  ;;  %2310 = vmatpush.bf16.msrb.mxu1 %v2203_v58 }
  0x31   :  { %v1963_v55 = vld [vmem:[#allocation2 + $0x4b0] sm:$0xff]  ;;  %v1993_v56 = vld [vmem:[#allocation2 + $0x5a0] sm:$0xff]  ;;  %v3580_v57 = vpack.c.bf16 %v1807_v52, %v1807_v52  ;;  %2323 = vmatpush.bf16.msrb.mxu2 %v2219_v59 }
  0x32   :  { %v1995_v60 = vld [vmem:[#allocation2 + $0x5b0] sm:$0xff]  ;;  %v2025_v61 = vld [vmem:[#allocation2 + $0x6a0] sm:$0xff]  ;;  %v2185_v8 = vpack.c.bf16 %v1963_v55, %v1961_v54  ;;  %2336 = vmatpush.bf16.msrb.mxu3 %v2235_v63 }
  0x33   :  { %v2027_v62 = vld [vmem:[#allocation2 + $0x6b0] sm:$0xff]  ;;  %2278 = vmatmul.bf16.vlgmr.msra.gmra.mxu2 %v3580_v57  ;;  %v1805_v0 = vld [vmem:[%s5844_s18] sm:$0xff]  ;;  %v2201_v9 = vpack.c.bf16 %v1995_v60, %v1993_v56 }
  0x34   :  { %v2057_v3 = vld [vmem:[#allocation2 + $0x7a0] sm:$0xff]  ;;  %v2059_v4 = vld [vmem:[#allocation2 + $0x7b0] sm:$0xff]  ;;  %v3592_v5 = vpack.c.bf16 %v1805_v0, %v1805_v0  ;;  %v2217_v10 = vpack.c.bf16 %v2027_v62, %v2025_v61  ;;  %2298 = vmatpush.bf16.msrb.mxu0 %v2185_v8  ;;  %v1842_v8 = vld [vmem:[#allocation2 + $0xe8] sm:$0xff] }
  0x35   :  { %v1957_v11 = vld [vmem:[#allocation2 + $0x480] sm:$0xff]  ;;  %v1959_v12 = vld [vmem:[#allocation2 + $0x490] sm:$0xff]  ;;  %v2233_v14 = vpack.c.bf16 %v2059_v4, %v2057_v3  ;;  %2311 = vmatpush.bf16.msrb.mxu1 %v2201_v9  ;;  %v1844_v9 = vld [vmem:[#allocation2 + $0xf8] sm:$0xff] }
  0x36   :  { %v1989_v13 = vld [vmem:[#allocation2 + $0x580] sm:$0xff]  ;;  %v1991_v15 = vld [vmem:[#allocation2 + $0x590] sm:$0xff]  ;;  %2252 = vmatmul.bf16.vlgmr.msra.gmra.mxu0 %v3592_v5  ;;  %v2183_v20 = vpack.c.bf16 %v1959_v12, %v1957_v11  ;;  %2324 = vmatpush.bf16.msrb.mxu2 %v2217_v10  ;;  %v1874_v10 = vld [vmem:[#allocation2 + $0x1e8] sm:$0xff] }
  0x37   :  { %v2021_v16 = vld [vmem:[#allocation2 + $0x680] sm:$0xff]  ;;  %v2023_v17 = vld [vmem:[#allocation2 + $0x690] sm:$0xff]  ;;  %v2199_v21 = vpack.c.bf16 %v1991_v15, %v1989_v13  ;;  %2337 = vmatpush.bf16.msrb.mxu3 %v2233_v14  ;;  %v1876_v12 = vld [vmem:[#allocation2 + $0x1f8] sm:$0xff] }
  0x38   :  { %v2053_v18 = vld [vmem:[#allocation2 + $0x780] sm:$0xff]  ;;  %v2055_v19 = vld [vmem:[#allocation2 + $0x790] sm:$0xff]  ;;  %v2215_v22 = vpack.c.bf16 %v2023_v17, %v2021_v16  ;;  %2299 = vmatpush.bf16.msrb.mxu0 %v2183_v20  ;;  %v1906_v13 = vld [vmem:[#allocation2 + $0x2e8] sm:$0xff] }
  0x39   :  { %v1953_v23 = vld [vmem:[#allocation2 + $0x460] sm:$0xff]  ;;  %v1955_v24 = vld [vmem:[#allocation2 + $0x470] sm:$0xff]  ;;  %v2231_v26 = vpack.c.bf16 %v2055_v19, %v2053_v18  ;;  %2312 = vmatpush.bf16.msrb.mxu1 %v2199_v21  ;;  %v1908_v14 = vld [vmem:[#allocation2 + $0x2f8] sm:$0xff]  ;;  %v2126_v21 = vpack.c.bf16 %v1844_v9, %v1842_v8 }
  0x3a   :  { %v1985_v25 = vld [vmem:[#allocation2 + $0x560] sm:$0xff]  ;;  %v1987_v27 = vld [vmem:[#allocation2 + $0x570] sm:$0xff]  ;;  %v2181_v32 = vpack.c.bf16 %v1955_v24, %v1953_v23  ;;  %2325 = vmatpush.bf16.msrb.mxu2 %v2215_v22  ;;  %v1938_v17 = vld [vmem:[#allocation2 + $0x3e8] sm:$0xff] }
  0x3b   :  { %v2017_v28 = vld [vmem:[#allocation2 + $0x660] sm:$0xff]  ;;  %v2019_v29 = vld [vmem:[#allocation2 + $0x670] sm:$0xff]  ;;  %v2197_v33 = vpack.c.bf16 %v1987_v27, %v1985_v25  ;;  %2338 = vmatpush.bf16.msrb.mxu3 %v2231_v26  ;;  %v1940_v18 = vld [vmem:[#allocation2 + $0x3f8] sm:$0xff]  ;;  %v2142_v25 = vpack.c.bf16 %v1876_v12, %v1874_v10  ;;  %v2158_v26 = vpack.c.bf16 %v1908_v14, %v1906_v13 }
  0x3c   :  { %v2049_v30 = vld [vmem:[#allocation2 + $0x760] sm:$0xff]  ;;  %v2051_v31 = vld [vmem:[#allocation2 + $0x770] sm:$0xff]  ;;  %v2213_v34 = vpack.c.bf16 %v2019_v29, %v2017_v28  ;;  %2300 = vmatpush.bf16.msrb.mxu0 %v2181_v32  ;;  %v1812_v23 = vld [vmem:[%s5844_s18 + $0x38] sm:$0xff] }
  0x3d   :  { %v1949_v35 = vld [vmem:[#allocation2 + $0x440] sm:$0xff]  ;;  %v1951_v36 = vld [vmem:[#allocation2 + $0x450] sm:$0xff]  ;;  %v2229_v38 = vpack.c.bf16 %v2051_v31, %v2049_v30  ;;  %2313 = vmatpush.bf16.msrb.mxu1 %v2197_v33  ;;  %v1838_v24 = vld [vmem:[#allocation2 + $0xc8] sm:$0xff]  ;;  %v2174_v30 = vpack.c.bf16 %v1940_v18, %v1938_v17 }
  0x3e   :  { %v1981_v37 = vld [vmem:[#allocation2 + $0x540] sm:$0xff]  ;;  %v1983_v39 = vld [vmem:[#allocation2 + $0x550] sm:$0xff]  ;;  %v2179_v44 = vpack.c.bf16 %v1951_v36, %v1949_v35  ;;  %2326 = vmatpush.bf16.msrb.mxu2 %v2213_v34  ;;  %v1840_v27 = vld [vmem:[#allocation2 + $0xd8] sm:$0xff]  ;;  %v3617_v36 = vpack.c.bf16 %v1812_v23, %v1812_v23 }
  0x3f   :  { %v2013_v40 = vld [vmem:[#allocation2 + $0x640] sm:$0xff]  ;;  %v2015_v41 = vld [vmem:[#allocation2 + $0x650] sm:$0xff]  ;;  %v2195_v45 = vpack.c.bf16 %v1983_v39, %v1981_v37  ;;  %2339 = vmatpush.bf16.msrb.mxu3 %v2229_v38  ;;  %v1870_v28 = vld [vmem:[#allocation2 + $0x1c8] sm:$0xff]  ;;  %v2124_v39 = vpack.c.bf16 %v1840_v27, %v1838_v24 }
  0x40   :  { %v2045_v42 = vld [vmem:[#allocation2 + $0x740] sm:$0xff]  ;;  %v2047_v43 = vld [vmem:[#allocation2 + $0x750] sm:$0xff]  ;;  %v2211_v46 = vpack.c.bf16 %v2015_v41, %v2013_v40  ;;  %2301 = vmatpush.bf16.msrb.mxu0 %v2179_v44  ;;  %v1810_v29 = vld [vmem:[%s5844_s18 + $0x28] sm:$0xff] }
  0x41   :  { %v1945_v47 = vld [vmem:[#allocation2 + $0x420] sm:$0xff]  ;;  %v1947_v48 = vld [vmem:[#allocation2 + $0x430] sm:$0xff]  ;;  %v2227_v50 = vpack.c.bf16 %v2047_v43, %v2045_v42  ;;  %2314 = vmatpush.bf16.msrb.mxu1 %v2195_v45  ;;  %v1872_v32 = vld [vmem:[#allocation2 + $0x1d8] sm:$0xff]  ;;  %v3619_v40 = vpack.c.bf16 %v1810_v29, %v1810_v29 }
  0x42   :  { %v1977_v49 = vld [vmem:[#allocation2 + $0x520] sm:$0xff]  ;;  %v1979_v51 = vld [vmem:[#allocation2 + $0x530] sm:$0xff]  ;;  %v2177_v56 = vpack.c.bf16 %v1947_v48, %v1945_v47  ;;  %2327 = vmatpush.bf16.msrb.mxu2 %v2211_v46  ;;  %v1902_v33 = vld [vmem:[#allocation2 + $0x2c8] sm:$0xff]  ;;  %v2140_v41 = vpack.c.bf16 %v1872_v32, %v1870_v28 }
  0x43   :  { %v2009_v52 = vld [vmem:[#allocation2 + $0x620] sm:$0xff]  ;;  %v2011_v53 = vld [vmem:[#allocation2 + $0x630] sm:$0xff]  ;;  %v2193_v60 = vpack.c.bf16 %v1979_v51, %v1977_v49  ;;  %2340 = vmatpush.bf16.msrb.mxu3 %v2227_v50  ;;  %v1904_v34 = vld [vmem:[#allocation2 + $0x2d8] sm:$0xff] }
  0x44   :  { %v2041_v54 = vld [vmem:[#allocation2 + $0x720] sm:$0xff]  ;;  %v2043_v55 = vld [vmem:[#allocation2 + $0x730] sm:$0xff]  ;;  %v2209_v61 = vpack.c.bf16 %v2011_v53, %v2009_v52  ;;  %2302 = vmatpush.bf16.msrb.mxu0 %v2177_v56  ;;  %v1934_v37 = vld [vmem:[#allocation2 + $0x3c8] sm:$0xff]  ;;  %v2156_v42 = vpack.c.bf16 %v1904_v34, %v1902_v33 }
  0x45   :  { %v1941_v58 = vld [vmem:[#allocation2 + $0x400] sm:$0xff]  ;;  %v1943_v59 = vld [vmem:[#allocation2 + $0x410] sm:$0xff]  ;;  %v2225_v1 = vpack.c.bf16 %v2043_v55, %v2041_v54  ;;  %2315 = vmatpush.bf16.msrb.mxu1 %v2193_v60  ;;  %v1936_v38 = vld [vmem:[#allocation2 + $0x3d8] sm:$0xff] }
  0x46   :  { %v1973_v62 = vld [vmem:[#allocation2 + $0x500] sm:$0xff]  ;;  %v1975_v63 = vld [vmem:[#allocation2 + $0x510] sm:$0xff]  ;;  %v2175_v11 = vpack.c.bf16 %v1943_v59, %v1941_v58  ;;  %2328 = vmatpush.bf16.msrb.mxu2 %v2209_v61  ;;  %v1834_v43 = vld [vmem:[#allocation2 + $0xa8] sm:$0xff]  ;;  %v2172_v46 = vpack.c.bf16 %v1936_v38, %v1934_v37 }
  0x47   :  { %v2005_v0 = vld [vmem:[#allocation2 + $0x600] sm:$0xff]  ;;  %v2007_v2 = vld [vmem:[#allocation2 + $0x610] sm:$0xff]  ;;  %v2191_v15 = vpack.c.bf16 %v1975_v63, %v1973_v62  ;;  %2341 = vmatpush.bf16.msrb.mxu3 %v2225_v1  ;;  %v1836_v44 = vld [vmem:[#allocation2 + $0xb8] sm:$0xff] }
  0x48   :  { %v2037_v3 = vld [vmem:[#allocation2 + $0x700] sm:$0xff]  ;;  %v2039_v4 = vld [vmem:[#allocation2 + $0x710] sm:$0xff]  ;;  %v2207_v16 = vpack.c.bf16 %v2007_v2, %v2005_v0  ;;  %2303 = vmatpush.bf16.msrb.mxu0 %v2175_v11  ;;  %v1866_v45 = vld [vmem:[#allocation2 + $0x1a8] sm:$0xff]  ;;  %v2122_v52 = vpack.c.bf16 %v1836_v44, %v1834_v43 }
  0x49   :  { %v1811_v19 = vld [vmem:[%s5844_s18 + $0x30] sm:$0xff]  ;;  %v2223_v20 = vpack.c.bf16 %v2039_v4, %v2037_v3  ;;  %v1809_v22 = vld [vmem:[%s5844_s18 + $0x20] sm:$0xff]  ;;  %2316 = vmatpush.bf16.msrb.mxu1 %v2191_v15  ;;  %v1868_v47 = vld [vmem:[#allocation2 + $0x1b8] sm:$0xff] }
  0x4a   :  { %v3613_v31 = vpack.c.bf16 %v1811_v19, %v1811_v19  ;;  %2329 = vmatpush.bf16.msrb.mxu2 %v2207_v16  ;;  %v3615_v35 = vpack.c.bf16 %v1809_v22, %v1809_v22  ;;  %v1898_v48 = vld [vmem:[#allocation2 + $0x2a8] sm:$0xff]  ;;  %v1900_v49 = vld [vmem:[#allocation2 + $0x2b8] sm:$0xff]  ;;  %v2138_v53 = vpack.c.bf16 %v1868_v47, %v1866_v45 }
  0x4b   :  { %2342 = vmatpush.bf16.msrb.mxu3 %v2223_v20  ;;  %v1930_v50 = vld [vmem:[#allocation2 + $0x3a8] sm:$0xff]  ;;  %v1932_v51 = vld [vmem:[#allocation2 + $0x3b8] sm:$0xff]  ;;  %v2154_v54 = vpack.c.bf16 %v1900_v49, %v1898_v48 }
  0x4c   :  { %2348 = vmatpush.bf16.msra.mxu0 %v2126_v21  ;;  %2317 = vmatmul.bf16.vlgmr.msrb.gmra.mxu1 %v3619_v40  ;;  %v1830_v55 = vld [vmem:[#allocation2 + $0x88] sm:$0xff]  ;;  %v1832_v56 = vld [vmem:[#allocation2 + $0x98] sm:$0xff]  ;;  %v2170_v59 = vpack.c.bf16 %v1932_v51, %v1930_v50 }
  0x4d   :  { %2361 = vmatpush.bf16.msra.mxu1 %v2142_v25  ;;  %2330 = vmatmul.bf16.vlgmr.msrb.gmra.mxu2 %v3613_v31  ;;  %v1862_v58 = vld [vmem:[#allocation2 + $0x188] sm:$0xff]  ;;  %v1864_v60 = vld [vmem:[#allocation2 + $0x198] sm:$0xff]  ;;  %v2120_v1 = vpack.c.bf16 %v1832_v56, %v1830_v55 }
  0x4e   :  { %2374 = vmatpush.bf16.msra.mxu2 %v2158_v26  ;;  %2304 = vmatmul.bf16.vlgmr.msrb.gmra.mxu0 %v3615_v35  ;;  %v1894_v61 = vld [vmem:[#allocation2 + $0x288] sm:$0xff]  ;;  %v1896_v62 = vld [vmem:[#allocation2 + $0x298] sm:$0xff]  ;;  %v2136_v2 = vpack.c.bf16 %v1864_v60, %v1862_v58 }
  0x4f   :  { %2387 = vmatpush.bf16.msra.mxu3 %v2174_v30  ;;  %v1926_v63 = vld [vmem:[#allocation2 + $0x388] sm:$0xff]  ;;  %v1928_v0 = vld [vmem:[#allocation2 + $0x398] sm:$0xff]  ;;  %v2152_v3 = vpack.c.bf16 %v1896_v62, %v1894_v61 }
  0x50   :  { %2343 = vmatmul.bf16.vlgmr.msrb.gmra.mxu3 %v3617_v36  ;;  %2349 = vmatpush.bf16.msra.mxu0 %v2124_v39  ;;  %v1826_v4 = vld [vmem:[#allocation2 + $0x68] sm:$0xff]  ;;  %v1828_v8 = vld [vmem:[#allocation2 + $0x78] sm:$0xff]  ;;  %v2168_v10 = vpack.c.bf16 %v1928_v0, %v1926_v63 }
  0x51   :  { %2362 = vmatpush.bf16.msra.mxu1 %v2140_v41  ;;  %v1858_v9 = vld [vmem:[#allocation2 + $0x168] sm:$0xff]  ;;  %v1860_v11 = vld [vmem:[#allocation2 + $0x178] sm:$0xff]  ;;  %v2118_v16 = vpack.c.bf16 %v1828_v8, %v1826_v4 }
  0x52   :  { %2375 = vmatpush.bf16.msra.mxu2 %v2156_v42  ;;  %v1890_v12 = vld [vmem:[#allocation2 + $0x268] sm:$0xff]  ;;  %v1892_v13 = vld [vmem:[#allocation2 + $0x278] sm:$0xff]  ;;  %v2134_v17 = vpack.c.bf16 %v1860_v11, %v1858_v9 }
  0x53   :  { %2388 = vmatpush.bf16.msra.mxu3 %v2172_v46  ;;  %v1922_v14 = vld [vmem:[#allocation2 + $0x368] sm:$0xff]  ;;  %v1924_v15 = vld [vmem:[#allocation2 + $0x378] sm:$0xff]  ;;  %v2150_v18 = vpack.c.bf16 %v1892_v13, %v1890_v12 }
  0x54   :  { %2350 = vmatpush.bf16.msra.mxu0 %v2122_v52  ;;  %v1822_v19 = vld [vmem:[#allocation2 + $0x48] sm:$0xff]  ;;  %v1824_v20 = vld [vmem:[#allocation2 + $0x58] sm:$0xff]  ;;  %v2166_v22 = vpack.c.bf16 %v1924_v15, %v1922_v14 }
  0x55   :  { %2363 = vmatpush.bf16.msra.mxu1 %v2138_v53  ;;  %v1854_v21 = vld [vmem:[#allocation2 + $0x148] sm:$0xff]  ;;  %v1856_v23 = vld [vmem:[#allocation2 + $0x158] sm:$0xff]  ;;  %v2116_v28 = vpack.c.bf16 %v1824_v20, %v1822_v19 }
  0x56   :  { %2376 = vmatpush.bf16.msra.mxu2 %v2154_v54  ;;  %v1886_v24 = vld [vmem:[#allocation2 + $0x248] sm:$0xff]  ;;  %v1888_v25 = vld [vmem:[#allocation2 + $0x258] sm:$0xff]  ;;  %v2132_v29 = vpack.c.bf16 %v1856_v23, %v1854_v21 }
  0x57   :  { %2389 = vmatpush.bf16.msra.mxu3 %v2170_v59  ;;  %v1918_v26 = vld [vmem:[#allocation2 + $0x348] sm:$0xff]  ;;  %v1920_v27 = vld [vmem:[#allocation2 + $0x358] sm:$0xff]  ;;  %v2148_v30 = vpack.c.bf16 %v1888_v25, %v1886_v24 }
  0x58   :  { %2351 = vmatpush.bf16.msra.mxu0 %v2120_v1  ;;  %v1818_v32 = vld [vmem:[#allocation2 + $0x28] sm:$0xff]  ;;  %v1820_v33 = vld [vmem:[#allocation2 + $0x38] sm:$0xff]  ;;  %v2164_v37 = vpack.c.bf16 %v1920_v27, %v1918_v26 }
  0x59   :  { %2364 = vmatpush.bf16.msra.mxu1 %v2136_v2  ;;  %v1850_v34 = vld [vmem:[#allocation2 + $0x128] sm:$0xff]  ;;  %v1852_v38 = vld [vmem:[#allocation2 + $0x138] sm:$0xff]  ;;  %v2114_v44 = vpack.c.bf16 %v1820_v33, %v1818_v32 }
  0x5a   :  { %2377 = vmatpush.bf16.msra.mxu2 %v2152_v3  ;;  %v1882_v39 = vld [vmem:[#allocation2 + $0x228] sm:$0xff]  ;;  %v1884_v41 = vld [vmem:[#allocation2 + $0x238] sm:$0xff]  ;;  %v2130_v47 = vpack.c.bf16 %v1852_v38, %v1850_v34 }
  0x5b   :  { %2390 = vmatpush.bf16.msra.mxu3 %v2168_v10  ;;  %v1914_v42 = vld [vmem:[#allocation2 + $0x328] sm:$0xff]  ;;  %v1916_v43 = vld [vmem:[#allocation2 + $0x338] sm:$0xff]  ;;  %v2146_v48 = vpack.c.bf16 %v1884_v41, %v1882_v39 }
  0x5c   :  { %2352 = vmatpush.bf16.msra.mxu0 %v2118_v16  ;;  %v1814_v45 = vld [vmem:[#allocation2 + $0x8] sm:$0xff]  ;;  %v1816_v46 = vld [vmem:[#allocation2 + $0x18] sm:$0xff]  ;;  %v2162_v52 = vpack.c.bf16 %v1916_v43, %v1914_v42 }
  0x5d   :  { %2365 = vmatpush.bf16.msra.mxu1 %v2134_v17  ;;  %v1846_v49 = vld [vmem:[#allocation2 + $0x108] sm:$0xff]  ;;  %v1848_v50 = vld [vmem:[#allocation2 + $0x118] sm:$0xff]  ;;  %v2112_v60 = vpack.c.bf16 %v1816_v46, %v1814_v45 }
  0x5e   :  { %2378 = vmatpush.bf16.msra.mxu2 %v2150_v18  ;;  %v1878_v51 = vld [vmem:[#allocation2 + $0x208] sm:$0xff]  ;;  %v1880_v53 = vld [vmem:[#allocation2 + $0x218] sm:$0xff]  ;;  %v2128_v0 = vpack.c.bf16 %v1848_v50, %v1846_v49 }
  0x5f   :  { %2391 = vmatpush.bf16.msra.mxu3 %v2166_v22  ;;  %v1910_v54 = vld [vmem:[#allocation2 + $0x308] sm:$0xff]  ;;  %v1912_v55 = vld [vmem:[#allocation2 + $0x318] sm:$0xff]  ;;  %v2144_v1 = vpack.c.bf16 %v1880_v53, %v1878_v51 }
  0x60   :  { %2353 = vmatpush.bf16.msra.mxu0 %v2116_v28  ;;  %v1970_v56 = vld [vmem:[#allocation2 + $0x4e8] sm:$0xff]  ;;  %v1972_v58 = vld [vmem:[#allocation2 + $0x4f8] sm:$0xff]  ;;  %v2160_v4 = vpack.c.bf16 %v1912_v55, %v1910_v54 }
  0x61   :  { %2366 = vmatpush.bf16.msra.mxu1 %v2132_v29  ;;  %v2002_v59 = vld [vmem:[#allocation2 + $0x5e8] sm:$0xff]  ;;  %v2004_v61 = vld [vmem:[#allocation2 + $0x5f8] sm:$0xff]  ;;  %v2190_v8 = vpack.c.bf16 %v1972_v58, %v1970_v56 }
  0x62   :  { %2379 = vmatpush.bf16.msra.mxu2 %v2148_v30  ;;  %v2034_v62 = vld [vmem:[#allocation2 + $0x6e8] sm:$0xff]  ;;  %v2036_v63 = vld [vmem:[#allocation2 + $0x6f8] sm:$0xff]  ;;  %v2206_v9 = vpack.c.bf16 %v2004_v61, %v2002_v59 }
  0x63   :  { %2392 = vmatpush.bf16.msra.mxu3 %v2164_v37  ;;  %v2066_v2 = vld [vmem:[#allocation2 + $0x7e8] sm:$0xff]  ;;  %v2068_v3 = vld [vmem:[#allocation2 + $0x7f8] sm:$0xff]  ;;  %v2222_v10 = vpack.c.bf16 %v2036_v63, %v2034_v62 }
  0x64   :  { %2354 = vmatpush.bf16.msra.mxu0 %v2114_v44  ;;  %v1966_v11 = vld [vmem:[#allocation2 + $0x4c8] sm:$0xff]  ;;  %v1968_v12 = vld [vmem:[#allocation2 + $0x4d8] sm:$0xff]  ;;  %v2238_v14 = vpack.c.bf16 %v2068_v3, %v2066_v2 }
  0x65   :  { %2367 = vmatpush.bf16.msra.mxu1 %v2130_v47  ;;  %v1998_v13 = vld [vmem:[#allocation2 + $0x5c8] sm:$0xff]  ;;  %v2000_v15 = vld [vmem:[#allocation2 + $0x5d8] sm:$0xff]  ;;  %v2188_v20 = vpack.c.bf16 %v1968_v12, %v1966_v11 }
  0x66   :  { %2380 = vmatpush.bf16.msra.mxu2 %v2146_v48  ;;  %v2030_v16 = vld [vmem:[#allocation2 + $0x6c8] sm:$0xff]  ;;  %v2032_v17 = vld [vmem:[#allocation2 + $0x6d8] sm:$0xff]  ;;  %v2204_v21 = vpack.c.bf16 %v2000_v15, %v1998_v13 }
  0x67   :  { %2393 = vmatpush.bf16.msra.mxu3 %v2162_v52  ;;  %v2062_v18 = vld [vmem:[#allocation2 + $0x7c8] sm:$0xff]  ;;  %v2064_v19 = vld [vmem:[#allocation2 + $0x7d8] sm:$0xff]  ;;  %v2220_v22 = vpack.c.bf16 %v2032_v17, %v2030_v16 }
  0x68   :  { %2355 = vmatpush.bf16.msra.mxu0 %v2112_v60  ;;  %v1962_v23 = vld [vmem:[#allocation2 + $0x4a8] sm:$0xff]  ;;  %v1964_v24 = vld [vmem:[#allocation2 + $0x4b8] sm:$0xff]  ;;  %v2236_v26 = vpack.c.bf16 %v2064_v19, %v2062_v18 }
  0x69   :  { %2368 = vmatpush.bf16.msra.mxu1 %v2128_v0  ;;  %v1994_v25 = vld [vmem:[#allocation2 + $0x5a8] sm:$0xff]  ;;  %v1996_v27 = vld [vmem:[#allocation2 + $0x5b8] sm:$0xff]  ;;  %v2186_v33 = vpack.c.bf16 %v1964_v24, %v1962_v23 }
  0x6a   :  { %2381 = vmatpush.bf16.msra.mxu2 %v2144_v1  ;;  %v2026_v28 = vld [vmem:[#allocation2 + $0x6a8] sm:$0xff]  ;;  %v2028_v29 = vld [vmem:[#allocation2 + $0x6b8] sm:$0xff]  ;;  %v2202_v34 = vpack.c.bf16 %v1996_v27, %v1994_v25 }
  0x6b   :  { %2394 = vmatpush.bf16.msra.mxu3 %v2160_v4  ;;  %v2058_v30 = vld [vmem:[#allocation2 + $0x7a8] sm:$0xff]  ;;  %v2060_v32 = vld [vmem:[#allocation2 + $0x7b8] sm:$0xff]  ;;  %2356 = vmatmul.bf16.vlgmr.msra.gmra.mxu0 %v3592_v5  ;;  %v2218_v37 = vpack.c.bf16 %v2028_v29, %v2026_v28 }
  0x6c   :  { %2400 = vmatpush.bf16.msrb.mxu0 %v2190_v8  ;;  %2369 = vmatmul.bf16.vlgmr.msra.gmra.mxu1 %v3596_v7  ;;  %v1958_v38 = vld [vmem:[#allocation2 + $0x488] sm:$0xff]  ;;  %v1960_v39 = vld [vmem:[#allocation2 + $0x498] sm:$0xff]  ;;  %v2234_v41 = vpack.c.bf16 %v2060_v32, %v2058_v30 }
  0x6d   :  { %2413 = vmatpush.bf16.msrb.mxu1 %v2206_v9  ;;  %2382 = vmatmul.bf16.vlgmr.msra.gmra.mxu2 %v3580_v57  ;;  %v1990_v57 = vld [vmem:[#allocation2 + $0x588] sm:$0xff]  ;;  %v1992_v42 = vld [vmem:[#allocation2 + $0x598] sm:$0xff] }
  0x6e   :  { %2426 = vmatpush.bf16.msrb.mxu2 %v2222_v10  ;;  %2395 = vmatmul.bf16.vlgmr.msra.gmra.mxu3 %v3594_v6  ;;  %v2022_v43 = vld [vmem:[#allocation2 + $0x688] sm:$0xff]  ;;  %v2024_v44 = vld [vmem:[#allocation2 + $0x698] sm:$0xff]  ;;  %v2184_v6 = vpack.c.bf16 %v1960_v39, %v1958_v38  ;;  %v2200_v46 = vpack.c.bf16 %v1992_v42, %v1990_v57  ;;  %v2082_v42 = vld [vmem:[%s5826_s4 + $0x60] sm:$0xff] }
  0x6f   :  { %2439 = vmatpush.bf16.msrb.mxu3 %v2238_v14  ;;  %v2054_v45 = vld [vmem:[#allocation2 + $0x788] sm:$0xff]  ;;  %v2056_v5 = vld [vmem:[#allocation2 + $0x798] sm:$0xff]  ;;  %v2216_v7 = vpack.c.bf16 %v2024_v44, %v2022_v43 }
  0x70   :  { %2401 = vmatpush.bf16.msrb.mxu0 %v2188_v20  ;;  %v1954_v47 = vld [vmem:[#allocation2 + $0x468] sm:$0xff]  ;;  %v1956_v48 = vld [vmem:[#allocation2 + $0x478] sm:$0xff]  ;;  %v2232_v50 = vpack.c.bf16 %v2056_v5, %v2054_v45 }
  0x71   :  { %2414 = vmatpush.bf16.msrb.mxu1 %v2204_v21  ;;  %v1986_v49 = vld [vmem:[#allocation2 + $0x568] sm:$0xff]  ;;  %v1988_v51 = vld [vmem:[#allocation2 + $0x578] sm:$0xff]  ;;  %v2182_v56 = vpack.c.bf16 %v1956_v48, %v1954_v47  ;;  %v2074_v47 = vld [vmem:[%s5826_s4 + $0x20] sm:$0xff] }
  0x72   :  { %2427 = vmatpush.bf16.msrb.mxu2 %v2220_v22  ;;  %v2018_v52 = vld [vmem:[#allocation2 + $0x668] sm:$0xff]  ;;  %v2020_v53 = vld [vmem:[#allocation2 + $0x678] sm:$0xff]  ;;  %v2198_v58 = vpack.c.bf16 %v1988_v51, %v1986_v49 }
  0x73   :  { %2440 = vmatpush.bf16.msrb.mxu3 %v2236_v26  ;;  %v2050_v54 = vld [vmem:[#allocation2 + $0x768] sm:$0xff]  ;;  %v2052_v55 = vld [vmem:[#allocation2 + $0x778] sm:$0xff]  ;;  %v2214_v59 = vpack.c.bf16 %v2020_v53, %v2018_v52  ;;  %v2072_v53 = vld [vmem:[%s5826_s4 + $0x10] sm:$0xff] }
  0x74   :  { %2402 = vmatpush.bf16.msrb.mxu0 %v2186_v33  ;;  %v1950_v60 = vld [vmem:[#allocation2 + $0x448] sm:$0xff]  ;;  %v1952_v61 = vld [vmem:[#allocation2 + $0x458] sm:$0xff]  ;;  %v2230_v63 = vpack.c.bf16 %v2052_v55, %v2050_v54  ;;  %v2084_v33 = vld [vmem:[%s5826_s4 + $0x70] sm:$0xff] }
  0x75   :  { %2415 = vmatpush.bf16.msrb.mxu1 %v2202_v34  ;;  %v1982_v62 = vld [vmem:[#allocation2 + $0x548] sm:$0xff]  ;;  %v1984_v0 = vld [vmem:[#allocation2 + $0x558] sm:$0xff]  ;;  %v2180_v8 = vpack.c.bf16 %v1952_v61, %v1950_v60  ;;  %v3678_v55 = vld [vmem:[%s5825_s3] sm:$0x3] }
  0x76   :  { %2428 = vmatpush.bf16.msrb.mxu2 %v2218_v37  ;;  %v2014_v1 = vld [vmem:[#allocation2 + $0x648] sm:$0xff]  ;;  %v2016_v2 = vld [vmem:[#allocation2 + $0x658] sm:$0xff]  ;;  %v2196_v9 = vpack.c.bf16 %v1984_v0, %v1982_v62 }
  0x77   :  { %2441 = vmatpush.bf16.msrb.mxu3 %v2234_v41  ;;  %v2046_v3 = vld [vmem:[#allocation2 + $0x748] sm:$0xff]  ;;  %v2048_v4 = vld [vmem:[#allocation2 + $0x758] sm:$0xff]  ;;  %v2212_v10 = vpack.c.bf16 %v2016_v2, %v2014_v1  ;;  %v2100_v1 = vld [vmem:[%s5826_s4 + $0xf0] sm:$0xff] }
  0x78   :  { %2403 = vmatpush.bf16.msrb.mxu0 %v2184_v6  ;;  %v1946_v11 = vld [vmem:[#allocation2 + $0x428] sm:$0xff]  ;;  %v1948_v12 = vld [vmem:[#allocation2 + $0x438] sm:$0xff]  ;;  %v2228_v14 = vpack.c.bf16 %v2048_v4, %v2046_v3  ;;  %v2076_v6 = vld [vmem:[%s5826_s4 + $0x30] sm:$0xff] }
  0x79   :  { %2416 = vmatpush.bf16.msrb.mxu1 %v2200_v46  ;;  %v1978_v13 = vld [vmem:[#allocation2 + $0x528] sm:$0xff]  ;;  %v1980_v15 = vld [vmem:[#allocation2 + $0x538] sm:$0xff]  ;;  %v2178_v20 = vpack.c.bf16 %v1948_v12, %v1946_v11  ;;  %v2098_v3 = vld [vmem:[%s5826_s4 + $0xe0] sm:$0xff] }
  0x7a   :  { %2429 = vmatpush.bf16.msrb.mxu2 %v2216_v7  ;;  %v2010_v16 = vld [vmem:[#allocation2 + $0x628] sm:$0xff]  ;;  %v2012_v17 = vld [vmem:[#allocation2 + $0x638] sm:$0xff]  ;;  %v2194_v22 = vpack.c.bf16 %v1980_v15, %v1978_v13  ;;  %v2096_v11 = vld [vmem:[%s5826_s4 + $0xd0] sm:$0xff] }
  0x7b   :  { %2442 = vmatpush.bf16.msrb.mxu3 %v2232_v50  ;;  %v2042_v18 = vld [vmem:[#allocation2 + $0x728] sm:$0xff]  ;;  %v2044_v19 = vld [vmem:[#allocation2 + $0x738] sm:$0xff]  ;;  %v2210_v23 = vpack.c.bf16 %v2012_v17, %v2010_v16  ;;  %v89_v13 = vld [vmem:[%s5828_s6 + $0xe0] sm:$0xff] }
  0x7c   :  { %2404 = vmatpush.bf16.msrb.mxu0 %v2182_v56  ;;  %v1942_v21 = vld [vmem:[#allocation2 + $0x408] sm:$0xff]  ;;  %v1944_v24 = vld [vmem:[#allocation2 + $0x418] sm:$0xff]  ;;  %v2226_v27 = vpack.c.bf16 %v2044_v19, %v2042_v18  ;;  %v601_v15 = vld [vmem:[#allocation2 + $0xe0] sm:$0xff]  ;;  %v345_v17 = vmul.f32 0.999, %v89_v13 }
  0x7d   :  { %2417 = vmatpush.bf16.msrb.mxu1 %v2198_v58  ;;  %v1974_v25 = vld [vmem:[#allocation2 + $0x508] sm:$0xff]  ;;  %v1976_v26 = vld [vmem:[#allocation2 + $0x518] sm:$0xff]  ;;  %v2176_v37 = vpack.c.bf16 %v1944_v24, %v1942_v21  ;;  %v2240_v58 = vperm.slane %v3678_v55, 0  ;;  %v603_v19 = vld [vmem:[#allocation2 + $0xf0] sm:$0xff]  ;;  %v857_v21 = vmul.f32 0.001, %v601_v15 }
  0x7e   :  { %2430 = vmatpush.bf16.msrb.mxu2 %v2214_v59  ;;  %v2006_v28 = vld [vmem:[#allocation2 + $0x608] sm:$0xff]  ;;  %v2008_v29 = vld [vmem:[#allocation2 + $0x618] sm:$0xff]  ;;  %v2192_v38 = vpack.c.bf16 %v1976_v26, %v1974_v25  ;;  %v2070_v59 = vld [vmem:[%s5826_s4] sm:$0xff] }
  0x7f   :  { %2443 = vmatpush.bf16.msrb.mxu3 %v2230_v63  ;;  %v2038_v30 = vld [vmem:[#allocation2 + $0x708] sm:$0xff]  ;;  %v2040_v32 = vld [vmem:[#allocation2 + $0x718] sm:$0xff]  ;;  %v2208_v39 = vpack.c.bf16 %v2008_v29, %v2006_v28  ;;  %v633_v24 = vld [vmem:[#allocation2 + $0x1e0] sm:$0xff] }
  0x80   :  { %2405 = vmatpush.bf16.msrb.mxu0 %v2180_v8  ;;  %v2085_v34 = vld [vmem:[%s5826_s4 + $0x78] sm:$0xff]  ;;  %v2224_v57 = vpack.c.bf16 %v2040_v32, %v2038_v30  ;;  %v2083_v43 = vld [vmem:[%s5826_s4 + $0x68] sm:$0xff]  ;;  %v635_v28 = vld [vmem:[#allocation2 + $0x1f0] sm:$0xff]  ;;  %v1113_v32 = vadd.f32 %v857_v21, %v345_v17 }
  0x81   :  { %2418 = vmatpush.bf16.msrb.mxu1 %v2196_v9  ;;  %v2463_v41 = vpack.c.bf16 %v2085_v34, %v2084_v33  ;;  %v2462_v44 = vpack.c.bf16 %v2083_v43, %v2082_v42  ;;  %v2079_v45 = vld [vmem:[%s5826_s4 + $0x48] sm:$0xff]  ;;  %v2077_v46 = vld [vmem:[%s5826_s4 + $0x38] sm:$0xff]  ;;  %v2094_v29 = vld [vmem:[%s5826_s4 + $0xc0] sm:$0xff]  ;;  %v889_v34 = vmul.f32 0.001, %v633_v24 }
  0x82   :  { %2431 = vmatpush.bf16.msrb.mxu2 %v2212_v10  ;;  %v2459_v7 = vpack.c.bf16 %v2077_v46, %v2076_v6  ;;  %v2075_v48 = vld [vmem:[%s5826_s4 + $0x28] sm:$0xff]  ;;  %v2073_v54 = vld [vmem:[%s5826_s4 + $0x18] sm:$0xff]  ;;  %v597_v43 = vld [vmem:[#allocation2 + $0xc0] sm:$0xff] }
  0x83   :  { %2444 = vmatpush.bf16.msrb.mxu3 %v2228_v14  ;;  %v2458_v49 = vpack.c.bf16 %v2075_v48, %v2074_v47  ;;  %v2457_v56 = vpack.c.bf16 %v2073_v54, %v2072_v53  ;;  %v2071_v60 = vld [vmem:[%s5826_s4 + $0x8] sm:$0xff]  ;;  %v2101_v2 = vld [vmem:[%s5826_s4 + $0xf8] sm:$0xff]  ;;  %v91_v14 = vld [vmem:[%s5828_s6 + $0xf0] sm:$0xff] }
  0x84   :  { %2406 = vmatpush.bf16.msrb.mxu0 %v2178_v20  ;;  %v2456_v62 = vpack.c.bf16 %v2071_v60, %v2070_v59  ;;  %v2471_v9 = vpack.c.bf16 %v2101_v2, %v2100_v1  ;;  %v2099_v10 = vld [vmem:[%s5826_s4 + $0xe8] sm:$0xff]  ;;  %v2097_v12 = vld [vmem:[%s5826_s4 + $0xd8] sm:$0xff]  ;;  %v347_v18 = vmul.f32 0.999, %v91_v14  ;;  %v121_v20 = vld [vmem:[%s5828_s6 + $0x1e0] sm:$0xff] }
  0x85   :  { %2419 = vmatpush.bf16.msrb.mxu1 %v2194_v22  ;;  %v2470_v16 = vpack.c.bf16 %v2099_v10, %v2098_v3  ;;  %v859_v22 = vmul.f32 0.001, %v603_v19  ;;  %v377_v26 = vmul.f32 0.999, %v121_v20  ;;  %v629_v6 = vld [vmem:[#allocation2 + $0x1c0] sm:$0xff]  ;;  %v631_v48 = vld [vmem:[#allocation2 + $0x1d0] sm:$0xff] }
  0x86   :  { %2432 = vmatpush.bf16.msrb.mxu2 %v2210_v23  ;;  %v123_v23 = vld [vmem:[%s5828_s6 + $0x1f0] sm:$0xff]  ;;  %v887_v59 = vmul.f32 0.001, %v631_v48  ;;  %v2093_v60 = vld [vmem:[%s5826_s4 + $0xb8] sm:$0xff]  ;;  %v625_v14 = vld [vmem:[#allocation2 + $0x1a0] sm:$0xff] }
  0x87   :  { %2445 = vmatpush.bf16.msrb.mxu3 %v2226_v27  ;;  %v379_v27 = vmul.f32 0.999, %v123_v23  ;;  %v1115_v33 = vadd.f32 %v859_v22, %v347_v18  ;;  %v627_v19 = vld [vmem:[#allocation2 + $0x1b0] sm:$0xff]  ;;  %v881_v21 = vmul.f32 0.001, %v625_v14 }
  0x88   :  { %2407 = vmatpush.bf16.msrb.mxu0 %v2176_v37  ;;  %v891_v37 = vmul.f32 0.001, %v635_v28  ;;  %v883_v24 = vmul.f32 0.001, %v627_v19 }
  0x89   :  { %2420 = vmatpush.bf16.msrb.mxu1 %v2192_v38  ;;  %v2095_v38 = vld [vmem:[%s5826_s4 + $0xc8] sm:$0xff] }
  0x8a   :  { %2433 = vmatpush.bf16.msrb.mxu2 %v2208_v39  ;;  %v85_v39 = vld [vmem:[%s5828_s6 + $0xc0] sm:$0xff] }
  0x8b   :  { %2446 = vmatpush.bf16.msrb.mxu3 %v2224_v57  ;;  %2408 = vmatmul.bf16.vlgmr.msrb.gmra.mxu0 %v3615_v35  ;;  %v2080_v35 = vld [vmem:[%s5826_s4 + $0x50] sm:$0xff]  ;;  %v2469_v57 = vpack.c.bf16 %v2097_v12, %v2096_v11  ;;  %v341_v42 = vmul.f32 0.999, %v85_v39 }
  0x8c   :  { %2475 = vmatpush.bf16.msra.mxu0 %v2463_v41  ;;  %2421 = vmatmul.bf16.vlgmr.msrb.gmra.mxu1 %v3619_v40  ;;  %v87_v41 = vld [vmem:[%s5828_s6 + $0xd0] sm:$0xff] }
  0x8d   :  { %2434 = vmatmul.bf16.vlgmr.msrb.gmra.mxu2 %v3613_v31  ;;  %v2081_v31 = vld [vmem:[%s5826_s4 + $0x58] sm:$0xff]  ;;  %2488 = vmatpush.bf16.msra.mxu1 %v2471_v9  ;;  %1539 = vst [vmem:[%s5836_s14 + $0xe0] sm:$0xff] %v1113_v32 }
  0x8e   :  { %2447 = vmatmul.bf16.vlgmr.msrb.gmra.mxu3 %v3617_v36  ;;  %v2461_v40 = vpack.c.bf16 %v2081_v31, %v2080_v35  ;;  %v2078_v36 = vld [vmem:[%s5826_s4 + $0x40] sm:$0xff]  ;;  %v2546_v35 = vpack.c.bf16 %v1115_v33, %v1113_v32  ;;  %v1145_v31 = vadd.f32 %v889_v34, %v377_v26  ;;  %v667_v32 = vld [vmem:[#allocation2 + $0x2f0] sm:$0xff] }
  0x8f   :  { %v2460_v5 = vpack.c.bf16 %v2079_v45, %v2078_v36  ;;  %v343_v36 = vmul.f32 0.999, %v87_v41  ;;  %v2090_v41 = vld [vmem:[%s5826_s4 + $0xa0] sm:$0xff] }
  0x90   :  { %2476 = vmatpush.bf16.msra.mxu0 %v2462_v44  ;;  %v599_v44 = vld [vmem:[#allocation2 + $0xd0] sm:$0xff]  ;;  %2665 = vmatpush.bf16.msra.mxu2 %v2546_v35 }
  0x91   :  { %2489 = vmatpush.bf16.msra.mxu1 %v2470_v16  ;;  %v855_v47 = vmul.f32 0.001, %v599_v44 }
  0x94   :  { %2477 = vmatpush.bf16.msra.mxu0 %v2461_v40  ;;  %v1147_v40 = vadd.f32 %v891_v37, %v379_v27  ;;  %v117_v45 = vld [vmem:[%s5828_s6 + $0x1c0] sm:$0xff] }
  0x95   :  { %2490 = vmatpush.bf16.msra.mxu1 %v2469_v57  ;;  %v665_v27 = vld [vmem:[#allocation2 + $0x2e0] sm:$0xff]  ;;  %v923_v57 = vmul.f32 0.001, %v667_v32 }
  0x98   :  { %2478 = vmatpush.bf16.msra.mxu0 %v2460_v5  ;;  %v119_v5 = vld [vmem:[%s5828_s6 + $0x1d0] sm:$0xff] }
  0x99   :  { %1541 = vst [vmem:[%s5836_s14 + $0xf0] sm:$0xff] %v1115_v33  ;;  %v375_v53 = vmul.f32 0.999, %v119_v5  ;;  %v921_v33 = vmul.f32 0.001, %v665_v27  ;;  %v585_v27 = vld [vmem:[#allocation2 + $0x60] sm:$0xff] }
  0x9a   :  { %1571 = vst [vmem:[%s5836_s14 + $0x1e0] sm:$0xff] %v1145_v31  ;;  %v841_v32 = vmul.f32 0.001, %v585_v27 }
  0x9b   :  { %1573 = vst [vmem:[%s5836_s14 + $0x1f0] sm:$0xff] %v1147_v40  ;;  %v1143_v3 = vadd.f32 %v887_v59, %v375_v53  ;;  %v623_v53 = vld [vmem:[#allocation2 + $0x190] sm:$0xff] }
  0x9c   :  { %2479 = vmatpush.bf16.msra.mxu0 %v2459_v7  ;;  %v853_v7 = vmul.f32 0.001, %v597_v43 }
  0x9e   :  { %v1109_v54 = vadd.f32 %v853_v7, %v341_v42  ;;  %v2091_v42 = vld [vmem:[%s5826_s4 + $0xa8] sm:$0xff] }
  0x9f   :  { %v2466_v35 = vpack.c.bf16 %v2091_v42, %v2090_v41  ;;  %v619_v41 = vld [vmem:[#allocation2 + $0x170] sm:$0xff] }
  0xa0   :  { %2480 = vmatpush.bf16.msra.mxu0 %v2458_v49  ;;  %v2562_v49 = vpack.c.bf16 %v1147_v40, %v1145_v31 }
  0xa2   :  { %2678 = vmatpush.bf16.msra.mxu3 %v2562_v49  ;;  %v621_v49 = vld [vmem:[#allocation2 + $0x180] sm:$0xff] }
  0xa4   :  { %2481 = vmatpush.bf16.msra.mxu0 %v2457_v56  ;;  %v1111_v56 = vadd.f32 %v855_v47, %v343_v36  ;;  %v589_v36 = vld [vmem:[#allocation2 + $0x80] sm:$0xff] }
  0xa6   :  { %v2544_v1 = vpack.c.bf16 %v1111_v56, %v1109_v54 }
  0xa8   :  { %v2266_v51 = vpop.f32.mrf.mxu1  ;;  %2482 = vmatpush.bf16.msra.mxu0 %v2456_v62  ;;  %v81_v62 = vld [vmem:[%s5828_s6 + $0xa0] sm:$0xff]  ;;  %2666 = vmatpush.bf16.msra.mxu2 %v2544_v1  ;;  %v877_v1 = vmul.f32 0.001, %v621_v49  ;;  %v659_v49 = vld [vmem:[#allocation2 + $0x2b0] sm:$0xff] }
  0xb0   :  { %v3687_v61 = vpop.f32.mrf.mxu3  ;;  %v2268_v0 = vpop.f32.mrf.mxu1 }
  0xb1   :  { %v593_v0 = vld [vmem:[#allocation2 + $0xa0] sm:$0xff] }
  0xb2   :  { %v849_v13 = vmul.f32 0.001, %v593_v0 }
  0xb3   :  { %v2253_v50 = vpop.f32.mrf.mxu0 }
  0xb4   :  { %v2254_v4 = vadd.f32 %v2253_v50, %v2240_v58  ;;  %v2468_v50 = vpack.c.bf16 %v2095_v38, %v2094_v29  ;;  %v885_v58 = vmul.f32 0.001, %v629_v6 }
  0xb6   :  { %v2279_v52 = vpop.f32.mrf.mxu2  ;;  %v2267_v25 = vadd.f32 %v2266_v51, %v2254_v4  ;;  %v373_v51 = vmul.f32 0.999, %v117_v45  ;;  %v337_v4 = vmul.f32 0.999, %v81_v62  ;;  %2491 = vmatpush.bf16.msra.mxu1 %v2468_v50  ;;  %v591_v45 = vld [vmem:[#allocation2 + $0x90] sm:$0xff] }
  0xb7   :  { %v845_v50 = vmul.f32 0.001, %v589_v36 }
  0xb8   :  { %v2294_v30 = vpop.f32.mrf.mxu3  ;;  %v2280_v46 = vadd.f32 %v2279_v52, %v2267_v25  ;;  %v2092_v52 = vld [vmem:[%s5826_s4 + $0xb0] sm:$0xff]  ;;  %v1141_v2 = vadd.f32 %v885_v58, %v373_v51  ;;  %v847_v51 = vmul.f32 0.001, %v591_v45  ;;  %v657_v45 = vld [vmem:[#allocation2 + $0x2a0] sm:$0xff] }
  0xb9   :  { %v2467_v16 = vpack.c.bf16 %v2093_v60, %v2092_v52 }
  0xba   :  { %v2293_v11 = vadd.f32 %v3687_v61, %v2280_v46  ;;  %v2560_v15 = vpack.c.bf16 %v1143_v3, %v1141_v2  ;;  %v1105_v61 = vadd.f32 %v849_v13, %v337_v4  ;;  %v663_v4 = vld [vmem:[#allocation2 + $0x2d0] sm:$0xff] }
  0xbb   :  { %v2255_v63 = vpop.f32.mrf.mxu0  ;;  %2492 = vmatpush.bf16.msra.mxu1 %v2467_v16  ;;  %v2088_v16 = vld [vmem:[%s5826_s4 + $0x90] sm:$0xff] }
  0xbc   :  { %v83_v63 = vld [vmem:[%s5828_s6 + $0xb0] sm:$0xff]  ;;  %2679 = vmatpush.bf16.msra.mxu3 %v2560_v15 }
  0xbd   :  { %1535 = vst [vmem:[%s5836_s14 + $0xc0] sm:$0xff] %v1109_v54  ;;  %v339_v12 = vmul.f32 0.999, %v83_v63 }
  0xbe   :  { %v2281_v8 = vpop.f32.mrf.mxu2 }
  0xbf   :  { %v595_v8 = vld [vmem:[#allocation2 + $0xb0] sm:$0xff]  ;;  %2493 = vmatpush.bf16.msra.mxu1 %v2466_v35 }
  0xc0   :  { %v851_v17 = vmul.f32 0.001, %v595_v8  ;;  %v879_v8 = vmul.f32 0.001, %v623_v53 }
  0xc2   :  { %v1107_v23 = vadd.f32 %v851_v17, %v339_v12  ;;  %v2089_v17 = vld [vmem:[%s5826_s4 + $0x98] sm:$0xff] }
  0xc4   :  { %v113_v9 = vld [vmem:[%s5828_s6 + $0x1a0] sm:$0xff]  ;;  %v115_v10 = vld [vmem:[%s5828_s6 + $0x1b0] sm:$0xff]  ;;  %v2542_v38 = vpack.c.bf16 %v1107_v23, %v1105_v61 }
  0xc5   :  { %1537 = vst [vmem:[%s5836_s14 + $0xd0] sm:$0xff] %v1111_v56  ;;  %v369_v18 = vmul.f32 0.999, %v113_v9  ;;  %v371_v20 = vmul.f32 0.999, %v115_v10 }
  0xc6   :  { %1567 = vst [vmem:[%s5836_s14 + $0x1c0] sm:$0xff] %v1141_v2  ;;  %2667 = vmatpush.bf16.msra.mxu2 %v2542_v38 }
  0xc7   :  { %1569 = vst [vmem:[%s5836_s14 + $0x1d0] sm:$0xff] %v1143_v3  ;;  %v1137_v29 = vadd.f32 %v881_v21, %v369_v18  ;;  %v1139_v39 = vadd.f32 %v883_v24, %v371_v20  ;;  %v661_v3 = vld [vmem:[#allocation2 + $0x2c0] sm:$0xff]  ;;  %v919_v20 = vmul.f32 0.001, %v663_v4  ;;  %v2465_v21 = vpack.c.bf16 %v2089_v17, %v2088_v16  ;;  %v699_v17 = vld [vmem:[#allocation2 + $0x3f0] sm:$0xff] }
  0xc8   :  { %v917_v15 = vmul.f32 0.001, %v661_v3  ;;  %v697_v16 = vld [vmem:[#allocation2 + $0x3e0] sm:$0xff] }
  0xc9   :  { %v2318_v37 = vpop.f32.mrf.mxu1  ;;  %v2558_v6 = vpack.c.bf16 %v1139_v39, %v1137_v29  ;;  %2494 = vmatpush.bf16.msra.mxu1 %v2465_v21 }
  0xcb   :  { %v2305_v28 = vpop.f32.mrf.mxu0  ;;  %2680 = vmatpush.bf16.msra.mxu3 %v2558_v6 }
  0xcc   :  { %v2306_v34 = vadd.f32 %v2305_v28, %v2293_v11  ;;  %v587_v28 = vld [vmem:[#allocation2 + $0x70] sm:$0xff] }
  0xce   :  { %v153_v22 = vld [vmem:[%s5828_s6 + $0x2e0] sm:$0xff]  ;;  %v155_v25 = vld [vmem:[%s5828_s6 + $0x2f0] sm:$0xff]  ;;  %v2319_v5 = vadd.f32 %v2318_v37, %v2306_v34 }
  0xcf   :  { %v409_v26 = vmul.f32 0.999, %v153_v22  ;;  %1531 = vst [vmem:[%s5836_s14 + $0xa0] sm:$0xff] %v1105_v61  ;;  %v411_v30 = vmul.f32 0.999, %v155_v25 }
  0xd0   :  { %1533 = vst [vmem:[%s5836_s14 + $0xb0] sm:$0xff] %v1107_v23  ;;  %v2331_v52 = vpop.f32.mrf.mxu2 }
  0xd1   :  { %v1177_v44 = vadd.f32 %v921_v33, %v409_v26  ;;  %v1179_v46 = vadd.f32 %v923_v57, %v411_v30  ;;  %v2332_v60 = vadd.f32 %v2331_v52, %v2319_v5  ;;  %v2320_v19 = vpop.f32.mrf.mxu1  ;;  %v843_v33 = vmul.f32 0.001, %v587_v28  ;;  %v617_v57 = vld [vmem:[#allocation2 + $0x160] sm:$0xff]  ;;  %v615_v28 = vld [vmem:[#allocation2 + $0x150] sm:$0xff] }
  0xd2   :  { %v873_v6 = vmul.f32 0.001, %v617_v57  ;;  %v915_v52 = vmul.f32 0.001, %v659_v49  ;;  %v653_v57 = vld [vmem:[#allocation2 + $0x280] sm:$0xff] }
  0xd3   :  { %v2578_v54 = vpack.c.bf16 %v1179_v46, %v1177_v44  ;;  %v2344_v62 = vpop.f32.mrf.mxu3  ;;  %v2307_v12 = vpop.f32.mrf.mxu0 }
  0xd4   :  { %v2345_v11 = vadd.f32 %v2344_v62, %v2332_v60 }
  0xd5   :  { %2691 = vmatpush.bf16.msrb.mxu0 %v2578_v54  ;;  %v2086_v54 = vld [vmem:[%s5826_s4 + $0x80] sm:$0xff] }
  0xd6   :  { %v2452_v24 = vmax.f32 %v2345_v11, 0.0 }
  0xd7   :  { %v77_v43 = vld [vmem:[%s5828_s6 + $0x80] sm:$0xff] }
  0xd8   :  { %1563 = vst [vmem:[%s5836_s14 + $0x1a0] sm:$0xff] %v1137_v29  ;;  %v333_v40 = vmul.f32 0.999, %v77_v43  ;;  %v2454_v37 = vpack.c.bf16 %v2452_v24, %v2452_v24  ;;  %v2333_v42 = vpop.f32.mrf.mxu2  ;;  %v613_v24 = vld [vmem:[#allocation2 + $0x140] sm:$0xff] }
  0xda   :  { %v1101_v63 = vadd.f32 %v845_v50, %v333_v40  ;;  %2483 = vmatmul.bf16.vlgmr.msra.gmra.mxu0 %v2454_v37  ;;  %v913_v50 = vmul.f32 0.001, %v657_v45  ;;  %v577_v45 = vld [vmem:[#allocation2 + $0x20] sm:$0xff] }
  0xdb   :  { %v2346_v5 = vpop.f32.mrf.mxu3 }
  0xdf   :  { %v79_v31 = vld [vmem:[%s5828_s6 + $0x90] sm:$0xff] }
  0xe0   :  { %1565 = vst [vmem:[%s5836_s14 + $0x1b0] sm:$0xff] %v1139_v39  ;;  %v335_v7 = vmul.f32 0.999, %v79_v31 }
  0xe2   :  { %v1103_v0 = vadd.f32 %v847_v51, %v335_v7 }
  0xe4   :  { %v2540_v13 = vpack.c.bf16 %v1103_v0, %v1101_v63 }
  0xe6   :  { %2668 = vmatpush.bf16.msra.mxu2 %v2540_v13 }
  0xe7   :  { %v109_v47 = vld [vmem:[%s5828_s6 + $0x180] sm:$0xff]  ;;  %v111_v48 = vld [vmem:[%s5828_s6 + $0x190] sm:$0xff] }
  0xe8   :  { %1603 = vst [vmem:[%s5836_s14 + $0x2e0] sm:$0xff] %v1177_v44  ;;  %v365_v56 = vmul.f32 0.999, %v109_v47  ;;  %v367_v58 = vmul.f32 0.999, %v111_v48 }
  0xe9   :  { %1605 = vst [vmem:[%s5836_s14 + $0x2f0] sm:$0xff] %v1179_v46  ;;  %v875_v46 = vmul.f32 0.001, %v619_v41  ;;  %v655_v41 = vld [vmem:[#allocation2 + $0x290] sm:$0xff] }
  0xea   :  { %v1133_v14 = vadd.f32 %v877_v1, %v365_v56  ;;  %v1135_v61 = vadd.f32 %v879_v8, %v367_v58  ;;  %v2087_v56 = vld [vmem:[%s5826_s4 + $0x88] sm:$0xff]  ;;  %v583_v1 = vld [vmem:[#allocation2 + $0x50] sm:$0xff] }
  0xeb   :  { %v2464_v60 = vpack.c.bf16 %v2087_v56, %v2086_v54 }
  0xec   :  { %v2556_v29 = vpack.c.bf16 %v1135_v61, %v1133_v14 }
  0xed   :  { %2495 = vmatpush.bf16.msra.mxu1 %v2464_v60 }
  0xee   :  { %2681 = vmatpush.bf16.msra.mxu3 %v2556_v29  ;;  %v869_v29 = vmul.f32 0.001, %v613_v24 }
  0xf0   :  { %v149_v59 = vld [vmem:[%s5828_s6 + $0x2c0] sm:$0xff]  ;;  %v151_v2 = vld [vmem:[%s5828_s6 + $0x2d0] sm:$0xff] }
  0xf1   :  { %v405_v9 = vmul.f32 0.999, %v149_v59  ;;  %v407_v10 = vmul.f32 0.999, %v151_v2  ;;  %1527 = vst [vmem:[%s5836_s14 + $0x80] sm:$0xff] %v1101_v63  ;;  %v3985_v24 = vpop.f32.mrf.mxu3 }
  0xf3   :  { %v1173_v25 = vadd.f32 %v917_v15, %v405_v9  ;;  %v1175_v30 = vadd.f32 %v919_v20, %v407_v10  ;;  %v839_v10 = vmul.f32 0.001, %v583_v1  ;;  %v955_v20 = vmul.f32 0.001, %v699_v17 }
  0xf5   :  { %v2576_v43 = vpack.c.bf16 %v1175_v30, %v1173_v25 }
  0xf7   :  { %2692 = vmatpush.bf16.msrb.mxu0 %v2576_v43 }
  0xf8   :  { %v73_v18 = vld [vmem:[%s5828_s6 + $0x60] sm:$0xff] }
  0xf9   :  { %1529 = vst [vmem:[%s5836_s14 + $0x90] sm:$0xff] %v1103_v0  ;;  %v329_v23 = vmul.f32 0.999, %v73_v18  ;;  %v581_v0 = vld [vmem:[#allocation2 + $0x40] sm:$0xff] }
  0xfa   :  { %v837_v8 = vmul.f32 0.001, %v581_v0 }
  0xfb   :  { %v1097_v44 = vadd.f32 %v841_v32, %v329_v23 }
 0x100   :  { %v75_v22 = vld [vmem:[%s5828_s6 + $0x70] sm:$0xff] }
 0x101   :  { %1559 = vst [vmem:[%s5836_s14 + $0x180] sm:$0xff] %v1133_v14  ;;  %v331_v26 = vmul.f32 0.999, %v75_v22 }
 0x102   :  { %1561 = vst [vmem:[%s5836_s14 + $0x190] sm:$0xff] %v1135_v61  ;;  %v953_v61 = vmul.f32 0.001, %v697_v16 }
 0x103   :  { %v1099_v35 = vadd.f32 %v843_v33, %v331_v26  ;;  %v871_v33 = vmul.f32 0.001, %v615_v28 }
 0x105   :  { %v2538_v47 = vpack.c.bf16 %v1099_v35, %v1097_v44 }
 0x107   :  { %2669 = vmatpush.bf16.msra.mxu2 %v2538_v47  ;;  %v833_v47 = vmul.f32 0.001, %v577_v45 }
 0x109   :  { %v105_v34 = vld [vmem:[%s5828_s6 + $0x160] sm:$0xff] }
 0x10a   :  { %1599 = vst [vmem:[%s5836_s14 + $0x2c0] sm:$0xff] %v1173_v25  ;;  %v361_v39 = vmul.f32 0.999, %v105_v34 }
 0x10c   :  { %v1129_v51 = vadd.f32 %v873_v6, %v361_v39 }
 0x111   :  { %v107_v38 = vld [vmem:[%s5828_s6 + $0x170] sm:$0xff] }
 0x112   :  { %1601 = vst [vmem:[%s5836_s14 + $0x2d0] sm:$0xff] %v1175_v30  ;;  %v363_v31 = vmul.f32 0.999, %v107_v38 }
 0x114   :  { %v1131_v53 = vadd.f32 %v875_v46, %v363_v31 }
 0x116   :  { %v2554_v2 = vpack.c.bf16 %v1131_v53, %v1129_v51 }
 0x118   :  { %2682 = vmatpush.bf16.msra.mxu3 %v2554_v2 }
 0x119   :  { %v145_v40 = vld [vmem:[%s5828_s6 + $0x2a0] sm:$0xff]  ;;  %v147_v36 = vld [vmem:[%s5828_s6 + $0x2b0] sm:$0xff] }
 0x11a   :  { %v401_v7 = vmul.f32 0.999, %v145_v40  ;;  %1523 = vst [vmem:[%s5836_s14 + $0x60] sm:$0xff] %v1097_v44  ;;  %v403_v48 = vmul.f32 0.999, %v147_v36 }
 0x11b   :  { %1525 = vst [vmem:[%s5836_s14 + $0x70] sm:$0xff] %v1099_v35  ;;  %v909_v44 = vmul.f32 0.001, %v653_v57  ;;  %v911_v35 = vmul.f32 0.001, %v655_v41 }
 0x11c   :  { %v1169_v59 = vadd.f32 %v913_v50, %v401_v7  ;;  %v1171_v3 = vadd.f32 %v915_v52, %v403_v48  ;;  %v579_v7 = vld [vmem:[#allocation2 + $0x30] sm:$0xff]  ;;  %v3948_v52 = vpop.f32.mrf.mxu0 }
 0x11d   :  { %v835_v50 = vmul.f32 0.001, %v579_v7 }
 0x11e   :  { %v2574_v13 = vpack.c.bf16 %v1171_v3, %v1169_v59 }
 0x120   :  { %2693 = vmatpush.bf16.msrb.mxu0 %v2574_v13  ;;  %v611_v13 = vld [vmem:[#allocation2 + $0x130] sm:$0xff] }
 0x121   :  { %v867_v17 = vmul.f32 0.001, %v611_v13 }
 0x122   :  { %v69_v58 = vld [vmem:[%s5828_s6 + $0x40] sm:$0xff]  ;;  %v71_v62 = vld [vmem:[%s5828_s6 + $0x50] sm:$0xff] }
 0x123   :  { %v325_v63 = vmul.f32 0.999, %v69_v58  ;;  %1555 = vst [vmem:[%s5836_s14 + $0x160] sm:$0xff] %v1129_v51  ;;  %v327_v4 = vmul.f32 0.999, %v71_v62  ;;  %v693_v58 = vld [vmem:[#allocation2 + $0x3c0] sm:$0xff]  ;;  %v3956_v62 = vpop.f32.mrf.mxu1 }
 0x124   :  { %v949_v0 = vmul.f32 0.001, %v693_v58 }
 0x125   :  { %v1093_v14 = vadd.f32 %v837_v8, %v325_v63  ;;  %v1095_v19 = vadd.f32 %v839_v10, %v327_v4  ;;  %v609_v8 = vld [vmem:[#allocation2 + $0x120] sm:$0xff] }
 0x126   :  { %v865_v16 = vmul.f32 0.001, %v609_v8 }
 0x127   :  { %v2536_v25 = vpack.c.bf16 %v1095_v19, %v1093_v14 }
 0x129   :  { %2670 = vmatpush.bf16.msra.mxu2 %v2536_v25 }
 0x12a   :  { %v185_v9 = vld [vmem:[%s5828_s6 + $0x3e0] sm:$0xff] }
 0x12b   :  { %1557 = vst [vmem:[%s5836_s14 + $0x170] sm:$0xff] %v1131_v53  ;;  %v441_v12 = vmul.f32 0.999, %v185_v9  ;;  %v2241_v9 = vperm.slane %v3678_v55, 1 }
 0x12d   :  { %v1209_v26 = vadd.f32 %v953_v61, %v441_v12 }
 0x132   :  { %v187_v11 = vld [vmem:[%s5828_s6 + $0x3f0] sm:$0xff] }
 0x133   :  { %1595 = vst [vmem:[%s5836_s14 + $0x2a0] sm:$0xff] %v1169_v59  ;;  %v443_v15 = vmul.f32 0.999, %v187_v11  ;;  %v695_v59 = vld [vmem:[#allocation2 + $0x3d0] sm:$0xff] }
 0x134   :  { %v951_v1 = vmul.f32 0.001, %v695_v59 }
 0x135   :  { %v1211_v27 = vadd.f32 %v955_v20, %v443_v15 }
 0x137   :  { %v2594_v38 = vpack.c.bf16 %v1211_v27, %v1209_v26 }
 0x139   :  { %2704 = vmatpush.bf16.msrb.mxu1 %v2594_v38 }
 0x13a   :  { %v101_v18 = vld [vmem:[%s5828_s6 + $0x140] sm:$0xff] }
 0x13b   :  { %1597 = vst [vmem:[%s5836_s14 + $0x2b0] sm:$0xff] %v1171_v3  ;;  %v357_v22 = vmul.f32 0.999, %v101_v18 }
 0x13d   :  { %v1125_v39 = vadd.f32 %v869_v29, %v357_v22  ;;  %v651_v22 = vld [vmem:[#allocation2 + $0x270] sm:$0xff]  ;;  %v573_v29 = vld [vmem:[#allocation2] sm:$0xff] }
 0x13e   :  { %v829_v57 = vmul.f32 0.001, %v573_v29 }
 0x142   :  { %v103_v21 = vld [vmem:[%s5828_s6 + $0x150] sm:$0xff] }
 0x143   :  { %1519 = vst [vmem:[%s5836_s14 + $0x40] sm:$0xff] %v1093_v14  ;;  %v359_v23 = vmul.f32 0.999, %v103_v21  ;;  %v649_v21 = vld [vmem:[#allocation2 + $0x260] sm:$0xff] }
 0x144   :  { %1521 = vst [vmem:[%s5836_s14 + $0x50] sm:$0xff] %v1095_v19  ;;  %v3977_v19 = vpop.f32.mrf.mxu2 }
 0x145   :  { %v1127_v43 = vadd.f32 %v871_v33, %v359_v23 }
 0x147   :  { %v2552_v5 = vpack.c.bf16 %v1127_v43, %v1125_v39 }
 0x149   :  { %2683 = vmatpush.bf16.msra.mxu3 %v2552_v5 }
 0x14b   :  { %v141_v30 = vld [vmem:[%s5828_s6 + $0x280] sm:$0xff]  ;;  %v143_v32 = vld [vmem:[%s5828_s6 + $0x290] sm:$0xff] }
 0x14c   :  { %v397_v34 = vmul.f32 0.999, %v141_v30  ;;  %v399_v37 = vmul.f32 0.999, %v143_v32  ;;  %1635 = vst [vmem:[%s5836_s14 + $0x3e0] sm:$0xff] %v1209_v26  ;;  %v575_v30 = vld [vmem:[#allocation2 + $0x10] sm:$0xff]  ;;  %v2385_v59 = vpop.f32.mrf.mxu2 }
 0x14d   :  { %v907_v32 = vmul.f32 0.001, %v651_v22  ;;  %v647_v22 = vld [vmem:[#allocation2 + $0x250] sm:$0xff] }
 0x14e   :  { %v1165_v6 = vadd.f32 %v909_v44, %v397_v34  ;;  %v1167_v46 = vadd.f32 %v911_v35, %v399_v37  ;;  %v2359_v37 = vpop.f32.mrf.mxu0  ;;  %v2372_v44 = vpop.f32.mrf.mxu1 }
 0x150   :  { %v2572_v54 = vpack.c.bf16 %v1167_v46, %v1165_v6 }
 0x152   :  { %2694 = vmatpush.bf16.msrb.mxu0 %v2572_v54  ;;  %v729_v54 = vld [vmem:[#allocation2 + $0x4e0] sm:$0xff] }
 0x153   :  { %v65_v42 = vld [vmem:[%s5828_s6 + $0x20] sm:$0xff] }
 0x154   :  { %1637 = vst [vmem:[%s5836_s14 + $0x3f0] sm:$0xff] %v1211_v27  ;;  %v321_v40 = vmul.f32 0.999, %v65_v42  ;;  %v905_v27 = vmul.f32 0.001, %v649_v21  ;;  %v645_v21 = vld [vmem:[#allocation2 + $0x240] sm:$0xff] }
 0x156   :  { %v1089_v56 = vadd.f32 %v833_v47, %v321_v40 }
 0x15b   :  { %v67_v31 = vld [vmem:[%s5828_s6 + $0x30] sm:$0xff] }
 0x15c   :  { %1551 = vst [vmem:[%s5836_s14 + $0x140] sm:$0xff] %v1125_v39  ;;  %v323_v36 = vmul.f32 0.999, %v67_v31  ;;  %v831_v31 = vmul.f32 0.001, %v575_v30 }
 0x15d   :  { %1553 = vst [vmem:[%s5836_s14 + $0x150] sm:$0xff] %v1127_v43  ;;  %v689_v43 = vld [vmem:[#allocation2 + $0x3a0] sm:$0xff] }
 0x15e   :  { %v1091_v63 = vadd.f32 %v835_v50, %v323_v36  ;;  %v691_v36 = vld [vmem:[#allocation2 + $0x3b0] sm:$0xff] }
 0x160   :  { %v2534_v10 = vpack.c.bf16 %v1091_v63, %v1089_v56 }
 0x162   :  { %2671 = vmatpush.bf16.msra.mxu2 %v2534_v10 }
 0x164   :  { %v181_v48 = vld [vmem:[%s5828_s6 + $0x3c0] sm:$0xff]  ;;  %v183_v49 = vld [vmem:[%s5828_s6 + $0x3d0] sm:$0xff] }
 0x165   :  { %v437_v51 = vmul.f32 0.999, %v181_v48  ;;  %v439_v53 = vmul.f32 0.999, %v183_v49  ;;  %1591 = vst [vmem:[%s5836_s14 + $0x280] sm:$0xff] %v1165_v6 }
 0x166   :  { %v945_v6 = vmul.f32 0.001, %v689_v43  ;;  %v947_v48 = vmul.f32 0.001, %v691_v36  ;;  %v687_v36 = vld [vmem:[#allocation2 + $0x390] sm:$0xff] }
 0x167   :  { %v1205_v11 = vadd.f32 %v949_v0, %v437_v51  ;;  %v1207_v12 = vadd.f32 %v951_v1, %v439_v53  ;;  %v985_v0 = vmul.f32 0.001, %v729_v54  ;;  %v727_v54 = vld [vmem:[#allocation2 + $0x4d0] sm:$0xff] }
 0x169   :  { %v2592_v61 = vpack.c.bf16 %v1207_v12, %v1205_v11 }
 0x16b   :  { %2705 = vmatpush.bf16.msrb.mxu1 %v2592_v61 }
 0x16c   :  { %v97_v60 = vld [vmem:[%s5828_s6 + $0x120] sm:$0xff] }
 0x16d   :  { %1593 = vst [vmem:[%s5836_s14 + $0x290] sm:$0xff] %v1167_v46  ;;  %v353_v3 = vmul.f32 0.999, %v97_v60 }
 0x16f   :  { %v1121_v25 = vadd.f32 %v865_v16, %v353_v3  ;;  %v2358_v3 = vadd.f32 %v3948_v52, %v2241_v9 }
 0x171   :  { %v2371_v29 = vadd.f32 %v3956_v62, %v2358_v3 }
 0x174   :  { %v99_v2 = vld [vmem:[%s5828_s6 + $0x130] sm:$0xff] }
 0x175   :  { %1515 = vst [vmem:[%s5836_s14 + $0x20] sm:$0xff] %v1089_v56  ;;  %v355_v4 = vmul.f32 0.999, %v99_v2  ;;  %v731_v56 = vld [vmem:[#allocation2 + $0x4f0] sm:$0xff] }
 0x176   :  { %1517 = vst [vmem:[%s5836_s14 + $0x30] sm:$0xff] %v1091_v63  ;;  %v987_v1 = vmul.f32 0.001, %v731_v56 }
 0x177   :  { %v1123_v26 = vadd.f32 %v867_v17, %v355_v4  ;;  %v2398_v4 = vpop.f32.mrf.mxu3 }
 0x178   :  { %v641_v4 = vld [vmem:[#allocation2 + $0x220] sm:$0xff] }
 0x179   :  { %v2550_v38 = vpack.c.bf16 %v1123_v26, %v1121_v25 }
 0x17b   :  { %2684 = vmatpush.bf16.msra.mxu3 %v2550_v38 }
 0x17d   :  { %v137_v14 = vld [vmem:[%s5828_s6 + $0x260] sm:$0xff]  ;;  %v139_v15 = vld [vmem:[%s5828_s6 + $0x270] sm:$0xff] }
 0x17e   :  { %v393_v18 = vmul.f32 0.999, %v137_v14  ;;  %1631 = vst [vmem:[%s5836_s14 + $0x3c0] sm:$0xff] %v1205_v11  ;;  %v395_v20 = vmul.f32 0.999, %v139_v15  ;;  %v605_v11 = vld [vmem:[#allocation2 + $0x100] sm:$0xff] }
 0x17f   :  { %v607_v15 = vld [vmem:[#allocation2 + $0x110] sm:$0xff]  ;;  %v861_v55 = vmul.f32 0.001, %v605_v11 }
 0x180   :  { %v1161_v39 = vadd.f32 %v905_v27, %v393_v18  ;;  %v1163_v35 = vadd.f32 %v907_v32, %v395_v20  ;;  %v863_v16 = vmul.f32 0.001, %v607_v15  ;;  %v903_v27 = vmul.f32 0.001, %v647_v22 }
 0x182   :  { %v2570_v7 = vpack.c.bf16 %v1163_v35, %v1161_v39 }
 0x184   :  { %2695 = vmatpush.bf16.msrb.mxu0 %v2570_v7  ;;  %v943_v7 = vmul.f32 0.001, %v687_v36 }
 0x185   :  { %v61_v23 = vld [vmem:[%s5828_s6] sm:$0xff] }
 0x186   :  { %1633 = vst [vmem:[%s5836_s14 + $0x3d0] sm:$0xff] %v1207_v12  ;;  %v317_v33 = vmul.f32 0.999, %v61_v23 }
 0x188   :  { %v1085_v45 = vadd.f32 %v829_v57, %v317_v33  ;;  %v761_v33 = vld [vmem:[#allocation2 + $0x5e0] sm:$0xff] }
 0x189   :  { %v1017_v57 = vmul.f32 0.001, %v761_v33 }
 0x18d   :  { %v63_v28 = vld [vmem:[%s5828_s6 + $0x10] sm:$0xff] }
 0x18e   :  { %v319_v34 = vmul.f32 0.999, %v63_v28  ;;  %1547 = vst [vmem:[%s5836_s14 + $0x120] sm:$0xff] %v1121_v25 }
 0x190   :  { %v1087_v47 = vadd.f32 %v831_v31, %v319_v34 }
 0x192   :  { %v2532_v60 = vpack.c.bf16 %v1087_v47, %v1085_v45 }
 0x194   :  { %2672 = vmatpush.bf16.msra.mxu2 %v2532_v60  ;;  %v983_v60 = vmul.f32 0.001, %v727_v54 }
 0x195   :  { %v177_v41 = vld [vmem:[%s5828_s6 + $0x3a0] sm:$0xff]  ;;  %v179_v42 = vld [vmem:[%s5828_s6 + $0x3b0] sm:$0xff] }
 0x196   :  { %1549 = vst [vmem:[%s5836_s14 + $0x130] sm:$0xff] %v1123_v26  ;;  %v433_v40 = vmul.f32 0.999, %v177_v41  ;;  %v435_v5 = vmul.f32 0.999, %v179_v42 }
 0x197   :  { %1587 = vst [vmem:[%s5836_s14 + $0x260] sm:$0xff] %v1161_v39  ;;  %v901_v26 = vmul.f32 0.001, %v645_v21  ;;  %v763_v39 = vld [vmem:[#allocation2 + $0x5f0] sm:$0xff] }
 0x198   :  { %v1201_v51 = vadd.f32 %v945_v6, %v433_v40  ;;  %v1203_v63 = vadd.f32 %v947_v48, %v435_v5  ;;  %v1019_v42 = vmul.f32 0.001, %v763_v39  ;;  %v685_v40 = vld [vmem:[#allocation2 + $0x380] sm:$0xff]  ;;  %v2384_v5 = vadd.f32 %v3977_v19, %v2371_v29 }
 0x19a   :  { %v2590_v12 = vpack.c.bf16 %v1203_v63, %v1201_v51 }
 0x19c   :  { %2706 = vmatpush.bf16.msrb.mxu1 %v2590_v12  ;;  %v2409_v12 = vpop.f32.mrf.mxu0 }
 0x19e   :  { %v217_v46 = vld [vmem:[%s5828_s6 + $0x4e0] sm:$0xff] }
 0x19f   :  { %1589 = vst [vmem:[%s5836_s14 + $0x270] sm:$0xff] %v1163_v35  ;;  %v473_v50 = vmul.f32 0.999, %v217_v46  ;;  %v941_v46 = vmul.f32 0.001, %v685_v40 }
 0x1a1   :  { %v1241_v13 = vadd.f32 %v985_v0, %v473_v50  ;;  %v725_v50 = vld [vmem:[#allocation2 + $0x4c0] sm:$0xff] }
 0x1a2   :  { %v981_v56 = vmul.f32 0.001, %v725_v50 }
 0x1a6   :  { %v219_v49 = vld [vmem:[%s5828_s6 + $0x4f0] sm:$0xff] }
 0x1a7   :  { %1511 = vst [vmem:[%s5836_s14] sm:$0xff] %v1085_v45  ;;  %v475_v53 = vmul.f32 0.999, %v219_v49 }
 0x1a9   :  { %v1243_v14 = vadd.f32 %v987_v1, %v475_v53  ;;  %v2397_v1 = vadd.f32 %v3985_v24, %v2384_v5  ;;  %v897_v24 = vmul.f32 0.001, %v641_v4  ;;  %v2435_v5 = vpop.f32.mrf.mxu2 }
 0x1ab   :  { %v2610_v61 = vpack.c.bf16 %v1243_v14, %v1241_v13  ;;  %v2410_v15 = vadd.f32 %v2409_v12, %v2397_v1 }
 0x1ad   :  { %2717 = vmatpush.bf16.msrb.mxu2 %v2610_v61 }
 0x1ae   :  { %v93_v58 = vld [vmem:[%s5828_s6 + $0x100] sm:$0xff] }
 0x1af   :  { %1513 = vst [vmem:[%s5836_s14 + $0x10] sm:$0xff] %v1087_v47  ;;  %v349_v8 = vmul.f32 0.999, %v93_v58 }
 0x1b1   :  { %v1117_v20 = vadd.f32 %v861_v55, %v349_v8  ;;  %v643_v8 = vld [vmem:[#allocation2 + $0x230] sm:$0xff]  ;;  %v2422_v55 = vpop.f32.mrf.mxu1 }
 0x1b6   :  { %v95_v2 = vld [vmem:[%s5828_s6 + $0x110] sm:$0xff] }
 0x1b7   :  { %1627 = vst [vmem:[%s5836_s14 + $0x3a0] sm:$0xff] %v1201_v51  ;;  %v351_v10 = vmul.f32 0.999, %v95_v2 }
 0x1b8   :  { %1629 = vst [vmem:[%s5836_s14 + $0x3b0] sm:$0xff] %v1203_v63 }
 0x1b9   :  { %v1119_v25 = vadd.f32 %v863_v16, %v351_v10  ;;  %v757_v16 = vld [vmem:[#allocation2 + $0x5c0] sm:$0xff] }
 0x1ba   :  { %v1013_v21 = vmul.f32 0.001, %v757_v16  ;;  %v793_v16 = vld [vmem:[#allocation2 + $0x6e0] sm:$0xff] }
 0x1bb   :  { %v2548_v34 = vpack.c.bf16 %v1119_v25, %v1117_v20 }
 0x1bd   :  { %2685 = vmatpush.bf16.msra.mxu3 %v2548_v34 }
 0x1bf   :  { %v133_v52 = vld [vmem:[%s5828_s6 + $0x240] sm:$0xff]  ;;  %v135_v9 = vld [vmem:[%s5828_s6 + $0x250] sm:$0xff] }
 0x1c0   :  { %v389_v17 = vmul.f32 0.999, %v133_v52  ;;  %v391_v18 = vmul.f32 0.999, %v135_v9  ;;  %1667 = vst [vmem:[%s5836_s14 + $0x4e0] sm:$0xff] %v1241_v13 }
 0x1c1   :  { %v899_v13 = vmul.f32 0.001, %v643_v8 }
 0x1c2   :  { %v1157_v37 = vadd.f32 %v901_v26, %v389_v17  ;;  %v1159_v38 = vadd.f32 %v903_v27, %v391_v18 }
 0x1c4   :  { %v2568_v35 = vpack.c.bf16 %v1159_v38, %v1157_v37 }
 0x1c6   :  { %2696 = vmatpush.bf16.msrb.mxu0 %v2568_v35 }
 0x1c7   :  { %v249_v23 = vld [vmem:[%s5828_s6 + $0x5e0] sm:$0xff] }
 0x1c8   :  { %1669 = vst [vmem:[%s5836_s14 + $0x4f0] sm:$0xff] %v1243_v14  ;;  %v505_v30 = vmul.f32 0.999, %v249_v23 }
 0x1ca   :  { %v1273_v31 = vadd.f32 %v1017_v57, %v505_v30  ;;  %v681_v30 = vld [vmem:[#allocation2 + $0x360] sm:$0xff]  ;;  %v2423_v57 = vadd.f32 %v2422_v55, %v2410_v15 }
 0x1cf   :  { %v251_v28 = vld [vmem:[%s5828_s6 + $0x5f0] sm:$0xff] }
 0x1d0   :  { %1543 = vst [vmem:[%s5836_s14 + $0x100] sm:$0xff] %v1117_v20  ;;  %v507_v32 = vmul.f32 0.999, %v251_v28  ;;  %v759_v20 = vld [vmem:[#allocation2 + $0x5d0] sm:$0xff] }
 0x1d1   :  { %1545 = vst [vmem:[%s5836_s14 + $0x110] sm:$0xff] %v1119_v25  ;;  %v1015_v25 = vmul.f32 0.001, %v759_v20 }
 0x1d2   :  { %v1275_v6 = vadd.f32 %v1019_v42, %v507_v32  ;;  %v683_v32 = vld [vmem:[#allocation2 + $0x370] sm:$0xff]  ;;  %v721_v42 = vld [vmem:[#allocation2 + $0x4a0] sm:$0xff] }
 0x1d3   :  { %v977_v40 = vmul.f32 0.001, %v721_v42 }
 0x1d4   :  { %v2626_v19 = vpack.c.bf16 %v1275_v6, %v1273_v31 }
 0x1d6   :  { %2730 = vmatpush.bf16.msrb.mxu3 %v2626_v19 }
 0x1d8   :  { %v173_v62 = vld [vmem:[%s5828_s6 + $0x380] sm:$0xff]  ;;  %v175_v41 = vld [vmem:[%s5828_s6 + $0x390] sm:$0xff] }
 0x1d9   :  { %v429_v43 = vmul.f32 0.999, %v173_v62  ;;  %v431_v44 = vmul.f32 0.999, %v175_v41  ;;  %1583 = vst [vmem:[%s5836_s14 + $0x240] sm:$0xff] %v1157_v37 }
 0x1da   :  { %v937_v37 = vmul.f32 0.001, %v681_v30 }
 0x1db   :  { %v1197_v51 = vadd.f32 %v941_v46, %v429_v43  ;;  %v1199_v53 = vadd.f32 %v943_v7, %v431_v44 }
 0x1dd   :  { %v2588_v2 = vpack.c.bf16 %v1199_v53, %v1197_v51 }
 0x1df   :  { %2707 = vmatpush.bf16.msrb.mxu1 %v2588_v2 }
 0x1e0   :  { %v213_v45 = vld [vmem:[%s5828_s6 + $0x4c0] sm:$0xff] }
 0x1e1   :  { %1585 = vst [vmem:[%s5836_s14 + $0x250] sm:$0xff] %v1159_v38  ;;  %v469_v48 = vmul.f32 0.999, %v213_v45  ;;  %v939_v38 = vmul.f32 0.001, %v683_v32 }
 0x1e3   :  { %v1237_v3 = vadd.f32 %v981_v56, %v469_v48  ;;  %v2448_v48 = vpop.f32.mrf.mxu3  ;;  %v2424_v56 = vpop.f32.mrf.mxu1 }
 0x1e8   :  { %v215_v47 = vld [vmem:[%s5828_s6 + $0x4d0] sm:$0xff] }
 0x1e9   :  { %1699 = vst [vmem:[%s5836_s14 + $0x5e0] sm:$0xff] %v1273_v31  ;;  %v471_v49 = vmul.f32 0.999, %v215_v47  ;;  %v723_v31 = vld [vmem:[#allocation2 + $0x4b0] sm:$0xff]  ;;  %v2436_v47 = vadd.f32 %v2435_v5, %v2423_v57 }
 0x1ea   :  { %1701 = vst [vmem:[%s5836_s14 + $0x5f0] sm:$0xff] %v1275_v6  ;;  %v979_v6 = vmul.f32 0.001, %v723_v31  ;;  %v719_v31 = vld [vmem:[#allocation2 + $0x490] sm:$0xff] }
 0x1eb   :  { %v1239_v11 = vadd.f32 %v983_v60, %v471_v49  ;;  %v2411_v49 = vpop.f32.mrf.mxu0  ;;  %v2450_v30 = vpop.f32.mrf.mxu3  ;;  %v975_v5 = vmul.f32 0.001, %v719_v31 }
 0x1ed   :  { %v2608_v17 = vpack.c.bf16 %v1239_v11, %v1237_v3 }
 0x1ef   :  { %2718 = vmatpush.bf16.msrb.mxu2 %v2608_v17  ;;  %v795_v17 = vld [vmem:[#allocation2 + $0x6f0] sm:$0xff] }
 0x1f1   :  { %v129_v58 = vld [vmem:[%s5828_s6 + $0x220] sm:$0xff]  ;;  %v131_v59 = vld [vmem:[%s5828_s6 + $0x230] sm:$0xff] }
 0x1f2   :  { %v385_v63 = vmul.f32 0.999, %v129_v58  ;;  %v387_v0 = vmul.f32 0.999, %v131_v59  ;;  %1623 = vst [vmem:[%s5836_s14 + $0x380] sm:$0xff] %v1197_v51  ;;  %v637_v51 = vld [vmem:[#allocation2 + $0x200] sm:$0xff] }
 0x1f3   :  { %v893_v59 = vmul.f32 0.001, %v637_v51 }
 0x1f4   :  { %v1153_v18 = vadd.f32 %v897_v24, %v385_v63  ;;  %v1155_v61 = vadd.f32 %v899_v13, %v387_v0  ;;  %v2449_v0 = vadd.f32 %v2448_v48, %v2436_v47  ;;  %v749_v47 = vld [vmem:[#allocation2 + $0x580] sm:$0xff] }
 0x1f5   :  { %v1005_v51 = vmul.f32 0.001, %v749_v47 }
 0x1f6   :  { %v2566_v28 = vpack.c.bf16 %v1155_v61, %v1153_v18 }
 0x1f8   :  { %2697 = vmatpush.bf16.msrb.mxu0 %v2566_v28 }
 0x1f9   :  { %v245_v10 = vld [vmem:[%s5828_s6 + $0x5c0] sm:$0xff] }
 0x1fa   :  { %1625 = vst [vmem:[%s5836_s14 + $0x390] sm:$0xff] %v1199_v53  ;;  %v501_v52 = vmul.f32 0.999, %v245_v10  ;;  %v639_v53 = vld [vmem:[#allocation2 + $0x210] sm:$0xff] }
 0x1fb   :  { %v895_v60 = vmul.f32 0.001, %v639_v53 }
 0x1fc   :  { %v1269_v29 = vadd.f32 %v1013_v21, %v501_v52  ;;  %v1049_v21 = vmul.f32 0.001, %v793_v16 }
 0x201   :  { %v247_v14 = vld [vmem:[%s5828_s6 + $0x5d0] sm:$0xff] }
 0x202   :  { %1663 = vst [vmem:[%s5836_s14 + $0x4c0] sm:$0xff] %v1237_v3  ;;  %v503_v9 = vmul.f32 0.999, %v247_v14  ;;  %v753_v3 = vld [vmem:[#allocation2 + $0x5a0] sm:$0xff] }
 0x203   :  { %1665 = vst [vmem:[%s5836_s14 + $0x4d0] sm:$0xff] %v1239_v11  ;;  %v755_v11 = vld [vmem:[#allocation2 + $0x5b0] sm:$0xff]  ;;  %v1009_v12 = vmul.f32 0.001, %v753_v3 }
 0x204   :  { %v1271_v34 = vadd.f32 %v1015_v25, %v503_v9  ;;  %v1011_v14 = vmul.f32 0.001, %v755_v11  ;;  %v2437_v25 = vpop.f32.mrf.mxu2 }
 0x206   :  { %v2624_v43 = vpack.c.bf16 %v1271_v34, %v1269_v29 }
 0x208   :  { %2731 = vmatpush.bf16.msrb.mxu3 %v2624_v43 }
 0x20a   :  { %v169_v22 = vld [vmem:[%s5828_s6 + $0x360] sm:$0xff]  ;;  %v171_v23 = vld [vmem:[%s5828_s6 + $0x370] sm:$0xff] }
 0x20b   :  { %v425_v26 = vmul.f32 0.999, %v169_v22  ;;  %v427_v27 = vmul.f32 0.999, %v171_v23  ;;  %1579 = vst [vmem:[%s5836_s14 + $0x220] sm:$0xff] %v1153_v18  ;;  %v2453_v18 = vmax.f32 %v2449_v0, 0.0 }
 0x20c   :  { %v1051_v22 = vmul.f32 0.001, %v795_v17  ;;  %v789_v0 = vld [vmem:[#allocation2 + $0x6c0] sm:$0xff] }
 0x20d   :  { %v1193_v44 = vadd.f32 %v937_v37, %v425_v26  ;;  %v1195_v35 = vadd.f32 %v939_v38, %v427_v27  ;;  %v2455_v26 = vpack.c.bf16 %v2453_v18, %v2453_v18  ;;  %v679_v37 = vld [vmem:[#allocation2 + $0x350] sm:$0xff] }
 0x20f   :  { %v2586_v50 = vpack.c.bf16 %v1195_v35, %v1193_v44  ;;  %2496 = vmatmul.bf16.vlgmr.msra.gmra.mxu1 %v2455_v26 }
 0x211   :  { %2708 = vmatpush.bf16.msrb.mxu1 %v2586_v50 }
 0x212   :  { %v209_v33 = vld [vmem:[%s5828_s6 + $0x4a0] sm:$0xff] }
 0x213   :  { %1581 = vst [vmem:[%s5836_s14 + $0x230] sm:$0xff] %v1155_v61  ;;  %v465_v62 = vmul.f32 0.999, %v209_v33 }
 0x215   :  { %v1233_v19 = vadd.f32 %v977_v40, %v465_v62  ;;  %v935_v62 = vmul.f32 0.001, %v679_v37 }
 0x21a   :  { %v211_v39 = vld [vmem:[%s5828_s6 + $0x4b0] sm:$0xff] }
 0x21b   :  { %1695 = vst [vmem:[%s5836_s14 + $0x5c0] sm:$0xff] %v1269_v29  ;;  %v467_v41 = vmul.f32 0.999, %v211_v39  ;;  %v677_v29 = vld [vmem:[#allocation2 + $0x340] sm:$0xff] }
 0x21c   :  { %1697 = vst [vmem:[%s5836_s14 + $0x5d0] sm:$0xff] %v1271_v34  ;;  %v933_v38 = vmul.f32 0.001, %v677_v29 }
 0x21d   :  { %v1235_v58 = vadd.f32 %v979_v6, %v467_v41 }
 0x21f   :  { %v2606_v4 = vpack.c.bf16 %v1235_v58, %v1233_v19 }
 0x221   :  { %2719 = vmatpush.bf16.msrb.mxu2 %v2606_v4  ;;  %v1045_v4 = vmul.f32 0.001, %v789_v0 }
 0x223   :  { %v125_v36 = vld [vmem:[%s5828_s6 + $0x200] sm:$0xff]  ;;  %v127_v45 = vld [vmem:[%s5828_s6 + $0x210] sm:$0xff] }
 0x224   :  { %v381_v46 = vmul.f32 0.999, %v125_v36  ;;  %v383_v7 = vmul.f32 0.999, %v127_v45  ;;  %1619 = vst [vmem:[%s5836_s14 + $0x360] sm:$0xff] %v1193_v44 }
 0x226   :  { %v1149_v8 = vadd.f32 %v893_v59, %v381_v46  ;;  %v1151_v10 = vadd.f32 %v895_v60, %v383_v7 }
 0x228   :  { %v2564_v52 = vpack.c.bf16 %v1151_v10, %v1149_v8 }
 0x22a   :  { %2698 = vmatpush.bf16.msrb.mxu0 %v2564_v52 }
 0x22b   :  { %v241_v54 = vld [vmem:[%s5828_s6 + $0x5a0] sm:$0xff] }
 0x22c   :  { %1621 = vst [vmem:[%s5836_s14 + $0x370] sm:$0xff] %v1195_v35  ;;  %v497_v1 = vmul.f32 0.999, %v241_v54  ;;  %v717_v35 = vld [vmem:[#allocation2 + $0x480] sm:$0xff] }
 0x22d   :  { %v973_v45 = vmul.f32 0.001, %v717_v35 }
 0x22e   :  { %v1265_v9 = vadd.f32 %v1009_v12, %v497_v1  ;;  %v791_v1 = vld [vmem:[#allocation2 + $0x6d0] sm:$0xff] }
 0x233   :  { %v243_v63 = vld [vmem:[%s5828_s6 + $0x5b0] sm:$0xff] }
 0x234   :  { %1659 = vst [vmem:[%s5836_s14 + $0x4a0] sm:$0xff] %v1233_v19  ;;  %v499_v2 = vmul.f32 0.999, %v243_v63  ;;  %v751_v19 = vld [vmem:[#allocation2 + $0x590] sm:$0xff] }
 0x235   :  { %1661 = vst [vmem:[%s5836_s14 + $0x4b0] sm:$0xff] %v1235_v58  ;;  %v1007_v56 = vmul.f32 0.001, %v751_v19 }
 0x236   :  { %v1267_v20 = vadd.f32 %v1011_v14, %v499_v2 }
 0x238   :  { %v2622_v32 = vpack.c.bf16 %v1267_v20, %v1265_v9 }
 0x23a   :  { %2732 = vmatpush.bf16.msrb.mxu3 %v2622_v32 }
 0x23c   :  { %v281_v24 = vld [vmem:[%s5828_s6 + $0x6e0] sm:$0xff]  ;;  %v283_v13 = vld [vmem:[%s5828_s6 + $0x6f0] sm:$0xff] }
 0x23d   :  { %v537_v15 = vmul.f32 0.999, %v281_v24  ;;  %v539_v55 = vmul.f32 0.999, %v283_v13  ;;  %1575 = vst [vmem:[%s5836_s14 + $0x200] sm:$0xff] %v1149_v8  ;;  %v673_v24 = vld [vmem:[#allocation2 + $0x320] sm:$0xff] }
 0x23e   :  { %v1047_v8 = vmul.f32 0.001, %v791_v1  ;;  %v929_v52 = vmul.f32 0.001, %v673_v24 }
 0x23f   :  { %v1305_v33 = vadd.f32 %v1049_v21, %v537_v15  ;;  %v1307_v34 = vadd.f32 %v1051_v22, %v539_v55  ;;  %v675_v55 = vld [vmem:[#allocation2 + $0x330] sm:$0xff]  ;;  %v713_v22 = vld [vmem:[#allocation2 + $0x460] sm:$0xff] }
 0x240   :  { %v931_v17 = vmul.f32 0.001, %v675_v55 }
 0x241   :  { %v2642_v43 = vpack.c.bf16 %v1307_v34, %v1305_v33 }
 0x243   :  { %2743 = vmatpush.bf16.msra.mxu0 %v2642_v43 }
 0x244   :  { %v165_v61 = vld [vmem:[%s5828_s6 + $0x340] sm:$0xff] }
 0x245   :  { %1577 = vst [vmem:[%s5836_s14 + $0x210] sm:$0xff] %v1151_v10  ;;  %v421_v27 = vmul.f32 0.999, %v165_v61 }
 0x247   :  { %v1189_v44 = vadd.f32 %v933_v38, %v421_v27  ;;  %v969_v27 = vmul.f32 0.001, %v713_v22 }
 0x24c   :  { %v167_v23 = vld [vmem:[%s5828_s6 + $0x350] sm:$0xff] }
 0x24d   :  { %1691 = vst [vmem:[%s5836_s14 + $0x5a0] sm:$0xff] %v1265_v9  ;;  %v423_v28 = vmul.f32 0.999, %v167_v23  ;;  %v715_v23 = vld [vmem:[#allocation2 + $0x470] sm:$0xff] }
 0x24e   :  { %1693 = vst [vmem:[%s5836_s14 + $0x5b0] sm:$0xff] %v1267_v20 }
 0x24f   :  { %v1191_v36 = vadd.f32 %v935_v62, %v423_v28  ;;  %v971_v28 = vmul.f32 0.001, %v715_v23 }
 0x251   :  { %v2584_v48 = vpack.c.bf16 %v1191_v36, %v1189_v44 }
 0x253   :  { %2709 = vmatpush.bf16.msrb.mxu1 %v2584_v48 }
 0x255   :  { %v205_v39 = vld [vmem:[%s5828_s6 + $0x480] sm:$0xff]  ;;  %v207_v57 = vld [vmem:[%s5828_s6 + $0x490] sm:$0xff] }
 0x256   :  { %v461_v41 = vmul.f32 0.999, %v205_v39  ;;  %v463_v42 = vmul.f32 0.999, %v207_v57  ;;  %1731 = vst [vmem:[%s5836_s14 + $0x6e0] sm:$0xff] %v1305_v33  ;;  %v745_v33 = vld [vmem:[#allocation2 + $0x560] sm:$0xff] }
 0x257   :  { %v747_v39 = vld [vmem:[#allocation2 + $0x570] sm:$0xff]  ;;  %v1001_v57 = vmul.f32 0.001, %v745_v33 }
 0x258   :  { %v1229_v49 = vadd.f32 %v973_v45, %v461_v41  ;;  %v1231_v50 = vadd.f32 %v975_v5, %v463_v42  ;;  %v1003_v42 = vmul.f32 0.001, %v747_v39 }
 0x25a   :  { %v2604_v60 = vpack.c.bf16 %v1231_v50, %v1229_v49 }
 0x25c   :  { %2720 = vmatpush.bf16.msrb.mxu2 %v2604_v60 }
 0x25d   :  { %v237_v40 = vld [vmem:[%s5828_s6 + $0x580] sm:$0xff] }
 0x25e   :  { %1733 = vst [vmem:[%s5836_s14 + $0x6f0] sm:$0xff] %v1307_v34  ;;  %v493_v46 = vmul.f32 0.999, %v237_v40  ;;  %v785_v40 = vld [vmem:[#allocation2 + $0x6a0] sm:$0xff] }
 0x260   :  { %v1261_v63 = vadd.f32 %v1005_v51, %v493_v46 }
 0x265   :  { %v239_v6 = vld [vmem:[%s5828_s6 + $0x590] sm:$0xff] }
 0x266   :  { %1615 = vst [vmem:[%s5836_s14 + $0x340] sm:$0xff] %v1189_v44  ;;  %v495_v7 = vmul.f32 0.999, %v239_v6  ;;  %v1041_v6 = vmul.f32 0.001, %v785_v40 }
 0x267   :  { %1617 = vst [vmem:[%s5836_s14 + $0x350] sm:$0xff] %v1191_v36  ;;  %v787_v36 = vld [vmem:[#allocation2 + $0x6b0] sm:$0xff] }
 0x268   :  { %v1263_v3 = vadd.f32 %v1007_v56, %v495_v7  ;;  %v1043_v46 = vmul.f32 0.001, %v787_v36  ;;  %v705_v36 = vld [vmem:[#allocation2 + $0x420] sm:$0xff] }
 0x26a   :  { %v2620_v13 = vpack.c.bf16 %v1263_v3, %v1261_v63 }
 0x26c   :  { %2733 = vmatpush.bf16.msrb.mxu3 %v2620_v13 }
 0x26e   :  { %v277_v53 = vld [vmem:[%s5828_s6 + $0x6c0] sm:$0xff]  ;;  %v279_v54 = vld [vmem:[%s5828_s6 + $0x6d0] sm:$0xff] }
 0x26f   :  { %v533_v58 = vmul.f32 0.999, %v277_v53  ;;  %v535_v59 = vmul.f32 0.999, %v279_v54  ;;  %1655 = vst [vmem:[%s5836_s14 + $0x480] sm:$0xff] %v1229_v49  ;;  %v669_v49 = vld [vmem:[#allocation2 + $0x300] sm:$0xff] }
 0x270   :  { %v671_v53 = vld [vmem:[#allocation2 + $0x310] sm:$0xff]  ;;  %v925_v54 = vmul.f32 0.001, %v669_v49 }
 0x271   :  { %v1301_v14 = vadd.f32 %v1045_v4, %v533_v58  ;;  %v1303_v15 = vadd.f32 %v1047_v8, %v535_v59  ;;  %v927_v59 = vmul.f32 0.001, %v671_v53 }
 0x273   :  { %v2640_v20 = vpack.c.bf16 %v1303_v15, %v1301_v14 }
 0x275   :  { %2744 = vmatpush.bf16.msra.mxu0 %v2640_v20 }
 0x276   :  { %v161_v2 = vld [vmem:[%s5828_s6 + $0x320] sm:$0xff] }
 0x277   :  { %1657 = vst [vmem:[%s5836_s14 + $0x490] sm:$0xff] %v1231_v50  ;;  %v417_v11 = vmul.f32 0.999, %v161_v2  ;;  %v709_v2 = vld [vmem:[#allocation2 + $0x440] sm:$0xff] }
 0x279   :  { %v1185_v21 = vadd.f32 %v929_v52, %v417_v11 }
 0x27e   :  { %v163_v10 = vld [vmem:[%s5828_s6 + $0x330] sm:$0xff] }
 0x27f   :  { %1687 = vst [vmem:[%s5836_s14 + $0x580] sm:$0xff] %v1261_v63  ;;  %v419_v12 = vmul.f32 0.999, %v163_v10  ;;  %v965_v10 = vmul.f32 0.001, %v709_v2 }
 0x280   :  { %1689 = vst [vmem:[%s5836_s14 + $0x590] sm:$0xff] %v1263_v3  ;;  %v711_v3 = vld [vmem:[#allocation2 + $0x450] sm:$0xff] }
 0x281   :  { %v1187_v26 = vadd.f32 %v931_v17, %v419_v12  ;;  %v967_v11 = vmul.f32 0.001, %v711_v3 }
 0x283   :  { %v2582_v34 = vpack.c.bf16 %v1187_v26, %v1185_v21 }
 0x285   :  { %2710 = vmatpush.bf16.msrb.mxu1 %v2582_v34 }
 0x287   :  { %v201_v9 = vld [vmem:[%s5828_s6 + $0x460] sm:$0xff]  ;;  %v203_v16 = vld [vmem:[%s5828_s6 + $0x470] sm:$0xff] }
 0x288   :  { %v457_v18 = vmul.f32 0.999, %v201_v9  ;;  %v459_v61 = vmul.f32 0.999, %v203_v16  ;;  %1727 = vst [vmem:[%s5836_s14 + $0x6c0] sm:$0xff] %v1301_v14  ;;  %v825_v14 = vld [vmem:[#allocation2 + $0x7e0] sm:$0xff] }
 0x289   :  { %v827_v9 = vld [vmem:[#allocation2 + $0x7f0] sm:$0xff]  ;;  %v1081_v16 = vmul.f32 0.001, %v825_v14 }
 0x28a   :  { %v1225_v37 = vadd.f32 %v969_v27, %v457_v18  ;;  %v1227_v38 = vadd.f32 %v971_v28, %v459_v61  ;;  %v1083_v61 = vmul.f32 0.001, %v827_v9 }
 0x28c   :  { %v2602_v35 = vpack.c.bf16 %v1227_v38, %v1225_v37 }
 0x28e   :  { %2721 = vmatpush.bf16.msrb.mxu2 %v2602_v35 }
 0x28f   :  { %v233_v25 = vld [vmem:[%s5828_s6 + $0x560] sm:$0xff] }
 0x290   :  { %1729 = vst [vmem:[%s5836_s14 + $0x6d0] sm:$0xff] %v1303_v15  ;;  %v489_v30 = vmul.f32 0.999, %v233_v25  ;;  %v741_v25 = vld [vmem:[#allocation2 + $0x540] sm:$0xff] }
 0x292   :  { %v1257_v31 = vadd.f32 %v1001_v57, %v489_v30 }
 0x297   :  { %v235_v29 = vld [vmem:[%s5828_s6 + $0x570] sm:$0xff] }
 0x298   :  { %1611 = vst [vmem:[%s5836_s14 + $0x320] sm:$0xff] %v1185_v21  ;;  %v491_v32 = vmul.f32 0.999, %v235_v29  ;;  %v997_v29 = vmul.f32 0.001, %v741_v25 }
 0x299   :  { %1613 = vst [vmem:[%s5836_s14 + $0x330] sm:$0xff] %v1187_v26  ;;  %v743_v26 = vld [vmem:[#allocation2 + $0x550] sm:$0xff] }
 0x29a   :  { %v1259_v5 = vadd.f32 %v1003_v42, %v491_v32  ;;  %v999_v30 = vmul.f32 0.001, %v743_v26  ;;  %v2516_v42 = vld [vmem:[%s5845_s20] sm:$0xff] }
 0x29b   :  { %v4335_v35 = vpack.c.bf16 %v2516_v42, %v2516_v42  ;;  %v817_v42 = vld [vmem:[#allocation2 + $0x7a0] sm:$0xff] }
 0x29c   :  { %v2618_v50 = vpack.c.bf16 %v1259_v5, %v1257_v31 }
 0x29d   :  { %2673 = vmatmul.bf16.vlgmr.msra.gmra.mxu2 %v4335_v35 }
 0x29e   :  { %2734 = vmatpush.bf16.msrb.mxu3 %v2618_v50 }
 0x2a0   :  { %v273_v62 = vld [vmem:[%s5828_s6 + $0x6a0] sm:$0xff]  ;;  %v275_v41 = vld [vmem:[%s5828_s6 + $0x6b0] sm:$0xff] }
 0x2a1   :  { %v529_v43 = vmul.f32 0.999, %v273_v62  ;;  %v531_v44 = vmul.f32 0.999, %v275_v41  ;;  %1651 = vst [vmem:[%s5836_s14 + $0x460] sm:$0xff] %v1225_v37  ;;  %v781_v37 = vld [vmem:[#allocation2 + $0x680] sm:$0xff] }
 0x2a2   :  { %v783_v62 = vld [vmem:[#allocation2 + $0x690] sm:$0xff]  ;;  %v1037_v41 = vmul.f32 0.001, %v781_v37 }
 0x2a3   :  { %v1297_v19 = vadd.f32 %v1041_v6, %v529_v43  ;;  %v1299_v51 = vadd.f32 %v1043_v46, %v531_v44  ;;  %v1039_v44 = vmul.f32 0.001, %v783_v62  ;;  %v707_v46 = vld [vmem:[#allocation2 + $0x430] sm:$0xff] }
 0x2a5   :  { %v2638_v0 = vpack.c.bf16 %v1299_v51, %v1297_v19 }
 0x2a7   :  { %2745 = vmatpush.bf16.msra.mxu0 %v2638_v0  ;;  %v2517_v0 = vld [vmem:[%s5845_s20 + $0x8] sm:$0xff] }
 0x2a8   :  { %v157_v45 = vld [vmem:[%s5828_s6 + $0x300] sm:$0xff] }
 0x2a9   :  { %1653 = vst [vmem:[%s5836_s14 + $0x470] sm:$0xff] %v1227_v38  ;;  %v413_v47 = vmul.f32 0.999, %v157_v45 }
 0x2ab   :  { %v1181_v1 = vadd.f32 %v925_v54, %v413_v47 }
 0x2b0   :  { %v159_v7 = vld [vmem:[%s5828_s6 + $0x310] sm:$0xff] }
 0x2b1   :  { %1683 = vst [vmem:[%s5836_s14 + $0x560] sm:$0xff] %v1257_v31  ;;  %v415_v48 = vmul.f32 0.999, %v159_v7  ;;  %v961_v7 = vmul.f32 0.001, %v705_v36 }
 0x2b2   :  { %1685 = vst [vmem:[%s5836_s14 + $0x570] sm:$0xff] %v1259_v5  ;;  %v1073_v36 = vmul.f32 0.001, %v817_v42 }
 0x2b3   :  { %v1183_v8 = vadd.f32 %v927_v59, %v415_v48  ;;  %v963_v48 = vmul.f32 0.001, %v707_v46 }
 0x2b5   :  { %v2580_v15 = vpack.c.bf16 %v1183_v8, %v1181_v1 }
 0x2b7   :  { %2711 = vmatpush.bf16.msrb.mxu1 %v2580_v15 }
 0x2b9   :  { %v197_v56 = vld [vmem:[%s5828_s6 + $0x440] sm:$0xff]  ;;  %v199_v58 = vld [vmem:[%s5828_s6 + $0x450] sm:$0xff] }
 0x2ba   :  { %v453_v60 = vmul.f32 0.999, %v197_v56  ;;  %v455_v63 = vmul.f32 0.999, %v199_v58  ;;  %1723 = vst [vmem:[%s5836_s14 + $0x6a0] sm:$0xff] %v1297_v19  ;;  %v821_v19 = vld [vmem:[#allocation2 + $0x7c0] sm:$0xff] }
 0x2bb   :  { %v823_v56 = vld [vmem:[#allocation2 + $0x7d0] sm:$0xff] }
 0x2bc   :  { %v1221_v55 = vadd.f32 %v965_v10, %v453_v60  ;;  %v1223_v52 = vadd.f32 %v967_v11, %v455_v63  ;;  %v1077_v60 = vmul.f32 0.001, %v821_v19  ;;  %v1079_v63 = vmul.f32 0.001, %v823_v56 }
 0x2be   :  { %v2600_v22 = vpack.c.bf16 %v1223_v52, %v1221_v55 }
 0x2c0   :  { %2722 = vmatpush.bf16.msrb.mxu2 %v2600_v22 }
 0x2c1   :  { %v313_v4 = vld [vmem:[%s5828_s6 + $0x7e0] sm:$0xff] }
 0x2c2   :  { %1725 = vst [vmem:[%s5836_s14 + $0x6b0] sm:$0xff] %v1299_v51  ;;  %v569_v24 = vmul.f32 0.999, %v313_v4  ;;  %v737_v4 = vld [vmem:[#allocation2 + $0x520] sm:$0xff] }
 0x2c4   :  { %v1337_v23 = vadd.f32 %v1081_v16, %v569_v24  ;;  %v739_v24 = vld [vmem:[#allocation2 + $0x530] sm:$0xff] }
 0x2c9   :  { %v315_v12 = vld [vmem:[%s5828_s6 + $0x7f0] sm:$0xff] }
 0x2ca   :  { %1607 = vst [vmem:[%s5836_s14 + $0x300] sm:$0xff] %v1181_v1  ;;  %v571_v13 = vmul.f32 0.999, %v315_v12  ;;  %v4365_v1 = vpack.c.bf16 %v2517_v0, %v2517_v0 }
 0x2cb   :  { %1609 = vst [vmem:[%s5836_s14 + $0x310] sm:$0xff] %v1183_v8 }
 0x2cc   :  { %v1339_v28 = vadd.f32 %v1083_v61, %v571_v13  ;;  %2686 = vmatmul.bf16.vlgmr.msra.gmra.mxu3 %v4365_v1 }
 0x2ce   :  { %v2658_v38 = vpack.c.bf16 %v1339_v28, %v1337_v23 }
 0x2d0   :  { %2756 = vmatpush.bf16.msra.mxu1 %v2658_v38 }
 0x2d2   :  { %v229_v17 = vld [vmem:[%s5828_s6 + $0x540] sm:$0xff]  ;;  %v231_v18 = vld [vmem:[%s5828_s6 + $0x550] sm:$0xff] }
 0x2d3   :  { %v485_v20 = vmul.f32 0.999, %v229_v17  ;;  %v487_v21 = vmul.f32 0.999, %v231_v18  ;;  %1647 = vst [vmem:[%s5836_s14 + $0x440] sm:$0xff] %v1221_v55  ;;  %v777_v18 = vld [vmem:[#allocation2 + $0x660] sm:$0xff] }
 0x2d4   :  { %v993_v55 = vmul.f32 0.001, %v737_v4  ;;  %v1033_v22 = vmul.f32 0.001, %v777_v18 }
 0x2d5   :  { %v1253_v39 = vadd.f32 %v997_v29, %v485_v20  ;;  %v1255_v57 = vadd.f32 %v999_v30, %v487_v21  ;;  %v779_v21 = vld [vmem:[#allocation2 + $0x670] sm:$0xff] }
 0x2d6   :  { %v1035_v26 = vmul.f32 0.001, %v779_v21  ;;  %v634_v21 = vld [vmem:[#allocation2 + $0x1e8] sm:$0xff] }
 0x2d7   :  { %v2616_v45 = vpack.c.bf16 %v1255_v57, %v1253_v39 }
 0x2d9   :  { %2735 = vmatpush.bf16.msrb.mxu3 %v2616_v45 }
 0x2da   :  { %v269_v27 = vld [vmem:[%s5828_s6 + $0x680] sm:$0xff] }
 0x2db   :  { %1649 = vst [vmem:[%s5836_s14 + $0x450] sm:$0xff] %v1223_v52  ;;  %v525_v33 = vmul.f32 0.999, %v269_v27  ;;  %v995_v52 = vmul.f32 0.001, %v739_v24 }
 0x2dd   :  { %v1293_v5 = vadd.f32 %v1037_v41, %v525_v33  ;;  %v703_v33 = vld [vmem:[#allocation2 + $0x410] sm:$0xff] }
 0x2e2   :  { %v271_v32 = vld [vmem:[%s5828_s6 + $0x690] sm:$0xff] }
 0x2e3   :  { %1763 = vst [vmem:[%s5836_s14 + $0x7e0] sm:$0xff] %v1337_v23  ;;  %v527_v34 = vmul.f32 0.999, %v271_v32  ;;  %v701_v32 = vld [vmem:[#allocation2 + $0x400] sm:$0xff] }
 0x2e4   :  { %1765 = vst [vmem:[%s5836_s14 + $0x7f0] sm:$0xff] %v1339_v28  ;;  %v957_v38 = vmul.f32 0.001, %v701_v32 }
 0x2e5   :  { %v1295_v47 = vadd.f32 %v1039_v44, %v527_v34 }
 0x2e7   :  { %v2636_v58 = vpack.c.bf16 %v1295_v47, %v1293_v5 }
 0x2e9   :  { %2746 = vmatpush.bf16.msra.mxu0 %v2636_v58 }
 0x2eb   :  { %v193_v43 = vld [vmem:[%s5828_s6 + $0x420] sm:$0xff]  ;;  %v195_v31 = vld [vmem:[%s5828_s6 + $0x430] sm:$0xff] }
 0x2ec   :  { %v449_v40 = vmul.f32 0.999, %v193_v43  ;;  %1679 = vst [vmem:[%s5836_s14 + $0x540] sm:$0xff] %v1253_v39  ;;  %v451_v6 = vmul.f32 0.999, %v195_v31 }
 0x2ed   :  { %1681 = vst [vmem:[%s5836_s14 + $0x550] sm:$0xff] %v1255_v57  ;;  %v959_v39 = vmul.f32 0.001, %v703_v33 }
 0x2ee   :  { %v1217_v51 = vadd.f32 %v961_v7, %v449_v40  ;;  %v1219_v59 = vadd.f32 %v963_v48, %v451_v6  ;;  %v819_v40 = vld [vmem:[#allocation2 + $0x7b0] sm:$0xff] }
 0x2ef   :  { %v1075_v6 = vmul.f32 0.001, %v819_v40  ;;  %v598_v40 = vld [vmem:[#allocation2 + $0xc8] sm:$0xff] }
 0x2f0   :  { %v2598_v8 = vpack.c.bf16 %v1219_v59, %v1217_v51 }
 0x2f2   :  { %2723 = vmatpush.bf16.msrb.mxu2 %v2598_v8 }
 0x2f4   :  { %v309_v49 = vld [vmem:[%s5828_s6 + $0x7c0] sm:$0xff]  ;;  %v311_v50 = vld [vmem:[%s5828_s6 + $0x7d0] sm:$0xff] }
 0x2f5   :  { %1719 = vst [vmem:[%s5836_s14 + $0x680] sm:$0xff] %v1293_v5  ;;  %v565_v53 = vmul.f32 0.999, %v309_v49  ;;  %v567_v54 = vmul.f32 0.999, %v311_v50  ;;  %v602_v49 = vld [vmem:[#allocation2 + $0xe8] sm:$0xff] }
 0x2f6   :  { %1721 = vst [vmem:[%s5836_s14 + $0x690] sm:$0xff] %v1295_v47  ;;  %v604_v50 = vld [vmem:[#allocation2 + $0xf8] sm:$0xff] }
 0x2f7   :  { %1643 = vst [vmem:[%s5836_s14 + $0x420] sm:$0xff] %v1217_v51  ;;  %v1333_v10 = vadd.f32 %v1077_v60, %v565_v53  ;;  %v1335_v11 = vadd.f32 %v1079_v63, %v567_v54  ;;  %v858_v53 = vmul.f32 0.001, %v602_v49  ;;  %v860_v54 = vmul.f32 0.001, %v604_v50  ;;  %v733_v60 = vld [vmem:[#allocation2 + $0x500] sm:$0xff] }
 0x2f8   :  { %v989_v4 = vmul.f32 0.001, %v733_v60 }
 0x2f9   :  { %v2656_v9 = vpack.c.bf16 %v1335_v11, %v1333_v10 }
 0x2fb   :  { %2757 = vmatpush.bf16.msra.mxu1 %v2656_v9 }
 0x2fe   :  { %v225_v2 = vld [vmem:[%s5828_s6 + $0x520] sm:$0xff]  ;;  %v227_v3 = vld [vmem:[%s5828_s6 + $0x530] sm:$0xff] }
 0x2ff   :  { %1645 = vst [vmem:[%s5836_s14 + $0x430] sm:$0xff] %v1219_v59  ;;  %v481_v12 = vmul.f32 0.999, %v225_v2  ;;  %v483_v15 = vmul.f32 0.999, %v227_v3  ;;  %v735_v3 = vld [vmem:[#allocation2 + $0x510] sm:$0xff] }
 0x301   :  { %v1249_v61 = vadd.f32 %v993_v55, %v481_v12  ;;  %v1251_v20 = vadd.f32 %v995_v52, %v483_v15  ;;  %v773_v15 = vld [vmem:[#allocation2 + $0x640] sm:$0xff]  ;;  %v775_v55 = vld [vmem:[#allocation2 + $0x650] sm:$0xff] }
 0x303   :  { %v2614_v29 = vpack.c.bf16 %v1251_v20, %v1249_v61 }
 0x305   :  { %2736 = vmatpush.bf16.msrb.mxu3 %v2614_v29 }
 0x306   :  { %v265_v13 = vld [vmem:[%s5828_s6 + $0x660] sm:$0xff]  ;;  %v267_v14 = vld [vmem:[%s5828_s6 + $0x670] sm:$0xff] }
 0x307   :  { %1759 = vst [vmem:[%s5836_s14 + $0x7c0] sm:$0xff] %v1333_v10  ;;  %v521_v16 = vmul.f32 0.999, %v265_v13  ;;  %v523_v17 = vmul.f32 0.999, %v267_v14 }
 0x308   :  { %1761 = vst [vmem:[%s5836_s14 + $0x7d0] sm:$0xff] %v1335_v11  ;;  %v991_v11 = vmul.f32 0.001, %v735_v3  ;;  %v630_v3 = vld [vmem:[#allocation2 + $0x1c8] sm:$0xff] }
 0x309   :  { %v1289_v30 = vadd.f32 %v1033_v22, %v521_v16  ;;  %v1291_v37 = vadd.f32 %v1035_v26, %v523_v17  ;;  %v1029_v16 = vmul.f32 0.001, %v773_v15  ;;  %v1031_v17 = vmul.f32 0.001, %v775_v55  ;;  %v636_v26 = vld [vmem:[#allocation2 + $0x1f8] sm:$0xff] }
 0x30a   :  { %v2519_v15 = vld [vmem:[%s5845_s20 + $0x18] sm:$0xff] }
 0x30b   :  { %v2634_v43 = vpack.c.bf16 %v1291_v37, %v1289_v30  ;;  %v4521_v55 = vpack.c.bf16 %v2519_v15, %v2519_v15 }
 0x30d   :  { %2747 = vmatpush.bf16.msra.mxu0 %v2634_v43  ;;  %2712 = vmatmul.bf16.vlgmr.msrb.gmra.mxu1 %v4521_v55 }
 0x30f   :  { %v189_v23 = vld [vmem:[%s5828_s6 + $0x400] sm:$0xff]  ;;  %v191_v25 = vld [vmem:[%s5828_s6 + $0x410] sm:$0xff] }
 0x310   :  { %v445_v27 = vmul.f32 0.999, %v189_v23  ;;  %v447_v28 = vmul.f32 0.999, %v191_v25  ;;  %1675 = vst [vmem:[%s5836_s14 + $0x520] sm:$0xff] %v1249_v61 }
 0x312   :  { %v1213_v44 = vadd.f32 %v957_v38, %v445_v27  ;;  %v1215_v31 = vadd.f32 %v959_v39, %v447_v28  ;;  %v890_v27 = vmul.f32 0.001, %v634_v21  ;;  %v813_v38 = vld [vmem:[#allocation2 + $0x780] sm:$0xff]  ;;  %v815_v39 = vld [vmem:[#allocation2 + $0x790] sm:$0xff] }
 0x313   :  { %v1071_v42 = vmul.f32 0.001, %v815_v39  ;;  %v811_v21 = vld [vmem:[#allocation2 + $0x770] sm:$0xff] }
 0x314   :  { %v2596_v47 = vpack.c.bf16 %v1215_v31, %v1213_v44 }
 0x316   :  { %2724 = vmatpush.bf16.msrb.mxu2 %v2596_v47 }
 0x317   :  { %v305_v34 = vld [vmem:[%s5828_s6 + $0x7a0] sm:$0xff] }
 0x318   :  { %1677 = vst [vmem:[%s5836_s14 + $0x530] sm:$0xff] %v1251_v20  ;;  %v561_v62 = vmul.f32 0.999, %v305_v34 }
 0x31a   :  { %v1329_v48 = vadd.f32 %v1073_v36, %v561_v62 }
 0x31f   :  { %v307_v57 = vld [vmem:[%s5828_s6 + $0x7b0] sm:$0xff] }
 0x320   :  { %1715 = vst [vmem:[%s5836_s14 + $0x660] sm:$0xff] %v1289_v30  ;;  %v563_v41 = vmul.f32 0.999, %v307_v57  ;;  %v892_v30 = vmul.f32 0.001, %v636_v26 }
 0x321   :  { %1717 = vst [vmem:[%s5836_s14 + $0x670] sm:$0xff] %v1291_v37 }
 0x322   :  { %v1331_v51 = vadd.f32 %v1075_v6, %v563_v41  ;;  %v1069_v41 = vmul.f32 0.001, %v813_v38  ;;  %v600_v6 = vld [vmem:[#allocation2 + $0xd8] sm:$0xff] }
 0x324   :  { %v2654_v63 = vpack.c.bf16 %v1331_v51, %v1329_v48 }
 0x326   :  { %2758 = vmatpush.bf16.msra.mxu1 %v2654_v63 }
 0x328   :  { %v90_v45 = vld [vmem:[%s5828_s6 + $0xe8] sm:$0xff]  ;;  %v92_v5 = vld [vmem:[%s5828_s6 + $0xf8] sm:$0xff] }
 0x329   :  { %v346_v46 = vmul.f32 0.999, %v90_v45  ;;  %v348_v7 = vmul.f32 0.999, %v92_v5  ;;  %1639 = vst [vmem:[%s5836_s14 + $0x400] sm:$0xff] %v1213_v44 }
 0x32b   :  { %v1114_v0 = vadd.f32 %v858_v53, %v346_v46  ;;  %v1116_v2 = vadd.f32 %v860_v54, %v348_v7  ;;  %v854_v46 = vmul.f32 0.001, %v598_v40  ;;  %v2518_v7 = vld [vmem:[%s5845_s20 + $0x10] sm:$0xff] }
 0x32c   :  { %v4491_v49 = vpack.c.bf16 %v2518_v7, %v2518_v7  ;;  %v767_v40 = vld [vmem:[#allocation2 + $0x610] sm:$0xff] }
 0x32d   :  { %v2547_v13 = vpack.c.bf16 %v1116_v2, %v1114_v0 }
 0x32e   :  { %2699 = vmatmul.bf16.vlgmr.msrb.gmra.mxu0 %v4491_v49 }
 0x32f   :  { %2769 = vmatpush.bf16.msra.mxu2 %v2547_v13  ;;  %v886_v13 = vmul.f32 0.001, %v630_v3  ;;  %v666_v3 = vld [vmem:[#allocation2 + $0x2e8] sm:$0xff] }
 0x330   :  { %v221_v19 = vld [vmem:[%s5828_s6 + $0x500] sm:$0xff] }
 0x331   :  { %1641 = vst [vmem:[%s5836_s14 + $0x410] sm:$0xff] %v1215_v31  ;;  %v477_v58 = vmul.f32 0.999, %v221_v19 }
 0x333   :  { %v1245_v14 = vadd.f32 %v989_v4, %v477_v58  ;;  %v771_v58 = vld [vmem:[#allocation2 + $0x630] sm:$0xff] }
 0x334   :  { %v1027_v63 = vmul.f32 0.001, %v771_v58 }
 0x338   :  { %v223_v56 = vld [vmem:[%s5828_s6 + $0x510] sm:$0xff] }
 0x339   :  { %1755 = vst [vmem:[%s5836_s14 + $0x7a0] sm:$0xff] %v1329_v48  ;;  %v479_v59 = vmul.f32 0.999, %v223_v56  ;;  %v856_v48 = vmul.f32 0.001, %v600_v6 }
 0x33a   :  { %1757 = vst [vmem:[%s5836_s14 + $0x7b0] sm:$0xff] %v1331_v51  ;;  %v769_v51 = vld [vmem:[#allocation2 + $0x620] sm:$0xff]  ;;  %v1023_v6 = vmul.f32 0.001, %v767_v40 }
 0x33b   :  { %v1247_v9 = vadd.f32 %v991_v11, %v479_v59  ;;  %v1025_v59 = vmul.f32 0.001, %v769_v51  ;;  %v632_v11 = vld [vmem:[#allocation2 + $0x1d8] sm:$0xff] }
 0x33d   :  { %v2612_v22 = vpack.c.bf16 %v1247_v9, %v1245_v14 }
 0x33f   :  { %2737 = vmatpush.bf16.msrb.mxu3 %v2612_v22 }
 0x341   :  { %v261_v8 = vld [vmem:[%s5828_s6 + $0x640] sm:$0xff]  ;;  %v263_v10 = vld [vmem:[%s5828_s6 + $0x650] sm:$0xff] }
 0x342   :  { %v517_v12 = vmul.f32 0.999, %v261_v8  ;;  %v519_v24 = vmul.f32 0.999, %v263_v10  ;;  %1540 = vst [vmem:[%s5836_s14 + $0xe8] sm:$0xff] %v1114_v0 }
 0x344   :  { %v1285_v23 = vadd.f32 %v1029_v16, %v517_v12  ;;  %v1287_v25 = vadd.f32 %v1031_v17, %v519_v24  ;;  %v809_v16 = vld [vmem:[#allocation2 + $0x760] sm:$0xff] }
 0x345   :  { %v1065_v26 = vmul.f32 0.001, %v809_v16 }
 0x346   :  { %v2632_v34 = vpack.c.bf16 %v1287_v25, %v1285_v23 }
 0x348   :  { %2748 = vmatpush.bf16.msra.mxu0 %v2632_v34 }
 0x349   :  { %v122_v52 = vld [vmem:[%s5828_s6 + $0x1e8] sm:$0xff] }
 0x34a   :  { %1542 = vst [vmem:[%s5836_s14 + $0xf8] sm:$0xff] %v1116_v2  ;;  %v378_v61 = vmul.f32 0.999, %v122_v52 }
 0x34c   :  { %v1146_v37 = vadd.f32 %v890_v27, %v378_v61  ;;  %v1067_v27 = vmul.f32 0.001, %v811_v21 }
 0x351   :  { %v124_v18 = vld [vmem:[%s5828_s6 + $0x1f8] sm:$0xff] }
 0x352   :  { %1671 = vst [vmem:[%s5836_s14 + $0x500] sm:$0xff] %v1245_v14  ;;  %v380_v20 = vmul.f32 0.999, %v124_v18  ;;  %v888_v14 = vmul.f32 0.001, %v632_v11 }
 0x353   :  { %1673 = vst [vmem:[%s5836_s14 + $0x510] sm:$0xff] %v1247_v9  ;;  %v922_v11 = vmul.f32 0.001, %v666_v3 }
 0x354   :  { %v1148_v62 = vadd.f32 %v892_v30, %v380_v20 }
 0x356   :  { %v2563_v36 = vpack.c.bf16 %v1148_v62, %v1146_v37 }
 0x358   :  { %2782 = vmatpush.bf16.msra.mxu3 %v2563_v36 }
 0x35a   :  { %v301_v28 = vld [vmem:[%s5828_s6 + $0x780] sm:$0xff]  ;;  %v303_v29 = vld [vmem:[%s5828_s6 + $0x790] sm:$0xff] }
 0x35b   :  { %v557_v32 = vmul.f32 0.999, %v301_v28  ;;  %v559_v33 = vmul.f32 0.999, %v303_v29  ;;  %1711 = vst [vmem:[%s5836_s14 + $0x640] sm:$0xff] %v1285_v23 }
 0x35d   :  { %v1325_v45 = vadd.f32 %v1069_v41, %v557_v32  ;;  %v1327_v5 = vadd.f32 %v1071_v42, %v559_v33  ;;  %v594_v32 = vld [vmem:[#allocation2 + $0xa8] sm:$0xff] }
 0x35e   :  { %v850_v38 = vmul.f32 0.001, %v594_v32 }
 0x35f   :  { %v2652_v53 = vpack.c.bf16 %v1327_v5, %v1325_v45 }
 0x361   :  { %2759 = vmatpush.bf16.msra.mxu1 %v2652_v53  ;;  %v628_v53 = vld [vmem:[#allocation2 + $0x1b8] sm:$0xff] }
 0x362   :  { %v86_v57 = vld [vmem:[%s5828_s6 + $0xc8] sm:$0xff] }
 0x363   :  { %1713 = vst [vmem:[%s5836_s14 + $0x650] sm:$0xff] %v1287_v25  ;;  %v342_v44 = vmul.f32 0.999, %v86_v57 }
 0x365   :  { %v1110_v54 = vadd.f32 %v854_v46, %v342_v44 }
 0x36a   :  { %v88_v43 = vld [vmem:[%s5828_s6 + $0xd8] sm:$0xff] }
 0x36b   :  { %1572 = vst [vmem:[%s5836_s14 + $0x1e8] sm:$0xff] %v1146_v37  ;;  %v344_v31 = vmul.f32 0.999, %v88_v43  ;;  %v596_v37 = vld [vmem:[#allocation2 + $0xb8] sm:$0xff] }
 0x36c   :  { %1574 = vst [vmem:[%s5836_s14 + $0x1f8] sm:$0xff] %v1148_v62  ;;  %v852_v62 = vmul.f32 0.001, %v596_v37  ;;  %v2521_v37 = vld [vmem:[%s5845_s20 + $0x28] sm:$0xff] }
 0x36d   :  { %v1112_v60 = vadd.f32 %v856_v48, %v344_v31  ;;  %v765_v31 = vld [vmem:[#allocation2 + $0x600] sm:$0xff]  ;;  %v626_v48 = vld [vmem:[#allocation2 + $0x1a8] sm:$0xff] }
 0x36f   :  { %v2545_v12 = vpack.c.bf16 %v1112_v60, %v1110_v54 }
 0x371   :  { %2770 = vmatpush.bf16.msra.mxu2 %v2545_v12 }
 0x373   :  { %v257_v47 = vld [vmem:[%s5828_s6 + $0x620] sm:$0xff]  ;;  %v259_v50 = vld [vmem:[%s5828_s6 + $0x630] sm:$0xff] }
 0x374   :  { %v513_v19 = vmul.f32 0.999, %v257_v47  ;;  %1751 = vst [vmem:[%s5836_s14 + $0x780] sm:$0xff] %v1325_v45  ;;  %v515_v56 = vmul.f32 0.999, %v259_v50 }
 0x375   :  { %1753 = vst [vmem:[%s5836_s14 + $0x790] sm:$0xff] %v1327_v5  ;;  %v1021_v5 = vmul.f32 0.001, %v765_v31 }
 0x376   :  { %v1281_v4 = vadd.f32 %v1025_v59, %v513_v19  ;;  %v1283_v24 = vadd.f32 %v1027_v63, %v515_v56  ;;  %v884_v59 = vmul.f32 0.001, %v628_v53 }
 0x378   :  { %v2630_v17 = vpack.c.bf16 %v1283_v24, %v1281_v4 }
 0x37a   :  { %2749 = vmatpush.bf16.msra.mxu0 %v2630_v17 }
 0x37c   :  { %v118_v0 = vld [vmem:[%s5828_s6 + $0x1c8] sm:$0xff]  ;;  %v120_v2 = vld [vmem:[%s5828_s6 + $0x1d8] sm:$0xff] }
 0x37d   :  { %1536 = vst [vmem:[%s5836_s14 + $0xc8] sm:$0xff] %v1110_v54  ;;  %v374_v8 = vmul.f32 0.999, %v118_v0  ;;  %v376_v10 = vmul.f32 0.999, %v120_v2 }
 0x37e   :  { %1538 = vst [vmem:[%s5836_s14 + $0xd8] sm:$0xff] %v1112_v60  ;;  %v882_v54 = vmul.f32 0.001, %v626_v48 }
 0x37f   :  { %1707 = vst [vmem:[%s5836_s14 + $0x620] sm:$0xff] %v1281_v4  ;;  %v1142_v18 = vadd.f32 %v886_v13, %v374_v8  ;;  %v1144_v61 = vadd.f32 %v888_v14, %v376_v10  ;;  %v668_v4 = vld [vmem:[#allocation2 + $0x2f8] sm:$0xff]  ;;  %v2520_v8 = vld [vmem:[%s5845_s20 + $0x20] sm:$0xff] }
 0x380   :  { %v924_v12 = vmul.f32 0.001, %v668_v4 }
 0x381   :  { %v2561_v28 = vpack.c.bf16 %v1144_v61, %v1142_v18 }
 0x383   :  { %2783 = vmatpush.bf16.msra.mxu3 %v2561_v28 }
 0x386   :  { %v297_v52 = vld [vmem:[%s5828_s6 + $0x760] sm:$0xff]  ;;  %v299_v9 = vld [vmem:[%s5828_s6 + $0x770] sm:$0xff] }
 0x387   :  { %1709 = vst [vmem:[%s5836_s14 + $0x630] sm:$0xff] %v1283_v24  ;;  %v553_v20 = vmul.f32 0.999, %v297_v52  ;;  %v555_v25 = vmul.f32 0.999, %v299_v9  ;;  %v4584_v24 = vpack.c.bf16 %v2520_v8, %v2520_v8  ;;  %v805_v52 = vld [vmem:[#allocation2 + $0x740] sm:$0xff] }
 0x388   :  { %v807_v9 = vld [vmem:[#allocation2 + $0x750] sm:$0xff] }
 0x389   :  { %v1321_v33 = vadd.f32 %v1065_v26, %v553_v20  ;;  %v1323_v34 = vadd.f32 %v1067_v27, %v555_v25  ;;  %2725 = vmatmul.bf16.vlgmr.msrb.gmra.mxu2 %v4584_v24  ;;  %v1063_v25 = vmul.f32 0.001, %v807_v9 }
 0x38b   :  { %v2650_v43 = vpack.c.bf16 %v1323_v34, %v1321_v33 }
 0x38d   :  { %2760 = vmatpush.bf16.msra.mxu1 %v2650_v43  ;;  %v622_v43 = vld [vmem:[#allocation2 + $0x188] sm:$0xff] }
 0x38e   :  { %v82_v22 = vld [vmem:[%s5828_s6 + $0xa8] sm:$0xff]  ;;  %v84_v23 = vld [vmem:[%s5828_s6 + $0xb8] sm:$0xff] }
 0x38f   :  { %1568 = vst [vmem:[%s5836_s14 + $0x1c8] sm:$0xff] %v1142_v18  ;;  %v338_v29 = vmul.f32 0.999, %v82_v22  ;;  %v340_v30 = vmul.f32 0.999, %v84_v23  ;;  %v590_v22 = vld [vmem:[#allocation2 + $0x88] sm:$0xff] }
 0x390   :  { %1570 = vst [vmem:[%s5836_s14 + $0x1d8] sm:$0xff] %v1144_v61  ;;  %v1061_v23 = vmul.f32 0.001, %v805_v52  ;;  %v588_v52 = vld [vmem:[#allocation2 + $0x78] sm:$0xff] }
 0x391   :  { %v1106_v44 = vadd.f32 %v850_v38, %v338_v29  ;;  %v1108_v45 = vadd.f32 %v852_v62, %v340_v30  ;;  %v592_v29 = vld [vmem:[#allocation2 + $0x98] sm:$0xff]  ;;  %v846_v30 = vmul.f32 0.001, %v590_v22  ;;  %v4620_v62 = vpack.c.bf16 %v2521_v37, %v2521_v37 }
 0x392   :  { %v844_v22 = vmul.f32 0.001, %v588_v52  ;;  %v700_v52 = vld [vmem:[#allocation2 + $0x3f8] sm:$0xff] }
 0x393   :  { %v2543_v50 = vpack.c.bf16 %v1108_v45, %v1106_v44  ;;  %2738 = vmatmul.bf16.vlgmr.msrb.gmra.mxu3 %v4620_v62 }
 0x395   :  { %2771 = vmatpush.bf16.msra.mxu2 %v2543_v50 }
 0x397   :  { %v253_v39 = vld [vmem:[%s5828_s6 + $0x600] sm:$0xff]  ;;  %v255_v57 = vld [vmem:[%s5828_s6 + $0x610] sm:$0xff] }
 0x398   :  { %v509_v41 = vmul.f32 0.999, %v253_v39  ;;  %v511_v42 = vmul.f32 0.999, %v255_v57  ;;  %1747 = vst [vmem:[%s5836_s14 + $0x760] sm:$0xff] %v1321_v33 }
 0x39a   :  { %v1277_v19 = vadd.f32 %v1021_v5, %v509_v41  ;;  %v1279_v51 = vadd.f32 %v1023_v6, %v511_v42 }
 0x39c   :  { %v2628_v0 = vpack.c.bf16 %v1279_v51, %v1277_v19 }
 0x39e   :  { %2750 = vmatpush.bf16.msra.mxu0 %v2628_v0 }
 0x39f   :  { %v114_v36 = vld [vmem:[%s5828_s6 + $0x1a8] sm:$0xff] }
 0x3a0   :  { %1749 = vst [vmem:[%s5836_s14 + $0x770] sm:$0xff] %v1323_v34  ;;  %v370_v7 = vmul.f32 0.999, %v114_v36  ;;  %v848_v34 = vmul.f32 0.001, %v592_v29 }
 0x3a1   :  { %v878_v36 = vmul.f32 0.001, %v622_v43 }
 0x3a2   :  { %v1138_v2 = vadd.f32 %v882_v54, %v370_v7  ;;  %v662_v7 = vld [vmem:[#allocation2 + $0x2c8] sm:$0xff] }
 0x3a7   :  { %v116_v46 = vld [vmem:[%s5828_s6 + $0x1b8] sm:$0xff] }
 0x3a8   :  { %1532 = vst [vmem:[%s5836_s14 + $0xa8] sm:$0xff] %v1106_v44  ;;  %v372_v47 = vmul.f32 0.999, %v116_v46  ;;  %v624_v44 = vld [vmem:[#allocation2 + $0x198] sm:$0xff] }
 0x3a9   :  { %1534 = vst [vmem:[%s5836_s14 + $0xb8] sm:$0xff] %v1108_v45  ;;  %v880_v45 = vmul.f32 0.001, %v624_v44 }
 0x3aa   :  { %v1140_v10 = vadd.f32 %v884_v59, %v372_v47  ;;  %v664_v47 = vld [vmem:[#allocation2 + $0x2d8] sm:$0xff] }
 0x3ab   :  { %v920_v59 = vmul.f32 0.001, %v664_v47 }
 0x3ac   :  { %v2559_v16 = vpack.c.bf16 %v1140_v10, %v1138_v2 }
 0x3ae   :  { %2784 = vmatpush.bf16.msra.mxu3 %v2559_v16 }
 0x3b0   :  { %v154_v56 = vld [vmem:[%s5828_s6 + $0x2e8] sm:$0xff]  ;;  %v156_v58 = vld [vmem:[%s5828_s6 + $0x2f8] sm:$0xff] }
 0x3b1   :  { %v410_v60 = vmul.f32 0.999, %v154_v56  ;;  %v412_v63 = vmul.f32 0.999, %v156_v58  ;;  %1703 = vst [vmem:[%s5836_s14 + $0x600] sm:$0xff] %v1277_v19  ;;  %v801_v56 = vld [vmem:[#allocation2 + $0x720] sm:$0xff] }
 0x3b2   :  { %1705 = vst [vmem:[%s5836_s14 + $0x610] sm:$0xff] %v1279_v51  ;;  %v918_v58 = vmul.f32 0.001, %v662_v7 }
 0x3b3   :  { %v1178_v17 = vadd.f32 %v922_v11, %v410_v60  ;;  %v1180_v18 = vadd.f32 %v924_v12, %v412_v63  ;;  %v803_v60 = vld [vmem:[#allocation2 + $0x730] sm:$0xff] }
 0x3b4   :  { %v1059_v11 = vmul.f32 0.001, %v803_v60  ;;  %v582_v60 = vld [vmem:[#allocation2 + $0x48] sm:$0xff] }
 0x3b5   :  { %v2579_v27 = vpack.c.bf16 %v1180_v18, %v1178_v17 }
 0x3b7   :  { %2795 = vmatpush.bf16.msrb.mxu0 %v2579_v27 }
 0x3b9   :  { %v293_v13 = vld [vmem:[%s5828_s6 + $0x740] sm:$0xff] }
 0x3ba   :  { %1564 = vst [vmem:[%s5836_s14 + $0x1a8] sm:$0xff] %v1138_v2  ;;  %v549_v15 = vmul.f32 0.999, %v293_v13 }
 0x3bc   :  { %v1317_v32 = vadd.f32 %v1061_v23, %v549_v15  ;;  %v586_v15 = vld [vmem:[#allocation2 + $0x68] sm:$0xff] }
 0x3c1   :  { %v295_v14 = vld [vmem:[%s5828_s6 + $0x750] sm:$0xff] }
 0x3c2   :  { %1566 = vst [vmem:[%s5836_s14 + $0x1b8] sm:$0xff] %v1140_v10  ;;  %v551_v61 = vmul.f32 0.999, %v295_v14  ;;  %v1057_v10 = vmul.f32 0.001, %v801_v56 }
 0x3c4   :  { %v1319_v33 = vadd.f32 %v1063_v25, %v551_v61  ;;  %v620_v25 = vld [vmem:[#allocation2 + $0x178] sm:$0xff] }
 0x3c6   :  { %v2648_v31 = vpack.c.bf16 %v1319_v33, %v1317_v32 }
 0x3c8   :  { %2761 = vmatpush.bf16.msra.mxu1 %v2648_v31 }
 0x3c9   :  { %v78_v20 = vld [vmem:[%s5828_s6 + $0x88] sm:$0xff]  ;;  %v80_v21 = vld [vmem:[%s5828_s6 + $0x98] sm:$0xff] }
 0x3ca   :  { %v334_v26 = vmul.f32 0.999, %v78_v20  ;;  %1604 = vst [vmem:[%s5836_s14 + $0x2e8] sm:$0xff] %v1178_v17  ;;  %v336_v28 = vmul.f32 0.999, %v80_v21  ;;  %v618_v21 = vld [vmem:[#allocation2 + $0x168] sm:$0xff] }
 0x3cb   :  { %1606 = vst [vmem:[%s5836_s14 + $0x2f8] sm:$0xff] %v1180_v18  ;;  %v842_v18 = vmul.f32 0.001, %v586_v15  ;;  %v874_v29 = vmul.f32 0.001, %v618_v21 }
 0x3cc   :  { %v1102_v57 = vadd.f32 %v846_v30, %v334_v26  ;;  %v1104_v40 = vadd.f32 %v848_v34, %v336_v28 }
 0x3ce   :  { %v2541_v48 = vpack.c.bf16 %v1104_v40, %v1102_v57 }
 0x3d0   :  { %2772 = vmatpush.bf16.msra.mxu2 %v2541_v48  ;;  %v799_v48 = vld [vmem:[#allocation2 + $0x710] sm:$0xff] }
 0x3d2   :  { %v110_v38 = vld [vmem:[%s5828_s6 + $0x188] sm:$0xff]  ;;  %v112_v39 = vld [vmem:[%s5828_s6 + $0x198] sm:$0xff] }
 0x3d3   :  { %v366_v41 = vmul.f32 0.999, %v110_v38  ;;  %v368_v42 = vmul.f32 0.999, %v112_v39  ;;  %1743 = vst [vmem:[%s5836_s14 + $0x740] sm:$0xff] %v1317_v32 }
 0x3d5   :  { %v1134_v50 = vadd.f32 %v878_v36, %v366_v41  ;;  %v1136_v19 = vadd.f32 %v880_v45, %v368_v42  ;;  %v660_v41 = vld [vmem:[#allocation2 + $0x2b8] sm:$0xff] }
 0x3d7   :  { %v2557_v63 = vpack.c.bf16 %v1136_v19, %v1134_v50 }
 0x3d9   :  { %2785 = vmatpush.bf16.msra.mxu3 %v2557_v63  ;;  %v584_v63 = vld [vmem:[#allocation2 + $0x58] sm:$0xff] }
 0x3da   :  { %v150_v5 = vld [vmem:[%s5828_s6 + $0x2c8] sm:$0xff] }
 0x3db   :  { %1745 = vst [vmem:[%s5836_s14 + $0x750] sm:$0xff] %v1319_v33  ;;  %v406_v46 = vmul.f32 0.999, %v150_v5  ;;  %v876_v33 = vmul.f32 0.001, %v620_v25 }
 0x3dd   :  { %v1174_v4 = vadd.f32 %v918_v58, %v406_v46 }
 0x3e2   :  { %v152_v6 = vld [vmem:[%s5828_s6 + $0x2d8] sm:$0xff] }
 0x3e3   :  { %1528 = vst [vmem:[%s5836_s14 + $0x88] sm:$0xff] %v1102_v57  ;;  %v408_v51 = vmul.f32 0.999, %v152_v6  ;;  %v658_v57 = vld [vmem:[#allocation2 + $0x2a8] sm:$0xff]  ;;  %v797_v6 = vld [vmem:[#allocation2 + $0x700] sm:$0xff] }
 0x3e4   :  { %v914_v31 = vmul.f32 0.001, %v658_v57  ;;  %v656_v57 = vld [vmem:[#allocation2 + $0x298] sm:$0xff] }
 0x3e5   :  { %v1176_v8 = vadd.f32 %v920_v59, %v408_v51 }
 0x3e7   :  { %v2577_v9 = vpack.c.bf16 %v1176_v8, %v1174_v4 }
 0x3e9   :  { %2796 = vmatpush.bf16.msrb.mxu0 %v2577_v9 }
 0x3ea   :  { %v289_v53 = vld [vmem:[%s5828_s6 + $0x720] sm:$0xff]  ;;  %v291_v54 = vld [vmem:[%s5828_s6 + $0x730] sm:$0xff] }
 0x3eb   :  { %1530 = vst [vmem:[%s5836_s14 + $0x98] sm:$0xff] %v1104_v40  ;;  %v545_v0 = vmul.f32 0.999, %v289_v53  ;;  %v547_v2 = vmul.f32 0.999, %v291_v54 }
 0x3ec   :  { %1560 = vst [vmem:[%s5836_s14 + $0x188] sm:$0xff] %v1134_v50  ;;  %v916_v40 = vmul.f32 0.001, %v660_v41  ;;  %v1053_v50 = vmul.f32 0.001, %v797_v6 }
 0x3ed   :  { %v1313_v16 = vadd.f32 %v1057_v10, %v545_v0  ;;  %v1315_v17 = vadd.f32 %v1059_v11, %v547_v2  ;;  %v1055_v53 = vmul.f32 0.001, %v799_v48  ;;  %v580_v48 = vld [vmem:[#allocation2 + $0x38] sm:$0xff] }
 0x3ef   :  { %v2646_v26 = vpack.c.bf16 %v1315_v17, %v1313_v16 }
 0x3f1   :  { %2762 = vmatpush.bf16.msra.mxu1 %v2646_v26 }
 0x3f3   :  { %v74_v3 = vld [vmem:[%s5828_s6 + $0x68] sm:$0xff] }
 0x3f4   :  { %1562 = vst [vmem:[%s5836_s14 + $0x198] sm:$0xff] %v1136_v19  ;;  %v330_v13 = vmul.f32 0.999, %v74_v3  ;;  %v838_v3 = vmul.f32 0.001, %v582_v60  ;;  %v694_v60 = vld [vmem:[#allocation2 + $0x3c8] sm:$0xff] }
 0x3f6   :  { %v1098_v27 = vadd.f32 %v842_v18, %v330_v13  ;;  %v956_v18 = vmul.f32 0.001, %v700_v52  ;;  %v612_v52 = vld [vmem:[#allocation2 + $0x138] sm:$0xff] }
 0x3fb   :  { %v76_v12 = vld [vmem:[%s5828_s6 + $0x78] sm:$0xff] }
 0x3fc   :  { %v332_v14 = vmul.f32 0.999, %v76_v12  ;;  %1600 = vst [vmem:[%s5836_s14 + $0x2c8] sm:$0xff] %v1174_v4  ;;  %v840_v4 = vmul.f32 0.001, %v584_v63  ;;  %v698_v12 = vld [vmem:[#allocation2 + $0x3e8] sm:$0xff] }
 0x3fd   :  { %v954_v9 = vmul.f32 0.001, %v698_v12 }
 0x3fe   :  { %v1100_v32 = vadd.f32 %v844_v22, %v332_v14  ;;  %v614_v22 = vld [vmem:[#allocation2 + $0x148] sm:$0xff] }
 0x400   :  { %v2539_v43 = vpack.c.bf16 %v1100_v32, %v1098_v27 }
 0x402   :  { %2773 = vmatpush.bf16.msra.mxu2 %v2539_v43 }
 0x403   :  { %v106_v61 = vld [vmem:[%s5828_s6 + $0x168] sm:$0xff]  ;;  %v108_v20 = vld [vmem:[%s5828_s6 + $0x178] sm:$0xff] }
 0x404   :  { %1602 = vst [vmem:[%s5836_s14 + $0x2d8] sm:$0xff] %v1176_v8  ;;  %v362_v23 = vmul.f32 0.999, %v106_v61  ;;  %v364_v28 = vmul.f32 0.999, %v108_v20 }
 0x405   :  { %1739 = vst [vmem:[%s5836_s14 + $0x720] sm:$0xff] %v1313_v16  ;;  %v2522_v16 = vld [vmem:[%s5845_s20 + $0x30] sm:$0xff] }
 0x406   :  { %v1130_v38 = vadd.f32 %v874_v29, %v362_v23  ;;  %v1132_v44 = vadd.f32 %v876_v33, %v364_v28  ;;  %v4731_v61 = vpack.c.bf16 %v2522_v16, %v2522_v16  ;;  %v870_v28 = vmul.f32 0.001, %v614_v22 }
 0x408   :  { %v2555_v46 = vpack.c.bf16 %v1132_v44, %v1130_v38  ;;  %2751 = vmatmul.bf16.vlgmr.msra.gmra.mxu0 %v4731_v61 }
 0x40a   :  { %2786 = vmatpush.bf16.msra.mxu3 %v2555_v46 }
 0x40c   :  { %v146_v30 = vld [vmem:[%s5828_s6 + $0x2a8] sm:$0xff] }
 0x40d   :  { %1741 = vst [vmem:[%s5836_s14 + $0x730] sm:$0xff] %v1315_v17  ;;  %v402_v37 = vmul.f32 0.999, %v146_v30 }
 0x40f   :  { %v1170_v7 = vadd.f32 %v914_v31, %v402_v37  ;;  %v2523_v31 = vld [vmem:[%s5845_s20 + $0x38] sm:$0xff] }
 0x414   :  { %v148_v34 = vld [vmem:[%s5828_s6 + $0x2b8] sm:$0xff] }
 0x415   :  { %1524 = vst [vmem:[%s5836_s14 + $0x68] sm:$0xff] %v1098_v27  ;;  %v404_v39 = vmul.f32 0.999, %v148_v34  ;;  %v616_v27 = vld [vmem:[#allocation2 + $0x158] sm:$0xff]  ;;  %v654_v34 = vld [vmem:[#allocation2 + $0x288] sm:$0xff] }
 0x416   :  { %v872_v30 = vmul.f32 0.001, %v616_v27  ;;  %v910_v43 = vmul.f32 0.001, %v654_v34 }
 0x417   :  { %v1172_v47 = vadd.f32 %v916_v40, %v404_v39  ;;  %v4761_v40 = vpack.c.bf16 %v2523_v31, %v2523_v31 }
 0x419   :  { %v2575_v58 = vpack.c.bf16 %v1172_v47, %v1170_v7 }
 0x41b   :  { %2797 = vmatpush.bf16.msrb.mxu0 %v2575_v58 }
 0x41c   :  { %v285_v42 = vld [vmem:[%s5828_s6 + $0x700] sm:$0xff] }
 0x41d   :  { %1526 = vst [vmem:[%s5836_s14 + $0x78] sm:$0xff] %v1100_v32  ;;  %v541_v45 = vmul.f32 0.999, %v285_v42 }
 0x41f   :  { %v1309_v59 = vadd.f32 %v1053_v50, %v541_v45 }
 0x424   :  { %v287_v36 = vld [vmem:[%s5828_s6 + $0x710] sm:$0xff] }
 0x425   :  { %1556 = vst [vmem:[%s5836_s14 + $0x168] sm:$0xff] %v1130_v38  ;;  %v543_v5 = vmul.f32 0.999, %v287_v36 }
 0x426   :  { %1558 = vst [vmem:[%s5836_s14 + $0x178] sm:$0xff] %v1132_v44  ;;  %v912_v44 = vmul.f32 0.001, %v656_v57  ;;  %v574_v57 = vld [vmem:[#allocation2 + $0x8] sm:$0xff] }
 0x427   :  { %v1311_v2 = vadd.f32 %v1055_v53, %v543_v5  ;;  %v578_v5 = vld [vmem:[#allocation2 + $0x28] sm:$0xff] }
 0x428   :  { %v834_v53 = vmul.f32 0.001, %v578_v5 }
 0x429   :  { %v2644_v13 = vpack.c.bf16 %v1311_v2, %v1309_v59 }
 0x42b   :  { %2763 = vmatpush.bf16.msra.mxu1 %v2644_v13 }
 0x42d   :  { %v70_v19 = vld [vmem:[%s5828_s6 + $0x48] sm:$0xff]  ;;  %v72_v51 = vld [vmem:[%s5828_s6 + $0x58] sm:$0xff] }
 0x42e   :  { %v326_v54 = vmul.f32 0.999, %v70_v19  ;;  %v328_v56 = vmul.f32 0.999, %v72_v51  ;;  %1596 = vst [vmem:[%s5836_s14 + $0x2a8] sm:$0xff] %v1170_v7  ;;  %2764 = vmatmul.bf16.vlgmr.msra.gmra.mxu1 %v4761_v40 }
 0x430   :  { %v1094_v14 = vadd.f32 %v838_v3, %v326_v54  ;;  %v1096_v15 = vadd.f32 %v840_v4, %v328_v56  ;;  %v836_v54 = vmul.f32 0.001, %v580_v48  ;;  %v950_v3 = vmul.f32 0.001, %v694_v60  ;;  %v692_v48 = vld [vmem:[#allocation2 + $0x3b8] sm:$0xff]  ;;  %v730_v60 = vld [vmem:[#allocation2 + $0x4e8] sm:$0xff] }
 0x432   :  { %v2537_v23 = vpack.c.bf16 %v1096_v15, %v1094_v14 }
 0x434   :  { %2774 = vmatpush.bf16.msra.mxu2 %v2537_v23  ;;  %v650_v23 = vld [vmem:[#allocation2 + $0x268] sm:$0xff] }
 0x435   :  { %v186_v0 = vld [vmem:[%s5828_s6 + $0x3e8] sm:$0xff] }
 0x436   :  { %1598 = vst [vmem:[%s5836_s14 + $0x2b8] sm:$0xff] %v1172_v47  ;;  %v442_v10 = vmul.f32 0.999, %v186_v0 }
 0x438   :  { %v1210_v25 = vadd.f32 %v954_v9, %v442_v10 }
 0x43d   :  { %v188_v8 = vld [vmem:[%s5828_s6 + $0x3f8] sm:$0xff] }
 0x43e   :  { %1735 = vst [vmem:[%s5836_s14 + $0x700] sm:$0xff] %v1309_v59  ;;  %v444_v11 = vmul.f32 0.999, %v188_v8 }
 0x43f   :  { %1737 = vst [vmem:[%s5836_s14 + $0x710] sm:$0xff] %v1311_v2  ;;  %v696_v2 = vld [vmem:[#allocation2 + $0x3d8] sm:$0xff] }
 0x440   :  { %v1212_v29 = vadd.f32 %v956_v18, %v444_v11  ;;  %v952_v10 = vmul.f32 0.001, %v696_v2  ;;  %v868_v18 = vmul.f32 0.001, %v612_v52  ;;  %v608_v52 = vld [vmem:[#allocation2 + $0x118] sm:$0xff] }
 0x442   :  { %v2595_v41 = vpack.c.bf16 %v1212_v29, %v1210_v25 }
 0x444   :  { %2808 = vmatpush.bf16.msrb.mxu1 %v2595_v41  ;;  %v576_v41 = vld [vmem:[#allocation2 + $0x18] sm:$0xff] }
 0x445   :  { %v832_v31 = vmul.f32 0.001, %v576_v41 }
 0x446   :  { %v102_v17 = vld [vmem:[%s5828_s6 + $0x148] sm:$0xff]  ;;  %v104_v20 = vld [vmem:[%s5828_s6 + $0x158] sm:$0xff] }
 0x447   :  { %v358_v21 = vmul.f32 0.999, %v102_v17  ;;  %1520 = vst [vmem:[%s5836_s14 + $0x48] sm:$0xff] %v1094_v14  ;;  %v360_v26 = vmul.f32 0.999, %v104_v20 }
 0x448   :  { %1522 = vst [vmem:[%s5836_s14 + $0x58] sm:$0xff] %v1096_v15  ;;  %v610_v15 = vld [vmem:[#allocation2 + $0x128] sm:$0xff] }
 0x449   :  { %v1126_v37 = vadd.f32 %v870_v28, %v358_v21  ;;  %v1128_v42 = vadd.f32 %v872_v30, %v360_v26  ;;  %v866_v17 = vmul.f32 0.001, %v610_v15  ;;  %v652_v28 = vld [vmem:[#allocation2 + $0x278] sm:$0xff] }
 0x44b   :  { %v2553_v6 = vpack.c.bf16 %v1128_v42, %v1126_v37 }
 0x44d   :  { %2787 = vmatpush.bf16.msra.mxu3 %v2553_v6  ;;  %v690_v6 = vld [vmem:[#allocation2 + $0x3a8] sm:$0xff] }
 0x44f   :  { %v142_v32 = vld [vmem:[%s5828_s6 + $0x288] sm:$0xff]  ;;  %v144_v33 = vld [vmem:[%s5828_s6 + $0x298] sm:$0xff] }
 0x450   :  { %1636 = vst [vmem:[%s5836_s14 + $0x3e8] sm:$0xff] %v1210_v25  ;;  %v398_v38 = vmul.f32 0.999, %v142_v32  ;;  %v400_v39 = vmul.f32 0.999, %v144_v33 }
 0x451   :  { %1638 = vst [vmem:[%s5836_s14 + $0x3f8] sm:$0xff] %v1212_v29  ;;  %v906_v29 = vmul.f32 0.001, %v650_v23  ;;  %v908_v33 = vmul.f32 0.001, %v652_v28 }
 0x452   :  { %1552 = vst [vmem:[%s5836_s14 + $0x148] sm:$0xff] %v1126_v37  ;;  %v1166_v46 = vadd.f32 %v910_v43, %v398_v38  ;;  %v1168_v7 = vadd.f32 %v912_v44, %v400_v39  ;;  %v830_v44 = vmul.f32 0.001, %v574_v57  ;;  %v764_v57 = vld [vmem:[#allocation2 + $0x5f8] sm:$0xff] }
 0x454   :  { %v2573_v56 = vpack.c.bf16 %v1168_v7, %v1166_v46 }
 0x456   :  { %2798 = vmatpush.bf16.msrb.mxu0 %v2573_v56 }
 0x459   :  { %v66_v36 = vld [vmem:[%s5828_s6 + $0x28] sm:$0xff]  ;;  %v68_v45 = vld [vmem:[%s5828_s6 + $0x38] sm:$0xff] }
 0x45a   :  { %1554 = vst [vmem:[%s5836_s14 + $0x158] sm:$0xff] %v1128_v42  ;;  %v322_v47 = vmul.f32 0.999, %v66_v36  ;;  %v324_v51 = vmul.f32 0.999, %v68_v45 }
 0x45c   :  { %v1090_v63 = vadd.f32 %v834_v53, %v322_v47  ;;  %v1092_v0 = vadd.f32 %v836_v54, %v324_v51  ;;  %v948_v53 = vmul.f32 0.001, %v692_v48 }
 0x45e   :  { %v2535_v13 = vpack.c.bf16 %v1092_v0, %v1090_v63 }
 0x460   :  { %2775 = vmatpush.bf16.msra.mxu2 %v2535_v13 }
 0x461   :  { %v182_v50 = vld [vmem:[%s5828_s6 + $0x3c8] sm:$0xff]  ;;  %v184_v19 = vld [vmem:[%s5828_s6 + $0x3d8] sm:$0xff] }
 0x462   :  { %1592 = vst [vmem:[%s5836_s14 + $0x288] sm:$0xff] %v1166_v46  ;;  %v438_v58 = vmul.f32 0.999, %v182_v50  ;;  %v440_v59 = vmul.f32 0.999, %v184_v19 }
 0x463   :  { %1594 = vst [vmem:[%s5836_s14 + $0x298] sm:$0xff] %v1168_v7  ;;  %v946_v50 = vmul.f32 0.001, %v690_v6  ;;  %v686_v6 = vld [vmem:[#allocation2 + $0x388] sm:$0xff] }
 0x464   :  { %v1206_v14 = vadd.f32 %v950_v3, %v438_v58  ;;  %v1208_v16 = vadd.f32 %v952_v10, %v440_v59  ;;  %v986_v3 = vmul.f32 0.001, %v730_v60  ;;  %v942_v48 = vmul.f32 0.001, %v686_v6  ;;  %v728_v60 = vld [vmem:[#allocation2 + $0x4d8] sm:$0xff] }
 0x466   :  { %v2593_v25 = vpack.c.bf16 %v1208_v16, %v1206_v14 }
 0x468   :  { %2809 = vmatpush.bf16.msrb.mxu1 %v2593_v25  ;;  %v646_v25 = vld [vmem:[#allocation2 + $0x248] sm:$0xff] }
 0x46a   :  { %v98_v4 = vld [vmem:[%s5828_s6 + $0x128] sm:$0xff]  ;;  %v100_v8 = vld [vmem:[%s5828_s6 + $0x138] sm:$0xff] }
 0x46b   :  { %v354_v11 = vmul.f32 0.999, %v98_v4  ;;  %v356_v12 = vmul.f32 0.999, %v100_v8  ;;  %1516 = vst [vmem:[%s5836_s14 + $0x28] sm:$0xff] %v1090_v63  ;;  %v732_v63 = vld [vmem:[#allocation2 + $0x4f8] sm:$0xff] }
 0x46c   :  { %v988_v4 = vmul.f32 0.001, %v732_v63 }
 0x46d   :  { %v1122_v26 = vadd.f32 %v866_v17, %v354_v11  ;;  %v1124_v27 = vadd.f32 %v868_v18, %v356_v12  ;;  %v606_v12 = vld [vmem:[#allocation2 + $0x108] sm:$0xff]  ;;  %v864_v18 = vmul.f32 0.001, %v608_v52 }
 0x46f   :  { %v2551_v38 = vpack.c.bf16 %v1124_v27, %v1122_v26 }
 0x471   :  { %2788 = vmatpush.bf16.msra.mxu3 %v2551_v38 }
 0x472   :  { %v138_v9 = vld [vmem:[%s5828_s6 + $0x268] sm:$0xff] }
 0x473   :  { %1518 = vst [vmem:[%s5836_s14 + $0x38] sm:$0xff] %v1092_v0  ;;  %v394_v21 = vmul.f32 0.999, %v138_v9  ;;  %v862_v9 = vmul.f32 0.001, %v606_v12  ;;  %v642_v12 = vld [vmem:[#allocation2 + $0x228] sm:$0xff] }
 0x475   :  { %v1162_v39 = vadd.f32 %v906_v29, %v394_v21  ;;  %v902_v29 = vmul.f32 0.001, %v646_v25 }
 0x47a   :  { %v140_v20 = vld [vmem:[%s5828_s6 + $0x278] sm:$0xff] }
 0x47b   :  { %1632 = vst [vmem:[%s5836_s14 + $0x3c8] sm:$0xff] %v1206_v14  ;;  %v396_v22 = vmul.f32 0.999, %v140_v20 }
 0x47c   :  { %1634 = vst [vmem:[%s5836_s14 + $0x3d8] sm:$0xff] %v1208_v16 }
 0x47d   :  { %v1164_v43 = vadd.f32 %v908_v33, %v396_v22 }
 0x47f   :  { %v2571_v46 = vpack.c.bf16 %v1164_v43, %v1162_v39 }
 0x481   :  { %2799 = vmatpush.bf16.msrb.mxu0 %v2571_v46  ;;  %v688_v46 = vld [vmem:[#allocation2 + $0x398] sm:$0xff] }
 0x483   :  { %v62_v30 = vld [vmem:[%s5828_s6 + $0x8] sm:$0xff]  ;;  %v64_v32 = vld [vmem:[%s5828_s6 + $0x18] sm:$0xff] }
 0x484   :  { %v318_v34 = vmul.f32 0.999, %v62_v30  ;;  %v320_v37 = vmul.f32 0.999, %v64_v32  ;;  %1548 = vst [vmem:[%s5836_s14 + $0x128] sm:$0xff] %v1122_v26  ;;  %v648_v26 = vld [vmem:[#allocation2 + $0x258] sm:$0xff] }
 0x485   :  { %v904_v30 = vmul.f32 0.001, %v648_v26 }
 0x486   :  { %v1086_v7 = vadd.f32 %v830_v44, %v318_v34  ;;  %v1088_v47 = vadd.f32 %v832_v31, %v320_v37  ;;  %v762_v37 = vld [vmem:[#allocation2 + $0x5e8] sm:$0xff]  ;;  %v1020_v44 = vmul.f32 0.001, %v764_v57 }
 0x487   :  { %v1018_v41 = vmul.f32 0.001, %v762_v37  ;;  %v684_v37 = vld [vmem:[#allocation2 + $0x378] sm:$0xff] }
 0x488   :  { %v2533_v58 = vpack.c.bf16 %v1088_v47, %v1086_v7  ;;  %v940_v57 = vmul.f32 0.001, %v684_v37 }
 0x48a   :  { %2776 = vmatpush.bf16.msra.mxu2 %v2533_v58 }
 0x48b   :  { %v178_v42 = vld [vmem:[%s5828_s6 + $0x3a8] sm:$0xff] }
 0x48c   :  { %1550 = vst [vmem:[%s5836_s14 + $0x138] sm:$0xff] %v1124_v27  ;;  %v434_v45 = vmul.f32 0.999, %v178_v42 }
 0x48d   :  { %2777 = vmatmul.bf16.vlgmr.msra.gmra.mxu2 %v4335_v35 }
 0x48e   :  { %v1202_v59 = vadd.f32 %v946_v50, %v434_v45  ;;  %v944_v50 = vmul.f32 0.001, %v688_v46 }
 0x493   :  { %v180_v36 = vld [vmem:[%s5828_s6 + $0x3b8] sm:$0xff] }
 0x494   :  { %1588 = vst [vmem:[%s5836_s14 + $0x268] sm:$0xff] %v1162_v39  ;;  %v436_v5 = vmul.f32 0.999, %v180_v36 }
 0x495   :  { %1590 = vst [vmem:[%s5836_s14 + $0x278] sm:$0xff] %v1164_v43 }
 0x496   :  { %v1204_v2 = vadd.f32 %v948_v53, %v436_v5 }
 0x498   :  { %v2591_v13 = vpack.c.bf16 %v1204_v2, %v1202_v59 }
 0x49a   :  { %2810 = vmatpush.bf16.msrb.mxu1 %v2591_v13  ;;  %v644_v13 = vld [vmem:[#allocation2 + $0x238] sm:$0xff] }
 0x49b   :  { %v900_v52 = vmul.f32 0.001, %v644_v13 }
 0x49c   :  { %v218_v19 = vld [vmem:[%s5828_s6 + $0x4e8] sm:$0xff]  ;;  %v220_v51 = vld [vmem:[%s5828_s6 + $0x4f8] sm:$0xff] }
 0x49d   :  { %v474_v54 = vmul.f32 0.999, %v218_v19  ;;  %v476_v56 = vmul.f32 0.999, %v220_v51  ;;  %1512 = vst [vmem:[%s5836_s14 + $0x8] sm:$0xff] %v1086_v7 }
 0x49f   :  { %v1242_v14 = vadd.f32 %v986_v3, %v474_v54  ;;  %v1244_v15 = vadd.f32 %v988_v4, %v476_v56  ;;  %v726_v54 = vld [vmem:[#allocation2 + $0x4c8] sm:$0xff]  ;;  %v984_v3 = vmul.f32 0.001, %v728_v60 }
 0x4a0   :  { %v982_v63 = vmul.f32 0.001, %v726_v54  ;;  %v640_v54 = vld [vmem:[#allocation2 + $0x218] sm:$0xff] }
 0x4a1   :  { %v2611_v22 = vpack.c.bf16 %v1244_v15, %v1242_v14  ;;  %v896_v60 = vmul.f32 0.001, %v640_v54 }
 0x4a3   :  { %2821 = vmatpush.bf16.msrb.mxu2 %v2611_v22 }
 0x4a4   :  { %v94_v0 = vld [vmem:[%s5828_s6 + $0x108] sm:$0xff] }
 0x4a5   :  { %1514 = vst [vmem:[%s5836_s14 + $0x18] sm:$0xff] %v1088_v47  ;;  %v350_v10 = vmul.f32 0.999, %v94_v0 }
 0x4a7   :  { %v1118_v23 = vadd.f32 %v862_v9, %v350_v10 }
 0x4ac   :  { %v96_v8 = vld [vmem:[%s5828_s6 + $0x118] sm:$0xff] }
 0x4ad   :  { %1628 = vst [vmem:[%s5836_s14 + $0x3a8] sm:$0xff] %v1202_v59  ;;  %v352_v11 = vmul.f32 0.999, %v96_v8 }
 0x4ae   :  { %1630 = vst [vmem:[%s5836_s14 + $0x3b8] sm:$0xff] %v1204_v2 }
 0x4af   :  { %v1120_v28 = vadd.f32 %v864_v18, %v352_v11  ;;  %v758_v18 = vld [vmem:[#allocation2 + $0x5c8] sm:$0xff] }
 0x4b0   :  { %v1014_v25 = vmul.f32 0.001, %v758_v18  ;;  %v796_v18 = vld [vmem:[#allocation2 + $0x6f8] sm:$0xff] }
 0x4b1   :  { %v2549_v35 = vpack.c.bf16 %v1120_v28, %v1118_v23 }
 0x4b3   :  { %2789 = vmatpush.bf16.msra.mxu3 %v2549_v35 }
 0x4b5   :  { %v134_v16 = vld [vmem:[%s5828_s6 + $0x248] sm:$0xff]  ;;  %v136_v17 = vld [vmem:[%s5828_s6 + $0x258] sm:$0xff] }
 0x4b6   :  { %v390_v20 = vmul.f32 0.999, %v134_v16  ;;  %v392_v21 = vmul.f32 0.999, %v136_v17  ;;  %1668 = vst [vmem:[%s5836_s14 + $0x4e8] sm:$0xff] %v1242_v14  ;;  %2790 = vmatmul.bf16.vlgmr.msra.gmra.mxu3 %v4365_v1 }
 0x4b8   :  { %v1158_v38 = vadd.f32 %v902_v29, %v390_v20  ;;  %v1160_v39 = vadd.f32 %v904_v30, %v392_v21 }
 0x4ba   :  { %v2569_v45 = vpack.c.bf16 %v1160_v39, %v1158_v38 }
 0x4bc   :  { %2800 = vmatpush.bf16.msrb.mxu0 %v2569_v45 }
 0x4bd   :  { %v250_v27 = vld [vmem:[%s5828_s6 + $0x5e8] sm:$0xff] }
 0x4be   :  { %1670 = vst [vmem:[%s5836_s14 + $0x4f8] sm:$0xff] %v1244_v15  ;;  %v506_v33 = vmul.f32 0.999, %v250_v27  ;;  %v898_v15 = vmul.f32 0.001, %v642_v12 }
 0x4c0   :  { %v1274_v5 = vadd.f32 %v1018_v41, %v506_v33 }
 0x4c5   :  { %v252_v32 = vld [vmem:[%s5828_s6 + $0x5f8] sm:$0xff] }
 0x4c6   :  { %1544 = vst [vmem:[%s5836_s14 + $0x108] sm:$0xff] %v1118_v23  ;;  %v508_v34 = vmul.f32 0.999, %v252_v32  ;;  %v760_v23 = vld [vmem:[#allocation2 + $0x5d8] sm:$0xff] }
 0x4c7   :  { %1546 = vst [vmem:[%s5836_s14 + $0x118] sm:$0xff] %v1120_v28  ;;  %v1016_v28 = vmul.f32 0.001, %v760_v23  ;;  %v1052_v23 = vmul.f32 0.001, %v796_v18 }
 0x4c8   :  { %v1276_v47 = vadd.f32 %v1020_v44, %v508_v34  ;;  %v682_v34 = vld [vmem:[#allocation2 + $0x368] sm:$0xff] }
 0x4c9   :  { %v722_v44 = vld [vmem:[#allocation2 + $0x4a8] sm:$0xff] }
 0x4ca   :  { %v2627_v56 = vpack.c.bf16 %v1276_v47, %v1274_v5  ;;  %v978_v6 = vmul.f32 0.001, %v722_v44  ;;  %v720_v44 = vld [vmem:[#allocation2 + $0x498] sm:$0xff] }
 0x4cc   :  { %2834 = vmatpush.bf16.msrb.mxu3 %v2627_v56 }
 0x4ce   :  { %v174_v42 = vld [vmem:[%s5828_s6 + $0x388] sm:$0xff]  ;;  %v176_v43 = vld [vmem:[%s5828_s6 + $0x398] sm:$0xff] }
 0x4cf   :  { %v430_v31 = vmul.f32 0.999, %v174_v42  ;;  %v432_v36 = vmul.f32 0.999, %v176_v43  ;;  %1584 = vst [vmem:[%s5836_s14 + $0x248] sm:$0xff] %v1158_v38 }
 0x4d1   :  { %v1198_v58 = vadd.f32 %v942_v48, %v430_v31  ;;  %v1200_v59 = vadd.f32 %v944_v50, %v432_v36 }
 0x4d3   :  { %v2589_v10 = vpack.c.bf16 %v1200_v59, %v1198_v58 }
 0x4d5   :  { %2811 = vmatpush.bf16.msrb.mxu1 %v2589_v10 }
 0x4d6   :  { %v214_v7 = vld [vmem:[%s5828_s6 + $0x4c8] sm:$0xff] }
 0x4d7   :  { %1586 = vst [vmem:[%s5836_s14 + $0x258] sm:$0xff] %v1160_v39  ;;  %v470_v51 = vmul.f32 0.999, %v214_v7  ;;  %v938_v39 = vmul.f32 0.001, %v682_v34 }
 0x4d9   :  { %v1238_v11 = vadd.f32 %v982_v63, %v470_v51 }
 0x4de   :  { %v216_v19 = vld [vmem:[%s5828_s6 + $0x4d8] sm:$0xff] }
 0x4df   :  { %1700 = vst [vmem:[%s5836_s14 + $0x5e8] sm:$0xff] %v1274_v5  ;;  %v472_v53 = vmul.f32 0.999, %v216_v19  ;;  %v724_v5 = vld [vmem:[#allocation2 + $0x4b8] sm:$0xff] }
 0x4e0   :  { %1702 = vst [vmem:[%s5836_s14 + $0x5f8] sm:$0xff] %v1276_v47  ;;  %v980_v47 = vmul.f32 0.001, %v724_v5  ;;  %v976_v5 = vmul.f32 0.001, %v720_v44 }
 0x4e1   :  { %v1240_v1 = vadd.f32 %v984_v3, %v472_v53  ;;  %v638_v53 = vld [vmem:[#allocation2 + $0x208] sm:$0xff] }
 0x4e2   :  { %v754_v3 = vld [vmem:[#allocation2 + $0x5a8] sm:$0xff] }
 0x4e3   :  { %v2609_v20 = vpack.c.bf16 %v1240_v1, %v1238_v11  ;;  %v1010_v12 = vmul.f32 0.001, %v754_v3 }
 0x4e5   :  { %2822 = vmatpush.bf16.msrb.mxu2 %v2609_v20 }
 0x4e7   :  { %v130_v0 = vld [vmem:[%s5828_s6 + $0x228] sm:$0xff]  ;;  %v132_v2 = vld [vmem:[%s5828_s6 + $0x238] sm:$0xff] }
 0x4e8   :  { %v386_v4 = vmul.f32 0.999, %v130_v0  ;;  %v388_v8 = vmul.f32 0.999, %v132_v2  ;;  %1624 = vst [vmem:[%s5836_s14 + $0x388] sm:$0xff] %v1198_v58 }
 0x4ea   :  { %v1154_v21 = vadd.f32 %v898_v15, %v386_v4  ;;  %v1156_v22 = vadd.f32 %v900_v52, %v388_v8 }
 0x4ec   :  { %v2567_v32 = vpack.c.bf16 %v1156_v22, %v1154_v21 }
 0x4ee   :  { %2801 = vmatpush.bf16.msrb.mxu0 %v2567_v32 }
 0x4ef   :  { %v246_v14 = vld [vmem:[%s5828_s6 + $0x5c8] sm:$0xff] }
 0x4f0   :  { %1626 = vst [vmem:[%s5836_s14 + $0x398] sm:$0xff] %v1200_v59  ;;  %v502_v16 = vmul.f32 0.999, %v246_v14  ;;  %v894_v59 = vmul.f32 0.001, %v638_v53 }
 0x4f2   :  { %v1270_v33 = vadd.f32 %v1014_v25, %v502_v16 }
 0x4f7   :  { %v248_v9 = vld [vmem:[%s5828_s6 + $0x5d8] sm:$0xff] }
 0x4f8   :  { %1664 = vst [vmem:[%s5836_s14 + $0x4c8] sm:$0xff] %v1238_v11  ;;  %v504_v17 = vmul.f32 0.999, %v248_v9  ;;  %v756_v11 = vld [vmem:[#allocation2 + $0x5b8] sm:$0xff] }
 0x4f9   :  { %1666 = vst [vmem:[%s5836_s14 + $0x4d8] sm:$0xff] %v1240_v1  ;;  %v1012_v1 = vmul.f32 0.001, %v756_v11 }
 0x4fa   :  { %v1272_v38 = vadd.f32 %v1016_v28, %v504_v17  ;;  %v794_v17 = vld [vmem:[#allocation2 + $0x6e8] sm:$0xff] }
 0x4fb   :  { %v678_v28 = vld [vmem:[#allocation2 + $0x348] sm:$0xff] }
 0x4fc   :  { %v2625_v31 = vpack.c.bf16 %v1272_v38, %v1270_v33  ;;  %v934_v34 = vmul.f32 0.001, %v678_v28 }
 0x4fe   :  { %2835 = vmatpush.bf16.msrb.mxu3 %v2625_v31 }
 0x500   :  { %v170_v26 = vld [vmem:[%s5828_s6 + $0x368] sm:$0xff]  ;;  %v172_v27 = vld [vmem:[%s5828_s6 + $0x378] sm:$0xff] }
 0x501   :  { %v426_v29 = vmul.f32 0.999, %v170_v26  ;;  %v428_v30 = vmul.f32 0.999, %v172_v27  ;;  %1580 = vst [vmem:[%s5836_s14 + $0x228] sm:$0xff] %v1154_v21 }
 0x503   :  { %v1194_v36 = vadd.f32 %v938_v39, %v426_v29  ;;  %v1196_v45 = vadd.f32 %v940_v57, %v428_v30 }
 0x505   :  { %v2587_v19 = vpack.c.bf16 %v1196_v45, %v1194_v36 }
 0x507   :  { %2812 = vmatpush.bf16.msrb.mxu1 %v2587_v19  ;;  %v752_v19 = vld [vmem:[#allocation2 + $0x598] sm:$0xff] }
 0x508   :  { %v210_v35 = vld [vmem:[%s5828_s6 + $0x4a8] sm:$0xff] }
 0x509   :  { %1582 = vst [vmem:[%s5836_s14 + $0x238] sm:$0xff] %v1156_v22  ;;  %v466_v42 = vmul.f32 0.999, %v210_v35  ;;  %v1050_v22 = vmul.f32 0.001, %v794_v17 }
 0x50b   :  { %v1234_v51 = vadd.f32 %v978_v6, %v466_v42 }
 0x510   :  { %v212_v41 = vld [vmem:[%s5828_s6 + $0x4b8] sm:$0xff] }
 0x511   :  { %1696 = vst [vmem:[%s5836_s14 + $0x5c8] sm:$0xff] %v1270_v33  ;;  %v468_v43 = vmul.f32 0.999, %v212_v41  ;;  %v680_v33 = vld [vmem:[#allocation2 + $0x358] sm:$0xff] }
 0x512   :  { %1698 = vst [vmem:[%s5836_s14 + $0x5d8] sm:$0xff] %v1272_v38  ;;  %v936_v38 = vmul.f32 0.001, %v680_v33 }
 0x513   :  { %v1236_v58 = vadd.f32 %v980_v47, %v468_v43  ;;  %v718_v43 = vld [vmem:[#allocation2 + $0x488] sm:$0xff] }
 0x514   :  { %v750_v47 = vld [vmem:[#allocation2 + $0x588] sm:$0xff] }
 0x515   :  { %v2607_v4 = vpack.c.bf16 %v1236_v58, %v1234_v51 }
 0x517   :  { %2823 = vmatpush.bf16.msrb.mxu2 %v2607_v4 }
 0x519   :  { %v126_v46 = vld [vmem:[%s5828_s6 + $0x208] sm:$0xff]  ;;  %v128_v7 = vld [vmem:[%s5828_s6 + $0x218] sm:$0xff] }
 0x51a   :  { %v382_v48 = vmul.f32 0.999, %v126_v46  ;;  %v384_v50 = vmul.f32 0.999, %v128_v7  ;;  %1620 = vst [vmem:[%s5836_s14 + $0x368] sm:$0xff] %v1194_v36 }
 0x51c   :  { %v1150_v8 = vadd.f32 %v894_v59, %v382_v48  ;;  %v1152_v10 = vadd.f32 %v896_v60, %v384_v50 }
 0x51e   :  { %v2565_v9 = vpack.c.bf16 %v1152_v10, %v1150_v8 }
 0x520   :  { %2802 = vmatpush.bf16.msrb.mxu0 %v2565_v9  ;;  %v676_v9 = vld [vmem:[#allocation2 + $0x338] sm:$0xff] }
 0x521   :  { %v242_v56 = vld [vmem:[%s5828_s6 + $0x5a8] sm:$0xff] }
 0x522   :  { %1622 = vst [vmem:[%s5836_s14 + $0x378] sm:$0xff] %v1196_v45  ;;  %v498_v0 = vmul.f32 0.999, %v242_v56  ;;  %v974_v45 = vmul.f32 0.001, %v718_v43 }
 0x523   :  { %2803 = vmatmul.bf16.vlgmr.msrb.gmra.mxu0 %v4491_v49  ;;  %v1008_v56 = vmul.f32 0.001, %v752_v19 }
 0x524   :  { %v1266_v16 = vadd.f32 %v1010_v12, %v498_v0  ;;  %v790_v0 = vld [vmem:[#allocation2 + $0x6c8] sm:$0xff] }
 0x529   :  { %v244_v63 = vld [vmem:[%s5828_s6 + $0x5b8] sm:$0xff] }
 0x52a   :  { %1660 = vst [vmem:[%s5836_s14 + $0x4a8] sm:$0xff] %v1234_v51  ;;  %v500_v2 = vmul.f32 0.999, %v244_v63  ;;  %v1006_v51 = vmul.f32 0.001, %v750_v47 }
 0x52b   :  { %1662 = vst [vmem:[%s5836_s14 + $0x4b8] sm:$0xff] %v1236_v58 }
 0x52c   :  { %v1268_v21 = vadd.f32 %v1012_v1, %v500_v2  ;;  %v792_v2 = vld [vmem:[#allocation2 + $0x6d8] sm:$0xff] }
 0x52e   :  { %v2623_v29 = vpack.c.bf16 %v1268_v21, %v1266_v16 }
 0x530   :  { %2836 = vmatpush.bf16.msrb.mxu3 %v2623_v29 }
 0x532   :  { %v282_v13 = vld [vmem:[%s5828_s6 + $0x6e8] sm:$0xff]  ;;  %v284_v14 = vld [vmem:[%s5828_s6 + $0x6f8] sm:$0xff] }
 0x533   :  { %v538_v15 = vmul.f32 0.999, %v282_v13  ;;  %v540_v52 = vmul.f32 0.999, %v284_v14  ;;  %1576 = vst [vmem:[%s5836_s14 + $0x208] sm:$0xff] %v1150_v8  ;;  %v674_v14 = vld [vmem:[#allocation2 + $0x328] sm:$0xff] }
 0x534   :  { %v1046_v8 = vmul.f32 0.001, %v790_v0 }
 0x535   :  { %v1306_v30 = vadd.f32 %v1050_v22, %v538_v15  ;;  %v1308_v32 = vadd.f32 %v1052_v23, %v540_v52 }
 0x537   :  { %v2643_v41 = vpack.c.bf16 %v1308_v32, %v1306_v30 }
 0x539   :  { %2847 = vmatpush.bf16.msra.mxu0 %v2643_v41  ;;  %v748_v41 = vld [vmem:[#allocation2 + $0x578] sm:$0xff] }
 0x53a   :  { %v166_v20 = vld [vmem:[%s5828_s6 + $0x348] sm:$0xff] }
 0x53b   :  { %1578 = vst [vmem:[%s5836_s14 + $0x218] sm:$0xff] %v1152_v10  ;;  %v422_v26 = vmul.f32 0.999, %v166_v20  ;;  %v1048_v10 = vmul.f32 0.001, %v792_v2 }
 0x53c   :  { %v932_v20 = vmul.f32 0.001, %v676_v9 }
 0x53d   :  { %v1190_v42 = vadd.f32 %v934_v34, %v422_v26  ;;  %v714_v26 = vld [vmem:[#allocation2 + $0x468] sm:$0xff] }
 0x542   :  { %v168_v25 = vld [vmem:[%s5828_s6 + $0x358] sm:$0xff] }
 0x543   :  { %1692 = vst [vmem:[%s5836_s14 + $0x5a8] sm:$0xff] %v1266_v16  ;;  %v424_v27 = vmul.f32 0.999, %v168_v25  ;;  %v930_v16 = vmul.f32 0.001, %v674_v14  ;;  %v712_v14 = vld [vmem:[#allocation2 + $0x458] sm:$0xff] }
 0x544   :  { %1694 = vst [vmem:[%s5836_s14 + $0x5b8] sm:$0xff] %v1268_v21  ;;  %v968_v9 = vmul.f32 0.001, %v712_v14 }
 0x545   :  { %v1192_v36 = vadd.f32 %v936_v38, %v424_v27  ;;  %v716_v27 = vld [vmem:[#allocation2 + $0x478] sm:$0xff] }
 0x547   :  { %v2585_v49 = vpack.c.bf16 %v1192_v36, %v1190_v42 }
 0x549   :  { %2813 = vmatpush.bf16.msrb.mxu1 %v2585_v49 }
 0x54b   :  { %v206_v37 = vld [vmem:[%s5828_s6 + $0x488] sm:$0xff]  ;;  %v208_v35 = vld [vmem:[%s5828_s6 + $0x498] sm:$0xff] }
 0x54c   :  { %v462_v39 = vmul.f32 0.999, %v206_v37  ;;  %v464_v57 = vmul.f32 0.999, %v208_v35  ;;  %1732 = vst [vmem:[%s5836_s14 + $0x6e8] sm:$0xff] %v1306_v30  ;;  %v746_v35 = vld [vmem:[#allocation2 + $0x568] sm:$0xff] }
 0x54d   :  { %v970_v30 = vmul.f32 0.001, %v714_v26 }
 0x54e   :  { %v1230_v48 = vadd.f32 %v974_v45, %v462_v39  ;;  %v1232_v50 = vadd.f32 %v976_v5, %v464_v57 }
 0x550   :  { %v2605_v60 = vpack.c.bf16 %v1232_v50, %v1230_v48 }
 0x552   :  { %2824 = vmatpush.bf16.msrb.mxu2 %v2605_v60  ;;  %v672_v60 = vld [vmem:[#allocation2 + $0x318] sm:$0xff] }
 0x553   :  { %v238_v31 = vld [vmem:[%s5828_s6 + $0x588] sm:$0xff] }
 0x554   :  { %1734 = vst [vmem:[%s5836_s14 + $0x6f8] sm:$0xff] %v1308_v32  ;;  %v494_v46 = vmul.f32 0.999, %v238_v31  ;;  %v972_v32 = vmul.f32 0.001, %v716_v27 }
 0x555   :  { %v1004_v31 = vmul.f32 0.001, %v748_v41 }
 0x556   :  { %v1262_v63 = vadd.f32 %v1006_v51, %v494_v46  ;;  %v786_v46 = vld [vmem:[#allocation2 + $0x6a8] sm:$0xff] }
 0x55b   :  { %v240_v6 = vld [vmem:[%s5828_s6 + $0x598] sm:$0xff] }
 0x55c   :  { %1616 = vst [vmem:[%s5836_s14 + $0x348] sm:$0xff] %v1190_v42  ;;  %v496_v7 = vmul.f32 0.999, %v240_v6  ;;  %v1002_v42 = vmul.f32 0.001, %v746_v35  ;;  %v744_v35 = vld [vmem:[#allocation2 + $0x558] sm:$0xff] }
 0x55d   :  { %1618 = vst [vmem:[%s5836_s14 + $0x358] sm:$0xff] %v1192_v36  ;;  %v1000_v41 = vmul.f32 0.001, %v744_v35 }
 0x55e   :  { %v1264_v4 = vadd.f32 %v1008_v56, %v496_v7  ;;  %v788_v7 = vld [vmem:[#allocation2 + $0x6b8] sm:$0xff] }
 0x560   :  { %v2621_v1 = vpack.c.bf16 %v1264_v4, %v1262_v63 }
 0x562   :  { %2837 = vmatpush.bf16.msrb.mxu3 %v2621_v1 }
 0x564   :  { %v278_v53 = vld [vmem:[%s5828_s6 + $0x6c8] sm:$0xff]  ;;  %v280_v54 = vld [vmem:[%s5828_s6 + $0x6d8] sm:$0xff] }
 0x565   :  { %v534_v58 = vmul.f32 0.999, %v278_v53  ;;  %v536_v59 = vmul.f32 0.999, %v280_v54  ;;  %1656 = vst [vmem:[%s5836_s14 + $0x488] sm:$0xff] %v1230_v48  ;;  %v670_v54 = vld [vmem:[#allocation2 + $0x308] sm:$0xff] }
 0x566   :  { %v1042_v48 = vmul.f32 0.001, %v786_v46  ;;  %v784_v46 = vld [vmem:[#allocation2 + $0x698] sm:$0xff] }
 0x567   :  { %v1302_v15 = vadd.f32 %v1046_v8, %v534_v58  ;;  %v1304_v52 = vadd.f32 %v1048_v10, %v536_v59 }
 0x569   :  { %v2641_v23 = vpack.c.bf16 %v1304_v52, %v1302_v15 }
 0x56b   :  { %2848 = vmatpush.bf16.msra.mxu0 %v2641_v23 }
 0x56c   :  { %v162_v3 = vld [vmem:[%s5828_s6 + $0x328] sm:$0xff] }
 0x56d   :  { %1658 = vst [vmem:[%s5836_s14 + $0x498] sm:$0xff] %v1232_v50  ;;  %v418_v12 = vmul.f32 0.999, %v162_v3  ;;  %v1044_v50 = vmul.f32 0.001, %v788_v7  ;;  %v5106_v3 = vpop.f32.mrf.mxu0 }
 0x56f   :  { %v1186_v25 = vadd.f32 %v930_v16, %v418_v12 }
 0x574   :  { %v164_v11 = vld [vmem:[%s5828_s6 + $0x338] sm:$0xff] }
 0x575   :  { %1688 = vst [vmem:[%s5836_s14 + $0x588] sm:$0xff] %v1262_v63  ;;  %v420_v13 = vmul.f32 0.999, %v164_v11  ;;  %v926_v63 = vmul.f32 0.001, %v670_v54  ;;  %v706_v54 = vld [vmem:[#allocation2 + $0x428] sm:$0xff] }
 0x576   :  { %1690 = vst [vmem:[%s5836_s14 + $0x598] sm:$0xff] %v1264_v4  ;;  %v928_v4 = vmul.f32 0.001, %v672_v60 }
 0x577   :  { %v1188_v29 = vadd.f32 %v932_v20, %v420_v13  ;;  %v710_v13 = vld [vmem:[#allocation2 + $0x448] sm:$0xff] }
 0x578   :  { %v826_v20 = vld [vmem:[#allocation2 + $0x7e8] sm:$0xff] }
 0x579   :  { %v2583_v38 = vpack.c.bf16 %v1188_v29, %v1186_v25  ;;  %v1082_v26 = vmul.f32 0.001, %v826_v20  ;;  %v740_v20 = vld [vmem:[#allocation2 + $0x538] sm:$0xff] }
 0x57b   :  { %2814 = vmatpush.bf16.msrb.mxu1 %v2583_v38 }
 0x57d   :  { %v202_v17 = vld [vmem:[%s5828_s6 + $0x468] sm:$0xff]  ;;  %v204_v18 = vld [vmem:[%s5828_s6 + $0x478] sm:$0xff] }
 0x57e   :  { %v458_v21 = vmul.f32 0.999, %v202_v17  ;;  %v460_v22 = vmul.f32 0.999, %v204_v18  ;;  %1728 = vst [vmem:[%s5836_s14 + $0x6c8] sm:$0xff] %v1302_v15 }
 0x580   :  { %v1226_v39 = vadd.f32 %v970_v30, %v458_v21  ;;  %v1228_v57 = vadd.f32 %v972_v32, %v460_v22 }
 0x582   :  { %v2603_v5 = vpack.c.bf16 %v1228_v57, %v1226_v39 }
 0x584   :  { %2825 = vmatpush.bf16.msrb.mxu2 %v2603_v5 }
 0x585   :  { %v234_v28 = vld [vmem:[%s5828_s6 + $0x568] sm:$0xff] }
 0x586   :  { %1730 = vst [vmem:[%s5836_s14 + $0x6d8] sm:$0xff] %v1304_v52  ;;  %v490_v34 = vmul.f32 0.999, %v234_v28  ;;  %v966_v52 = vmul.f32 0.001, %v710_v13 }
 0x588   :  { %v1258_v6 = vadd.f32 %v1002_v42, %v490_v34 }
 0x58d   :  { %v236_v33 = vld [vmem:[%s5828_s6 + $0x578] sm:$0xff] }
 0x58e   :  { %1612 = vst [vmem:[%s5836_s14 + $0x328] sm:$0xff] %v1186_v25  ;;  %v492_v37 = vmul.f32 0.999, %v236_v33  ;;  %v828_v25 = vld [vmem:[#allocation2 + $0x7f8] sm:$0xff] }
 0x58f   :  { %1614 = vst [vmem:[%s5836_s14 + $0x338] sm:$0xff] %v1188_v29  ;;  %v1084_v29 = vmul.f32 0.001, %v828_v25  ;;  %v996_v25 = vmul.f32 0.001, %v740_v20 }
 0x590   :  { %v1260_v49 = vadd.f32 %v1004_v31, %v492_v37  ;;  %v742_v37 = vld [vmem:[#allocation2 + $0x548] sm:$0xff] }
 0x592   :  { %v2619_v56 = vpack.c.bf16 %v1260_v49, %v1258_v6 }
 0x594   :  { %2838 = vmatpush.bf16.msrb.mxu3 %v2619_v56  ;;  %v708_v56 = vld [vmem:[#allocation2 + $0x438] sm:$0xff] }
 0x595   :  { %v964_v60 = vmul.f32 0.001, %v708_v56 }
 0x596   :  { %v274_v43 = vld [vmem:[%s5828_s6 + $0x6a8] sm:$0xff]  ;;  %v276_v44 = vld [vmem:[%s5828_s6 + $0x6b8] sm:$0xff] }
 0x597   :  { %v530_v36 = vmul.f32 0.999, %v274_v43  ;;  %v532_v45 = vmul.f32 0.999, %v276_v44  ;;  %1652 = vst [vmem:[%s5836_s14 + $0x468] sm:$0xff] %v1226_v39  ;;  %v2486_v43 = vpop.f32.mrf.mxu0 }
 0x599   :  { %v1298_v58 = vadd.f32 %v1042_v48, %v530_v36  ;;  %v1300_v59 = vadd.f32 %v1044_v50, %v532_v45  ;;  %v782_v36 = vld [vmem:[#allocation2 + $0x688] sm:$0xff]  ;;  %v1040_v48 = vmul.f32 0.001, %v784_v46 }
 0x59a   :  { %v1038_v7 = vmul.f32 0.001, %v782_v36 }
 0x59b   :  { %v2639_v11 = vpack.c.bf16 %v1300_v59, %v1298_v58 }
 0x59d   :  { %2849 = vmatpush.bf16.msra.mxu0 %v2639_v11 }
 0x59e   :  { %v158_v47 = vld [vmem:[%s5828_s6 + $0x308] sm:$0xff] }
 0x59f   :  { %1654 = vst [vmem:[%s5836_s14 + $0x478] sm:$0xff] %v1228_v57  ;;  %v414_v51 = vmul.f32 0.999, %v158_v47  ;;  %v998_v57 = vmul.f32 0.001, %v742_v37 }
 0x5a1   :  { %v1182_v12 = vadd.f32 %v926_v63, %v414_v51 }
 0x5a6   :  { %v160_v19 = vld [vmem:[%s5828_s6 + $0x318] sm:$0xff] }
 0x5a7   :  { %1684 = vst [vmem:[%s5836_s14 + $0x568] sm:$0xff] %v1258_v6  ;;  %v416_v53 = vmul.f32 0.999, %v160_v19 }
 0x5a8   :  { %1686 = vst [vmem:[%s5836_s14 + $0x578] sm:$0xff] %v1260_v49 }
 0x5a9   :  { %v1184_v15 = vadd.f32 %v928_v4, %v416_v53  ;;  %v822_v4 = vld [vmem:[#allocation2 + $0x7c8] sm:$0xff] }
 0x5aa   :  { %v1078_v13 = vmul.f32 0.001, %v822_v4  ;;  %v736_v4 = vld [vmem:[#allocation2 + $0x518] sm:$0xff] }
 0x5ab   :  { %v2581_v21 = vpack.c.bf16 %v1184_v15, %v1182_v12 }
 0x5ad   :  { %2815 = vmatpush.bf16.msrb.mxu1 %v2581_v21 }
 0x5af   :  { %v198_v0 = vld [vmem:[%s5828_s6 + $0x448] sm:$0xff]  ;;  %v200_v2 = vld [vmem:[%s5828_s6 + $0x458] sm:$0xff] }
 0x5b0   :  { %v454_v8 = vmul.f32 0.999, %v198_v0  ;;  %v456_v10 = vmul.f32 0.999, %v200_v2  ;;  %1724 = vst [vmem:[%s5836_s14 + $0x6a8] sm:$0xff] %v1298_v58  ;;  %2816 = vmatmul.bf16.vlgmr.msrb.gmra.mxu1 %v4521_v55 }
 0x5b2   :  { %v1222_v22 = vadd.f32 %v966_v52, %v454_v8  ;;  %v1224_v23 = vadd.f32 %v968_v9, %v456_v10 }
 0x5b4   :  { %v2601_v33 = vpack.c.bf16 %v1224_v23, %v1222_v22 }
 0x5b6   :  { %2826 = vmatpush.bf16.msrb.mxu2 %v2601_v33 }
 0x5b7   :  { %v314_v1 = vld [vmem:[%s5828_s6 + $0x7e8] sm:$0xff] }
 0x5b8   :  { %1726 = vst [vmem:[%s5836_s14 + $0x6b8] sm:$0xff] %v1300_v59  ;;  %v570_v17 = vmul.f32 0.999, %v314_v1  ;;  %v962_v59 = vmul.f32 0.001, %v706_v54 }
 0x5b9   :  { %v3450_v54 = vld [vmem:[%s5827_s5] ss:$0 sm:$0xff] }
 0x5ba   :  { %v1338_v34 = vadd.f32 %v1082_v26, %v570_v17 }
 0x5bf   :  { %v316_v16 = vld [vmem:[%s5828_s6 + $0x7f8] sm:$0xff] }
 0x5c0   :  { %1608 = vst [vmem:[%s5836_s14 + $0x308] sm:$0xff] %v1182_v12  ;;  %v572_v18 = vmul.f32 0.999, %v316_v16  ;;  %v824_v12 = vld [vmem:[#allocation2 + $0x7d8] sm:$0xff] }
 0x5c1   :  { %1610 = vst [vmem:[%s5836_s14 + $0x318] sm:$0xff] %v1184_v15  ;;  %v1080_v15 = vmul.f32 0.001, %v824_v12  ;;  %v5242_v12 = vpop.f32.mrf.mxu2 }
 0x5c2   :  { %v1340_v39 = vadd.f32 %v1084_v29, %v572_v18  ;;  %v738_v18 = vld [vmem:[#allocation2 + $0x528] sm:$0xff] }
 0x5c3   :  { %v778_v29 = vld [vmem:[#allocation2 + $0x668] sm:$0xff] }
 0x5c4   :  { %v2659_v45 = vpack.c.bf16 %v1340_v39, %v1338_v34  ;;  %v1034_v37 = vmul.f32 0.001, %v778_v29 }
 0x5c6   :  { %2860 = vmatpush.bf16.msra.mxu1 %v2659_v45 }
 0x5c8   :  { %v230_v27 = vld [vmem:[%s5828_s6 + $0x548] sm:$0xff]  ;;  %v232_v28 = vld [vmem:[%s5828_s6 + $0x558] sm:$0xff] }
 0x5c9   :  { %v486_v30 = vmul.f32 0.999, %v230_v27  ;;  %v488_v32 = vmul.f32 0.999, %v232_v28  ;;  %1648 = vst [vmem:[%s5836_s14 + $0x448] sm:$0xff] %v1222_v22 }
 0x5cb   :  { %v1254_v5 = vadd.f32 %v998_v57, %v486_v30  ;;  %v1256_v6 = vadd.f32 %v1000_v41, %v488_v32 }
 0x5cd   :  { %v2617_v51 = vpack.c.bf16 %v1256_v6, %v1254_v5 }
 0x5cf   :  { %2839 = vmatpush.bf16.msrb.mxu3 %v2617_v51  ;;  %v820_v51 = vld [vmem:[#allocation2 + $0x7b8] sm:$0xff] }
 0x5d0   :  { %v270_v38 = vld [vmem:[%s5828_s6 + $0x688] sm:$0xff]  ;;  %v1076_v56 = vmul.f32 0.001, %v820_v51  ;;  %v812_v51 = vld [vmem:[#allocation2 + $0x778] sm:$0xff] }
 0x5d1   :  { %1650 = vst [vmem:[%s5836_s14 + $0x458] sm:$0xff] %v1224_v23  ;;  %v526_v44 = vmul.f32 0.999, %v270_v38  ;;  %v994_v23 = vmul.f32 0.001, %v738_v18 }
 0x5d3   :  { %v1294_v53 = vadd.f32 %v1038_v7, %v526_v44  ;;  %v702_v44 = vld [vmem:[#allocation2 + $0x408] sm:$0xff] }
 0x5d8   :  { %v272_v42 = vld [vmem:[%s5828_s6 + $0x698] sm:$0xff] }
 0x5d9   :  { %1764 = vst [vmem:[%s5836_s14 + $0x7e8] sm:$0xff] %v1338_v34  ;;  %v528_v31 = vmul.f32 0.999, %v272_v42  ;;  %v780_v34 = vld [vmem:[#allocation2 + $0x678] sm:$0xff] }
 0x5da   :  { %1766 = vst [vmem:[%s5836_s14 + $0x7f8] sm:$0xff] %v1340_v39  ;;  %v1036_v39 = vmul.f32 0.001, %v780_v34 }
 0x5db   :  { %v1296_v55 = vadd.f32 %v1040_v48, %v528_v31  ;;  %v704_v31 = vld [vmem:[#allocation2 + $0x418] sm:$0xff] }
 0x5dd   :  { %v2637_v8 = vpack.c.bf16 %v1296_v55, %v1294_v53 }
 0x5df   :  { %2850 = vmatpush.bf16.msra.mxu0 %v2637_v8 }
 0x5e1   :  { %v194_v47 = vld [vmem:[%s5828_s6 + $0x428] sm:$0xff]  ;;  %v196_v49 = vld [vmem:[%s5828_s6 + $0x438] sm:$0xff] }
 0x5e2   :  { %v450_v50 = vmul.f32 0.999, %v194_v47  ;;  %v452_v19 = vmul.f32 0.999, %v196_v49  ;;  %1680 = vst [vmem:[%s5836_s14 + $0x548] sm:$0xff] %v1254_v5  ;;  %v818_v49 = vld [vmem:[#allocation2 + $0x7a8] sm:$0xff] }
 0x5e3   :  { %v958_v5 = vmul.f32 0.001, %v702_v44 }
 0x5e4   :  { %v1218_v10 = vadd.f32 %v962_v59, %v450_v50  ;;  %v1220_v11 = vadd.f32 %v964_v60, %v452_v19  ;;  %v734_v59 = vld [vmem:[#allocation2 + $0x508] sm:$0xff] }
 0x5e6   :  { %v2599_v16 = vpack.c.bf16 %v1220_v11, %v1218_v10 }
 0x5e8   :  { %2827 = vmatpush.bf16.msrb.mxu2 %v2599_v16 }
 0x5e9   :  { %v310_v58 = vld [vmem:[%s5828_s6 + $0x7c8] sm:$0xff] }
 0x5ea   :  { %1682 = vst [vmem:[%s5836_s14 + $0x558] sm:$0xff] %v1256_v6  ;;  %v566_v0 = vmul.f32 0.999, %v310_v58  ;;  %v960_v6 = vmul.f32 0.001, %v704_v31 }
 0x5ec   :  { %v1334_v17 = vadd.f32 %v1078_v13, %v566_v0  ;;  %v2485_v0 = vadd.f32 %v3450_v54, %v5106_v3  ;;  %v990_v3 = vmul.f32 0.001, %v734_v59 }
 0x5f1   :  { %v312_v63 = vld [vmem:[%s5828_s6 + $0x7d8] sm:$0xff] }
 0x5f2   :  { %1720 = vst [vmem:[%s5836_s14 + $0x688] sm:$0xff] %v1294_v53  ;;  %v568_v2 = vmul.f32 0.999, %v312_v63  ;;  %v1074_v53 = vmul.f32 0.001, %v818_v49  ;;  %v2676_v49 = vpop.f32.mrf.mxu2 }
 0x5f3   :  { %1722 = vst [vmem:[%s5836_s14 + $0x698] sm:$0xff] %v1296_v55 }
 0x5f4   :  { %v1336_v22 = vadd.f32 %v1080_v15, %v568_v2  ;;  %v5247_v15 = vpop.f32.mrf.mxu3 }
 0x5f6   :  { %v2657_v30 = vpack.c.bf16 %v1336_v22, %v1334_v17 }
 0x5f8   :  { %2861 = vmatpush.bf16.msra.mxu1 %v2657_v30  ;;  %v814_v30 = vld [vmem:[#allocation2 + $0x788] sm:$0xff] }
 0x5fa   :  { %v226_v14 = vld [vmem:[%s5828_s6 + $0x528] sm:$0xff]  ;;  %v228_v1 = vld [vmem:[%s5828_s6 + $0x538] sm:$0xff] }
 0x5fb   :  { %v482_v52 = vmul.f32 0.999, %v226_v14  ;;  %v484_v9 = vmul.f32 0.999, %v228_v1  ;;  %1644 = vst [vmem:[%s5836_s14 + $0x428] sm:$0xff] %v1218_v10  ;;  %v774_v1 = vld [vmem:[#allocation2 + $0x648] sm:$0xff] }
 0x5fd   :  { %v1250_v32 = vadd.f32 %v994_v23, %v482_v52  ;;  %v1252_v33 = vadd.f32 %v996_v25, %v484_v9  ;;  %v5249_v52 = vpop.f32.mrf.mxu0  ;;  %v992_v9 = vmul.f32 0.001, %v736_v4  ;;  %v1030_v23 = vmul.f32 0.001, %v774_v1 }
 0x5fe   :  { %v1068_v4 = vmul.f32 0.001, %v812_v51  ;;  %v1361_v51 = vld [vmem:[%s5830_s8 + $0x78] sm:$0xff] }
 0x5ff   :  { %v2615_v42 = vpack.c.bf16 %v1252_v33, %v1250_v32 }
 0x601   :  { %2840 = vmatpush.bf16.msrb.mxu3 %v2615_v42 }
 0x602   :  { %v266_v21 = vld [vmem:[%s5828_s6 + $0x668] sm:$0xff] }
 0x603   :  { %1646 = vst [vmem:[%s5836_s14 + $0x438] sm:$0xff] %v1220_v11  ;;  %v522_v27 = vmul.f32 0.999, %v266_v21  ;;  %v2497_v11 = vpop.f32.mrf.mxu1 }
 0x604   :  { %v5254_v18 = vadd.f32 %v2497_v11, %v2485_v0  ;;  %v766_v0 = vld [vmem:[#allocation2 + $0x608] sm:$0xff] }
 0x605   :  { %v1290_v43 = vadd.f32 %v1034_v37, %v522_v27  ;;  %v816_v37 = vld [vmem:[#allocation2 + $0x798] sm:$0xff]  ;;  %v2702_v54 = vpop.f32.mrf.mxu0 }
 0x60a   :  { %v268_v26 = vld [vmem:[%s5828_s6 + $0x678] sm:$0xff] }
 0x60b   :  { %1760 = vst [vmem:[%s5836_s14 + $0x7c8] sm:$0xff] %v1334_v17  ;;  %v524_v28 = vmul.f32 0.999, %v268_v26  ;;  %v776_v17 = vld [vmem:[#allocation2 + $0x658] sm:$0xff] }
 0x60c   :  { %1762 = vst [vmem:[%s5836_s14 + $0x7d8] sm:$0xff] %v1336_v22  ;;  %v1032_v27 = vmul.f32 0.001, %v776_v17  ;;  %v806_v17 = vld [vmem:[#allocation2 + $0x748] sm:$0xff] }
 0x60d   :  { %v1292_v45 = vadd.f32 %v1036_v39, %v524_v28 }
 0x60f   :  { %v2635_v48 = vpack.c.bf16 %v1292_v45, %v1290_v43 }
 0x611   :  { %2851 = vmatpush.bf16.msra.mxu0 %v2635_v48 }
 0x613   :  { %v190_v35 = vld [vmem:[%s5828_s6 + $0x408] sm:$0xff]  ;;  %v192_v38 = vld [vmem:[%s5828_s6 + $0x418] sm:$0xff] }
 0x614   :  { %v446_v57 = vmul.f32 0.999, %v190_v35  ;;  %v448_v41 = vmul.f32 0.999, %v192_v38  ;;  %1676 = vst [vmem:[%s5836_s14 + $0x528] sm:$0xff] %v1250_v32  ;;  %v2501_v32 = vmul.f32 %v5254_v18, %v5254_v18 }
 0x615   :  { %v1070_v35 = vmul.f32 0.001, %v814_v30 }
 0x616   :  { %v1214_v50 = vadd.f32 %v958_v5, %v446_v57  ;;  %v1216_v19 = vadd.f32 %v960_v6, %v448_v41  ;;  %v1072_v57 = vmul.f32 0.001, %v816_v37  ;;  %2502 = vadd.xlane.f32.xlu0 %v2501_v32 }
 0x618   :  { %v2597_v60 = vpack.c.bf16 %v1216_v19, %v1214_v50 }
 0x61a   :  { %2828 = vmatpush.bf16.msrb.mxu2 %v2597_v60 }
 0x61b   :  { %v306_v36 = vld [vmem:[%s5828_s6 + $0x7a8] sm:$0xff] }
 0x61c   :  { %1678 = vst [vmem:[%s5836_s14 + $0x538] sm:$0xff] %v1252_v33  ;;  %v562_v7 = vmul.f32 0.999, %v306_v36  ;;  %v772_v36 = vld [vmem:[#allocation2 + $0x638] sm:$0xff] }
 0x61d   :  { %2829 = vmatmul.bf16.vlgmr.msrb.gmra.mxu2 %v4584_v24 }
 0x61e   :  { %v1330_v63 = vadd.f32 %v1074_v53, %v562_v7  ;;  %v2689_v53 = vpop.f32.mrf.mxu3 }
 0x61f   :  { %v1424_v53 = vld [vmem:[%s5826_s4 + $0x70] sm:$0xff] }
 0x623   :  { %v308_v46 = vld [vmem:[%s5828_s6 + $0x7b8] sm:$0xff] }
 0x624   :  { %1716 = vst [vmem:[%s5836_s14 + $0x668] sm:$0xff] %v1290_v43  ;;  %v564_v47 = vmul.f32 0.999, %v308_v46  ;;  %v770_v43 = vld [vmem:[#allocation2 + $0x628] sm:$0xff]  ;;  %v1028_v46 = vmul.f32 0.001, %v772_v36 }
 0x625   :  { %1718 = vst [vmem:[%s5836_s14 + $0x678] sm:$0xff] %v1292_v45  ;;  %v1026_v6 = vmul.f32 0.001, %v770_v43 }
 0x626   :  { %v1332_v13 = vadd.f32 %v1076_v56, %v564_v47  ;;  %v2499_v47 = vpop.f32.mrf.mxu1 }
 0x627   :  { %v800_v47 = vld [vmem:[#allocation2 + $0x718] sm:$0xff] }
 0x628   :  { %v2655_v20 = vpack.c.bf16 %v1332_v13, %v1330_v63 }
 0x62a   :  { %2862 = vmatpush.bf16.msra.mxu1 %v2655_v20 }
 0x62c   :  { %v222_v58 = vld [vmem:[%s5828_s6 + $0x508] sm:$0xff]  ;;  %v224_v55 = vld [vmem:[%s5828_s6 + $0x518] sm:$0xff] }
 0x62d   :  { %1640 = vst [vmem:[%s5836_s14 + $0x408] sm:$0xff] %v1214_v50  ;;  %v478_v2 = vmul.f32 0.999, %v222_v58  ;;  %v480_v14 = vmul.f32 0.999, %v224_v55 }
 0x62e   :  { %v5329_v37 = vpop.f32.mrf.mxu1 }
 0x62f   :  { %v1246_v21 = vadd.f32 %v990_v3, %v478_v2  ;;  %v1248_v26 = vadd.f32 %v992_v9, %v480_v14  ;;  %v1022_v14 = vmul.f32 0.001, %v766_v0 }
 0x631   :  { %v2613_v38 = vpack.c.bf16 %v1248_v26, %v1246_v21 }
 0x633   :  { %2841 = vmatpush.bf16.msrb.mxu3 %v2613_v38 }
 0x634   :  { %v262_v8 = vld [vmem:[%s5828_s6 + $0x648] sm:$0xff]  ;;  %v264_v10 = vld [vmem:[%s5828_s6 + $0x658] sm:$0xff] }
 0x635   :  { %1642 = vst [vmem:[%s5836_s14 + $0x418] sm:$0xff] %v1216_v19  ;;  %v518_v16 = vmul.f32 0.999, %v262_v8  ;;  %v520_v22 = vmul.f32 0.999, %v264_v10  ;;  %v810_v19 = vld [vmem:[#allocation2 + $0x768] sm:$0xff] }
 0x636   :  { %1756 = vst [vmem:[%s5836_s14 + $0x7a8] sm:$0xff] %v1330_v63  ;;  %2842 = vmatmul.bf16.vlgmr.msrb.gmra.mxu3 %v4620_v62  ;;  %v1066_v2 = vmul.f32 0.001, %v810_v19  ;;  %v1360_v19 = vld [vmem:[%s5830_s8 + $0x70] sm:$0xff] }
 0x637   :  { %1758 = vst [vmem:[%s5836_s14 + $0x7b8] sm:$0xff] %v1332_v13  ;;  %v1286_v33 = vadd.f32 %v1030_v23, %v518_v16  ;;  %v1288_v39 = vadd.f32 %v1032_v27, %v520_v22  ;;  %v768_v13 = vld [vmem:[#allocation2 + $0x618] sm:$0xff] }
 0x638   :  { %v1024_v9 = vmul.f32 0.001, %v768_v13  ;;  %v808_v23 = vld [vmem:[#allocation2 + $0x758] sm:$0xff] }
 0x639   :  { %v2633_v45 = vpack.c.bf16 %v1288_v39, %v1286_v33 }
 0x63b   :  { %2852 = vmatpush.bf16.msra.mxu0 %v2633_v45  ;;  %v798_v45 = vld [vmem:[#allocation2 + $0x708] sm:$0xff] }
 0x63c   :  { %v1054_v49 = vmul.f32 0.001, %v798_v45 }
 0x63e   :  { %v302_v25 = vld [vmem:[%s5828_s6 + $0x788] sm:$0xff]  ;;  %v304_v28 = vld [vmem:[%s5828_s6 + $0x798] sm:$0xff] }
 0x63f   :  { %v558_v29 = vmul.f32 0.999, %v302_v25  ;;  %1672 = vst [vmem:[%s5836_s14 + $0x508] sm:$0xff] %v1246_v21  ;;  %v560_v34 = vmul.f32 0.999, %v304_v28 }
 0x640   :  { %1674 = vst [vmem:[%s5836_s14 + $0x518] sm:$0xff] %v1248_v26  ;;  %v1062_v28 = vmul.f32 0.001, %v806_v17 }
 0x641   :  { %v1326_v24 = vadd.f32 %v1070_v35, %v558_v29  ;;  %v1328_v5 = vadd.f32 %v1072_v57, %v560_v34  ;;  %v1064_v29 = vmul.f32 0.001, %v808_v23  ;;  %v802_v34 = vld [vmem:[#allocation2 + $0x728] sm:$0xff]  ;;  %v5331_v35 = vpop.f32.mrf.mxu2 }
 0x643   :  { %v2653_v56 = vpack.c.bf16 %v1328_v5, %v1326_v24 }
 0x645   :  { %2863 = vmatpush.bf16.msra.mxu1 %v2653_v56  ;;  %v1392_v56 = vmul.f32 0.999, %v1360_v19 }
 0x647   :  { %v258_v41 = vld [vmem:[%s5828_s6 + $0x628] sm:$0xff]  ;;  %v260_v42 = vld [vmem:[%s5828_s6 + $0x638] sm:$0xff] }
 0x648   :  { %1712 = vst [vmem:[%s5836_s14 + $0x648] sm:$0xff] %v1286_v33  ;;  %v514_v44 = vmul.f32 0.999, %v258_v41  ;;  %v516_v31 = vmul.f32 0.999, %v260_v42  ;;  %v804_v41 = vld [vmem:[#allocation2 + $0x738] sm:$0xff] }
 0x649   :  { %1714 = vst [vmem:[%s5836_s14 + $0x658] sm:$0xff] %v1288_v39  ;;  %v1058_v42 = vmul.f32 0.001, %v802_v34  ;;  %v1421_v34 = vld [vmem:[%s5826_s4 + $0x58] sm:$0xff] }
 0x64a   :  { %v1282_v58 = vadd.f32 %v1026_v6, %v514_v44  ;;  %v1284_v55 = vadd.f32 %v1028_v46, %v516_v31  ;;  %v5342_v44 = vpop.f32.mrf.mxu3  ;;  %v1060_v31 = vmul.f32 0.001, %v804_v41 }
 0x64c   :  { %v2631_v10 = vpack.c.bf16 %v1284_v55, %v1282_v58 }
 0x64e   :  { %2853 = vmatpush.bf16.msra.mxu0 %v2631_v10 }
 0x650   :  { %v298_v7 = vld [vmem:[%s5828_s6 + $0x768] sm:$0xff] }
 0x651   :  { %1752 = vst [vmem:[%s5836_s14 + $0x788] sm:$0xff] %v1326_v24  ;;  %v554_v50 = vmul.f32 0.999, %v298_v7 }
 0x653   :  { %v1322_v3 = vadd.f32 %v1066_v2, %v554_v50  ;;  %v1056_v50 = vmul.f32 0.001, %v800_v47  ;;  %v1358_v2 = vld [vmem:[%s5830_s8 + $0x60] sm:$0xff] }
 0x658   :  { %v300_v48 = vld [vmem:[%s5828_s6 + $0x778] sm:$0xff] }
 0x659   :  { %1754 = vst [vmem:[%s5836_s14 + $0x798] sm:$0xff] %v1328_v5  ;;  %v556_v59 = vmul.f32 0.999, %v300_v48  ;;  %v1767_v5 = vlaneseq }
 0x65b   :  { %v1324_v1 = vadd.f32 %v1068_v4, %v556_v59  ;;  %v1343_v4 = vld [vmem:[%s5825_s3] sm:$0x3]  ;;  %vm5384_vm0 = vcmp.lt.s32.totalorder %v1767_v5, 256 }
 0x65c   :  { %v1344_v17 = vmul.f32 0.001, %v1343_v4 }
 0x65d   :  { %v2651_v26 = vpack.c.bf16 %v1324_v1, %v1322_v3 }
 0x65f   :  { %2864 = vmatpush.bf16.msra.mxu1 %v2651_v26 }
 0x660   :  { %v254_v60 = vld [vmem:[%s5828_s6 + $0x608] sm:$0xff]  ;;  %v256_v63 = vld [vmem:[%s5828_s6 + $0x618] sm:$0xff] }
 0x661   :  { %v510_v8 = vmul.f32 0.999, %v254_v60  ;;  %1708 = vst [vmem:[%s5836_s14 + $0x628] sm:$0xff] %v1282_v58  ;;  %v512_v11 = vmul.f32 0.999, %v256_v63 }
 0x662   :  { %1710 = vst [vmem:[%s5836_s14 + $0x638] sm:$0xff] %v1284_v55  ;;  %v1393_v58 = vmul.f32 0.999, %v1361_v51  ;;  %v1425_v55 = vld [vmem:[%s5826_s4 + $0x78] sm:$0xff]  ;;  %v1456_v63 = vmul.f32 0.001, %v1424_v53 }
 0x663   :  { %v1278_v20 = vadd.f32 %v1022_v14, %v510_v8  ;;  %v1280_v27 = vadd.f32 %v1024_v9, %v512_v11  ;;  %v1457_v0 = vmul.f32 0.001, %v1425_v55  ;;  %v1359_v14 = vld [vmem:[%s5830_s8 + $0x68] sm:$0xff]  ;;  %v2715_v9 = vpop.f32.mrf.mxu1  ;;  %v1416_v53 = vld [vmem:[%s5826_s4 + $0x30] sm:$0xff] }
 0x664   :  { %v1488_v10 = vadd.f32 %v1456_v63, %v1392_v56 }
 0x665   :  { %v2629_v38 = vpack.c.bf16 %v1280_v27, %v1278_v20  ;;  %v1489_v11 = vadd.f32 %v1457_v0, %v1393_v58  ;;  %v1414_v0 = vld [vmem:[%s5826_s4 + $0x20] sm:$0xff] }
 0x666   :  { %1786 = vst [vmem:[%s5838_s16 + $0x70] sm:$0xff] %v1488_v10  ;;  %v1446_v9 = vmul.f32 0.001, %v1414_v0 }
 0x667   :  { %2854 = vmatpush.bf16.msra.mxu0 %v2629_v38  ;;  %v2884_v23 = vpack.c.bf16 %v1489_v11, %v1488_v10 }
 0x669   :  { %v294_v62 = vld [vmem:[%s5828_s6 + $0x748] sm:$0xff]  ;;  %v296_v16 = vld [vmem:[%s5828_s6 + $0x758] sm:$0xff]  ;;  %2896 = vmatpush.bf16.msra.mxu2 %v2884_v23 }
 0x66a   :  { %v550_v21 = vmul.f32 0.999, %v294_v62  ;;  %v552_v22 = vmul.f32 0.999, %v296_v16  ;;  %v290_v25 = vld [vmem:[%s5828_s6 + $0x728] sm:$0xff]  ;;  %2855 = vmatmul.bf16.vlgmr.msra.gmra.mxu0 %v4731_v61  ;;  %v2728_v62 = vpop.f32.mrf.mxu2 }
 0x66b   :  { %1748 = vst [vmem:[%s5836_s14 + $0x768] sm:$0xff] %v1322_v3  ;;  %v546_v32 = vmul.f32 0.999, %v290_v25  ;;  %v1341_v61 = vld [vmem:[%s5829_s7] sm:$0x3]  ;;  %v5464_v56 = vpop.f32.mrf.mxu1 }
 0x66c   :  { %v1318_v39 = vadd.f32 %v1062_v28, %v550_v21  ;;  %v1320_v57 = vadd.f32 %v1064_v29, %v552_v22  ;;  %v1342_v13 = vmul.f32 0.999, %v1341_v61  ;;  %v1422_v3 = vld [vmem:[%s5826_s4 + $0x60] sm:$0xff]  ;;  %v1391_v21 = vmul.f32 0.999, %v1359_v14  ;;  %v2741_v22 = vpop.f32.mrf.mxu3  ;;  %v5406_v28 = vpop.f32.mrf.mxu0  ;;  %v1415_v14 = vld [vmem:[%s5826_s4 + $0x28] sm:$0xff] }
 0x66d   :  { %v1314_v46 = vadd.f32 %v1058_v42, %v546_v32  ;;  %v1454_v25 = vmul.f32 0.001, %v1422_v3  ;;  %v1413_v22 = vld [vmem:[%s5826_s4 + $0x18] sm:$0xff] }
 0x66e   :  { %v2649_v6 = vpack.c.bf16 %v1320_v57, %v1318_v39  ;;  %v5411_v29 = vadd.f32 %v1344_v17, %v1342_v13 }
 0x670   :  { %2865 = vmatpush.bf16.msra.mxu1 %v2649_v6  ;;  %1771 = vst.msk [vmem:[%s5837_s15] sm:$0x3] %vm5384_vm0, %v5411_v29 }
 0x672   :  { %v292_v30 = vld [vmem:[%s5828_s6 + $0x738] sm:$0xff] }
 0x673   :  { %1750 = vst [vmem:[%s5836_s14 + $0x778] sm:$0xff] %v1324_v1  ;;  %v548_v33 = vmul.f32 0.999, %v292_v30  ;;  %v1423_v1 = vld [vmem:[%s5826_s4 + $0x68] sm:$0xff] }
 0x674   :  { %1704 = vst [vmem:[%s5836_s14 + $0x608] sm:$0xff] %v1278_v20  ;;  %v1390_v20 = vmul.f32 0.999, %v1358_v2  ;;  %v1455_v26 = vmul.f32 0.001, %v1423_v1  ;;  %v2754_v4 = vpop.f32.mrf.mxu0 }
 0x675   :  { %v1316_v48 = vadd.f32 %v1060_v31, %v548_v33  ;;  %v1420_v33 = vld [vmem:[%s5826_s4 + $0x50] sm:$0xff]  ;;  %v1453_v31 = vmul.f32 0.001, %v1421_v34  ;;  %v1448_v2 = vmul.f32 0.001, %v1416_v53 }
 0x676   :  { %v1486_v38 = vadd.f32 %v1454_v25, %v1390_v20  ;;  %v1452_v41 = vmul.f32 0.001, %v1420_v33  ;;  %v1445_v34 = vmul.f32 0.001, %v1413_v22 }
 0x677   :  { %v2647_v59 = vpack.c.bf16 %v1316_v48, %v1314_v46 }
 0x679   :  { %2866 = vmatpush.bf16.msra.mxu1 %v2647_v59 }
 0x67b   :  { %v286_v43 = vld [vmem:[%s5828_s6 + $0x708] sm:$0xff]  ;;  %v288_v24 = vld [vmem:[%s5828_s6 + $0x718] sm:$0xff] }
 0x67c   :  { %1706 = vst [vmem:[%s5836_s14 + $0x618] sm:$0xff] %v1280_v27  ;;  %v542_v36 = vmul.f32 0.999, %v286_v43  ;;  %v544_v7 = vmul.f32 0.999, %v288_v24  ;;  %v1356_v27 = vld [vmem:[%s5830_s8 + $0x50] sm:$0xff] }
 0x67d   :  { %1744 = vst [vmem:[%s5836_s14 + $0x748] sm:$0xff] %v1318_v39  ;;  %v1388_v32 = vmul.f32 0.999, %v1356_v27  ;;  %v1487_v39 = vadd.f32 %v1455_v26, %v1391_v21  ;;  %v2661_v24 = vperm.slane %v5411_v29, 0  ;;  %v1412_v21 = vld [vmem:[%s5826_s4 + $0x10] sm:$0xff]  ;;  %v1410_v27 = vld [vmem:[%s5826_s4] sm:$0xff] }
 0x67e   :  { %1746 = vst [vmem:[%s5836_s14 + $0x758] sm:$0xff] %v1320_v57  ;;  %v1310_v54 = vadd.f32 %v1054_v49, %v542_v36  ;;  %v1312_v60 = vadd.f32 %v1056_v50, %v544_v7  ;;  %v1418_v36 = vld [vmem:[%s5826_s4 + $0x40] sm:$0xff]  ;;  %v1419_v7 = vld [vmem:[%s5826_s4 + $0x48] sm:$0xff]  ;;  %v1444_v33 = vmul.f32 0.001, %v1412_v21 }
 0x67f   :  { %1740 = vst [vmem:[%s5836_s14 + $0x728] sm:$0xff] %v1314_v46  ;;  %v2883_v45 = vpack.c.bf16 %v1487_v39, %v1486_v38  ;;  %v1484_v5 = vadd.f32 %v1452_v41, %v1388_v32  ;;  %v2675_v47 = vadd.f32 %v5242_v12, %v2661_v24  ;;  %v1451_v50 = vmul.f32 0.001, %v1419_v7 }
 0x680   :  { %1742 = vst [vmem:[%s5836_s14 + $0x738] sm:$0xff] %v1316_v48  ;;  %v2645_v16 = vpack.c.bf16 %v1312_v60, %v1310_v54  ;;  %v1450_v48 = vmul.f32 0.001, %v1418_v36 }
 0x681   :  { %1736 = vst [vmem:[%s5836_s14 + $0x708] sm:$0xff] %v1310_v54  ;;  %2897 = vmatpush.bf16.msra.mxu2 %v2883_v45  ;;  %v1417_v54 = vld [vmem:[%s5826_s4 + $0x38] sm:$0xff]  ;;  %v1440_v45 = vld [vmem:[%s5826_s4 + $0xf0] sm:$0xff] }
 0x682   :  { %1738 = vst [vmem:[%s5836_s14 + $0x718] sm:$0xff] %v1312_v60  ;;  %2867 = vmatpush.bf16.msra.mxu1 %v2645_v16  ;;  %v1449_v61 = vmul.f32 0.001, %v1417_v54 }
 0x683   :  { %1787 = vst [vmem:[%s5838_s16 + $0x78] sm:$0xff] %v1489_v11 }
 0x685   :  { %2868 = vmatmul.bf16.vlgmr.msra.gmra.mxu1 %v4761_v40  ;;  %v2688_v40 = vadd.f32 %v5247_v15, %v2675_v47 }
 0x687   :  { %v2701_v8 = vadd.f32 %v5249_v52, %v2688_v40  ;;  %v1447_v52 = vmul.f32 0.001, %v1415_v14  ;;  %v1439_v40 = vld [vmem:[%s5826_s4 + $0xe8] sm:$0xff] }
 0x689   :  { %v2714_v16 = vadd.f32 %v5329_v37, %v2701_v8 }
 0x68a   :  { %v1357_v30 = vld [vmem:[%s5830_s8 + $0x58] sm:$0xff]  ;;  %v1354_v42 = vld [vmem:[%s5830_s8 + $0x40] sm:$0xff]  ;;  %v1355_v43 = vld [vmem:[%s5830_s8 + $0x48] sm:$0xff] }
 0x68b   :  { %v1389_v57 = vmul.f32 0.999, %v1357_v30  ;;  %1784 = vst [vmem:[%s5838_s16 + $0x60] sm:$0xff] %v1486_v38  ;;  %v1386_v6 = vmul.f32 0.999, %v1354_v42  ;;  %v2727_v30 = vadd.f32 %v5331_v35, %v2714_v16  ;;  %v1411_v38 = vld [vmem:[%s5826_s4 + $0x8] sm:$0xff]  ;;  %v2767_v35 = vpop.f32.mrf.mxu1 }
 0x68c   :  { %v1387_v46 = vmul.f32 0.999, %v1355_v43  ;;  %1785 = vst [vmem:[%s5838_s16 + $0x68] sm:$0xff] %v1487_v39  ;;  %v2662_v16 = vperm.slane %v5411_v29, 1 }
 0x68d   :  { %v1485_v49 = vadd.f32 %v1453_v31, %v1389_v57  ;;  %v1482_v55 = vadd.f32 %v1450_v48, %v1386_v6  ;;  %v2740_v43 = vadd.f32 %v5342_v44, %v2727_v30  ;;  %v1442_v31 = vmul.f32 0.001, %v1410_v27 }
 0x68e   :  { %v1483_v59 = vadd.f32 %v1451_v50, %v1387_v46  ;;  %v1443_v44 = vmul.f32 0.001, %v1411_v38  ;;  %v1472_v48 = vmul.f32 0.001, %v1440_v45  ;;  %v1433_v45 = vld [vmem:[%s5826_s4 + $0xb8] sm:$0xff] }
 0x68f   :  { %v2882_v58 = vpack.c.bf16 %v1485_v49, %v1484_v5  ;;  %v2753_v47 = vadd.f32 %v5406_v28, %v2740_v43  ;;  %v1432_v43 = vld [vmem:[%s5826_s4 + $0xb0] sm:$0xff] }
 0x690   :  { %v2881_v10 = vpack.c.bf16 %v1483_v59, %v1482_v55 }
 0x691   :  { %2898 = vmatpush.bf16.msra.mxu2 %v2882_v58  ;;  %v2766_v0 = vadd.f32 %v5464_v56, %v2753_v47 }
 0x693   :  { %v1352_v19 = vld [vmem:[%s5830_s8 + $0x30] sm:$0xff] }
 0x694   :  { %1782 = vst [vmem:[%s5838_s16 + $0x50] sm:$0xff] %v1484_v5  ;;  %v1384_v51 = vmul.f32 0.999, %v1352_v19  ;;  %v1441_v5 = vld [vmem:[%s5826_s4 + $0xf8] sm:$0xff] }
 0x695   :  { %2899 = vmatpush.bf16.msra.mxu2 %v2881_v10  ;;  %v1473_v53 = vmul.f32 0.001, %v1441_v5  ;;  %v1436_v10 = vld [vmem:[%s5826_s4 + $0xd0] sm:$0xff] }
 0x696   :  { %v1480_v3 = vadd.f32 %v1448_v2, %v1384_v51 }
 0x69b   :  { %v1353_v12 = vld [vmem:[%s5830_s8 + $0x38] sm:$0xff] }
 0x69c   :  { %1783 = vst [vmem:[%s5838_s16 + $0x58] sm:$0xff] %v1485_v49  ;;  %v1385_v15 = vmul.f32 0.999, %v1353_v12  ;;  %v1438_v12 = vld [vmem:[%s5826_s4 + $0xe0] sm:$0xff] }
 0x69e   :  { %v1481_v1 = vadd.f32 %v1449_v61, %v1385_v15 }
 0x6a0   :  { %v2880_v39 = vpack.c.bf16 %v1481_v1, %v1480_v3 }
 0x6a2   :  { %2900 = vmatpush.bf16.msra.mxu2 %v2880_v39  ;;  %v1435_v39 = vld [vmem:[%s5826_s4 + $0xc8] sm:$0xff] }
 0x6a3   :  { %v1350_v60 = vld [vmem:[%s5830_s8 + $0x20] sm:$0xff]  ;;  %v1351_v63 = vld [vmem:[%s5830_s8 + $0x28] sm:$0xff] }
 0x6a4   :  { %1780 = vst [vmem:[%s5838_s16 + $0x40] sm:$0xff] %v1482_v55  ;;  %v1382_v11 = vmul.f32 0.999, %v1350_v60  ;;  %v1383_v13 = vmul.f32 0.999, %v1351_v63 }
 0x6a5   :  { %1781 = vst [vmem:[%s5838_s16 + $0x48] sm:$0xff] %v1483_v59  ;;  %v1470_v59 = vmul.f32 0.001, %v1438_v12  ;;  %v1471_v63 = vmul.f32 0.001, %v1439_v40  ;;  %v1431_v40 = vld [vmem:[%s5826_s4 + $0xa8] sm:$0xff] }
 0x6a6   :  { %v1478_v23 = vadd.f32 %v1446_v9, %v1382_v11  ;;  %v1479_v32 = vadd.f32 %v1447_v52, %v1383_v13  ;;  %v1468_v9 = vmul.f32 0.001, %v1436_v10 }
 0x6a8   :  { %v2879_v28 = vpack.c.bf16 %v1479_v32, %v1478_v23 }
 0x6aa   :  { %2901 = vmatpush.bf16.msra.mxu2 %v2879_v28 }
 0x6ac   :  { %v1348_v62 = vld [vmem:[%s5830_s8 + $0x10] sm:$0xff]  ;;  %v1349_v17 = vld [vmem:[%s5830_s8 + $0x18] sm:$0xff] }
 0x6ad   :  { %v1380_v20 = vmul.f32 0.999, %v1348_v62  ;;  %1778 = vst [vmem:[%s5838_s16 + $0x30] sm:$0xff] %v1480_v3  ;;  %v1381_v25 = vmul.f32 0.999, %v1349_v17  ;;  %v1437_v3 = vld [vmem:[%s5826_s4 + $0xd8] sm:$0xff] }
 0x6ae   :  { %v1469_v52 = vmul.f32 0.001, %v1437_v3 }
 0x6af   :  { %v1476_v24 = vadd.f32 %v1444_v33, %v1380_v20  ;;  %v1477_v6 = vadd.f32 %v1445_v34, %v1381_v25  ;;  %v1434_v33 = vld [vmem:[%s5826_s4 + $0xc0] sm:$0xff] }
 0x6b1   :  { %v2878_v2 = vpack.c.bf16 %v1477_v6, %v1476_v24 }
 0x6b3   :  { %2902 = vmatpush.bf16.msra.mxu2 %v2878_v2  ;;  %v1428_v2 = vld [vmem:[%s5826_s4 + $0x90] sm:$0xff] }
 0x6b4   :  { %v1346_v37 = vld [vmem:[%s5830_s8] sm:$0xff]  ;;  %v1347_v26 = vld [vmem:[%s5830_s8 + $0x8] sm:$0xff]  ;;  %v1460_v10 = vmul.f32 0.001, %v1428_v2  ;;  %v3417_v2 = vld [vmem:[%s5832_s10 + $0x10] sm:$0xff] }
 0x6b5   :  { %1779 = vst [vmem:[%s5838_s16 + $0x38] sm:$0xff] %v1481_v1  ;;  %v1378_v57 = vmul.f32 0.999, %v1346_v37  ;;  %v1379_v41 = vmul.f32 0.999, %v1347_v26  ;;  %v2873_v1 = vmax.f32 %v2766_v0, 0.0  ;;  %v2791_v37 = vpop.f32.mrf.mxu3 }
 0x6b6   :  { %1776 = vst [vmem:[%s5838_s16 + $0x20] sm:$0xff] %v1478_v23  ;;  %v2778_v23 = vpop.f32.mrf.mxu2 }
 0x6b7   :  { %v1474_v49 = vadd.f32 %v1442_v31, %v1378_v57  ;;  %v1475_v51 = vadd.f32 %v1443_v44, %v1379_v41  ;;  %v2875_v21 = vpack.c.bf16 %v2873_v1, %v2873_v1  ;;  %v2779_v25 = vadd.f32 %v2778_v23, %v2662_v16  ;;  %v1427_v16 = vld [vmem:[%s5826_s4 + $0x88] sm:$0xff] }
 0x6b8   :  { %v1466_v41 = vmul.f32 0.001, %v1434_v33  ;;  %v3429_v33 = vld [vmem:[%s5832_s10 + $0x70] sm:$0xff] }
 0x6b9   :  { %v2877_v62 = vpack.c.bf16 %v1475_v51, %v1474_v49  ;;  %v2792_v26 = vadd.f32 %v2791_v37, %v2779_v25  ;;  %v3422_v37 = vld [vmem:[%s5832_s10 + $0x38] sm:$0xff] }
 0x6ba   :  { %3202 = vmatpush.bf16.xpose.msrb.mxu0 %v3422_v37 }
 0x6bb   :  { %2903 = vmatpush.bf16.msra.mxu2 %v2877_v62 }
 0x6bd   :  { %v1376_v42 = vld [vmem:[%s5830_s8 + $0xf0] sm:$0xff]  ;;  %v2793_v27 = vpop.f32.mrf.mxu3 }
 0x6be   :  { %1777 = vst [vmem:[%s5838_s16 + $0x28] sm:$0xff] %v1479_v32  ;;  %v1408_v46 = vmul.f32 0.999, %v1376_v42  ;;  %2904 = vmatmul.bf16.vlgmr.msra.gmra.mxu2 %v2875_v21  ;;  %v2780_v29 = vpop.f32.mrf.mxu2  ;;  %v1467_v42 = vmul.f32 0.001, %v1435_v39  ;;  %v3446_v27 = vld [vmem:[%s5832_s10 + $0xf8] sm:$0xff] }
 0x6bf   :  { %v1459_v21 = vmul.f32 0.001, %v1427_v16  ;;  %v3430_v29 = vld [vmem:[%s5832_s10 + $0x78] sm:$0xff]  ;;  %v3420_v39 = vld [vmem:[%s5832_s10 + $0x28] sm:$0xff] }
 0x6c0   :  { %v1504_v58 = vadd.f32 %v1472_v48, %v1408_v46  ;;  %v1464_v46 = vmul.f32 0.001, %v1432_v43  ;;  %3215 = vmatpush.bf16.xpose.msrb.mxu1 %v3430_v29  ;;  %v3440_v16 = vld [vmem:[%s5832_s10 + $0xc8] sm:$0xff] }
 0x6c5   :  { %v1377_v36 = vld [vmem:[%s5830_s8 + $0xf8] sm:$0xff] }
 0x6c6   :  { %v1409_v7 = vmul.f32 0.999, %v1377_v36  ;;  %1774 = vst [vmem:[%s5838_s16 + $0x10] sm:$0xff] %v1476_v24  ;;  %v2804_v24 = vpop.f32.mrf.mxu0 }
 0x6c7   :  { %v5621_v5 = vadd.f32 %v2804_v24, %v2792_v26  ;;  %v3438_v26 = vld [vmem:[%s5832_s10 + $0xb8] sm:$0xff]  ;;  %v2830_v24 = vpop.f32.mrf.mxu2 }
 0x6c8   :  { %v1505_v60 = vadd.f32 %v1473_v53, %v1409_v7  ;;  %v1465_v7 = vmul.f32 0.001, %v1433_v45  ;;  %3228 = vmatpush.bf16.xpose.msrb.mxu2 %v3438_v26  ;;  %3216 = vmatpush.bf16.xpose.msrb.mxu1 %v3429_v33  ;;  %v3435_v45 = vld [vmem:[%s5832_s10 + $0xa0] sm:$0xff] }
 0x6ca   :  { %v2892_v61 = vpack.c.bf16 %v1505_v60, %v1504_v58 }
 0x6cc   :  { %2909 = vmatpush.bf16.msra.mxu3 %v2892_v61 }
 0x6cd   :  { %v1374_v50 = vld [vmem:[%s5830_s8 + $0xe0] sm:$0xff]  ;;  %v1375_v19 = vld [vmem:[%s5830_s8 + $0xe8] sm:$0xff] }
 0x6ce   :  { %1775 = vst [vmem:[%s5838_s16 + $0x18] sm:$0xff] %v1477_v6  ;;  %v1406_v54 = vmul.f32 0.999, %v1374_v50  ;;  %v1407_v55 = vmul.f32 0.999, %v1375_v19  ;;  %v2806_v19 = vpop.f32.mrf.mxu0 }
 0x6cf   :  { %1772 = vst [vmem:[%s5838_s16] sm:$0xff] %v1474_v49  ;;  %v3426_v19 = vld [vmem:[%s5832_s10 + $0x58] sm:$0xff] }
 0x6d0   :  { %1773 = vst [vmem:[%s5838_s16 + $0x8] sm:$0xff] %v1475_v51  ;;  %v1502_v15 = vadd.f32 %v1470_v59, %v1406_v54  ;;  %v1503_v4 = vadd.f32 %v1471_v63, %v1407_v55  ;;  %v1430_v51 = vld [vmem:[%s5826_s4 + $0xa0] sm:$0xff]  ;;  %v1463_v55 = vmul.f32 0.001, %v1431_v40  ;;  %v5647_v59 = vpop.f32.mrf.mxu1 }
 0x6d1   :  { %1802 = vst [vmem:[%s5838_s16 + $0xf0] sm:$0xff] %v1504_v58  ;;  %v1462_v58 = vmul.f32 0.001, %v1430_v51  ;;  %v1506_v40 = vld [vmem:[%s5831_s9] sm:$0x1] }
 0x6d2   :  { %1803 = vst [vmem:[%s5838_s16 + $0xf8] sm:$0xff] %v1505_v60  ;;  %v2891_v11 = vpack.c.bf16 %v1503_v4, %v1502_v15 }
 0x6d3   :  { %1800 = vst [vmem:[%s5838_s16 + $0xe0] sm:$0xff] %v1502_v15 }
 0x6d4   :  { %2910 = vmatpush.bf16.msra.mxu3 %v2891_v11 }
 0x6da   :  { %v1372_v56 = vld [vmem:[%s5830_s8 + $0xd0] sm:$0xff]  ;;  %v1373_v8 = vld [vmem:[%s5830_s8 + $0xd8] sm:$0xff] }
 0x6db   :  { %1801 = vst [vmem:[%s5838_s16 + $0xe8] sm:$0xff] %v1503_v4  ;;  %v1404_v13 = vmul.f32 0.999, %v1372_v56  ;;  %v1405_v14 = vmul.f32 0.999, %v1373_v8  ;;  %v1429_v56 = vld [vmem:[%s5826_s4 + $0x98] sm:$0xff] }
 0x6dc   :  { %v1461_v11 = vmul.f32 0.001, %v1429_v56  ;;  %v3433_v56 = vld [vmem:[%s5832_s10 + $0x90] sm:$0xff] }
 0x6dd   :  { %v1500_v17 = vadd.f32 %v1468_v9, %v1404_v13  ;;  %v1501_v20 = vadd.f32 %v1469_v52, %v1405_v14  ;;  %v1426_v9 = vld [vmem:[%s5826_s4 + $0x80] sm:$0xff] }
 0x6df   :  { %1798 = vst [vmem:[%s5838_s16 + $0xd0] sm:$0xff] %v1500_v17  ;;  %v2890_v22 = vpack.c.bf16 %v1501_v20, %v1500_v17 }
 0x6e0   :  { %1799 = vst [vmem:[%s5838_s16 + $0xd8] sm:$0xff] %v1501_v20  ;;  %v1458_v20 = vmul.f32 0.001, %v1426_v9  ;;  %v3424_v9 = vld [vmem:[%s5832_s10 + $0x48] sm:$0xff] }
 0x6e1   :  { %2911 = vmatpush.bf16.msra.mxu3 %v2890_v22  ;;  %v2819_v22 = vpop.f32.mrf.mxu1 }
 0x6e2   :  { %v3423_v22 = vld [vmem:[%s5832_s10 + $0x40] sm:$0xff] }
 0x6e7   :  { %v1370_v30 = vld [vmem:[%s5830_s8 + $0xc0] sm:$0xff]  ;;  %v1371_v32 = vld [vmem:[%s5830_s8 + $0xc8] sm:$0xff]  ;;  %v1368_v57 = vld [vmem:[%s5830_s8 + $0xb0] sm:$0xff] }
 0x6e8   :  { %v1402_v34 = vmul.f32 0.999, %v1370_v30  ;;  %v1403_v38 = vmul.f32 0.999, %v1371_v32  ;;  %v1369_v35 = vld [vmem:[%s5830_s8 + $0xb8] sm:$0xff]  ;;  %v3421_v32 = vld [vmem:[%s5832_s10 + $0x30] sm:$0xff] }
 0x6e9   :  { %v1400_v31 = vmul.f32 0.999, %v1368_v57  ;;  %v1401_v36 = vmul.f32 0.999, %v1369_v35  ;;  %3203 = vmatpush.bf16.xpose.msrb.mxu0 %v3421_v32  ;;  %v3428_v57 = vld [vmem:[%s5832_s10 + $0x68] sm:$0xff] }
 0x6ea   :  { %v1498_v6 = vadd.f32 %v1466_v41, %v1402_v34  ;;  %v1499_v44 = vadd.f32 %v1467_v42, %v1403_v38  ;;  %v3437_v34 = vld [vmem:[%s5832_s10 + $0xb0] sm:$0xff]  ;;  %v3436_v41 = vld [vmem:[%s5832_s10 + $0xa8] sm:$0xff]  ;;  %v2503_v42 = vpop.xlane.xlu0 %2502  ;;  %3217 = vmatpush.bf16.xpose.msrb.mxu1 %v3428_v57 }
 0x6eb   :  { %v1496_v49 = vadd.f32 %v1464_v46, %v1400_v31  ;;  %v1497_v48 = vadd.f32 %v1465_v7, %v1401_v36  ;;  %v3445_v38 = vld [vmem:[%s5832_s10 + $0xf0] sm:$0xff]  ;;  %3229 = vmatpush.bf16.xpose.msrb.mxu2 %v3437_v34  ;;  %v3444_v35 = vld [vmem:[%s5832_s10 + $0xe8] sm:$0xff]  ;;  %v5727_v43 = vmax.f32 %v2503_v42, 1e-24  ;;  %v3419_v31 = vld [vmem:[%s5832_s10 + $0x20] sm:$0xff]  ;;  %v2818_v46 = vadd.f32 %v5647_v59, %v5621_v5  ;;  %v2832_v7 = vpop.f32.mrf.mxu2 }
 0x6ec   :  { %1796 = vst [vmem:[%s5838_s16 + $0xc0] sm:$0xff] %v1498_v6  ;;  %v2889_v47 = vpack.c.bf16 %v1499_v44, %v1498_v6  ;;  %v3427_v36 = vld [vmem:[%s5832_s10 + $0x60] sm:$0xff]  ;;  %v3434_v5 = vld [vmem:[%s5832_s10 + $0x98] sm:$0xff] }
 0x6ed   :  { %1797 = vst [vmem:[%s5838_s16 + $0xc8] sm:$0xff] %v1499_v44  ;;  %v2888_v50 = vpack.c.bf16 %v1497_v48, %v1496_v49  ;;  %3451 = vrsqrt.f32 %v5727_v43  ;;  %v3443_v6 = vld [vmem:[%s5832_s10 + $0xe0] sm:$0xff]  ;;  %v2843_v44 = vpop.f32.mrf.mxu3  ;;  %vm2511_vm2 = vweird.f32 %v5727_v43 }
 0x6ee   :  { %2912 = vmatpush.bf16.msra.mxu3 %v2889_v47  ;;  %1794 = vst [vmem:[%s5838_s16 + $0xb0] sm:$0xff] %v1496_v49  ;;  %v2856_v49 = vpop.f32.mrf.mxu0 }
 0x6ef   :  { %1795 = vst [vmem:[%s5838_s16 + $0xb8] sm:$0xff] %v1497_v48  ;;  %v2831_v48 = vadd.f32 %v2830_v24, %v2818_v46 }
 0x6f1   :  { %3204 = vmatpush.bf16.xpose.msrb.mxu0 %v3420_v39 }
 0x6f2   :  { %2913 = vmatpush.bf16.msra.mxu3 %v2888_v50  ;;  %3218 = vmatpush.bf16.xpose.msrb.mxu1 %v3427_v36  ;;  %v3418_v50 = vld [vmem:[%s5832_s10 + $0x18] sm:$0xff] }
 0x6f3   :  { %3230 = vmatpush.bf16.xpose.msrb.mxu2 %v3436_v41  ;;  %v3452_v47 = vpop.eup %3451 }
 0x6f4   :  { %vm2512_vm1 = vweird.f32 %v3452_v47 }
 0x6f5   :  { %v2845_v51 = vpop.f32.mrf.mxu3  ;;  %vm2513_vm3 = vmor %vm2511_vm2, %vm2512_vm1 }
 0x6f6   :  { %v1366_v12 = vld [vmem:[%s5830_s8 + $0xa0] sm:$0xff]  ;;  %v1367_v28 = vld [vmem:[%s5830_s8 + $0xa8] sm:$0xff]  ;;  %v1364_v0 = vld [vmem:[%s5830_s8 + $0x90] sm:$0xff] }
 0x6f7   :  { %v1398_v53 = vmul.f32 0.999, %v1366_v12  ;;  %v1399_v54 = vmul.f32 0.999, %v1367_v28  ;;  %v1365_v15 = vld [vmem:[%s5830_s8 + $0x98] sm:$0xff]  ;;  %v2506_v12 = vmul.f32 %v3452_v47, %v5727_v43 }
 0x6f8   :  { %v1396_v61 = vmul.f32 0.999, %v1364_v0  ;;  %v1397_v4 = vmul.f32 0.999, %v1365_v15  ;;  %v3442_v28 = vld [vmem:[%s5832_s10 + $0xd8] sm:$0xff] }
 0x6f9   :  { %v1494_v60 = vadd.f32 %v1462_v58, %v1398_v53  ;;  %v1495_v63 = vadd.f32 %v1463_v55, %v1399_v54  ;;  %3205 = vmatpush.bf16.xpose.msrb.mxu0 %v3419_v31  ;;  %v2844_v53 = vadd.f32 %v2843_v44, %v2831_v48  ;;  %v2507_v54 = vmul.f32 %v3452_v47, %v2506_v12  ;;  %v1508_v58 = vld [vmem:[%s5827_s5] sm:$0x1] }
 0x6fa   :  { %v1492_v13 = vadd.f32 %v1460_v10, %v1396_v61  ;;  %v1493_v14 = vadd.f32 %v1461_v11, %v1397_v4  ;;  %3219 = vmatpush.bf16.xpose.msrb.mxu1 %v3426_v19  ;;  %v1507_v55 = vmul.f32 0.999, %v1506_v40  ;;  %v1509_v59 = vmul.f32 0.001, %v1508_v58  ;;  %v3425_v61 = vld [vmem:[%s5832_s10 + $0x50] sm:$0xff] }
 0x6fb   :  { %1792 = vst [vmem:[%s5838_s16 + $0xa0] sm:$0xff] %v1494_v60  ;;  %v2887_v8 = vpack.c.bf16 %v1495_v63, %v1494_v60  ;;  %3231 = vmatpush.bf16.xpose.msrb.mxu2 %v3435_v45  ;;  %v2858_v60 = vpop.f32.mrf.mxu0  ;;  %v2857_v0 = vadd.f32 %v2856_v49, %v2844_v53  ;;  %v2508_v15 = vmul.f32 0.5, %v2507_v54 }
 0x6fc   :  { %1793 = vst [vmem:[%s5838_s16 + $0xa8] sm:$0xff] %v1495_v63  ;;  %v2886_v17 = vpack.c.bf16 %v1493_v14, %v1492_v13  ;;  %v1510_v63 = vadd.f32 %v1509_v59, %v1507_v55 }
 0x6fd   :  { %2914 = vmatpush.bf16.msra.mxu3 %v2887_v8  ;;  %v3441_v8 = vld [vmem:[%s5832_s10 + $0xd0] sm:$0xff] }
 0x6fe   :  { %1804 = vst [vmem:[%s5839_s17] sm:$0x1] %v1510_v63  ;;  %v2894_v29 = vperm.slane %v1510_v63, 0 }
 0x701   :  { %2915 = vmatpush.bf16.msra.mxu3 %v2886_v17  ;;  %3206 = vmatpush.bf16.xpose.msrb.mxu0 %v3418_v50 }
 0x702   :  { %v2869_v4 = vpop.f32.mrf.mxu1  ;;  %3220 = vmatpush.bf16.xpose.msrb.mxu1 %v3425_v61 }
 0x703   :  { %v1362_v3 = vld [vmem:[%s5830_s8 + $0x80] sm:$0xff]  ;;  %v1363_v1 = vld [vmem:[%s5830_s8 + $0x88] sm:$0xff]  ;;  %3232 = vmatpush.bf16.xpose.msrb.mxu2 %v3434_v5  ;;  %v2870_v10 = vadd.f32 %v2869_v4, %v2857_v0 }
 0x704   :  { %v1394_v52 = vmul.f32 0.999, %v1362_v3  ;;  %v1395_v62 = vmul.f32 0.999, %v1363_v1  ;;  %1790 = vst [vmem:[%s5838_s16 + $0x90] sm:$0xff] %v1492_v13  ;;  %v2509_v13 = vsub.f32 1.5, %v2508_v15 }
 0x705   :  { %1791 = vst [vmem:[%s5838_s16 + $0x98] sm:$0xff] %v1493_v14  ;;  %v2874_v11 = vmax.f32 %v2870_v10, 0.0  ;;  %v3416_v1 = vld [vmem:[%s5832_s10 + $0x8] sm:$0xff] }
 0x706   :  { %v1490_v23 = vadd.f32 %v1458_v20, %v1394_v52  ;;  %v1491_v25 = vadd.f32 %v1459_v21, %v1395_v62  ;;  %v2510_v3 = vmul.f32 %v3452_v47, %v2509_v13  ;;  %v3432_v62 = vld [vmem:[%s5832_s10 + $0x88] sm:$0xff]  ;;  %v3415_v21 = vld [vmem:[%s5832_s10] sm:$0xff] }
 0x707   :  { %v2876_v14 = vpack.c.bf16 %v2874_v11, %v2874_v11 }
 0x708   :  { %1788 = vst [vmem:[%s5838_s16 + $0x80] sm:$0xff] %v1490_v23  ;;  %v2885_v30 = vpack.c.bf16 %v1491_v25, %v1490_v23  ;;  %v2514_v17 = vsel %vm2513_vm3, %v3452_v47, %v2510_v3  ;;  %v3431_v23 = vld [vmem:[%s5832_s10 + $0x80] sm:$0xff] }
 0x709   :  { %1789 = vst [vmem:[%s5838_s16 + $0x88] sm:$0xff] %v1491_v25  ;;  %3207 = vmatpush.bf16.xpose.msrb.mxu0 %v3417_v2  ;;  %v2515_v20 = vmul.f32 %v2514_v17, %v5254_v18  ;;  %v3439_v25 = vld [vmem:[%s5832_s10 + $0xc0] sm:$0xff] }
 0x70a   :  { %2916 = vmatpush.bf16.msra.mxu3 %v2885_v30  ;;  %v2871_v52 = vpop.f32.mrf.mxu1  ;;  %3221 = vmatpush.bf16.xpose.msrb.mxu1 %v3424_v9 }
 0x70b   :  { %3233 = vmatpush.bf16.xpose.msrb.mxu2 %v3433_v56  ;;  %v2939_v37 = vmul.f32 14.285714, %v2515_v20 }
 0x70d   :  { %2917 = vmatmul.bf16.vlgmr.msra.gmra.mxu3 %v2876_v14  ;;  %v2945_v18 = vpack.c.bf16 %v2939_v37, %v2939_v37 }
 0x70e   :  { %3241 = vmatpush.bf16.xpose.msrb.mxu3 %v3446_v27 }
 0x711   :  { %3208 = vmatpush.bf16.xpose.msrb.mxu0 %v3416_v1 }
 0x712   :  { %3222 = vmatpush.bf16.xpose.msrb.mxu1 %v3423_v22 }
 0x713   :  { %3234 = vmatpush.bf16.xpose.msrb.mxu2 %v3432_v62 }
 0x716   :  { %3242 = vmatpush.bf16.xpose.msrb.mxu3 %v3445_v38 }
 0x719   :  { %3209 = vmatpush.bf16.xpose.msrb.mxu0 %v3415_v21  ;;  %3223 = vmatmul.bf16.vlgmr.msrb.gmra.mxu1 %v2945_v18 }
 0x71b   :  { %3235 = vmatpush.bf16.xpose.msrb.mxu2 %v3431_v23 }
 0x71e   :  { %3243 = vmatpush.bf16.xpose.msrb.mxu3 %v3444_v35 }
 0x720   :  { %3210 = vmatmul.bf16.vlgmr.msrb.gmra.mxu0 %v2945_v18 }
 0x722   :  { %3236 = vmatmul.bf16.vlgmr.msrb.gmra.mxu2 %v2945_v18 }
 0x726   :  { %3244 = vmatpush.bf16.xpose.msrb.mxu3 %v3443_v6 }
 0x72e   :  { %3245 = vmatpush.bf16.xpose.msrb.mxu3 %v3442_v28 }
 0x736   :  { %3246 = vmatpush.bf16.xpose.msrb.mxu3 %v3441_v8 }
 0x73e   :  { %3247 = vmatpush.bf16.xpose.msrb.mxu3 %v3440_v16 }
 0x741   :  { %v2905_v26 = vpop.f32.mrf.mxu2 }
 0x742   :  { %v2906_v27 = vadd.f32 %v2905_v26, %v2894_v29 }
 0x746   :  { %3248 = vmatpush.bf16.xpose.msrb.mxu3 %v3439_v25 }
 0x749   :  { %v2907_v30 = vpop.f32.mrf.mxu2 }
 0x74d   :  { %3249 = vmatmul.bf16.vlgmr.msrb.gmra.mxu3 %v2945_v18 }
 0x790   :  { %v2918_v32 = vpop.f32.mrf.mxu3 }
 0x791   :  { %v2919_v33 = vadd.f32 %v2918_v32, %v2906_v27 }
 0x793   :  { %v2922_v34 = vmul.f32 %v2919_v33, %v2919_v33 }
 0x795   :  { %2923 = vadd.xlane.f32.xlu0 %v2922_v34 }
 0x796   :  { %v3224_v57 = vpop.f32.mrf.mxu1 }
 0x797   :  { %3255 = vst [vmem:[%s5834_s12 + $0x8] sm:$0xff] %v3224_v57 }
 0x798   :  { %v2920_v38 = vpop.f32.mrf.mxu3 }
 0x79d   :  { %v3211_v39 = vpop.f32.mrf.mxu0 }
 0x79e   :  { %3254 = vst [vmem:[%s5834_s12] sm:$0xff] %v3211_v39  ;;  %v3226_v43 = vpop.f32.mrf.mxu1 }
 0x7a5   :  { %v3237_v41 = vpop.f32.mrf.mxu2  ;;  %v3213_v35 = vpop.f32.mrf.mxu0 }
 0x7a6   :  { %3256 = vst [vmem:[%s5834_s12 + $0x10] sm:$0xff] %v3237_v41 }
 0x7ad   :  { %v3239_v24 = vpop.f32.mrf.mxu2 }
 0x7d0   :  { %v3250_v42 = vpop.f32.mrf.mxu3 }
 0x7d1   :  { %3257 = vst [vmem:[%s5834_s12 + $0x18] sm:$0xff] %v3250_v42 }
 0x7d8   :  { %v3252_v31 = vpop.f32.mrf.mxu3 }
 0x808   :  { %v2924_v36 = vpop.xlane.xlu0 %2923 }
 0x809   :  { %v2925_v45 = vmax.f32 %v2924_v36, 1e-24 }
 0x80b   :  { %3453 = vrsqrt.f32 %v2925_v45  ;;  %vm2932_vm5 = vweird.f32 %v2925_v45 }
 0x811   :  { %v3454_v6 = vpop.eup %3453 }
 0x812   :  { %v2927_v44 = vmul.f32 %v3454_v6, %v2925_v45  ;;  %vm2933_vm4 = vweird.f32 %v3454_v6 }
 0x813   :  { %vm2934_vm6 = vmor %vm2932_vm5, %vm2933_vm4 }
 0x814   :  { %v2928_v46 = vmul.f32 %v3454_v6, %v2927_v44 }
 0x816   :  { %v2929_v7 = vmul.f32 0.5, %v2928_v46 }
 0x818   :  { %v2930_v47 = vsub.f32 1.5, %v2929_v7 }
 0x81a   :  { %v2931_v49 = vmul.f32 %v3454_v6, %v2930_v47 }
 0x81c   :  { %v2935_v48 = vsel %vm2934_vm6, %v3454_v6, %v2931_v49 }
 0x81d   :  { %v2936_v50 = vmul.f32 %v2935_v48, %v2919_v33 }
 0x81f   :  { %v2940_v19 = vmul.f32 %v2939_v37, %v2936_v50  ;;  %v2937_v12 = vpack.c.bf16 %v2936_v50, %v2936_v50 }
 0x821   :  { %2941 = vadd.xlane.f32.xlu1 %v2940_v19  ;;  %2938 = vst [vmem:[%s5835_s13] sm:$0xf] %v2937_v12 }
 0x894   :  { %v2942_v5 = vpop.xlane.xlu1 %2941 }
 0x895   :  { %2944 = vst.msk [vmem:[%s5833_s11] sm:$0xff] %vm2943_vm7, %v2942_v5 }
 0x896   :  { %3286 = vsyncpa [#allocation3], 1 }

</bundles_post_ra>
